<compile_context>
chip_gen: v7x
topology: tpu7x:2x2x1
jax: 0.10.0
libtpu: 0.0.40
codegen_flags: <defaults>
</compile_context>

<pallas_src>
import functools
import math

import jax
import jax.numpy as jnp
from jax.experimental import pallas as pl
from jax.experimental.pallas import tpu as pltpu


def temporal_attn_kernel(x_ref, w_ref, blin_ref, bias_ref, o_ref, *,
                         nchunk, crows, F, residual):
    """One grid step: a (bn*T, F) slab of flattened (node, time) rows.

    w_ref[0] = A      = (Wq * 1/sqrt(num_time_steps)) @ Wk^T   (score operator)
    w_ref[1] = Wv                                              (value projection)
    w_ref[2] = Wlin^T                                          (feed-forward weight)
    bias_ref = (crows, crows) block-diagonal causal additive mask.
    """
    rows = nchunk * crows
    x2 = x_ref[...]                                                  # (rows, F)

    # S = Q K^T = (X Wq_s)(X Wk)^T = X (Wq_s Wk^T) X^T = (X A) X^T : one projection matmul.
    xa = jnp.dot(x2, w_ref[0], preferred_element_type=jnp.float32)   # (rows, F)

    # Block-diagonal attention: each chunk of crows = (128//T)*T = 128 rows gives one
    # lane-dense (128, 128) score matmul on the MXU instead of per-node (T,T) micro-matmuls.
    xc = x2.reshape(nchunk, crows, F)       # leading-dim-only reshapes (free, no relayout)
    xac = xa.reshape(nchunk, crows, F)
    s = jnp.einsum('cqd,ckd->cqk', xac, xc,
                   preferred_element_type=jnp.float32)               # (nchunk, crows, crows)

    # Additive mask: 0 where (same node) & (key time <= query time), else -2^32+1.
    s = s + bias_ref[...]                                            # broadcast over chunks

    # Softmax over the (lane-dense) key axis.
    s = s - jnp.max(s, axis=-1, keepdims=True)
    e = jnp.exp(s)
    denom = jnp.sum(e, axis=-1, keepdims=True)
    inv = pl.reciprocal(denom, approx=True)          # EUP vrcp (otherwise-idle slot)
    inv = inv * (2.0 - denom * inv)                  # one Newton step -> ~f32 accuracy
    p = e * inv

    # TODO(synk): attention dropout (self.attn_dp) only applies in training mode; eval path only.

    # P @ V = (P @ X) @ Wv : hoist the value projection so it is one slab-wide matmul.
    px = jnp.einsum('cqk,ckd->cqd', p, xc,
                    preferred_element_type=jnp.float32)              # (nchunk, crows, F)
    attn = jnp.dot(px.reshape(rows, F), w_ref[1],
                   preferred_element_type=jnp.float32)               # (rows, F)

    # Feed-forward: relu(attn @ Wlin^T + b) + attn  (Wlin pre-transposed in the wrapper).
    h = jnp.dot(attn, w_ref[2], preferred_element_type=jnp.float32) + blin_ref[...]
    out = jnp.maximum(h, 0.0) + attn
    if residual:
        out = out + x2
    o_ref[...] = out.astype(o_ref.dtype)


def _choose_tiles(N, T, bn=None, target_lanes=128, target_steps=2):
    """Pick (bn nodes per grid step, chunk nodes per lane-dense attention block)."""
    chunk = math.gcd(N, max(1, target_lanes // T))
    if bn is None:
        bn = chunk
        for cand in range(chunk, N + 1, chunk):
            if N % cand == 0 and N // cand >= target_steps:
                bn = cand                     # largest tile that still gives >= 2 grid steps
    chunk = math.gcd(bn, chunk)
    assert N % bn == 0 and bn % chunk == 0 and chunk >= 1
    return bn, chunk


def temporal_attention_layer(x, wq, wk, wv, wlin, blin, *,
                             num_time_steps, residual=True, bn=None):
    """x: [N, T, F] float32.  Returns [N, T, F]."""
    N, T, F = x.shape
    bn, chunk = _choose_tiles(N, T, bn)
    crows = chunk * T
    nchunk = bn // chunk
    rows = bn * T
    scale = 1.0 / float(num_time_steps) ** 0.5

    # One-time host/XLA-side weight prep (outside the kernel):
    #   * fold the score scale into Wq and pre-contract A = Wq_s @ Wk^T (full f32 precision),
    #   * pre-transpose the nn.Linear (out,in) weight,
    #   * stack [A, Wv, Wlin^T] into one tiny weight slab (single DMA / BlockSpec),
    #   * precompute the block-diagonal causal additive mask.
    a = jnp.einsum('ij,lj->il', wq * scale, wk, precision='highest')   # (F, F)
    wstack = jnp.stack([a, wv, jnp.transpose(wlin)], axis=0)           # (3, F, F)
    blin2 = blin.reshape(1, F)

    idx = jnp.arange(crows, dtype=jnp.int32)
    node_id = idx // T
    t_id = idx % T
    allowed = (node_id[:, None] == node_id[None, :]) & (t_id[None, :] <= t_id[:, None])
    bias = jnp.where(allowed, 0.0, jnp.float32(-2.0 ** 32 + 1))        # (crows, crows)

    # Flatten (node, time) into one long row axis: each block is a contiguous (bn*T, F) slab.
    x2 = x.reshape(N * T, F)

    # VMEM budget: lane-padded in/out slabs (double buffered) + softmax temporaries,
    # clamped to 32 MiB so it is safe on v7x (64 MiB physical VMEM) as well as v5e/v6e.
    slab = rows * 128 * 4
    est = (4 + 3) * slab + 3 * nchunk * crows * crows * 4 \
        + 2 * (3 * F * 128 + 128 + crows * crows) * 4 + (4 << 20)
    vmem_limit = int(min(max(est, 16 << 20), 32 << 20))

    kernel = functools.partial(temporal_attn_kernel, nchunk=nchunk, crows=crows,
                               F=F, residual=residual)

    out2 = pl.pallas_call(
        kernel,
        out_shape=jax.ShapeDtypeStruct((N * T, F), x.dtype),
        grid_spec=pltpu.PrefetchScalarGridSpec(
            num_scalar_prefetch=0,
            grid=(N // bn,),
            in_specs=[
                pl.BlockSpec((rows, F), lambda i: (i, 0)),        # x rows slab
                pl.BlockSpec((3, F, F), lambda i: (0, 0, 0)),     # [A | Wv | Wlin^T]
                pl.BlockSpec((1, F), lambda i: (0, 0)),           # Linear bias
                pl.BlockSpec((crows, crows), lambda i: (0, 0)),   # block-diag causal mask
            ],
            out_specs=pl.BlockSpec((rows, F), lambda i: (i, 0)),
        ),
        compiler_params=pltpu.CompilerParams(
            dimension_semantics=("parallel",),     # grid of 2 -> both v7x TCs get one step
            vmem_limit_bytes=vmem_limit),
    )(x2, wstack, blin2, bias)

    return out2.reshape(N, T, F)


def ref_forward(x, wq, wk, wv, wlin, blin, *, num_time_steps, residual=True):
    """Pure-JAX reference mirroring the PyTorch forward (eval mode), full f32 precision."""
    hp = jax.lax.Precision.HIGHEST
    q = jnp.einsum('ntd,df->ntf', x, wq, precision=hp)
    k = jnp.einsum('ntd,df->ntf', x, wk, precision=hp)
    v = jnp.einsum('ntd,df->ntf', x, wv, precision=hp)
    s = jnp.einsum('nqd,nkd->nqk', q, k, precision=hp) / float(num_time_steps) ** 0.5
    T = x.shape[1]
    mask = jnp.tril(jnp.ones((T, T), jnp.float32))
    s = jnp.where(mask[None] == 0, jnp.float32(-2.0 ** 32 + 1), s)
    p = jax.nn.softmax(s, axis=2)
    o = jnp.einsum('nqk,nkd->nqd', p, v, precision=hp)
    h = jax.nn.relu(jnp.einsum('ntd,fd->ntf', o, wlin, precision=hp) + blin) + o
    return h + x if residual else h


if __name__ == "__main__":
    # Small shapes consistent with the module: N nodes, T time steps, F = input_dim.
    N, T, F = 256, 8, 32
    num_time_steps_ = T + 2          # module uses num_time_steps = num_time_steps_ - 2
    num_time_steps = num_time_steps_ - 2
    residual = True

    key = jax.random.PRNGKey(0)
    kx, kq, kk, kv, kw, kb = jax.random.split(key, 6)

    x = jax.random.normal(kx, (N, T, F), jnp.float32)

    # Deterministic xavier-uniform-style init for Q/K/V embedding weights.
    bound = (6.0 / (F + F)) ** 0.5
    wq = jax.random.uniform(kq, (F, F), jnp.float32, -bound, bound)
    wk = jax.random.uniform(kk, (F, F), jnp.float32, -bound, bound)
    wv = jax.random.uniform(kv, (F, F), jnp.float32, -bound, bound)
    # nn.Linear(input_dim, input_dim): weight (out, in), bias (out,)
    lin_bound = 1.0 / (F ** 0.5)
    wlin = jax.random.uniform(kw, (F, F), jnp.float32, -lin_bound, lin_bound)
    blin = jax.random.uniform(kb, (F,), jnp.float32, -lin_bound, lin_bound)

    out = temporal_attention_layer(
        x, wq, wk, wv, wlin, blin,
        num_time_steps=num_time_steps, residual=residual)   # auto tiles: bn=N//2, grid=2
    out = jax.block_until_ready(out)

    ref = ref_forward(x, wq, wk, wv, wlin, blin,
                      num_time_steps=num_time_steps, residual=residual)
    assert out.shape == (N, T, F)
    err = float(jnp.max(jnp.abs(out - ref)))
    # Tolerance covers MXU f32 multi-pass rounding + the (exactly equivalent) algebraic
    # reassociation (A = Wq_s Wk^T, V-projection hoisted); real bugs produce O(1) errors.
    assert jnp.allclose(out, ref, rtol=1e-3, atol=1e-3), f"max err {err}"

    print("KERNEL_OK")
</pallas_src>

<mosaic_0001>
module attributes {stable_mosaic.version = 11 : i64} {
  func.func @temporal_attn_kernel(%arg0: i32, %arg1: memref<1024x32xf32, #tpu.memory_space<vmem>>, %arg2: memref<3x32x32xf32, #tpu.memory_space<vmem>>, %arg3: memref<1x32xf32, #tpu.memory_space<vmem>>, %arg4: memref<128x128xf32, #tpu.memory_space<vmem>>, %arg5: memref<1024x32xf32, #tpu.memory_space<vmem>>) attributes {dimension_semantics = [#tpu.dimension_semantics<parallel>], iteration_bounds = array<i64: 2>, scalar_prefetch = 0 : i64, scratch_operands = 0 : i64, tpu.core_type = #tpu.core_type<tc>, window_params = [{transform_indices = @transform_0, window_bounds = array<i64: 1024, 32>}, {pipeline_mode = #tpu.pipeline_mode<synchronous>, transform_indices = @transform_1, window_bounds = array<i64: 3, 32, 32>}, {pipeline_mode = #tpu.pipeline_mode<synchronous>, transform_indices = @transform_2, window_bounds = array<i64: 1, 32>}, {pipeline_mode = #tpu.pipeline_mode<synchronous>, transform_indices = @transform_3, window_bounds = array<i64: 128, 128>}, {transform_indices = @transform_4, window_bounds = array<i64: 1024, 32>}]} {
    %c0 = arith.constant 0 : index
    %c0_0 = arith.constant 0 : index
    %0 = vector.load %arg1[%c0, %c0_0] : memref<1024x32xf32, #tpu.memory_space<vmem>>, vector<1024x32xf32>
    %c0_1 = arith.constant 0 : index
    %c0_2 = arith.constant 0 : index
    %c0_3 = arith.constant 0 : index
    %1 = vector.load %arg2[%c0_1, %c0_2, %c0_3] : memref<3x32x32xf32, #tpu.memory_space<vmem>>, vector<1x32x32xf32>
    %2 = vector.shape_cast %1 : vector<1x32x32xf32> to vector<32x32xf32>
    %cst = arith.constant dense<0.000000e+00> : vector<1024x32xf32>
    %3 = tpu.matmul %0, %2, %cst {dimension_numbers = #tpu.dot_dimension_numbers<[1], [0], [0], [1], [0, 0, 1, 1], [], []>} : vector<1024x32xf32>, vector<32x32xf32>, vector<1024x32xf32> -> vector<1024x32xf32>
    %4 = vector.shape_cast %0 : vector<1024x32xf32> to vector<8x128x32xf32>
    %5 = vector.shape_cast %3 : vector<1024x32xf32> to vector<8x128x32xf32>
    "tpu.trace_start"() <{level = 10 : i32, message = "cqd,ckd->cqk"}> : () -> ()
    %cst_4 = arith.constant dense<0.000000e+00> : vector<8x128x128xf32>
    %6 = tpu.matmul %5, %4, %cst_4 {dimension_numbers = #tpu.dot_dimension_numbers<[2], [2], [1], [1], [0, 0, 0, 1, 1, 1], [0], [0]>} : vector<8x128x32xf32>, vector<8x128x32xf32>, vector<8x128x128xf32> -> vector<8x128x128xf32>
    "tpu.trace_stop"() : () -> ()
    %c0_5 = arith.constant 0 : index
    %c0_6 = arith.constant 0 : index
    %7 = vector.load %arg4[%c0_5, %c0_6] : memref<128x128xf32, #tpu.memory_space<vmem>>, vector<128x128xf32>
    %8 = vector.shape_cast %7 : vector<128x128xf32> to vector<1x128x128xf32>
    %9 = vector.broadcast %8 : vector<1x128x128xf32> to vector<8x128x128xf32>
    %10 = arith.addf %6, %9 : vector<8x128x128xf32>
    %cst_7 = arith.constant dense<0xFF800000> : vector<8x128xf32>
    %11 = vector.multi_reduction <maximumf>, %10, %cst_7 [2] : vector<8x128x128xf32> to vector<8x128xf32>
    %12 = vector.shape_cast %11 : vector<8x128xf32> to vector<8x128x1xf32>
    %13 = vector.broadcast %12 : vector<8x128x1xf32> to vector<8x128x128xf32>
    %14 = arith.subf %10, %13 : vector<8x128x128xf32>
    %15 = math.exp %14 : vector<8x128x128xf32>
    %cst_8 = arith.constant dense<0.000000e+00> : vector<8x128xf32>
    %16 = vector.multi_reduction <add>, %15, %cst_8 [2] : vector<8x128x128xf32> to vector<8x128xf32>
    %17 = vector.shape_cast %16 : vector<8x128xf32> to vector<8x128x1xf32>
    %18 = tpu.reciprocal %17 {approx = true} : vector<8x128x1xf32> -> vector<8x128x1xf32>
    %19 = arith.mulf %17, %18 : vector<8x128x1xf32>
    %cst_9 = arith.constant 2.000000e+00 : f32
    %20 = vector.broadcast %cst_9 : f32 to vector<8x128x1xf32>
    %21 = arith.subf %20, %19 : vector<8x128x1xf32>
    %22 = arith.mulf %18, %21 : vector<8x128x1xf32>
    %23 = vector.broadcast %22 : vector<8x128x1xf32> to vector<8x128x128xf32>
    %24 = arith.mulf %15, %23 : vector<8x128x128xf32>
    "tpu.trace_start"() <{level = 10 : i32, message = "cqk,ckd->cqd"}> : () -> ()
    %cst_10 = arith.constant dense<0.000000e+00> : vector<8x128x32xf32>
    %25 = tpu.matmul %24, %4, %cst_10 {dimension_numbers = #tpu.dot_dimension_numbers<[2], [1], [1], [2], [0, 0, 0, 1, 1, 2], [0], [0]>} : vector<8x128x128xf32>, vector<8x128x32xf32>, vector<8x128x32xf32> -> vector<8x128x32xf32>
    "tpu.trace_stop"() : () -> ()
    %26 = vector.shape_cast %25 : vector<8x128x32xf32> to vector<1024x32xf32>
    %c1 = arith.constant 1 : index
    %c0_11 = arith.constant 0 : index
    %c0_12 = arith.constant 0 : index
    %27 = vector.load %arg2[%c1, %c0_11, %c0_12] : memref<3x32x32xf32, #tpu.memory_space<vmem>>, vector<1x32x32xf32>
    %28 = vector.shape_cast %27 : vector<1x32x32xf32> to vector<32x32xf32>
    %cst_13 = arith.constant dense<0.000000e+00> : vector<1024x32xf32>
    %29 = tpu.matmul %26, %28, %cst_13 {dimension_numbers = #tpu.dot_dimension_numbers<[1], [0], [0], [1], [0, 0, 1, 1], [], []>} : vector<1024x32xf32>, vector<32x32xf32>, vector<1024x32xf32> -> vector<1024x32xf32>
    %c2 = arith.constant 2 : index
    %c0_14 = arith.constant 0 : index
    %c0_15 = arith.constant 0 : index
    %30 = vector.load %arg2[%c2, %c0_14, %c0_15] : memref<3x32x32xf32, #tpu.memory_space<vmem>>, vector<1x32x32xf32>
    %31 = vector.shape_cast %30 : vector<1x32x32xf32> to vector<32x32xf32>
    %cst_16 = arith.constant dense<0.000000e+00> : vector<1024x32xf32>
    %32 = tpu.matmul %29, %31, %cst_16 {dimension_numbers = #tpu.dot_dimension_numbers<[1], [0], [0], [1], [0, 0, 1, 1], [], []>} : vector<1024x32xf32>, vector<32x32xf32>, vector<1024x32xf32> -> vector<1024x32xf32>
    %c0_17 = arith.constant 0 : index
    %c0_18 = arith.constant 0 : index
    %33 = vector.load %arg3[%c0_17, %c0_18] : memref<1x32xf32, #tpu.memory_space<vmem>>, vector<1x32xf32>
    %34 = vector.broadcast %33 : vector<1x32xf32> to vector<1024x32xf32>
    %35 = arith.addf %32, %34 : vector<1024x32xf32>
    %cst_19 = arith.constant 0.000000e+00 : f32
    %36 = vector.broadcast %cst_19 : f32 to vector<1024x32xf32>
    %37 = arith.maximumf %35, %36 : vector<1024x32xf32>
    %38 = arith.addf %37, %29 : vector<1024x32xf32>
    %39 = arith.addf %38, %0 : vector<1024x32xf32>
    %c0_20 = arith.constant 0 : index
    %c0_21 = arith.constant 0 : index
    %40 = vector.load %arg5[%c0_20, %c0_21] : memref<1024x32xf32, #tpu.memory_space<vmem>>, vector<1024x32xf32>
    tpu.vector_store %arg5[%c0_20, %c0_21], %39 {strides = array<i32>} : memref<1024x32xf32, #tpu.memory_space<vmem>>, vector<1024x32xf32>,
    return
  }
  func.func @transform_0(%arg0: i32) -> (i32, i32) {
    %c0_i32 = arith.constant 0 : i32
    %c0_i32_0 = arith.constant 0 : i32
    return %arg0, %c0_i32 : i32, i32
  }
  func.func @transform_1(%arg0: i32) -> (i32, i32, i32) {
    %c0_i32 = arith.constant 0 : i32
    %c0_i32_0 = arith.constant 0 : i32
    %c0_i32_1 = arith.constant 0 : i32
    %c0_i32_2 = arith.constant 0 : i32
    return %c0_i32, %c0_i32_0, %c0_i32_1 : i32, i32, i32
  }
  func.func @transform_2(%arg0: i32) -> (i32, i32) {
    %c0_i32 = arith.constant 0 : i32
    %c0_i32_0 = arith.constant 0 : i32
    %c0_i32_1 = arith.constant 0 : i32
    return %c0_i32, %c0_i32_0 : i32, i32
  }
  func.func @transform_3(%arg0: i32) -> (i32, i32) {
    %c0_i32 = arith.constant 0 : i32
    %c0_i32_0 = arith.constant 0 : i32
    %c0_i32_1 = arith.constant 0 : i32
    return %c0_i32, %c0_i32_0 : i32, i32
  }
  func.func @transform_4(%arg0: i32) -> (i32, i32) {
    %c0_i32 = arith.constant 0 : i32
    %c0_i32_0 = arith.constant 0 : i32
    return %arg0, %c0_i32 : i32, i32
  }
}

</mosaic_0001>

<bundles_post_ra>
// kernel: tpu_custom_call.1
= control target key start
LH: loop header
LB: loop body
LE: loop exit
PB: predicated region body
PF: predicated region fallthrough
CT: control target
= control target key end

     0   :  { %s12880_s15 = smov 0   ;;  %s17978_s0 = inlined_call_operand.vmem [shape: f32[2048,32], index: 0, kind: input, shape index: {}]   ;;  %s17979_s1 = inlined_call_operand.vmem [shape: f32[3,32,32], index: 1, kind: input, shape index: {}]   ;;  %s17980_s2 = inlined_call_operand.vmem [shape: f32[1,32], index: 2, kind: input, shape index: {}]   ;;  %s17981_s3 = inlined_call_operand.vmem [shape: f32[128,128], index: 3, kind: input, shape index: {}]   ;;  %s17982_s4 = inlined_call_operand.vmem [shape: f32[2048,32], index: 4, kind: output, shape index: {}]  }
   0x1 LB: > { %s8442_s16 = sadd.s32 4294967295, %s12853_s15   ;;  %p8446_p0 = scmp.ge.s32.totalorder %s12853_s15, 1  ;;  %s12853_s15 = sphi %s12880_s15, %s14_s15  }
   0x2   : > { %p163_p1 = scmp.lt.s32.totalorder %s12853_s15, 3 }
   0x4   : > { %p164_p2 = pnand %p8446_p0, %p163_p1 }
   0x6   : > { %167 = sbr.rel (%p164_p2) target bundleno = 1927 (0x787), region = 36 }
   0xd   : > { %v329_v0 = vld [vmem:[%s17979_s1] sm:$0xff]  ;;  %v330_v1 = vld [vmem:[%s17979_s1 + $0x8] sm:$0xff]  ;;  %v331_v2 = vld [vmem:[%s17979_s1 + $0x10] sm:$0xff]  ;;  %s8447_s23 = sshll.u32 %s8442_s16, 7  ;;  %vm333_vm0 = vcmask 261120  }
   0xe   : > { %v11506_v3 = vpack.c.bf16 %v330_v1, %v329_v0  ;;  %v332_v4 = vld [vmem:[%s17979_s1 + $0x18] sm:$0xff]  ;;  %p190_p3 = scmp.lt.s32.totalorder %s8447_s23, 255  ;;  %vm12914_vm1 = vmpackc.low %vm333_vm0, %vm333_vm0 }
   0xf   : > { %v11510_v5 = vpack.c.bf16 %v332_v4, %v331_v2 }
  0x10   : > { %11507 = vmatprep.subr.bf16.mxu0 %v11506_v3  ;;  %s19162_s23 = smov (!%p190_p3, %s8447_s23), 255 }
  0x11   : > { %11509 = vmatpush3.bf16.msra.mxu0 %v11506_v3  ;;  %s8448_s26 = sshll.u32 %s19162_s23, 3 }
  0x12   : > { %11511 = vmatprep.subr.bf16.mxu0 %v11510_v5  ;;  %s12908_s29 = scalar_lea.vmem %s17978_s0, %s8448_s26  ;;  %s17260_s17 = scalar_lea.vmem %s17982_s4, %s8448_s26 }
  0x13   : > { %v201_v6 = vld [vmem:[%s12908_s29] sm:$0xff]  ;;  %v202_v7 = vld [vmem:[%s12908_s29 + $0x8] sm:$0xff]  ;;  %v203_v10 = vld [vmem:[%s12908_s29 + $0x10] sm:$0xff] }
  0x14   : > { %10018 = vmatprep.mubr.msk.f32.mxu0 %vm333_vm0, %v201_v6  ;;  %v12919_v9 = vpack.c.bf16 %v202_v7, %v201_v6  ;;  %v204_v11 = vld [vmem:[%s12908_s29 + $0x18] sm:$0xff]  ;;  %v205_v13 = vld [vmem:[%s12908_s29 + $0x20] sm:$0xff]  ;;  %v206_v14 = vld [vmem:[%s12908_s29 + $0x28] sm:$0xff] }
  0x15   : > { %11513 = vmatpush3.bf16.msra.mxu0 %v11510_v5  ;;  %v12923_v12 = vpack.c.bf16 %v204_v11, %v203_v10  ;;  %v12940_v15 = vpack.c.bf16 %v206_v14, %v205_v13  ;;  %v207_v16 = vld [vmem:[%s12908_s29 + $0x30] sm:$0xff]  ;;  %v208_v17 = vld [vmem:[%s12908_s29 + $0x38] sm:$0xff]  ;;  %v209_v18 = vld [vmem:[%s12908_s29 + $0x40] sm:$0xff] }
  0x16   : > { %18396 = vst [vmem:[#allocation2_spill] sm:$0xff] %v12919_v9  ;;  %11516 = vmatprep.subr.msk.bf16.mxu1 %vm12914_vm1, %v12919_v9  ;;  %v12954_v19 = vld [vmem:[%s12908_s29 + $0x200] sm:$0xff]  ;;  %v12957_v20 = vld [vmem:[%s12908_s29 + $0x208] sm:$0xff]  ;;  %v12964_v22 = vpack.c.bf16 %v208_v17, %v207_v16  ;;  %v211_v24 = vld [vmem:[%s12908_s29 + $0x50] sm:$0xff] }
  0x17   : > { %18397 = vst [vmem:[#allocation3_spill] sm:$0xff] %v12923_v12  ;;  %11519 = vmatpush3.bf16.xpose.msk.msra.mxu1 %vm12914_vm1, %v12919_v9  ;;  %18398 = vst [vmem:[#allocation4_spill] sm:$0xff] %v12940_v15  ;;  %v12962_v21 = vpack.c.bf16 %v12957_v20, %v12954_v19  ;;  %v210_v23 = vld [vmem:[%s12908_s29 + $0x48] sm:$0xff]  ;;  %v212_v25 = vld [vmem:[%s12908_s29 + $0x58] sm:$0xff] }
  0x18   : > { %10019 = vmatmul.mubr.msk.f32.vlgmr.msra.gmra.mrb[0].mxu0 %vm333_vm0, %v202_v7  ;;  %11522 = vmatprep.subr.msk.bf16.mxu1 %vm12914_vm1, %v12923_v12  ;;  %18400 = vst [vmem:[#allocation6_spill] sm:$0xff] %v12964_v22  ;;  %v12982_v26 = vld [vmem:[%s12908_s29 + $0x210] sm:$0xff]  ;;  %v12985_v27 = vld [vmem:[%s12908_s29 + $0x218] sm:$0xff]  ;;  %v213_v28 = vld [vmem:[%s12908_s29 + $0x60] sm:$0xff]  ;;  %v13011_v34 = vpack.c.bf16 %v210_v23, %v209_v18  ;;  %v13043_v42 = vpack.c.bf16 %v212_v25, %v211_v24 }
  0x19   : > { %10021 = vmatprep.mubr.msk.f32.mxu0 %vm333_vm0, %v203_v10  ;;  %18399 = vst [vmem:[#allocation5_spill] sm:$0xff] %v12962_v21  ;;  %11708 = vmatprep.subr.msk.bf16.mxu0 %vm12914_vm1, %v12962_v21  ;;  %v12993_v29 = vpack.c.bf16 %v12985_v27, %v12982_v26  ;;  %v12996_v30 = vld [vmem:[%s12908_s29 + $0x220] sm:$0xff]  ;;  %v12999_v31 = vld [vmem:[%s12908_s29 + $0x228] sm:$0xff]  ;;  %v215_v35 = vld [vmem:[%s12908_s29 + $0x70] sm:$0xff] }
  0x1a   : > { %v13007_v32 = vpack.c.bf16 %v12999_v31, %v12996_v30  ;;  %v214_v33 = vld [vmem:[%s12908_s29 + $0x68] sm:$0xff]  ;;  %18403 = vst [vmem:[#allocation9_spill] sm:$0xff] %v13011_v34  ;;  %v216_v36 = vld [vmem:[%s12908_s29 + $0x78] sm:$0xff]  ;;  %v217_v37 = vld [vmem:[%s12908_s29 + $0x80] sm:$0xff] }
  0x1b   : > { %18401 = vst [vmem:[#allocation7_spill] sm:$0xff] %v12993_v29  ;;  %v13031_v38 = vld [vmem:[%s12908_s29 + $0x230] sm:$0xff]  ;;  %v13034_v39 = vld [vmem:[%s12908_s29 + $0x238] sm:$0xff]  ;;  %v218_v41 = vld [vmem:[%s12908_s29 + $0x88] sm:$0xff]  ;;  %v13086_v50 = vpack.c.bf16 %v214_v33, %v213_v28  ;;  %v13130_v58 = vpack.c.bf16 %v216_v36, %v215_v35 }
  0x1c   : > { %10022 = vmatmul.mubr.msk.f32.gmra.mrb[2].mxu0 %vm333_vm0, %v204_v11  ;;  %18402 = vst [vmem:[#allocation8_spill] sm:$0xff] %v13007_v32  ;;  %v13039_v40 = vpack.c.bf16 %v13034_v39, %v13031_v38  ;;  %18405 = vst [vmem:[#allocation11_spill] sm:$0xff] %v13043_v42  ;;  %v13046_v43 = vld [vmem:[%s12908_s29 + $0x90] sm:$0xff]  ;;  %v13058_v44 = vld [vmem:[%s12908_s29 + $0x98] sm:$0xff]  ;;  %v13174_v2 = vpack.c.bf16 %v218_v41, %v217_v37 }
  0x1d   : > { %10024 = vmatprep.mubr.msk.f32.mxu0 %vm333_vm0, %v205_v13  ;;  %v13064_v45 = vld [vmem:[%s12908_s29 + $0xa0] sm:$0xff]  ;;  %v13073_v47 = vld [vmem:[%s12908_s29 + $0x248] sm:$0xff]  ;;  %18407 = vst [vmem:[#allocation13_spill] sm:$0xff] %v13086_v50  ;;  %v13089_v51 = vld [vmem:[%s12908_s29 + $0xb0] sm:$0xff] }
  0x1e   : > { %11711 = vmatpush3.bf16.xpose.msk.msra.mxu0 %vm12914_vm1, %v12962_v21  ;;  %18404 = vst [vmem:[#allocation10_spill] sm:$0xff] %v13039_v40  ;;  %v13070_v46 = vld [vmem:[%s12908_s29 + $0x240] sm:$0xff]  ;;  %v13084_v49 = vld [vmem:[%s12908_s29 + $0xa8] sm:$0xff]  ;;  %v13102_v52 = vld [vmem:[%s12908_s29 + $0xb8] sm:$0xff] }
  0x1f   : > { %11525 = vmatpush3.bf16.xpose.msk.msra.mxu1 %vm12914_vm1, %v12923_v12  ;;  %11714 = vmatprep.subr.msk.bf16.mxu0 %vm12914_vm1, %v12993_v29  ;;  %v13079_v48 = vpack.c.bf16 %v13073_v47, %v13070_v46  ;;  %v13108_v53 = vld [vmem:[%s12908_s29 + $0xc0] sm:$0xff]  ;;  %v13114_v54 = vld [vmem:[%s12908_s29 + $0x250] sm:$0xff]  ;;  %v13117_v55 = vld [vmem:[%s12908_s29 + $0x258] sm:$0xff]  ;;  %18409 = vst [vmem:[#allocation15_spill] sm:$0xff] %v13130_v58 }
  0x20   : > { %10025 = vmatmul.mubr.msk.f32.gmra.mrb[4].mxu0 %vm333_vm0, %v206_v14  ;;  %11528 = vmatprep.subr.msk.bf16.mxu1 %vm12914_vm1, %v12940_v15  ;;  %v13123_v56 = vpack.c.bf16 %v13117_v55, %v13114_v54  ;;  %v13128_v57 = vld [vmem:[%s12908_s29 + $0xc8] sm:$0xff]  ;;  %v13133_v59 = vld [vmem:[%s12908_s29 + $0xd0] sm:$0xff]  ;;  %v13146_v60 = vld [vmem:[%s12908_s29 + $0xd8] sm:$0xff]  ;;  %18411 = vst [vmem:[#allocation17_spill] sm:$0xff] %v13174_v2 }
  0x21   : > { %10027 = vmatprep.mubr.msk.f32.mxu0 %vm333_vm0, %v207_v16  ;;  %18406 = vst [vmem:[#allocation12_spill] sm:$0xff] %v13079_v48  ;;  %v13152_v61 = vld [vmem:[%s12908_s29 + $0xe0] sm:$0xff]  ;;  %v13161_v63 = vld [vmem:[%s12908_s29 + $0x268] sm:$0xff]  ;;  %v13177_v3 = vld [vmem:[%s12908_s29 + $0xf0] sm:$0xff] }
  0x22   : > { %18408 = vst [vmem:[#allocation14_spill] sm:$0xff] %v13123_v56  ;;  %v13158_v62 = vld [vmem:[%s12908_s29 + $0x260] sm:$0xff]  ;;  %v13172_v1 = vld [vmem:[%s12908_s29 + $0xe8] sm:$0xff]  ;;  %v13190_v4 = vld [vmem:[%s12908_s29 + $0xf8] sm:$0xff] }
  0x23   : > { %v13167_v0 = vpack.c.bf16 %v13161_v63, %v13158_v62  ;;  %v13196_v5 = vld [vmem:[%s12908_s29 + $0x100] sm:$0xff]  ;;  %v13202_v6 = vld [vmem:[%s12908_s29 + $0x270] sm:$0xff]  ;;  %v13205_v7 = vld [vmem:[%s12908_s29 + $0x278] sm:$0xff] }
  0x24   : > { %10028 = vmatmul.mubr.msk.f32.gmra.mrb[6].mxu0 %vm333_vm0, %v208_v17  ;;  %v13211_v10 = vpack.c.bf16 %v13205_v7, %v13202_v6  ;;  %v13216_v11 = vld [vmem:[%s12908_s29 + $0x108] sm:$0xff]  ;;  %v13219_v13 = vld [vmem:[%s12908_s29 + $0x110] sm:$0xff]  ;;  %v13232_v14 = vld [vmem:[%s12908_s29 + $0x118] sm:$0xff] }
  0x25   : > { %10030 = vmatprep.mubr.msk.f32.mxu0 %vm333_vm0, %v209_v18  ;;  %18410 = vst [vmem:[#allocation16_spill] sm:$0xff] %v13167_v0  ;;  %v13235_v16 = vld [vmem:[%s12908_s29 + $0x120] sm:$0xff]  ;;  %v13242_v17 = vld [vmem:[%s12908_s29 + $0x128] sm:$0xff]  ;;  %v13245_v18 = vld [vmem:[%s12908_s29 + $0x130] sm:$0xff] }
  0x26   : > { %11717 = vmatpush3.bf16.xpose.msk.msra.mxu0 %vm12914_vm1, %v12993_v29  ;;  %18412 = vst [vmem:[#allocation18_spill] sm:$0xff] %v13211_v10  ;;  %v13328_v29 = vld [vmem:[%s12908_s29 + $0x198] sm:$0xff]  ;;  %v13331_v21 = vld [vmem:[%s12908_s29 + $0x1a0] sm:$0xff] }
  0x27   : > { %11531 = vmatpush3.bf16.xpose.msk.msra.mxu1 %vm12914_vm1, %v12940_v15  ;;  %11720 = vmatprep.subr.msk.bf16.mxu0 %vm12914_vm1, %v13007_v32  ;;  %v13361_v15 = vld [vmem:[%s12908_s29 + $0x1d0] sm:$0xff]  ;;  %v13368_v12 = vld [vmem:[%s12908_s29 + $0x1d8] sm:$0xff]  ;;  %v13371_v9 = vld [vmem:[%s12908_s29 + $0x1e0] sm:$0xff] }
  0x28   : > { %10031 = vmatmul.mubr.msk.f32.gmra.mrb[8].mxu0 %vm333_vm0, %v210_v23  ;;  %11534 = vmatprep.subr.msk.bf16.mxu1 %vm12914_vm1, %v12964_v22  ;;  %v13255_v23 = vld [vmem:[%s12908_s29 + $0x138] sm:$0xff]  ;;  %18416 = vst [vmem:[#allocation22_spill] sm:$0xff] %v13361_v15 }
  0x29   : > { %10033 = vmatprep.mubr.msk.f32.mxu0 %vm333_vm0, %v211_v24  ;;  %v13258_v24 = vld [vmem:[%s12908_s29 + $0x140] sm:$0xff] }
  0x2c   : > { %10034 = vmatmul.mubr.msk.f32.gmra.mrb[10].mxu0 %vm333_vm0, %v212_v25  ;;  %v13265_v25 = vld [vmem:[%s12908_s29 + $0x148] sm:$0xff] }
  0x2d   : > { %10036 = vmatprep.mubr.msk.f32.mxu0 %vm333_vm0, %v213_v28  ;;  %v13268_v28 = vld [vmem:[%s12908_s29 + $0x150] sm:$0xff] }
  0x2e   : > { %11723 = vmatpush3.bf16.xpose.msk.msra.mxu0 %vm12914_vm1, %v13007_v32  ;;  %v13318_v32 = vld [vmem:[%s12908_s29 + $0x190] sm:$0xff] }
  0x2f   : > { %11537 = vmatpush3.bf16.xpose.msk.msra.mxu1 %vm12914_vm1, %v12964_v22  ;;  %11726 = vmatprep.subr.msk.bf16.mxu0 %vm12914_vm1, %v13039_v40  ;;  %v13358_v22 = vld [vmem:[%s12908_s29 + $0x1c8] sm:$0xff] }
  0x30   : > { %10037 = vmatmul.mubr.msk.f32.gmra.mrb[12].mxu0 %vm333_vm0, %v214_v33  ;;  %11540 = vmatprep.subr.msk.bf16.mxu1 %vm12914_vm1, %v13011_v34  ;;  %v13275_v33 = vld [vmem:[%s12908_s29 + $0x158] sm:$0xff] }
  0x31   : > { %10039 = vmatprep.mubr.msk.f32.mxu0 %vm333_vm0, %v215_v35  ;;  %v13278_v35 = vld [vmem:[%s12908_s29 + $0x160] sm:$0xff] }
  0x34   : > { %10040 = vmatmul.mubr.msk.f32.gmra.mrb[14].mxu0 %vm333_vm0, %v216_v36  ;;  %v13285_v36 = vld [vmem:[%s12908_s29 + $0x168] sm:$0xff] }
  0x35   : > { %10042 = vmatprep.mubr.msk.f32.mxu0 %vm333_vm0, %v217_v37  ;;  %v13288_v37 = vld [vmem:[%s12908_s29 + $0x170] sm:$0xff] }
  0x36   : > { %11729 = vmatpush3.bf16.xpose.msk.msra.mxu0 %vm12914_vm1, %v13039_v40 }
  0x37   : > { %11543 = vmatpush3.bf16.xpose.msk.msra.mxu1 %vm12914_vm1, %v13011_v34  ;;  %11732 = vmatprep.subr.msk.bf16.mxu0 %vm12914_vm1, %v13079_v48  ;;  %v13351_v34 = vld [vmem:[%s12908_s29 + $0x1c0] sm:$0xff] }
  0x38   : > { %10043 = vmatmul.mubr.msk.f32.gmra.mrb[16].mxu0 %vm333_vm0, %v218_v41  ;;  %11546 = vmatprep.subr.msk.bf16.mxu1 %vm12914_vm1, %v13043_v42  ;;  %v13295_v41 = vld [vmem:[%s12908_s29 + $0x178] sm:$0xff]  ;;  %18415 = vst [vmem:[#allocation21_spill] sm:$0xff] %v13351_v34 }
  0x39   : > { %10045 = vmatprep.mubr.msk.f32.mxu0 %vm333_vm0, %v13046_v43 }
  0x3c   : > { %10046 = vmatmul.mubr.msk.f32.gmra.mrb[18].mxu0 %vm333_vm0, %v13058_v44 }
  0x3d   : > { %10048 = vmatprep.mubr.msk.f32.mxu0 %vm333_vm0, %v13064_v45 }
  0x3e   : > { %11735 = vmatpush3.bf16.xpose.msk.msra.mxu0 %vm12914_vm1, %v13079_v48  ;;  %v13311_v48 = vld [vmem:[%s12908_s29 + $0x188] sm:$0xff] }
  0x3f   : > { %11549 = vmatpush3.bf16.xpose.msk.msra.mxu1 %vm12914_vm1, %v13043_v42  ;;  %11738 = vmatprep.subr.msk.bf16.mxu0 %vm12914_vm1, %v13123_v56  ;;  %v13348_v42 = vld [vmem:[%s12908_s29 + $0x1b8] sm:$0xff] }
  0x40   : > { %10049 = vmatmul.mubr.msk.f32.gmra.mrb[20].mxu0 %vm333_vm0, %v13084_v49  ;;  %11552 = vmatprep.subr.msk.bf16.mxu1 %vm12914_vm1, %v13086_v50  ;;  %18414 = vst [vmem:[#allocation20_spill] sm:$0xff] %v13348_v42 }
  0x41   : > { %10051 = vmatprep.mubr.msk.f32.mxu0 %vm333_vm0, %v13089_v51 }
  0x44   : > { %10052 = vmatmul.mubr.msk.f32.gmra.mrb[22].mxu0 %vm333_vm0, %v13102_v52 }
  0x45   : > { %10054 = vmatprep.mubr.msk.f32.mxu0 %vm333_vm0, %v13108_v53 }
  0x46   : > { %11741 = vmatpush3.bf16.xpose.msk.msra.mxu0 %vm12914_vm1, %v13123_v56  ;;  %v13306_v56 = vld [vmem:[%s12908_s29 + $0x308] sm:$0xff] }
  0x47   : > { %11555 = vmatpush3.bf16.xpose.msk.msra.mxu1 %vm12914_vm1, %v13086_v50  ;;  %11744 = vmatprep.subr.msk.bf16.mxu0 %vm12914_vm1, %v13167_v0  ;;  %v13341_v50 = vld [vmem:[%s12908_s29 + $0x1b0] sm:$0xff] }
  0x48   : > { %10055 = vmatmul.mubr.msk.f32.gmra.mrb[24].mxu0 %vm333_vm0, %v13128_v57  ;;  %11558 = vmatprep.subr.msk.bf16.mxu1 %vm12914_vm1, %v13130_v58 }
  0x49   : > { %10057 = vmatprep.mubr.msk.f32.mxu0 %vm333_vm0, %v13133_v59 }
  0x4c   : > { %10058 = vmatmul.mubr.msk.f32.gmra.mrb[26].mxu0 %vm333_vm0, %v13146_v60 }
  0x4d   : > { %10060 = vmatprep.mubr.msk.f32.mxu0 %vm333_vm0, %v13152_v61 }
  0x4e   : > { %11747 = vmatpush3.bf16.xpose.msk.msra.mxu0 %vm12914_vm1, %v13167_v0  ;;  %v13303_v0 = vld [vmem:[%s12908_s29 + $0x300] sm:$0xff] }
  0x4f   : > { %11561 = vmatpush3.bf16.xpose.msk.msra.mxu1 %vm12914_vm1, %v13130_v58  ;;  %11750 = vmatprep.subr.msk.bf16.mxu0 %vm12914_vm1, %v13211_v10  ;;  %v13315_v40 = vpack.c.bf16 %v13306_v56, %v13303_v0  ;;  %v13338_v58 = vld [vmem:[%s12908_s29 + $0x1a8] sm:$0xff] }
  0x50   : > { %10061 = vmatmul.mubr.msk.f32.gmra.mrb[28].mxu0 %vm333_vm0, %v13172_v1  ;;  %11564 = vmatprep.subr.msk.bf16.mxu1 %vm12914_vm1, %v13174_v2 }
  0x51   : > { %10063 = vmatprep.mubr.msk.f32.mxu0 %vm333_vm0, %v13177_v3  ;;  %18413 = vst [vmem:[#allocation19_spill] sm:$0xff] %v13315_v40 }
  0x54   : > { %10064 = vmatmul.mubr.msk.f32.gmra.mrb[30].mxu0 %vm333_vm0, %v13190_v4 }
  0x55   : > { %10066 = vmatprep.mubr.msk.f32.mxu0 %vm333_vm0, %v13196_v5 }
  0x56   : > { %11753 = vmatpush3.bf16.xpose.msk.msra.mxu0 %vm12914_vm1, %v13211_v10  ;;  %v13298_v10 = vld [vmem:[%s12908_s29 + $0x180] sm:$0xff] }
  0x57   : > { %11804 = vmatprep.subr.msk.bf16.mxu0 %vm12914_vm1, %v13315_v40 }
  0x58   : > { %10067 = vmatmul.mubr.msk.f32.gmra.mrb[32].mxu0 %vm333_vm0, %v13216_v11 }
  0x59   : > { %10069 = vmatprep.mubr.msk.f32.mxu0 %vm333_vm0, %v13219_v13 }
  0x5c   : > { %10070 = vmatmul.mubr.msk.f32.gmra.mrb[34].mxu0 %vm333_vm0, %v13232_v14 }
  0x5d   : > { %10072 = vmatprep.mubr.msk.f32.mxu0 %vm333_vm0, %v13235_v16 }
  0x60   : > { %10073 = vmatmul.mubr.msk.f32.gmra.mrb[36].mxu0 %vm333_vm0, %v13242_v17 }
  0x61   : > { %10075 = vmatprep.mubr.msk.f32.mxu0 %vm333_vm0, %v13245_v18 }
  0x64   : > { %10076 = vmatmul.mubr.msk.f32.gmra.mrb[38].mxu0 %vm333_vm0, %v13255_v23 }
  0x65   : > { %10078 = vmatprep.mubr.msk.f32.mxu0 %vm333_vm0, %v13258_v24 }
  0x68   : > { %10079 = vmatmul.mubr.msk.f32.gmra.mrb[40].mxu0 %vm333_vm0, %v13265_v25 }
  0x69   : > { %10081 = vmatprep.mubr.msk.f32.mxu0 %vm333_vm0, %v13268_v28 }
  0x6c   : > { %10082 = vmatmul.mubr.msk.f32.gmra.mrb[42].mxu0 %vm333_vm0, %v13275_v33 }
  0x6d   : > { %10084 = vmatprep.mubr.msk.f32.mxu0 %vm333_vm0, %v13278_v35 }
  0x70   : > { %10085 = vmatmul.mubr.msk.f32.gmra.mrb[44].mxu0 %vm333_vm0, %v13285_v36 }
  0x71   : > { %10087 = vmatprep.mubr.msk.f32.mxu0 %vm333_vm0, %v13288_v37 }
  0x74   : > { %10088 = vmatmul.mubr.msk.f32.gmra.mrb[46].mxu0 %vm333_vm0, %v13295_v41 }
  0x75   : > { %10090 = vmatprep.mubr.msk.f32.mxu0 %vm333_vm0, %v13298_v10 }
  0x78   : > { %10091 = vmatmul.mubr.msk.f32.gmra.mrb[48].mxu0 %vm333_vm0, %v13311_v48 }
  0x79   : > { %10093 = vmatprep.mubr.msk.f32.mxu0 %vm333_vm0, %v13318_v32 }
  0x7c   : > { %10094 = vmatmul.mubr.msk.f32.gmra.mrb[50].mxu0 %vm333_vm0, %v13328_v29 }
  0x7d   : > { %10096 = vmatprep.mubr.msk.f32.mxu0 %vm333_vm0, %v13331_v21 }
  0x80   : > { %10097 = vmatmul.mubr.msk.f32.gmra.mrb[52].mxu0 %vm333_vm0, %v13338_v58 }
  0x81   : > { %10099 = vmatprep.mubr.msk.f32.mxu0 %vm333_vm0, %v13341_v50 }
  0x84   : > { %10100 = vmatmul.mubr.msk.f32.gmra.mrb[54].mxu0 %vm333_vm0, %v13348_v42  ;;  %v13381_v42 = vld [vmem:[%s12908_s29 + $0x1f0] sm:$0xff] }
  0x85   : > { %10102 = vmatprep.mubr.msk.f32.mxu0 %vm333_vm0, %v13351_v34  ;;  %v13378_v34 = vld [vmem:[%s12908_s29 + $0x1e8] sm:$0xff] }
  0x88   : > { %10103 = vmatmul.mubr.msk.f32.gmra.mrb[56].mxu0 %vm333_vm0, %v13358_v22 }
  0x89   : > { %10105 = vmatprep.mubr.msk.f32.mxu0 %vm333_vm0, %v13361_v15  ;;  %v13388_v15 = vld [vmem:[%s12908_s29 + $0x1f8] sm:$0xff] }
  0x8c   : > { %10106 = vmatmul.mubr.msk.f32.gmra.mrb[58].mxu0 %vm333_vm0, %v13368_v12 }
  0x8d   : > { %10108 = vmatprep.mubr.msk.f32.mxu0 %vm333_vm0, %v13371_v9 }
  0x90   : > { %10109 = vmatmul.mubr.msk.f32.gmra.mrb[60].mxu0 %vm333_vm0, %v13378_v34 }
  0x91   : > { %10111 = vmatprep.mubr.msk.f32.mxu0 %vm333_vm0, %v13381_v42 }
  0x94   : > { %10112 = vmatmul.mubr.msk.f32.gmra.mrb[62].mxu0 %vm333_vm0, %v13388_v15 }
  0x95   : > { %10114 = vmatprep.mubr.msk.f32.mxu0 %vm333_vm0, %v12954_v19  ;;  %v13423_v19 = vld [vmem:[%s12908_s29 + $0x280] sm:$0xff] }
  0x96   : > { %18417 = vst [vmem:[#allocation23_spill] sm:$0xff] %v13423_v19 }
  0x98   : > { %10115 = vmatmul.mubr.msk.f32.gmra.mrb[64].mxu0 %vm333_vm0, %v12957_v20  ;;  %v13430_v20 = vld [vmem:[%s12908_s29 + $0x288] sm:$0xff] }
  0x99   : > { %10117 = vmatprep.mubr.msk.f32.mxu0 %vm333_vm0, %v12982_v26  ;;  %18418 = vst [vmem:[#allocation24_spill] sm:$0xff] %v13430_v20  ;;  %v13433_v26 = vld [vmem:[%s12908_s29 + $0x290] sm:$0xff] }
  0x9a   : > { %18419 = vst [vmem:[#allocation25_spill] sm:$0xff] %v13433_v26 }
  0x9c   : > { %10118 = vmatmul.mubr.msk.f32.gmra.mrb[66].mxu0 %vm333_vm0, %v12985_v27  ;;  %v13440_v27 = vld [vmem:[%s12908_s29 + $0x298] sm:$0xff] }
  0x9d   : > { %10120 = vmatprep.mubr.msk.f32.mxu0 %vm333_vm0, %v12996_v30  ;;  %18420 = vst [vmem:[#allocation26_spill] sm:$0xff] %v13440_v27  ;;  %v13443_v30 = vld [vmem:[%s12908_s29 + $0x2a0] sm:$0xff] }
  0x9e   : > { %18421 = vst [vmem:[#allocation27_spill] sm:$0xff] %v13443_v30 }
  0xa0   : > { %10121 = vmatmul.mubr.msk.f32.gmra.mrb[68].mxu0 %vm333_vm0, %v12999_v31  ;;  %v13450_v31 = vld [vmem:[%s12908_s29 + $0x2a8] sm:$0xff] }
  0xa1   : > { %10123 = vmatprep.mubr.msk.f32.mxu0 %vm333_vm0, %v13031_v38  ;;  %18422 = vst [vmem:[#allocation28_spill] sm:$0xff] %v13450_v31  ;;  %v13453_v38 = vld [vmem:[%s12908_s29 + $0x2b0] sm:$0xff] }
  0xa2   : > { %18423 = vst [vmem:[#allocation29_spill] sm:$0xff] %v13453_v38 }
  0xa4   : > { %10124 = vmatmul.mubr.msk.f32.gmra.mrb[70].mxu0 %vm333_vm0, %v13034_v39  ;;  %v13460_v39 = vld [vmem:[%s12908_s29 + $0x2b8] sm:$0xff] }
  0xa5   : > { %10126 = vmatprep.mubr.msk.f32.mxu0 %vm333_vm0, %v13070_v46  ;;  %18424 = vst [vmem:[#allocation30_spill] sm:$0xff] %v13460_v39  ;;  %v13463_v46 = vld [vmem:[%s12908_s29 + $0x2c0] sm:$0xff] }
  0xa6   : > { %18425 = vst [vmem:[#allocation31_spill] sm:$0xff] %v13463_v46 }
  0xa8   : > { %10127 = vmatmul.mubr.msk.f32.gmra.mrb[72].mxu0 %vm333_vm0, %v13073_v47  ;;  %v13470_v47 = vld [vmem:[%s12908_s29 + $0x2c8] sm:$0xff] }
  0xa9   : > { %10129 = vmatprep.mubr.msk.f32.mxu0 %vm333_vm0, %v13114_v54  ;;  %18426 = vst [vmem:[#allocation32_spill] sm:$0xff] %v13470_v47  ;;  %v13473_v54 = vld [vmem:[%s12908_s29 + $0x2d0] sm:$0xff] }
  0xaa   : > { %18427 = vst [vmem:[#allocation33_spill] sm:$0xff] %v13473_v54 }
  0xac   : > { %10130 = vmatmul.mubr.msk.f32.gmra.mrb[74].mxu0 %vm333_vm0, %v13117_v55  ;;  %v13480_v55 = vld [vmem:[%s12908_s29 + $0x2d8] sm:$0xff] }
  0xad   : > { %10132 = vmatprep.mubr.msk.f32.mxu0 %vm333_vm0, %v13158_v62  ;;  %18428 = vst [vmem:[#allocation34_spill] sm:$0xff] %v13480_v55  ;;  %v13483_v62 = vld [vmem:[%s12908_s29 + $0x2e0] sm:$0xff] }
  0xae   : > { %18429 = vst [vmem:[#allocation35_spill] sm:$0xff] %v13483_v62 }
  0xb0   : > { %10133 = vmatmul.mubr.msk.f32.gmra.mrb[76].mxu0 %vm333_vm0, %v13161_v63  ;;  %v13490_v63 = vld [vmem:[%s12908_s29 + $0x2e8] sm:$0xff] }
  0xb1   : > { %10135 = vmatprep.mubr.msk.f32.mxu0 %vm333_vm0, %v13202_v6  ;;  %18430 = vst [vmem:[#allocation36_spill] sm:$0xff] %v13490_v63  ;;  %v13493_v6 = vld [vmem:[%s12908_s29 + $0x2f0] sm:$0xff] }
  0xb2   : > { %18431 = vst [vmem:[#allocation37_spill] sm:$0xff] %v13493_v6 }
  0xb4   : > { %10136 = vmatmul.mubr.msk.f32.gmra.mrb[78].mxu0 %vm333_vm0, %v13205_v7  ;;  %v13500_v7 = vld [vmem:[%s12908_s29 + $0x2f8] sm:$0xff] }
  0xb5   : > { %10138 = vmatprep.mubr.msk.f32.mxu0 %vm333_vm0, %v13423_v19  ;;  %18432 = vst [vmem:[#allocation38_spill] sm:$0xff] %v13500_v7 }
  0xb8   : > { %10139 = vmatmul.mubr.msk.f32.gmra.mrb[80].mxu0 %vm333_vm0, %v13430_v20  ;;  %v13595_v20 = vpack.c.bf16 %v13084_v49, %v13064_v45 }
  0xb9   : > { %10141 = vmatprep.mubr.msk.f32.mxu0 %vm333_vm0, %v13433_v26  ;;  %v13573_v26 = vld [vmem:[%s12908_s29 + $0x370] sm:$0xff] }
  0xba   : > { %18436 = vst [vmem:[#allocation42_spill] sm:$0xff] %v13595_v20 }
  0xbc   : > { %10142 = vmatmul.mubr.msk.f32.gmra.mrb[82].mxu0 %vm333_vm0, %v13440_v27  ;;  %v13569_v27 = vld [vmem:[%s12908_s29 + $0x368] sm:$0xff] }
  0xbd   : > { %10144 = vmatprep.mubr.msk.f32.mxu0 %vm333_vm0, %v13443_v30 }
  0xc0   : > { %10145 = vmatmul.mubr.msk.f32.gmra.mrb[84].mxu0 %vm333_vm0, %v13450_v31  ;;  %v13561_v31 = vpack.c.bf16 %v13058_v44, %v13046_v43 }
  0xc1   : > { %10147 = vmatprep.mubr.msk.f32.mxu0 %vm333_vm0, %v13453_v38 }
  0xc2   : > { %18433 = vst [vmem:[#allocation39_spill] sm:$0xff] %v13561_v31 }
  0xc4   : > { %10148 = vmatmul.mubr.msk.f32.gmra.mrb[86].mxu0 %vm333_vm0, %v13460_v39  ;;  %v13557_v39 = vld [vmem:[%s12908_s29 + $0x360] sm:$0xff] }
  0xc5   : > { %10150 = vmatprep.mubr.msk.f32.mxu0 %vm333_vm0, %v13463_v46  ;;  %v13554_v46 = vld [vmem:[%s12908_s29 + $0x358] sm:$0xff] }
  0xc8   : > { %10151 = vmatmul.mubr.msk.f32.gmra.mrb[88].mxu0 %vm333_vm0, %v13470_v47  ;;  %v13547_v47 = vld [vmem:[%s12908_s29 + $0x350] sm:$0xff] }
  0xc9   : > { %10153 = vmatprep.mubr.msk.f32.mxu0 %vm333_vm0, %v13473_v54  ;;  %v13544_v54 = vld [vmem:[%s12908_s29 + $0x348] sm:$0xff] }
  0xcc   : > { %10154 = vmatmul.mubr.msk.f32.gmra.mrb[90].mxu0 %vm333_vm0, %v13480_v55  ;;  %v13537_v55 = vld [vmem:[%s12908_s29 + $0x340] sm:$0xff] }
  0xcd   : > { %10156 = vmatprep.mubr.msk.f32.mxu0 %vm333_vm0, %v13483_v62  ;;  %v13507_v62 = vld [vmem:[%s12908_s29 + $0x310] sm:$0xff] }
  0xd0   : > { %10157 = vmatmul.mubr.msk.f32.gmra.mrb[92].mxu0 %vm333_vm0, %v13490_v63  ;;  %v13517_v63 = vld [vmem:[%s12908_s29 + $0x320] sm:$0xff] }
  0xd1   : > { %10159 = vmatprep.mubr.msk.f32.mxu0 %vm333_vm0, %v13493_v6  ;;  %v13514_v6 = vld [vmem:[%s12908_s29 + $0x318] sm:$0xff] }
  0xd4   : > { %10160 = vmatmul.mubr.msk.f32.gmra.mrb[94].mxu0 %vm333_vm0, %v13500_v7  ;;  %v13527_v7 = vld [vmem:[%s12908_s29 + $0x330] sm:$0xff] }
  0xd5   : > { %10162 = vmatprep.mubr.msk.f32.mxu0 %vm333_vm0, %v13303_v0  ;;  %v13524_v0 = vld [vmem:[%s12908_s29 + $0x328] sm:$0xff] }
  0xd8   : > { %10163 = vmatmul.mubr.msk.f32.gmra.mrb[96].mxu0 %vm333_vm0, %v13306_v56  ;;  %v13534_v56 = vld [vmem:[%s12908_s29 + $0x338] sm:$0xff] }
  0xd9   : > { %10165 = vmatprep.mubr.msk.f32.mxu0 %vm333_vm0, %v13507_v62 }
  0xdc   : > { %10166 = vmatmul.mubr.msk.f32.gmra.mrb[98].mxu0 %vm333_vm0, %v13514_v6 }
  0xdd   : > { %10168 = vmatprep.mubr.msk.f32.mxu0 %vm333_vm0, %v13517_v63 }
  0xe0   : > { %10169 = vmatmul.mubr.msk.f32.gmra.mrb[100].mxu0 %vm333_vm0, %v13524_v0 }
  0xe1   : > { %10171 = vmatprep.mubr.msk.f32.mxu0 %vm333_vm0, %v13527_v7 }
  0xe4   : > { %10172 = vmatmul.mubr.msk.f32.gmra.mrb[102].mxu0 %vm333_vm0, %v13534_v56 }
  0xe5   : > { %10174 = vmatprep.mubr.msk.f32.mxu0 %vm333_vm0, %v13537_v55 }
  0xe8   : > { %10175 = vmatmul.mubr.msk.f32.gmra.mrb[104].mxu0 %vm333_vm0, %v13544_v54 }
  0xe9   : > { %10177 = vmatprep.mubr.msk.f32.mxu0 %vm333_vm0, %v13547_v47 }
  0xeb   : > { %v10020_v38 = vpop.f32.mrb[0].mxu0 }
  0xec   : > { %v784_v30 = vpop.f32.mrb[1].mxu0  ;;  %10178 = vmatmul.mubr.msk.f32.gmra.mrb[106].mxu0 %vm333_vm0, %v13554_v46 }
  0xed   : > { %10242 = vmatprep.mubr.msk.f32.mxu1 %vm333_vm0, %v784_v30  ;;  %10180 = vmatprep.mubr.msk.f32.mxu0 %vm333_vm0, %v13557_v39  ;;  %v13587_v30 = vld [vmem:[%s12908_s29 + $0x378] sm:$0xff] }
  0xee   : > { %10243 = vmatmul.mubr.msk.f32.vlgmr.msra.gmra.mrb[0].mxu1 %vm333_vm0, %v10020_v38  ;;  %18434 = vst [vmem:[#allocation40_spill] sm:$0xff] %v13587_v30  ;;  %v13591_v38 = vld [vmem:[%s12908_s29 + $0x380] sm:$0xff] }
  0xef   : > { %11567 = vmatpush3.bf16.xpose.msk.msra.mxu1 %vm12914_vm1, %v13174_v2  ;;  %v10023_v43 = vpop.f32.mrb[2].mxu0  ;;  %18435 = vst [vmem:[#allocation41_spill] sm:$0xff] %v13591_v38 }
  0xf0   : > { %v794_v44 = vpop.f32.mrb[3].mxu0  ;;  %11570 = vmatprep.subr.msk.bf16.mxu1 %vm12914_vm1, %v13561_v31  ;;  %10181 = vmatmul.mubr.msk.f32.gmra.mrb[108].mxu0 %vm333_vm0, %v13569_v27 }
  0xf1   : > { %10245 = vmatprep.mubr.msk.f32.mxu1 %vm333_vm0, %v794_v44  ;;  %10183 = vmatprep.mubr.msk.f32.mxu0 %vm333_vm0, %v13573_v26  ;;  %v13603_v44 = vld [vmem:[%s12908_s29 + $0x388] sm:$0xff] }
  0xf2   : > { %10246 = vmatmul.mubr.msk.f32.gmra.mrb[2].mxu1 %vm333_vm0, %v10023_v43  ;;  %18437 = vst [vmem:[#allocation43_spill] sm:$0xff] %v13603_v44  ;;  %v13607_v43 = vld [vmem:[%s12908_s29 + $0x390] sm:$0xff] }
  0xf3   : > { %v10026_v2 = vpop.f32.mrb[4].mxu0  ;;  %18438 = vst [vmem:[#allocation44_spill] sm:$0xff] %v13607_v43 }
  0xf4   : > { %v804_v19 = vpop.f32.mrb[5].mxu0  ;;  %10184 = vmatmul.mubr.msk.f32.gmra.mrb[110].mxu0 %vm333_vm0, %v13587_v30 }
  0xf5   : > { %10248 = vmatprep.mubr.msk.f32.mxu1 %vm333_vm0, %v804_v19  ;;  %10186 = vmatprep.mubr.msk.f32.mxu0 %vm333_vm0, %v13591_v38  ;;  %v13625_v19 = vld [vmem:[%s12908_s29 + $0x3a0] sm:$0xff]  ;;  %v13629_v38 = vpack.c.bf16 %v13102_v52, %v13089_v51 }
  0xf6   : > { %10249 = vmatmul.mubr.msk.f32.gmra.mrb[4].mxu1 %vm333_vm0, %v10026_v2  ;;  %v13621_v2 = vld [vmem:[%s12908_s29 + $0x398] sm:$0xff]  ;;  %18440 = vst [vmem:[#allocation46_spill] sm:$0xff] %v13625_v19 }
  0xf7   : > { %11573 = vmatpush3.bf16.xpose.msk.msra.mxu1 %vm12914_vm1, %v13561_v31  ;;  %v10029_v45 = vpop.f32.mrb[6].mxu0  ;;  %18439 = vst [vmem:[#allocation45_spill] sm:$0xff] %v13621_v2  ;;  %18441 = vst [vmem:[#allocation47_spill] sm:$0xff] %v13629_v38 }
  0xf8   : > { %v814_v49 = vpop.f32.mrb[7].mxu0  ;;  %11576 = vmatprep.subr.msk.bf16.mxu1 %vm12914_vm1, %v13595_v20  ;;  %10187 = vmatmul.mubr.msk.f32.gmra.mrb[112].mxu0 %vm333_vm0, %v13603_v44 }
  0xf9   : > { %10251 = vmatprep.mubr.msk.f32.mxu1 %vm333_vm0, %v814_v49  ;;  %10189 = vmatprep.mubr.msk.f32.mxu0 %vm333_vm0, %v13607_v43  ;;  %v13637_v49 = vld [vmem:[%s12908_s29 + $0x3a8] sm:$0xff]  ;;  %v13759_v43 = vpack.c.bf16 %v13232_v14, %v13219_v13  ;;  %v13779_v14 = vpack.c.bf16 %v13242_v17, %v13235_v16  ;;  %v13801_v17 = vpack.c.bf16 %v13255_v23, %v13245_v18 }
  0xfa   : > { %10252 = vmatmul.mubr.msk.f32.gmra.mrb[6].mxu1 %vm333_vm0, %v10029_v45  ;;  %18442 = vst [vmem:[#allocation48_spill] sm:$0xff] %v13637_v49  ;;  %v13641_v45 = vld [vmem:[%s12908_s29 + $0x3b0] sm:$0xff]  ;;  %v13823_v23 = vpack.c.bf16 %v13265_v25, %v13258_v24  ;;  %v13845_v25 = vpack.c.bf16 %v13275_v33, %v13268_v28  ;;  %v13863_v28 = vpack.c.bf16 %v13285_v36, %v13278_v35 }
  0xfb   : > { %v10032_v31 = vpop.f32.mrb[8].mxu0  ;;  %18443 = vst [vmem:[#allocation49_spill] sm:$0xff] %v13641_v45  ;;  %18457 = vst [vmem:[#allocation63_spill] sm:$0xff] %v13759_v43  ;;  %v13881_v35 = vpack.c.bf16 %v13295_v41, %v13288_v37  ;;  %v13899_v37 = vpack.c.bf16 %v13311_v48, %v13298_v10  ;;  %v13919_v10 = vpack.c.bf16 %v13514_v6, %v13507_v62 }
  0xfc   : > { %v824_v30 = vpop.f32.mrb[9].mxu0  ;;  %10190 = vmatmul.mubr.msk.f32.gmra.mrb[114].mxu0 %vm333_vm0, %v13621_v2  ;;  %18458 = vst [vmem:[#allocation64_spill] sm:$0xff] %v13779_v14  ;;  %18459 = vst [vmem:[#allocation65_spill] sm:$0xff] %v13801_v17  ;;  %v13947_v6 = vpack.c.bf16 %v13338_v58, %v13331_v21 }
  0xfd   : > { %10254 = vmatprep.mubr.msk.f32.mxu1 %vm333_vm0, %v824_v30  ;;  %10192 = vmatprep.mubr.msk.f32.mxu0 %vm333_vm0, %v13625_v19  ;;  %v13659_v30 = vld [vmem:[%s12908_s29 + $0x3c0] sm:$0xff]  ;;  %v13663_v19 = vpack.c.bf16 %v13128_v57, %v13108_v53  ;;  %18460 = vst [vmem:[#allocation66_spill] sm:$0xff] %v13823_v23  ;;  %18461 = vst [vmem:[#allocation67_spill] sm:$0xff] %v13845_v25 }
  0xfe   : > { %10255 = vmatmul.mubr.msk.f32.gmra.mrb[8].mxu1 %vm333_vm0, %v10032_v31  ;;  %v13655_v31 = vld [vmem:[%s12908_s29 + $0x3b8] sm:$0xff]  ;;  %18445 = vst [vmem:[#allocation51_spill] sm:$0xff] %v13659_v30  ;;  %18462 = vst [vmem:[#allocation68_spill] sm:$0xff] %v13863_v28 }
  0xff   : > { %11579 = vmatpush3.bf16.xpose.msk.msra.mxu1 %vm12914_vm1, %v13595_v20  ;;  %v10035_v51 = vpop.f32.mrb[10].mxu0  ;;  %18444 = vst [vmem:[#allocation50_spill] sm:$0xff] %v13655_v31  ;;  %18446 = vst [vmem:[#allocation52_spill] sm:$0xff] %v13663_v19 }
 0x100   : > { %v834_v52 = vpop.f32.mrb[11].mxu0  ;;  %11582 = vmatprep.subr.msk.bf16.mxu1 %vm12914_vm1, %v13629_v38  ;;  %10193 = vmatmul.mubr.msk.f32.gmra.mrb[116].mxu0 %vm333_vm0, %v13637_v49  ;;  %18463 = vst [vmem:[#allocation69_spill] sm:$0xff] %v13899_v37  ;;  %18465 = vst [vmem:[#allocation71_spill] sm:$0xff] %v13919_v10 }
 0x101   : > { %10257 = vmatprep.mubr.msk.f32.mxu1 %vm333_vm0, %v834_v52  ;;  %10195 = vmatprep.mubr.msk.f32.mxu0 %vm333_vm0, %v13641_v45  ;;  %v13671_v52 = vld [vmem:[%s12908_s29 + $0x3c8] sm:$0xff]  ;;  %v13747_v45 = vpack.c.bf16 %v13216_v11, %v13196_v5  ;;  %18466 = vst [vmem:[#allocation72_spill] sm:$0xff] %v13947_v6 }
 0x102   : > { %10258 = vmatmul.mubr.msk.f32.gmra.mrb[10].mxu1 %vm333_vm0, %v10035_v51  ;;  %18447 = vst [vmem:[#allocation53_spill] sm:$0xff] %v13671_v52  ;;  %v13675_v51 = vld [vmem:[%s12908_s29 + $0x3d0] sm:$0xff] }
 0x103   : > { %v10038_v20 = vpop.f32.mrb[12].mxu0  ;;  %18448 = vst [vmem:[#allocation54_spill] sm:$0xff] %v13675_v51  ;;  %v18549_v8 = vld [vmem:[#allocation64_spill] sm:$0xff] }
 0x104   : > { %v844_v2 = vpop.f32.mrb[13].mxu0  ;;  %10196 = vmatmul.mubr.msk.f32.gmra.mrb[118].mxu0 %vm333_vm0, %v13655_v31 }
 0x105   : > { %10260 = vmatprep.mubr.msk.f32.mxu1 %vm333_vm0, %v844_v2  ;;  %10198 = vmatprep.mubr.msk.f32.mxu0 %vm333_vm0, %v13659_v30  ;;  %v13693_v2 = vld [vmem:[%s12908_s29 + $0x3e0] sm:$0xff]  ;;  %v13697_v30 = vpack.c.bf16 %v13146_v60, %v13133_v59  ;;  %v13721_v60 = vld [vmem:[%s12908_s29 + $0x3f8] sm:$0xff] }
 0x106   : > { %10261 = vmatmul.mubr.msk.f32.gmra.mrb[12].mxu1 %vm333_vm0, %v10038_v20  ;;  %v13689_v20 = vld [vmem:[%s12908_s29 + $0x3d8] sm:$0xff]  ;;  %18450 = vst [vmem:[#allocation56_spill] sm:$0xff] %v13693_v2  ;;  %18454 = vst [vmem:[#allocation60_spill] sm:$0xff] %v13721_v60 }
 0x107   : > { %11585 = vmatpush3.bf16.xpose.msk.msra.mxu1 %vm12914_vm1, %v13629_v38  ;;  %v10041_v53 = vpop.f32.mrb[14].mxu0  ;;  %18449 = vst [vmem:[#allocation55_spill] sm:$0xff] %v13689_v20  ;;  %18451 = vst [vmem:[#allocation57_spill] sm:$0xff] %v13697_v30 }
 0x108   : > { %v854_v57 = vpop.f32.mrb[15].mxu0  ;;  %11588 = vmatprep.subr.msk.bf16.mxu1 %vm12914_vm1, %v13663_v19  ;;  %10199 = vmatmul.mubr.msk.f32.gmra.mrb[120].mxu0 %vm333_vm0, %v13671_v52  ;;  %v13737_v52 = vpack.c.bf16 %v13190_v4, %v13177_v3 }
 0x109   : > { %10263 = vmatprep.mubr.msk.f32.mxu1 %vm333_vm0, %v854_v57  ;;  %10201 = vmatprep.mubr.msk.f32.mxu0 %vm333_vm0, %v13675_v51  ;;  %v13705_v57 = vld [vmem:[%s12908_s29 + $0x3e8] sm:$0xff] }
 0x10a   : > { %10264 = vmatmul.mubr.msk.f32.gmra.mrb[14].mxu1 %vm333_vm0, %v10041_v53  ;;  %18452 = vst [vmem:[#allocation58_spill] sm:$0xff] %v13705_v57  ;;  %v13708_v53 = vld [vmem:[%s12908_s29 + $0x3f0] sm:$0xff]  ;;  %18456 = vst [vmem:[#allocation62_spill] sm:$0xff] %v13737_v52 }
 0x10b   : > { %v10044_v38 = vpop.f32.mrb[16].mxu0  ;;  %18453 = vst [vmem:[#allocation59_spill] sm:$0xff] %v13708_v53 }
 0x10c   : > { %v864_v31 = vpop.f32.mrb[17].mxu0  ;;  %10202 = vmatmul.mubr.msk.f32.gmra.mrb[122].mxu0 %vm333_vm0, %v13689_v20 }
 0x10d   : > { %10298 = vmatprep.mubr.msk.f32.mxu1 %vm333_vm0, %v864_v31  ;;  %10204 = vmatprep.mubr.msk.f32.mxu0 %vm333_vm0, %v13693_v2  ;;  %v13725_v2 = vpack.c.bf16 %v13172_v1, %v13152_v61 }
 0x10f   : > { %11591 = vmatpush3.bf16.xpose.msk.msra.mxu1 %vm12914_vm1, %v13663_v19  ;;  %v10047_v51 = vpop.f32.mrb[18].mxu0  ;;  %18455 = vst [vmem:[#allocation61_spill] sm:$0xff] %v13725_v2 }
 0x110   : > { %v874_v59 = vpop.f32.mrb[19].mxu0  ;;  %11594 = vmatprep.subr.msk.bf16.mxu1 %vm12914_vm1, %v13697_v30  ;;  %10205 = vmatmul.mubr.msk.f32.gmra.mrb[124].mxu0 %vm333_vm0, %v13705_v57 }
 0x111   : > { %10207 = vmatprep.mubr.msk.f32.mxu0 %vm333_vm0, %v13708_v53 }
 0x113   : > { %v10050_v31 = vpop.f32.mrb[20].mxu0 }
 0x114   : > { %v884_v19 = vpop.f32.mrb[21].mxu0  ;;  %10208 = vmatmul.mubr.msk.f32.gmra.mrb[126].mxu0 %vm333_vm0, %v13721_v60 }
 0x117   : > { %11597 = vmatpush3.bf16.xpose.msk.msra.mxu1 %vm12914_vm1, %v13697_v30  ;;  %v10053_v20 = vpop.f32.mrb[22].mxu0 }
 0x118   : > { %v894_v57 = vpop.f32.mrb[23].mxu0  ;;  %11600 = vmatprep.subr.msk.bf16.mxu1 %vm12914_vm1, %v13725_v2 }
 0x11b   : > { %v10056_v53 = vpop.f32.mrb[24].mxu0 }
 0x11c   : > { %v904_v61 = vpop.f32.mrb[25].mxu0 }
 0x11f   : > { %11603 = vmatpush3.bf16.xpose.msk.msra.mxu1 %vm12914_vm1, %v13725_v2  ;;  %v10059_v1 = vpop.f32.mrb[26].mxu0 }
 0x120   : > { %v914_v60 = vpop.f32.mrb[27].mxu0  ;;  %11606 = vmatprep.subr.msk.bf16.mxu1 %vm12914_vm1, %v13737_v52 }
 0x123   : > { %v10062_v30 = vpop.f32.mrb[28].mxu0 }
 0x124   : > { %v924_v49 = vpop.f32.mrb[29].mxu0 }
 0x127   : > { %11609 = vmatpush3.bf16.xpose.msk.msra.mxu1 %vm12914_vm1, %v13737_v52  ;;  %v10065_v3 = vpop.f32.mrb[30].mxu0 }
 0x128   : > { %v934_v4 = vpop.f32.mrb[31].mxu0  ;;  %11612 = vmatprep.subr.msk.bf16.mxu1 %vm12914_vm1, %v13747_v45 }
 0x12b   : > { %v13755_v2 = vpop.f32.mrb[32].mxu0 }
 0x12c   : > { %v944_v44 = vpop.f32.mrb[33].mxu0 }
 0x12e   : > { %10299 = vmatmul.mubr.msk.f32.vlgmr.msra.gmra.mrb[16].mxu1 %vm333_vm0, %v10044_v38 }
 0x12f   : > { %10301 = vmatprep.mubr.msk.f32.mxu1 %vm333_vm0, %v874_v59  ;;  %11615 = vmatpush3.bf16.xpose.msk.msra.mxu1 %vm12914_vm1, %v13747_v45  ;;  %v13766_v5 = vpop.f32.mrb[34].mxu0 }
 0x130   : > { %v13768_v11 = vpop.f32.mrb[35].mxu0  ;;  %11618 = vmatprep.subr.msk.bf16.mxu1 %vm12914_vm1, %v13759_v43 }
 0x132   : > { %10302 = vmatmul.mubr.msk.f32.gmra.mrb[18].mxu1 %vm333_vm0, %v10047_v51 }
 0x133   : > { %10304 = vmatprep.mubr.msk.f32.mxu1 %vm333_vm0, %v884_v19  ;;  %v13775_v13 = vpop.f32.mrb[36].mxu0 }
 0x134   : > { %v13781_v38 = vpop.f32.mrb[37].mxu0 }
 0x136   : > { %10305 = vmatmul.mubr.msk.f32.gmra.mrb[20].mxu1 %vm333_vm0, %v10050_v31 }
 0x137   : > { %10307 = vmatprep.mubr.msk.f32.mxu1 %vm333_vm0, %v894_v57  ;;  %11621 = vmatpush3.bf16.xpose.msk.msra.mxu1 %vm12914_vm1, %v13759_v43  ;;  %v13788_v59 = vpop.f32.mrb[38].mxu0  ;;  %v13915_v43 = vpack.c.bf16 %v13328_v29, %v13318_v32 }
 0x138   : > { %v13790_v51 = vpop.f32.mrb[39].mxu0  ;;  %11624 = vmatprep.subr.msk.bf16.mxu1 %vm12914_vm1, %v13779_v14 }
 0x139   : > { %18464 = vst [vmem:[#allocation70_spill] sm:$0xff] %v13915_v43 }
 0x13a   : > { %10308 = vmatmul.mubr.msk.f32.gmra.mrb[22].mxu1 %vm333_vm0, %v10053_v20 }
 0x13b   : > { %10310 = vmatprep.mubr.msk.f32.mxu1 %vm333_vm0, %v904_v61  ;;  %v13797_v16 = vpop.f32.mrb[40].mxu0 }
 0x13c   : > { %v13803_v19 = vpop.f32.mrb[41].mxu0 }
 0x13e   : > { %10311 = vmatmul.mubr.msk.f32.gmra.mrb[24].mxu1 %vm333_vm0, %v10056_v53 }
 0x13f   : > { %10313 = vmatprep.mubr.msk.f32.mxu1 %vm333_vm0, %v914_v60  ;;  %11627 = vmatpush3.bf16.xpose.msk.msra.mxu1 %vm12914_vm1, %v13779_v14  ;;  %v13810_v57 = vpop.f32.mrb[42].mxu0 }
 0x140   : > { %v13812_v20 = vpop.f32.mrb[43].mxu0  ;;  %11630 = vmatprep.subr.msk.bf16.mxu1 %vm12914_vm1, %v13801_v17 }
 0x142   : > { %10314 = vmatmul.mubr.msk.f32.gmra.mrb[26].mxu1 %vm333_vm0, %v10059_v1 }
 0x143   : > { %10316 = vmatprep.mubr.msk.f32.mxu1 %vm333_vm0, %v924_v49  ;;  %v13819_v18 = vpop.f32.mrb[44].mxu0 }
 0x144   : > { %v13825_v53 = vpop.f32.mrb[45].mxu0 }
 0x146   : > { %10317 = vmatmul.mubr.msk.f32.gmra.mrb[28].mxu1 %vm333_vm0, %v10062_v30 }
 0x147   : > { %10319 = vmatprep.mubr.msk.f32.mxu1 %vm333_vm0, %v934_v4  ;;  %11633 = vmatpush3.bf16.xpose.msk.msra.mxu1 %vm12914_vm1, %v13801_v17  ;;  %v13832_v60 = vpop.f32.mrb[46].mxu0 }
 0x148   : > { %v13834_v31 = vpop.f32.mrb[47].mxu0  ;;  %11636 = vmatprep.subr.msk.bf16.mxu1 %vm12914_vm1, %v13823_v23 }
 0x14a   : > { %10320 = vmatmul.mubr.msk.f32.gmra.mrb[30].mxu1 %vm333_vm0, %v10065_v3 }
 0x14b   : > { %10354 = vmatprep.mubr.msk.f32.mxu1 %vm333_vm0, %v944_v44  ;;  %v13841_v24 = vpop.f32.mrb[48].mxu0 }
 0x14c   : > { %v13847_v49 = vpop.f32.mrb[49].mxu0 }
 0x14f   : > { %11639 = vmatpush3.bf16.xpose.msk.msra.mxu1 %vm12914_vm1, %v13823_v23  ;;  %v13852_v30 = vpop.f32.mrb[50].mxu0 }
 0x150   : > { %v13854_v61 = vpop.f32.mrb[51].mxu0  ;;  %11642 = vmatprep.subr.msk.bf16.mxu1 %vm12914_vm1, %v13845_v25 }
 0x153   : > { %v13859_v44 = vpop.f32.mrb[52].mxu0 }
 0x154   : > { %v13865_v33 = vpop.f32.mrb[53].mxu0 }
 0x157   : > { %11645 = vmatpush3.bf16.xpose.msk.msra.mxu1 %vm12914_vm1, %v13845_v25  ;;  %v13870_v1 = vpop.f32.mrb[54].mxu0 }
 0x158   : > { %v13872_v3 = vpop.f32.mrb[55].mxu0  ;;  %11648 = vmatprep.subr.msk.bf16.mxu1 %vm12914_vm1, %v13863_v28 }
 0x15b   : > { %v13877_v4 = vpop.f32.mrb[56].mxu0 }
 0x15c   : > { %v13883_v36 = vpop.f32.mrb[57].mxu0 }
 0x15f   : > { %11651 = vmatpush3.bf16.xpose.msk.msra.mxu1 %vm12914_vm1, %v13863_v28  ;;  %v13888_v52 = vpop.f32.mrb[58].mxu0 }
 0x160   : > { %v13890_v25 = vpop.f32.mrb[59].mxu0  ;;  %11654 = vmatprep.subr.msk.bf16.mxu1 %vm12914_vm1, %v13881_v35 }
 0x163   : > { %v13895_v23 = vpop.f32.mrb[60].mxu0 }
 0x164   : > { %v13901_v41 = vpop.f32.mrb[61].mxu0 }
 0x167   : > { %11657 = vmatpush3.bf16.xpose.msk.msra.mxu1 %vm12914_vm1, %v13881_v35  ;;  %v13906_v28 = vpop.f32.mrb[62].mxu0 }
 0x168   : > { %v13908_v17 = vpop.f32.mrb[63].mxu0  ;;  %11660 = vmatprep.subr.msk.bf16.mxu1 %vm12914_vm1, %v13899_v37 }
 0x16b   : > { %v10116_v14 = vpop.f32.mrb[64].mxu0 }
 0x16c   : > { %v1104_v48 = vpop.f32.mrb[65].mxu0 }
 0x16d   : > { %10466 = vmatprep.mubr.msk.f32.mxu0 %vm333_vm0, %v1104_v48  ;;  %v18480_v48 = vld [vmem:[#allocation40_spill] sm:$0xff] }
 0x16e   : > { %10355 = vmatmul.mubr.msk.f32.vlgmr.msra.gmra.mrb[32].mxu1 %vm333_vm0, %v13755_v2  ;;  %10467 = vmatmul.mubr.msk.f32.vlgmr.msra.gmra.mrb[128].mxu0 %vm333_vm0, %v10116_v14  ;;  %v13983_v14 = vpack.c.bf16 %v13534_v56, %v13527_v7 }
 0x16f   : > { %10357 = vmatprep.mubr.msk.f32.mxu1 %vm333_vm0, %v13768_v11  ;;  %11663 = vmatpush3.bf16.xpose.msk.msra.mxu1 %vm12914_vm1, %v13899_v37  ;;  %v10119_v29 = vpop.f32.mrb[66].mxu0  ;;  %v13951_v11 = vpack.c.bf16 %v13524_v0, %v13517_v63  ;;  %v18468_v0 = vld [vmem:[#allocation20_spill] sm:$0xff] }
 0x170   : > { %11666 = vmatprep.subr.msk.bf16.mxu1 %vm12914_vm1, %v13915_v43  ;;  %v1114_v32 = vpop.f32.mrb[67].mxu0  ;;  %11807 = vmatpush3.bf16.xpose.msk.msra.mxu0 %vm12914_vm1, %v13315_v40  ;;  %18470 = vst [vmem:[#allocation74_spill] sm:$0xff] %v13983_v14 }
 0x171   : > { %10469 = vmatprep.mubr.msk.f32.mxu0 %vm333_vm0, %v1114_v32  ;;  %11810 = vmatprep.subr.msk.bf16.mxu0 %vm12914_vm1, %v13919_v10  ;;  %18467 = vst [vmem:[#allocation73_spill] sm:$0xff] %v13951_v11 }
 0x172   : > { %10358 = vmatmul.mubr.msk.f32.gmra.mrb[34].mxu1 %vm333_vm0, %v13766_v5  ;;  %10470 = vmatmul.mubr.msk.f32.gmra.mrb[130].mxu0 %vm333_vm0, %v10119_v29  ;;  %v13979_v5 = vpack.c.bf16 %v18468_v0, %v13341_v50  ;;  %v14107_v29 = vpack.c.bf16 %v18480_v48, %v13573_v26  ;;  %v18482_v26 = vld [vmem:[#allocation23_spill] sm:$0xff]  ;;  %v18485_v0 = vld [vmem:[#allocation2_spill] sm:$0xff] }
 0x173   : > { %10360 = vmatprep.mubr.msk.f32.mxu1 %vm333_vm0, %v13781_v38  ;;  %v10122_v62 = vpop.f32.mrb[68].mxu0  ;;  %v18471_v38 = vld [vmem:[#allocation21_spill] sm:$0xff] }
 0x174   : > { %v1124_v2 = vpop.f32.mrb[69].mxu0  ;;  %18469 = vst [vmem:[#allocation20_spill] sm:$0xff] %v13979_v5  ;;  %18481 = vst [vmem:[#allocation40_spill] sm:$0xff] %v14107_v29 }
 0x175   : > { %10472 = vmatprep.mubr.msk.f32.mxu0 %vm333_vm0, %v1124_v2 }
 0x176   : > { %10361 = vmatmul.mubr.msk.f32.gmra.mrb[36].mxu1 %vm333_vm0, %v13775_v13  ;;  %10473 = vmatmul.mubr.msk.f32.gmra.mrb[132].mxu0 %vm333_vm0, %v10122_v62  ;;  %v18483_v62 = vld [vmem:[#allocation24_spill] sm:$0xff] }
 0x177   : > { %10363 = vmatprep.mubr.msk.f32.mxu1 %vm333_vm0, %v13790_v51  ;;  %11669 = vmatpush3.bf16.xpose.msk.msra.mxu1 %vm12914_vm1, %v13915_v43  ;;  %v10125_v21 = vpop.f32.mrb[70].mxu0  ;;  %v14129_v2 = vpack.c.bf16 %v18483_v62, %v18482_v26 }
 0x178   : > { %11672 = vmatprep.subr.msk.bf16.mxu1 %vm12914_vm1, %v13947_v6  ;;  %v1134_v58 = vpop.f32.mrb[71].mxu0  ;;  %11813 = vmatpush3.bf16.xpose.msk.msra.mxu0 %vm12914_vm1, %v13919_v10 }
 0x179   : > { %10475 = vmatprep.mubr.msk.f32.mxu0 %vm333_vm0, %v1134_v58  ;;  %11816 = vmatprep.subr.msk.bf16.mxu0 %vm12914_vm1, %v13951_v11  ;;  %18484 = vst [vmem:[#allocation23_spill] sm:$0xff] %v14129_v2 }
 0x17a   : > { %10364 = vmatmul.mubr.msk.f32.gmra.mrb[38].mxu1 %vm333_vm0, %v13788_v59  ;;  %10476 = vmatmul.mubr.msk.f32.gmra.mrb[134].mxu0 %vm333_vm0, %v10125_v21  ;;  %v14011_v59 = vpack.c.bf16 %v13358_v22, %v18471_v38 }
 0x17b   : > { %10366 = vmatprep.mubr.msk.f32.mxu1 %vm333_vm0, %v13803_v19  ;;  %v10128_v63 = vpop.f32.mrb[72].mxu0  ;;  %v18474_v19 = vld [vmem:[#allocation22_spill] sm:$0xff] }
 0x17c   : > { %v1144_v13 = vpop.f32.mrb[73].mxu0  ;;  %18472 = vst [vmem:[#allocation21_spill] sm:$0xff] %v14011_v59 }
 0x17d   : > { %10478 = vmatprep.mubr.msk.f32.mxu0 %vm333_vm0, %v1144_v13 }
 0x17e   : > { %10367 = vmatmul.mubr.msk.f32.gmra.mrb[40].mxu1 %vm333_vm0, %v13797_v16  ;;  %10479 = vmatmul.mubr.msk.f32.gmra.mrb[136].mxu0 %vm333_vm0, %v10128_v63  ;;  %v14015_v16 = vpack.c.bf16 %v13544_v54, %v13537_v55 }
 0x17f   : > { %10369 = vmatprep.mubr.msk.f32.mxu1 %vm333_vm0, %v13812_v20  ;;  %11675 = vmatpush3.bf16.xpose.msk.msra.mxu1 %vm12914_vm1, %v13947_v6  ;;  %v10131_v50 = vpop.f32.mrb[74].mxu0 }
 0x180   : > { %11678 = vmatprep.subr.msk.bf16.mxu1 %vm12914_vm1, %v13979_v5  ;;  %11819 = vmatpush3.bf16.xpose.msk.msra.mxu0 %vm12914_vm1, %v13951_v11  ;;  %v1154_v7 = vpop.f32.mrb[75].mxu0  ;;  %18473 = vst [vmem:[#allocation75_spill] sm:$0xff] %v14015_v16 }
 0x181   : > { %11822 = vmatprep.subr.msk.bf16.mxu0 %vm12914_vm1, %v13983_v14  ;;  %10481 = vmatprep.mubr.msk.f32.mxu0 %vm333_vm0, %v1154_v7  ;;  %v18487_v7 = vld [vmem:[#allocation26_spill] sm:$0xff] }
 0x182   : > { %10370 = vmatmul.mubr.msk.f32.gmra.mrb[42].mxu1 %vm333_vm0, %v13810_v57  ;;  %10482 = vmatmul.mubr.msk.f32.gmra.mrb[138].mxu0 %vm333_vm0, %v10131_v50  ;;  %v14045_v57 = vpack.c.bf16 %v13368_v12, %v18474_v19  ;;  %v18486_v50 = vld [vmem:[#allocation25_spill] sm:$0xff]  ;;  %v18491_v19 = vld [vmem:[#allocation28_spill] sm:$0xff] }
 0x183   : > { %10372 = vmatprep.mubr.msk.f32.mxu1 %vm333_vm0, %v13825_v53  ;;  %v10134_v56 = vpop.f32.mrb[76].mxu0 }
 0x184   : > { %v1164_v51 = vpop.f32.mrb[77].mxu0  ;;  %18475 = vst [vmem:[#allocation22_spill] sm:$0xff] %v14045_v57 }
 0x185   : > { %10484 = vmatprep.mubr.msk.f32.mxu0 %vm333_vm0, %v1164_v51 }
 0x186   : > { %10373 = vmatmul.mubr.msk.f32.gmra.mrb[44].mxu1 %vm333_vm0, %v13819_v18  ;;  %10485 = vmatmul.mubr.msk.f32.gmra.mrb[140].mxu0 %vm333_vm0, %v10134_v56  ;;  %v14051_v18 = vpack.c.bf16 %v13554_v46, %v13547_v47  ;;  %v14073_v47 = vpack.c.bf16 %v13378_v34, %v13371_v9  ;;  %v14149_v56 = vpack.c.bf16 %v18487_v7, %v18486_v50 }
 0x187   : > { %10375 = vmatprep.mubr.msk.f32.mxu1 %vm333_vm0, %v13834_v31  ;;  %11681 = vmatpush3.bf16.xpose.msk.msra.mxu1 %vm12914_vm1, %v13979_v5  ;;  %v10137_v22 = vpop.f32.mrb[78].mxu0  ;;  %v14079_v31 = vpack.c.bf16 %v13569_v27, %v13557_v39  ;;  %v14101_v27 = vpack.c.bf16 %v13388_v15, %v13381_v42  ;;  %v18519_v5 = vld [vmem:[#allocation38_spill] sm:$0xff] }
 0x188   : > { %11684 = vmatprep.subr.msk.bf16.mxu1 %vm12914_vm1, %v14011_v59  ;;  %11825 = vmatpush3.bf16.xpose.msk.msra.mxu0 %vm12914_vm1, %v13983_v14  ;;  %v1174_v54 = vpop.f32.mrb[79].mxu0  ;;  %18476 = vst [vmem:[#allocation76_spill] sm:$0xff] %v14051_v18  ;;  %18477 = vst [vmem:[#allocation77_spill] sm:$0xff] %v14073_v47 }
 0x189   : > { %11828 = vmatprep.subr.msk.bf16.mxu0 %vm12914_vm1, %v14015_v16  ;;  %10487 = vmatprep.mubr.msk.f32.mxu0 %vm333_vm0, %v1174_v54  ;;  %18478 = vst [vmem:[#allocation78_spill] sm:$0xff] %v14079_v31  ;;  %18479 = vst [vmem:[#allocation79_spill] sm:$0xff] %v14101_v27  ;;  %v18490_v54 = vld [vmem:[#allocation27_spill] sm:$0xff] }
 0x18a   : > { %10376 = vmatmul.mubr.msk.f32.gmra.mrb[46].mxu1 %vm333_vm0, %v13832_v60  ;;  %10488 = vmatmul.mubr.msk.f32.gmra.mrb[142].mxu0 %vm333_vm0, %v10137_v22  ;;  %18488 = vst [vmem:[#allocation24_spill] sm:$0xff] %v14149_v56  ;;  %v14172_v48 = vpack.c.bf16 %v18491_v19, %v18490_v54  ;;  %v14238_v54 = vld [vmem:[%s17981_s3 + $0x18] sm:$0xff] }
 0x18b   : > { %10410 = vmatprep.mubr.msk.f32.mxu1 %vm333_vm0, %v13847_v49  ;;  %v14041_v55 = vpop.f32.mrb[80].mxu0 }
 0x18c   : > { %v14047_v20 = vpop.f32.mrb[81].mxu0  ;;  %18492 = vst [vmem:[#allocation2_spill] sm:$0xff] %v14172_v48 }
 0x18f   : > { %11687 = vmatpush3.bf16.xpose.msk.msra.mxu1 %vm12914_vm1, %v14011_v59  ;;  %v14056_v53 = vpop.f32.mrb[82].mxu0  ;;  %v18518_v59 = vld [vmem:[#allocation37_spill] sm:$0xff] }
 0x190   : > { %11690 = vmatprep.subr.msk.bf16.mxu1 %vm12914_vm1, %v14045_v57  ;;  %11831 = vmatpush3.bf16.xpose.msk.msra.mxu0 %vm12914_vm1, %v14015_v16  ;;  %v14064_v12 = vpop.f32.mrb[83].mxu0  ;;  %v18511_v16 = vld [vmem:[#allocation35_spill] sm:$0xff]  ;;  %v14411_v6 = vpack.c.bf16 %v18519_v5, %v18518_v59  ;;  %v14434_v59 = vld [vmem:[%s17981_s3 + $0x78] sm:$0xff] }
 0x191   : > { %11834 = vmatprep.subr.msk.bf16.mxu0 %vm12914_vm1, %v14051_v18 }
 0x193   : > { %v14069_v46 = vpop.f32.mrb[84].mxu0 }
 0x194   : > { %v14075_v60 = vpop.f32.mrb[85].mxu0 }
 0x197   : > { %11693 = vmatpush3.bf16.xpose.msk.msra.mxu1 %vm12914_vm1, %v14045_v57  ;;  %v14084_v49 = vpop.f32.mrb[86].mxu0 }
 0x198   : > { %11696 = vmatprep.subr.msk.bf16.mxu1 %vm12914_vm1, %v14073_v47  ;;  %11837 = vmatpush3.bf16.xpose.msk.msra.mxu0 %vm12914_vm1, %v14051_v18  ;;  %v14092_v9 = vpop.f32.mrb[87].mxu0  ;;  %v14351_v18 = vld [vmem:[%s17981_s3 + $0x48] sm:$0xff] }
 0x199   : > { %11840 = vmatprep.subr.msk.bf16.mxu0 %vm12914_vm1, %v14079_v31 }
 0x19b   : > { %v14097_v34 = vpop.f32.mrb[88].mxu0 }
 0x19c   : > { %v14103_v39 = vpop.f32.mrb[89].mxu0 }
 0x19f   : > { %11699 = vmatpush3.bf16.xpose.msk.msra.mxu1 %vm12914_vm1, %v14073_v47  ;;  %v14112_v32 = vpop.f32.mrb[90].mxu0  ;;  %v14405_v47 = vld [vmem:[%s17981_s3 + $0x68] sm:$0xff] }
 0x1a0   : > { %11702 = vmatprep.subr.msk.bf16.mxu1 %vm12914_vm1, %v14101_v27  ;;  %11843 = vmatpush3.bf16.xpose.msk.msra.mxu0 %vm12914_vm1, %v14079_v31  ;;  %v14120_v15 = vpop.f32.mrb[91].mxu0 }
 0x1a1   : > { %11846 = vmatprep.subr.msk.bf16.mxu0 %vm12914_vm1, %v14107_v29 }
 0x1a3   : > { %v14125_v42 = vpop.f32.mrb[92].mxu0 }
 0x1a4   : > { %v14131_v21 = vpop.f32.mrb[93].mxu0 }
 0x1a7   : > { %11705 = vmatpush3.bf16.xpose.msk.msra.mxu1 %vm12914_vm1, %v14101_v27  ;;  %v14136_v58 = vpop.f32.mrb[94].mxu0 }
 0x1a8   : > { %11756 = vmatprep.subr.msk.bf16.mxu1 %vm12914_vm1, %v14129_v2  ;;  %11849 = vmatpush3.bf16.xpose.msk.msra.mxu0 %vm12914_vm1, %v14107_v29  ;;  %v14144_v63 = vpop.f32.mrb[95].mxu0 }
 0x1a9   : > { %11899 = vmatprep.subr.bf16.mxu0 %v18485_v0 }
 0x1ab   : > { %v10164_v13 = vpop.f32.mrb[96].mxu0 }
 0x1ac   : > { %v1264_v38 = vpop.f32.mrb[97].mxu0 }
 0x1ad   : > { %10578 = vmatprep.mubr.msk.f32.mxu0 %vm333_vm0, %v1264_v38 }
 0x1ae   : > { %10411 = vmatmul.mubr.msk.f32.vlgmr.msra.gmra.mrb[48].mxu1 %vm333_vm0, %v13841_v24  ;;  %v18489_v24 = vld [vmem:[#allocation3_spill] sm:$0xff] }
 0x1af   : > { %10413 = vmatprep.mubr.msk.f32.mxu1 %vm333_vm0, %v13854_v61  ;;  %11759 = vmatpush3.bf16.xpose.msk.msra.mxu1 %vm12914_vm1, %v14129_v2  ;;  %v10167_v51 = vpop.f32.mrb[98].mxu0 }
 0x1b0   : > { %11762 = vmatprep.subr.msk.bf16.mxu1 %vm12914_vm1, %v14149_v56  ;;  %10579 = vmatmul.mubr.msk.f32.vlgmr.msra.gmra.mrb[144].mxu0 %vm333_vm0, %v10164_v13  ;;  %v1274_v22 = vpop.f32.mrb[99].mxu0  ;;  %v18496_v13 = vld [vmem:[#allocation30_spill] sm:$0xff] }
 0x1b1   : > { %10581 = vmatprep.mubr.msk.f32.mxu0 %vm333_vm0, %v1274_v22  ;;  %11901 = vmatpush3.bf16.msra.mxu0 %v18485_v0  ;;  %v18495_v0 = vld [vmem:[#allocation29_spill] sm:$0xff] }
 0x1b2   : > { %10414 = vmatmul.mubr.msk.f32.gmra.mrb[50].mxu1 %vm333_vm0, %v13852_v30  ;;  %11903 = vmatprep.subr.bf16.mxu0 %v18489_v24  ;;  %v18493_v30 = vld [vmem:[#allocation4_spill] sm:$0xff]  ;;  %v14198_v50 = vpack.c.bf16 %v18496_v13, %v18495_v0  ;;  %v18503_v0 = vld [vmem:[#allocation13_spill] sm:$0xff] }
 0x1b3   : > { %10416 = vmatprep.mubr.msk.f32.mxu1 %vm333_vm0, %v13865_v33  ;;  %v10170_v61 = vpop.f32.mrb[100].mxu0 }
 0x1b4   : > { %10582 = vmatmul.mubr.msk.f32.gmra.mrb[146].mxu0 %vm333_vm0, %v10167_v51  ;;  %v1284_v26 = vpop.f32.mrb[101].mxu0  ;;  %18497 = vst [vmem:[#allocation25_spill] sm:$0xff] %v14198_v50 }
 0x1b5   : > { %10584 = vmatprep.mubr.msk.f32.mxu0 %vm333_vm0, %v1284_v26  ;;  %11905 = vmatpush3.bf16.msra.mxu0 %v18489_v24  ;;  %v18499_v24 = vld [vmem:[#allocation11_spill] sm:$0xff] }
 0x1b6   : > { %10417 = vmatmul.mubr.msk.f32.gmra.mrb[52].mxu1 %vm333_vm0, %v13859_v44  ;;  %11907 = vmatprep.subr.bf16.mxu0 %v18493_v30  ;;  %v18494_v44 = vld [vmem:[#allocation6_spill] sm:$0xff]  ;;  %v18500_v26 = vld [vmem:[#allocation31_spill] sm:$0xff]  ;;  %18520 = vst [vmem:[#allocation11_spill] sm:$0xff] %v14411_v6 }
 0x1b7   : > { %10419 = vmatprep.mubr.msk.f32.mxu1 %vm333_vm0, %v13872_v3  ;;  %11765 = vmatpush3.bf16.xpose.msk.msra.mxu1 %vm12914_vm1, %v14149_v56  ;;  %v10173_v33 = vpop.f32.mrb[102].mxu0 }
 0x1b8   : > { %11768 = vmatprep.subr.msk.bf16.mxu1 %vm12914_vm1, %v14172_v48  ;;  %10585 = vmatmul.mubr.msk.f32.gmra.mrb[148].mxu0 %vm333_vm0, %v10170_v61  ;;  %v1294_v62 = vpop.f32.mrb[103].mxu0  ;;  %v14233_v61 = vld [vmem:[%s17981_s3] sm:$0xff] }
 0x1b9   : > { %10587 = vmatprep.mubr.msk.f32.mxu0 %vm333_vm0, %v1294_v62  ;;  %11909 = vmatpush3.bf16.msra.mxu0 %v18493_v30  ;;  %v18501_v30 = vld [vmem:[#allocation32_spill] sm:$0xff] }
 0x1ba   : > { %10420 = vmatmul.mubr.msk.f32.gmra.mrb[54].mxu1 %vm333_vm0, %v13870_v1  ;;  %11911 = vmatprep.subr.bf16.mxu0 %v18494_v44  ;;  %v18498_v1 = vld [vmem:[#allocation9_spill] sm:$0xff] }
 0x1bb   : > { %10422 = vmatprep.mubr.msk.f32.mxu1 %vm333_vm0, %v13883_v36  ;;  %v10176_v3 = vpop.f32.mrb[104].mxu0  ;;  %v14214_v36 = vld [vmem:[%s17981_s3 + $0x8] sm:$0xff] }
 0x1bc   : > { %10588 = vmatmul.mubr.msk.f32.gmra.mrb[150].mxu0 %vm333_vm0, %v10173_v33  ;;  %v1304_v7 = vpop.f32.mrb[105].mxu0  ;;  %v14244_v33 = vpack.c.bf16 %v18501_v30, %v18500_v26  ;;  %v18507_v30 = vld [vmem:[#allocation15_spill] sm:$0xff] }
 0x1bd   : > { %10590 = vmatprep.mubr.msk.f32.mxu0 %vm333_vm0, %v1304_v7  ;;  %11913 = vmatpush3.bf16.msra.mxu0 %v18494_v44  ;;  %v14272_v7 = vld [vmem:[%s17981_s3 + $0x20] sm:$0xff] }
 0x1be   : > { %10423 = vmatmul.mubr.msk.f32.gmra.mrb[56].mxu1 %vm333_vm0, %v13877_v4  ;;  %11915 = vmatprep.subr.bf16.mxu0 %v18498_v1  ;;  %18502 = vst [vmem:[#allocation26_spill] sm:$0xff] %v14244_v33 }
 0x1bf   : > { %10425 = vmatprep.mubr.msk.f32.mxu1 %vm333_vm0, %v13890_v25  ;;  %11771 = vmatpush3.bf16.xpose.msk.msra.mxu1 %vm12914_vm1, %v14172_v48  ;;  %v10179_v38 = vpop.f32.mrb[106].mxu0 }
 0x1c0   : > { %11774 = vmatprep.subr.msk.bf16.mxu1 %vm12914_vm1, %v14198_v50  ;;  %10591 = vmatmul.mubr.msk.f32.gmra.mrb[152].mxu0 %vm333_vm0, %v10176_v3  ;;  %v1314_v4 = vpop.f32.mrb[107].mxu0 }
 0x1c1   : > { %v10244_v51 = vpop.f32.mrb[0].mxu1  ;;  %10593 = vmatprep.mubr.msk.f32.mxu0 %vm333_vm0, %v1314_v4  ;;  %11917 = vmatpush3.bf16.msra.mxu0 %v18498_v1 }
 0x1c2   : > { %10426 = vmatmul.mubr.msk.f32.gmra.mrb[58].mxu1 %vm333_vm0, %v13888_v52  ;;  %v1553_v25 = vpop.f32.mrb[1].mxu1  ;;  %v14225_v22 = vadd.f32 %v10244_v51, %v14214_v36  ;;  %11919 = vmatprep.subr.bf16.mxu0 %v18499_v24 }
 0x1c3   : > { %10428 = vmatprep.mubr.msk.f32.mxu1 %vm333_vm0, %v13901_v41  ;;  %v10182_v52 = vpop.f32.mrb[108].mxu0  ;;  %v14251_v44 = vadd.f32 %v1553_v25, %v14233_v61  ;;  %v14292_v25 = vld [vmem:[%s17981_s3 + $0x28] sm:$0xff] }
 0x1c4   : > { %2985 = vmax.xlane.f32.xlu0 %v14225_v22  ;;  %10594 = vmatmul.mubr.msk.f32.gmra.mrb[154].mxu0 %vm333_vm0, %v10179_v38  ;;  %v1324_v19 = vpop.f32.mrb[109].mxu0 }
 0x1c5   : > { %v10247_v41 = vpop.f32.mrb[2].mxu1  ;;  %10596 = vmatprep.mubr.msk.f32.mxu0 %vm333_vm0, %v1324_v19  ;;  %11921 = vmatpush3.bf16.msra.mxu0 %v18499_v24 }
 0x1c6   : > { %10429 = vmatmul.mubr.msk.f32.gmra.mrb[60].mxu1 %vm333_vm0, %v13895_v23  ;;  %v1563_v62 = vpop.f32.mrb[3].mxu1  ;;  %v14254_v3 = vadd.f32 %v10247_v41, %v14238_v54  ;;  %11923 = vmatprep.subr.bf16.mxu0 %v18503_v0  ;;  %v14265_v23 = vld [vmem:[%s17981_s3 + $0x10] sm:$0xff] }
 0x1c7   : > { %10431 = vmatprep.mubr.msk.f32.mxu1 %vm333_vm0, %v13908_v17  ;;  %11777 = vmatpush3.bf16.xpose.msk.msra.mxu1 %vm12914_vm1, %v14198_v50  ;;  %v10185_v13 = vpop.f32.mrb[110].mxu0  ;;  %v14281_v4 = vadd.f32 %v1563_v62, %v14265_v23  ;;  %v18512_v50 = vld [vmem:[#allocation36_spill] sm:$0xff] }
 0x1c8   : > { %2983 = vmax.xlane.f32.xlu0 %v14251_v44  ;;  %2989 = vmax.xlane.f32.xlu1 %v14254_v3  ;;  %v1334_v17 = vpop.f32.mrb[111].mxu0  ;;  %v14357_v14 = vpack.c.bf16 %v18512_v50, %v18511_v16  ;;  %v14380_v50 = vld [vmem:[%s17981_s3 + $0x58] sm:$0xff] }
 0x1c9   : > { %v10250_v1 = vpop.f32.mrb[4].mxu1  ;;  %11780 = vmatprep.subr.msk.bf16.mxu1 %vm12914_vm1, %v14244_v33  ;;  %10597 = vmatmul.mubr.msk.f32.gmra.mrb[156].mxu0 %vm333_vm0, %v10182_v52  ;;  %v18505_v52 = vld [vmem:[#allocation34_spill] sm:$0xff] }
 0x1ca   : > { %10432 = vmatmul.mubr.msk.f32.gmra.mrb[62].mxu1 %vm333_vm0, %v13906_v28  ;;  %v1573_v38 = vpop.f32.mrb[5].mxu1  ;;  %10599 = vmatprep.mubr.msk.f32.mxu0 %vm333_vm0, %v1334_v17  ;;  %v18504_v28 = vld [vmem:[#allocation33_spill] sm:$0xff]  ;;  %18513 = vst [vmem:[#allocation4_spill] sm:$0xff] %v14357_v14 }
 0x1cb   : > { %10522 = vmatprep.mubr.msk.f32.mxu1 %vm333_vm0, %v14047_v20  ;;  %v14287_v51 = vadd.f32 %v1573_v38, %v14272_v7  ;;  %v14294_v24 = vpop.f32.mrb[112].mxu0  ;;  %11925 = vmatpush3.bf16.msra.mxu0 %v18503_v0  ;;  %v14299_v19 = vpack.c.bf16 %v18505_v52, %v18504_v28  ;;  %v14305_v20 = vld [vmem:[%s17981_s3 + $0x30] sm:$0xff]  ;;  %v14313_v0 = vadd.f32 %v10250_v1, %v14292_v25  ;;  %v14324_v38 = vld [vmem:[%s17981_s3 + $0x38] sm:$0xff] }
 0x1cc   : > { %2987 = vmax.xlane.f32.xlu1 %v14281_v4  ;;  %v14307_v26 = vpop.f32.mrb[113].mxu0  ;;  %11927 = vmatprep.subr.bf16.mxu0 %v18507_v30 }
 0x1cd   : > { %18506 = vst [vmem:[#allocation3_spill] sm:$0xff] %v14299_v19  ;;  %2991 = vmax.xlane.f32.xlu0 %v14287_v51  ;;  %v10253_v41 = vpop.f32.mrb[6].mxu1  ;;  %10600 = vmatmul.mubr.msk.f32.gmra.mrb[158].mxu0 %vm333_vm0, %v10185_v13  ;;  %v14333_v13 = vld [vmem:[%s17981_s3 + $0x40] sm:$0xff] }
 0x1ce   : > { %v1583_v62 = vpop.f32.mrb[7].mxu1 }
 0x1cf   : > { %11783 = vmatpush3.bf16.xpose.msk.msra.mxu1 %vm12914_vm1, %v14244_v33  ;;  %v14319_v17 = vadd.f32 %v1583_v62, %v14305_v20  ;;  %v14326_v28 = vpop.f32.mrb[114].mxu0  ;;  %11929 = vmatpush3.bf16.msra.mxu0 %v18507_v30  ;;  %v18509_v62 = vld [vmem:[#allocation17_spill] sm:$0xff]  ;;  %v14343_v30 = vadd.f32 %v10253_v41, %v14324_v38  ;;  %v14363_v41 = vld [vmem:[%s17981_s3 + $0x50] sm:$0xff] }
 0x1d0   : > { %2993 = vmax.xlane.f32.xlu1 %v14313_v0  ;;  %11786 = vmatprep.subr.msk.bf16.mxu1 %vm12914_vm1, %v14299_v19  ;;  %v14338_v1 = vpop.f32.mrb[115].mxu0 }
 0x1d1   : > { %18508 = vst [vmem:[#allocation27_spill] sm:$0xff] %v14319_v17  ;;  %2995 = vmax.xlane.f32.xlu0 %v14319_v17  ;;  %v10256_v52 = vpop.f32.mrb[8].mxu1  ;;  %11931 = vmatprep.subr.bf16.mxu0 %v18509_v62  ;;  %v18527_v17 = vld [vmem:[#allocation45_spill] sm:$0xff] }
 0x1d2   : > { %v1593_v29 = vpop.f32.mrb[9].mxu1  ;;  %v14369_v56 = vadd.f32 %v10256_v52, %v14351_v18  ;;  %v14388_v52 = vld [vmem:[%s17981_s3 + $0x60] sm:$0xff] }
 0x1d3   : > { %v14346_v31 = vadd.f32 %v1593_v29, %v14333_v13  ;;  %v14353_v33 = vpop.f32.mrb[116].mxu0 }
 0x1d4   : > { %2997 = vmax.xlane.f32.xlu1 %v14343_v30  ;;  %v14365_v29 = vpop.f32.mrb[117].mxu0  ;;  %18514 = vst [vmem:[#allocation6_spill] sm:$0xff] %v14369_v56 }
 0x1d5   : > { %18510 = vst [vmem:[#allocation28_spill] sm:$0xff] %v14346_v31  ;;  %2999 = vmax.xlane.f32.xlu0 %v14346_v31  ;;  %v10259_v48 = vpop.f32.mrb[10].mxu1 }
 0x1d6   : > { %v1603_v11 = vpop.f32.mrb[11].mxu1  ;;  %v14397_v2 = vadd.f32 %v10259_v48, %v14380_v50  ;;  %v14417_v48 = vld [vmem:[%s17981_s3 + $0x70] sm:$0xff] }
 0x1d7   : > { %11789 = vmatpush3.bf16.xpose.msk.msra.mxu1 %vm12914_vm1, %v14299_v19  ;;  %v14375_v16 = vadd.f32 %v1603_v11, %v14363_v41  ;;  %v14382_v10 = vpop.f32.mrb[118].mxu0 }
 0x1d8   : > { %3001 = vmax.xlane.f32.xlu1 %v14369_v56  ;;  %11792 = vmatprep.subr.msk.bf16.mxu1 %vm12914_vm1, %v14357_v14  ;;  %v14393_v11 = vpop.f32.mrb[119].mxu0  ;;  %18516 = vst [vmem:[#allocation30_spill] sm:$0xff] %v14397_v2 }
 0x1d9   : > { %18515 = vst [vmem:[#allocation29_spill] sm:$0xff] %v14375_v16  ;;  %3003 = vmax.xlane.f32.xlu0 %v14375_v16  ;;  %v10262_v19 = vpop.f32.mrb[12].mxu1 }
 0x1da   : > { %v1613_v40 = vpop.f32.mrb[13].mxu1  ;;  %v14423_v62 = vadd.f32 %v10262_v19, %v14405_v47 }
 0x1db   : > { %v14400_v27 = vadd.f32 %v1613_v40, %v14388_v52  ;;  %v14407_v57 = vpop.f32.mrb[120].mxu0 }
 0x1dc   : > { %3005 = vmax.xlane.f32.xlu1 %v14397_v2  ;;  %v14419_v40 = vpop.f32.mrb[121].mxu0  ;;  %18521 = vst [vmem:[#allocation31_spill] sm:$0xff] %v14423_v62  ;;  %v18524_v2 = vld [vmem:[#allocation43_spill] sm:$0xff] }
 0x1dd   : > { %18517 = vst [vmem:[#allocation9_spill] sm:$0xff] %v14400_v27  ;;  %3007 = vmax.xlane.f32.xlu0 %v14400_v27  ;;  %v10265_v43 = vpop.f32.mrb[14].mxu1  ;;  %v18523_v27 = vld [vmem:[#allocation41_spill] sm:$0xff] }
 0x1de   : > { %v1623_v37 = vpop.f32.mrb[15].mxu1  ;;  %v14452_v31 = vpack.c.bf16 %v18524_v2, %v18523_v27  ;;  %v18529_v2 = vld [vmem:[#allocation46_spill] sm:$0xff] }
 0x1df   : > { %11795 = vmatpush3.bf16.xpose.msk.msra.mxu1 %vm12914_vm1, %v14357_v14  ;;  %v14429_v5 = vadd.f32 %v1623_v37, %v14417_v48  ;;  %v14436_v16 = vpop.f32.mrb[122].mxu0  ;;  %v14446_v37 = vadd.f32 %v10265_v43, %v14434_v59 }
 0x1e0   : > { %3009 = vmax.xlane.f32.xlu1 %v14423_v62  ;;  %11798 = vmatprep.subr.msk.bf16.mxu1 %vm12914_vm1, %v14411_v6  ;;  %v14442_v19 = vpop.f32.mrb[123].mxu0  ;;  %18525 = vst [vmem:[#allocation13_spill] sm:$0xff] %v14452_v31 }
 0x1e1   : > { %18522 = vst [vmem:[#allocation32_spill] sm:$0xff] %v14429_v5  ;;  %3011 = vmax.xlane.f32.xlu0 %v14429_v5  ;;  %v18526_v5 = vld [vmem:[#allocation44_spill] sm:$0xff] }
 0x1e2   : > { %v14469_v27 = vpack.c.bf16 %v18527_v17, %v18526_v5  ;;  %v18530_v17 = vld [vmem:[#allocation48_spill] sm:$0xff] }
 0x1e3   : > { %v14448_v14 = vpop.f32.mrb[124].mxu0 }
 0x1e4   : > { %3013 = vmax.xlane.f32.xlu1 %v14446_v37  ;;  %v14455_v62 = vpop.f32.mrb[125].mxu0  ;;  %18528 = vst [vmem:[#allocation33_spill] sm:$0xff] %v14469_v27 }
 0x1e7   : > { %11801 = vmatpush3.bf16.xpose.msk.msra.mxu1 %vm12914_vm1, %v14411_v6  ;;  %v14460_v56 = vpop.f32.mrb[126].mxu0 }
 0x1e8   : > { %11852 = vmatprep.subr.msk.bf16.mxu1 %vm12914_vm1, %v14452_v31  ;;  %v14465_v43 = vpop.f32.mrb[127].mxu0 }
 0x1ee   : > { %10523 = vmatmul.mubr.msk.f32.vlgmr.msra.gmra.mrb[64].mxu1 %vm333_vm0, %v14041_v55  ;;  %v14487_v55 = vpack.c.bf16 %v18530_v17, %v18529_v2 }
 0x1ef   : > { %10525 = vmatprep.mubr.msk.f32.mxu1 %vm333_vm0, %v14064_v12  ;;  %11855 = vmatpush3.bf16.xpose.msk.msra.mxu1 %vm12914_vm1, %v14452_v31  ;;  %v18533_v12 = vld [vmem:[#allocation50_spill] sm:$0xff] }
 0x1f0   : > { %11858 = vmatprep.subr.msk.bf16.mxu1 %vm12914_vm1, %v14469_v27  ;;  %18531 = vst [vmem:[#allocation34_spill] sm:$0xff] %v14487_v55 }
 0x1f2   : > { %10526 = vmatmul.mubr.msk.f32.gmra.mrb[66].mxu1 %vm333_vm0, %v14056_v53  ;;  %v18532_v53 = vld [vmem:[#allocation49_spill] sm:$0xff] }
 0x1f3   : > { %10528 = vmatprep.mubr.msk.f32.mxu1 %vm333_vm0, %v14075_v60 }
 0x1f6   : > { %10529 = vmatmul.mubr.msk.f32.gmra.mrb[68].mxu1 %vm333_vm0, %v14069_v46  ;;  %v14505_v46 = vpack.c.bf16 %v18533_v12, %v18532_v53 }
 0x1f7   : > { %10531 = vmatprep.mubr.msk.f32.mxu1 %vm333_vm0, %v14092_v9  ;;  %11861 = vmatpush3.bf16.xpose.msk.msra.mxu1 %vm12914_vm1, %v14469_v27  ;;  %v18546_v27 = vld [vmem:[#allocation60_spill] sm:$0xff] }
 0x1f8   : > { %11864 = vmatprep.subr.msk.bf16.mxu1 %vm12914_vm1, %v14487_v55  ;;  %18534 = vst [vmem:[#allocation15_spill] sm:$0xff] %v14505_v46 }
 0x1fa   : > { %10532 = vmatmul.mubr.msk.f32.gmra.mrb[70].mxu1 %vm333_vm0, %v14084_v49 }
 0x1fb   : > { %10534 = vmatprep.mubr.msk.f32.mxu1 %vm333_vm0, %v14103_v39  ;;  %v18535_v39 = vld [vmem:[#allocation51_spill] sm:$0xff] }
 0x1fe   : > { %10535 = vmatmul.mubr.msk.f32.gmra.mrb[72].mxu1 %vm333_vm0, %v14097_v34 }
 0x1ff   : > { %10537 = vmatprep.mubr.msk.f32.mxu1 %vm333_vm0, %v14120_v15  ;;  %11867 = vmatpush3.bf16.xpose.msk.msra.mxu1 %vm12914_vm1, %v14487_v55  ;;  %v18536_v15 = vld [vmem:[#allocation53_spill] sm:$0xff] }
 0x200   : > { %11870 = vmatprep.subr.msk.bf16.mxu1 %vm12914_vm1, %v14505_v46  ;;  %v14529_v5 = vpack.c.bf16 %v18536_v15, %v18535_v39 }
 0x201   : > { %v10300_v60 = vpop.f32.mrb[16].mxu1 }
 0x202   : > { %v1746_v49 = vpop.f32.mrb[17].mxu1  ;;  %10538 = vmatmul.mubr.msk.f32.gmra.mrb[74].mxu1 %vm333_vm0, %v14112_v32  ;;  %v14520_v9 = vadd.f32 %v10300_v60, %v14214_v36  ;;  %18537 = vst [vmem:[#allocation35_spill] sm:$0xff] %v14529_v5  ;;  %v18538_v60 = vld [vmem:[#allocation54_spill] sm:$0xff] }
 0x203   : > { %10540 = vmatprep.mubr.msk.f32.mxu1 %vm333_vm0, %v14131_v21  ;;  %v14525_v34 = vadd.f32 %v1746_v49, %v14233_v61  ;;  %v18539_v49 = vld [vmem:[#allocation55_spill] sm:$0xff] }
 0x204   : > { %3017 = vmax.xlane.f32.xlu1 %v14520_v9  ;;  %v14563_v39 = vpack.c.bf16 %v18539_v49, %v18538_v60  ;;  %v18541_v49 = vld [vmem:[#allocation56_spill] sm:$0xff] }
 0x205   : > { %3015 = vmax.xlane.f32.xlu0 %v14525_v34  ;;  %v10303_v2 = vpop.f32.mrb[18].mxu1 }
 0x206   : > { %v14534_v32 = vadd.f32 %v10303_v2, %v14238_v54  ;;  %v1756_v17 = vpop.f32.mrb[19].mxu1  ;;  %10541 = vmatmul.mubr.msk.f32.gmra.mrb[76].mxu1 %vm333_vm0, %v14125_v42  ;;  %18540 = vst [vmem:[#allocation36_spill] sm:$0xff] %v14563_v39 }
 0x207   : > { %v14539_v21 = vadd.f32 %v1756_v17, %v14265_v23  ;;  %10543 = vmatprep.mubr.msk.f32.mxu1 %vm333_vm0, %v14144_v63  ;;  %11873 = vmatpush3.bf16.xpose.msk.msra.mxu1 %vm12914_vm1, %v14505_v46 }
 0x208   : > { %3021 = vmax.xlane.f32.xlu1 %v14534_v32  ;;  %11876 = vmatprep.subr.msk.bf16.mxu1 %vm12914_vm1, %v14529_v5 }
 0x209   : > { %3019 = vmax.xlane.f32.xlu0 %v14539_v21  ;;  %v10306_v53 = vpop.f32.mrb[20].mxu1 }
 0x20a   : > { %v14552_v42 = vadd.f32 %v10306_v53, %v14292_v25  ;;  %v1766_v12 = vpop.f32.mrb[21].mxu1  ;;  %10544 = vmatmul.mubr.msk.f32.gmra.mrb[78].mxu1 %vm333_vm0, %v14136_v58 }
 0x20b   : > { %v14557_v63 = vadd.f32 %v1766_v12, %v14272_v7  ;;  %10634 = vmatprep.mubr.msk.f32.mxu1 %vm333_vm0, %v14307_v26 }
 0x20c   : > { %3025 = vmax.xlane.f32.xlu1 %v14552_v42 }
 0x20d   : > { %3023 = vmax.xlane.f32.xlu0 %v14557_v63  ;;  %v10309_v15 = vpop.f32.mrb[22].mxu1 }
 0x20e   : > { %v14568_v2 = vadd.f32 %v10309_v15, %v14324_v38  ;;  %v1776_v17 = vpop.f32.mrb[23].mxu1  ;;  %v18542_v15 = vld [vmem:[#allocation58_spill] sm:$0xff] }
 0x20f   : > { %v14571_v58 = vadd.f32 %v1776_v17, %v14305_v20  ;;  %11879 = vmatpush3.bf16.xpose.msk.msra.mxu1 %vm12914_vm1, %v14529_v5  ;;  %v14589_v17 = vpack.c.bf16 %v18542_v15, %v18541_v49  ;;  %v18545_v15 = vld [vmem:[#allocation59_spill] sm:$0xff] }
 0x210   : > { %3029 = vmax.xlane.f32.xlu1 %v14568_v2  ;;  %11882 = vmatprep.subr.msk.bf16.mxu1 %vm12914_vm1, %v14563_v39  ;;  %v14615_v31 = vpack.c.bf16 %v18546_v27, %v18545_v15  ;;  %v18548_v27 = vld [vmem:[#allocation63_spill] sm:$0xff] }
 0x211   : > { %3027 = vmax.xlane.f32.xlu0 %v14571_v58  ;;  %v10312_v26 = vpop.f32.mrb[24].mxu1  ;;  %18543 = vst [vmem:[#allocation37_spill] sm:$0xff] %v14589_v17 }
 0x212   : > { %v14582_v53 = vadd.f32 %v10312_v26, %v14351_v18  ;;  %v1786_v12 = vpop.f32.mrb[25].mxu1  ;;  %18547 = vst [vmem:[#allocation41_spill] sm:$0xff] %v14615_v31 }
 0x213   : > { %v14585_v60 = vadd.f32 %v1786_v12, %v14333_v13 }
 0x214   : > { %3033 = vmax.xlane.f32.xlu1 %v14582_v53 }
 0x215   : > { %3031 = vmax.xlane.f32.xlu0 %v14585_v60  ;;  %v10315_v5 = vpop.f32.mrb[26].mxu1 }
 0x216   : > { %v14594_v46 = vadd.f32 %v10315_v5, %v14380_v50  ;;  %v1796_v55 = vpop.f32.mrb[27].mxu1 }
 0x217   : > { %v14597_v26 = vadd.f32 %v1796_v55, %v14363_v41  ;;  %11885 = vmatpush3.bf16.xpose.msk.msra.mxu1 %vm12914_vm1, %v14563_v39 }
 0x218   : > { %3037 = vmax.xlane.f32.xlu1 %v14594_v46  ;;  %11888 = vmatprep.subr.msk.bf16.mxu1 %vm12914_vm1, %v14589_v17 }
 0x219   : > { %18544 = vst [vmem:[#allocation38_spill] sm:$0xff] %v14597_v26  ;;  %3035 = vmax.xlane.f32.xlu0 %v14597_v26  ;;  %v10318_v12 = vpop.f32.mrb[28].mxu1 }
 0x21a   : > { %v14608_v5 = vadd.f32 %v10318_v12, %v14405_v47  ;;  %v1806_v49 = vpop.f32.mrb[29].mxu1 }
 0x21b   : > { %v14611_v55 = vadd.f32 %v1806_v49, %v14388_v52 }
 0x21c   : > { %3041 = vmax.xlane.f32.xlu1 %v14608_v5 }
 0x21d   : > { %3039 = vmax.xlane.f32.xlu0 %v14611_v55  ;;  %v10321_v39 = vpop.f32.mrb[30].mxu1 }
 0x21e   : > { %v14620_v6 = vadd.f32 %v10321_v39, %v14434_v59  ;;  %v1816_v26 = vpop.f32.mrb[31].mxu1 }
 0x21f   : > { %v14623_v12 = vadd.f32 %v1816_v26, %v14417_v48  ;;  %11891 = vmatpush3.bf16.xpose.msk.msra.mxu1 %vm12914_vm1, %v14589_v17 }
 0x220   : > { %3045 = vmax.xlane.f32.xlu1 %v14620_v6  ;;  %11894 = vmatprep.subr.msk.bf16.mxu1 %vm12914_vm1, %v14615_v31 }
 0x221   : > { %3043 = vmax.xlane.f32.xlu0 %v14623_v12 }
 0x227   : > { %11897 = vmatpush3.bf16.xpose.msk.msra.mxu1 %vm12914_vm1, %v14615_v31 }
 0x228   : > { %11963 = vmatprep.subr.bf16.mxu1 %v13747_v45 }
 0x22e   : > { %10635 = vmatmul.mubr.msk.f32.vlgmr.msra.gmra.mrb[80].mxu1 %vm333_vm0, %v14294_v24  ;;  %v18551_v24 = vld [vmem:[#allocation66_spill] sm:$0xff] }
 0x22f   : > { %10637 = vmatprep.mubr.msk.f32.mxu1 %vm333_vm0, %v14338_v1  ;;  %11965 = vmatpush3.bf16.msra.mxu1 %v13747_v45  ;;  %v18550_v45 = vld [vmem:[#allocation65_spill] sm:$0xff] }
 0x230   : > { %11967 = vmatprep.subr.bf16.mxu1 %v18548_v27 }
 0x232   : > { %10638 = vmatmul.mubr.msk.f32.gmra.mrb[82].mxu1 %vm333_vm0, %v14326_v28 }
 0x233   : > { %10640 = vmatprep.mubr.msk.f32.mxu1 %vm333_vm0, %v14365_v29  ;;  %11969 = vmatpush3.bf16.msra.mxu1 %v18548_v27 }
 0x234   : > { %11971 = vmatprep.subr.bf16.mxu1 %v18549_v8 }
 0x236   : > { %10641 = vmatmul.mubr.msk.f32.gmra.mrb[84].mxu1 %vm333_vm0, %v14353_v33  ;;  %v18552_v33 = vld [vmem:[#allocation67_spill] sm:$0xff] }
 0x237   : > { %10643 = vmatprep.mubr.msk.f32.mxu1 %vm333_vm0, %v14393_v11  ;;  %11973 = vmatpush3.bf16.msra.mxu1 %v18549_v8 }
 0x238   : > { %11975 = vmatprep.subr.bf16.mxu1 %v18550_v45 }
 0x23a   : > { %10644 = vmatmul.mubr.msk.f32.gmra.mrb[86].mxu1 %vm333_vm0, %v14382_v10 }
 0x23b   : > { %10646 = vmatprep.mubr.msk.f32.mxu1 %vm333_vm0, %v14419_v40  ;;  %11977 = vmatpush3.bf16.msra.mxu1 %v18550_v45 }
 0x23c   : > { %11979 = vmatprep.subr.bf16.mxu1 %v18551_v24 }
 0x23e   : > { %10647 = vmatmul.mubr.msk.f32.gmra.mrb[88].mxu1 %vm333_vm0, %v14407_v57  ;;  %v18555_v57 = vld [vmem:[#allocation68_spill] sm:$0xff] }
 0x23f   : > { %10649 = vmatprep.mubr.msk.f32.mxu1 %vm333_vm0, %v14442_v19  ;;  %11981 = vmatpush3.bf16.msra.mxu1 %v18551_v24  ;;  %v18560_v24 = vld [vmem:[#allocation5_spill] sm:$0xff] }
 0x240   : > { %11983 = vmatprep.subr.bf16.mxu1 %v18552_v33 }
 0x241   : > { %v10356_v28 = vpop.f32.mrb[32].mxu1  ;;  %v10468_v1 = vpop.f32.mrb[128].mxu0 }
 0x242   : > { %v14668_v10 = vadd.f32 %v10356_v28, %v14214_v36  ;;  %v1939_v29 = vpop.f32.mrb[33].mxu1  ;;  %10650 = vmatmul.mubr.msk.f32.gmra.mrb[90].mxu1 %vm333_vm0, %v14436_v16  ;;  %v2325_v11 = vpop.f32.mrb[129].mxu0  ;;  %v14682_v26 = vadd.f32 %v10468_v1, %v14214_v36 }
 0x243   : > { %v14673_v40 = vadd.f32 %v1939_v29, %v14233_v61  ;;  %10652 = vmatprep.mubr.msk.f32.mxu1 %vm333_vm0, %v14455_v62  ;;  %11985 = vmatpush3.bf16.msra.mxu1 %v18552_v33  ;;  %v14696_v8 = vadd.f32 %v2325_v11, %v14233_v61 }
 0x244   : > { %18553 = vst [vmem:[#allocation43_spill] sm:$0xff] %v14668_v10  ;;  %3049 = vmax.xlane.f32.xlu1 %v14668_v10  ;;  %11987 = vmatprep.subr.bf16.mxu1 %v18555_v57  ;;  %18556 = vst [vmem:[#allocation45_spill] sm:$0xff] %v14682_v26 }
 0x245   : > { %18554 = vst [vmem:[#allocation44_spill] sm:$0xff] %v14673_v40  ;;  %3047 = vmax.xlane.f32.xlu0 %v14673_v40  ;;  %v10359_v19 = vpop.f32.mrb[34].mxu1  ;;  %v10471_v39 = vpop.f32.mrb[130].mxu0  ;;  %18558 = vst [vmem:[#allocation48_spill] sm:$0xff] %v14696_v8 }
 0x246   : > { %v1949_v16 = vpop.f32.mrb[35].mxu1  ;;  %10653 = vmatmul.mubr.msk.f32.gmra.mrb[92].mxu1 %vm333_vm0, %v14448_v14  ;;  %v2335_v49 = vpop.f32.mrb[131].mxu0  ;;  %v14714_v1 = vadd.f32 %v10359_v19, %v14238_v54 }
 0x247   : > { %v14687_v62 = vadd.f32 %v1949_v16, %v14265_v23  ;;  %10655 = vmatprep.mubr.msk.f32.mxu1 %vm333_vm0, %v14465_v43  ;;  %11989 = vmatpush3.bf16.msra.mxu1 %v18555_v57  ;;  %v14726_v16 = vadd.f32 %v10471_v39, %v14238_v54  ;;  %v14741_v39 = vadd.f32 %v2335_v49, %v14265_v23 }
 0x248   : > { %3113 = vmax.xlane.f32.xlu1 %v14682_v26  ;;  %11991 = vmatprep.subr.bf16.mxu1 %v13881_v35  ;;  %18561 = vst [vmem:[#allocation50_spill] sm:$0xff] %v14714_v1 }
 0x249   : > { %18557 = vst [vmem:[#allocation46_spill] sm:$0xff] %v14687_v62  ;;  %3051 = vmax.xlane.f32.xlu0 %v14687_v62  ;;  %v10362_v15 = vpop.f32.mrb[36].mxu1  ;;  %v10474_v27 = vpop.f32.mrb[132].mxu0  ;;  %18563 = vst [vmem:[#allocation53_spill] sm:$0xff] %v14726_v16 }
 0x24a   : > { %v1959_v14 = vpop.f32.mrb[37].mxu1  ;;  %10656 = vmatmul.mubr.msk.f32.gmra.mrb[94].mxu1 %vm333_vm0, %v14460_v56  ;;  %v14700_v45 = vpop.f32.mrb[133].mxu0  ;;  %18565 = vst [vmem:[#allocation55_spill] sm:$0xff] %v14741_v39 }
 0x24b   : > { %v14703_v43 = vadd.f32 %v1959_v14, %v14272_v7  ;;  %11993 = vmatpush3.bf16.msra.mxu1 %v13881_v35 }
 0x24c   : > { %3111 = vmax.xlane.f32.xlu1 %v14696_v8  ;;  %12027 = vmatprep.subr.bf16.mxu1 %v18560_v24 }
 0x24d   : > { %18559 = vst [vmem:[#allocation49_spill] sm:$0xff] %v14703_v43  ;;  %3055 = vmax.xlane.f32.xlu0 %v14703_v43  ;;  %v14709_v33 = vpop.f32.mrb[38].mxu1  ;;  %v14711_v28 = vpop.f32.mrb[134].mxu0 }
 0x24e   : > { %v1969_v56 = vpop.f32.mrb[39].mxu1  ;;  %v14716_v29 = vpop.f32.mrb[135].mxu0 }
 0x24f   : > { %v14719_v11 = vadd.f32 %v1969_v56, %v14305_v20 }
 0x250   : > { %3053 = vmax.xlane.f32.xlu1 %v14714_v1 }
 0x251   : > { %18562 = vst [vmem:[#allocation51_spill] sm:$0xff] %v14719_v11  ;;  %3059 = vmax.xlane.f32.xlu0 %v14719_v11  ;;  %v14723_v35 = vpop.f32.mrb[40].mxu1  ;;  %v2986_v57 = vpop.xlane.xlu0 %2985 }
 0x252   : > { %v3240_v14 = vsub.f32 %v14225_v22, %v2986_v57  ;;  %v1979_v19 = vpop.f32.mrb[41].mxu1  ;;  %v14729_v31 = vpop.f32.mrb[136].mxu0 }
 0x253   : > { %v14732_v17 = vadd.f32 %v1979_v19, %v14333_v13  ;;  %v14734_v56 = vpop.f32.mrb[137].mxu0 }
 0x254   : > { %v3369_v24 = vmul.f32 1.442695, %v3240_v14  ;;  %3117 = vmax.xlane.f32.xlu1 %v14726_v16 }
 0x255   : > { %18564 = vst [vmem:[#allocation54_spill] sm:$0xff] %v14732_v17  ;;  %3063 = vmax.xlane.f32.xlu0 %v14732_v17  ;;  %v14738_v26 = vpop.f32.mrb[42].mxu1  ;;  %v2984_v11 = vpop.xlane.xlu0 %2983 }
 0x256   : > { %12182 = vpow2.f32 %v3369_v24  ;;  %v3239_v22 = vsub.f32 %v14251_v44, %v2984_v11  ;;  %v2990_v57 = vpop.xlane.xlu1 %2989  ;;  %v1989_v43 = vpop.f32.mrb[43].mxu1  ;;  %v14759_v44 = vadd.f32 %v10362_v15, %v14292_v25  ;;  %v14772_v15 = vadd.f32 %v10474_v27, %v14292_v25 }
 0x257   : > { %v3242_v19 = vsub.f32 %v14254_v3, %v2990_v57  ;;  %v14746_v62 = vadd.f32 %v1989_v43, %v14363_v41  ;;  %v14748_v14 = vpop.f32.mrb[138].mxu0  ;;  %v14786_v27 = vadd.f32 %v14700_v45, %v14272_v7 }
 0x258   : > { %v3367_v16 = vmul.f32 1.442695, %v3239_v22  ;;  %3115 = vmax.xlane.f32.xlu1 %v14741_v39  ;;  %v14751_v17 = vpop.f32.mrb[139].mxu0  ;;  %18567 = vst [vmem:[#allocation58_spill] sm:$0xff] %v14759_v44  ;;  %18568 = vst [vmem:[#allocation59_spill] sm:$0xff] %v14772_v15 }
 0x259   : > { %18566 = vst [vmem:[#allocation56_spill] sm:$0xff] %v14746_v62  ;;  %3067 = vmax.xlane.f32.xlu0 %v14746_v62  ;;  %v14754_v49 = vpop.f32.mrb[44].mxu1  ;;  %v14756_v24 = vpop.f32.mrb[140].mxu0  ;;  %v3373_v3 = vmul.f32 1.442695, %v3242_v19  ;;  %18570 = vst [vmem:[#allocation63_spill] sm:$0xff] %v14786_v27 }
 0x25a   : > { %12184 = vpow2.f32 %v3367_v16  ;;  %v2988_v43 = vpop.xlane.xlu1 %2987  ;;  %v14761_v11 = vpop.f32.mrb[45].mxu1 }
 0x25b   : > { %v3241_v22 = vsub.f32 %v14281_v4, %v2988_v43  ;;  %v14764_v57 = vpop.f32.mrb[141].mxu0  ;;  %12186 = vpow2.f32 %v3373_v3  ;;  %v2992_v8 = vpop.xlane.xlu0 %2991 }
 0x25c   : > { %3057 = vmax.xlane.f32.xlu1 %v14759_v44  ;;  %v3243_v3 = vsub.f32 %v14287_v51, %v2992_v8 }
 0x25d   : > { %v14767_v39 = vpop.f32.mrb[46].mxu1  ;;  %v14769_v62 = vpop.f32.mrb[142].mxu0  ;;  %v3371_v1 = vmul.f32 1.442695, %v3241_v22 }
 0x25e   : > { %v2994_v16 = vpop.xlane.xlu1 %2993  ;;  %v14774_v19 = vpop.f32.mrb[47].mxu1 }
 0x25f   : > { %v3244_v40 = vsub.f32 %v14313_v0, %v2994_v16  ;;  %v14777_v4 = vpop.f32.mrb[143].mxu0  ;;  %12188 = vpow2.f32 %v3371_v1  ;;  %v14794_v0 = vadd.f32 %v14709_v33, %v14324_v38  ;;  %v3375_v16 = vmul.f32 1.442695, %v3243_v3  ;;  %v2996_v8 = vpop.xlane.xlu0 %2995 }
 0x260   : > { %v14779_v43 = vpop.eup %12182  ;;  %3121 = vmax.xlane.f32.xlu1 %v14772_v15  ;;  %v14804_v15 = vadd.f32 %v14711_v28, %v14324_v38  ;;  %v14821_v28 = vadd.f32 %v14723_v35, %v14351_v18 }
 0x261   : > { %18569 = vst [vmem:[#allocation60_spill] sm:$0xff] %v14779_v43  ;;  %3625 = vadd.xlane.f32.xlu0 %v14779_v43  ;;  %v3377_v22 = vmul.f32 1.442695, %v3244_v40  ;;  %18572 = vst [vmem:[#allocation65_spill] sm:$0xff] %v14794_v0  ;;  %v18574_v40 = vld [vmem:[#allocation27_spill] sm:$0xff] }
 0x262   : > { %v2998_v44 = vpop.xlane.xlu1 %2997  ;;  %v3245_v45 = vsub.f32 %v18574_v40, %v2996_v8  ;;  %18575 = vst [vmem:[#allocation67_spill] sm:$0xff] %v14804_v15  ;;  %18580 = vst [vmem:[#allocation80_spill] sm:$0xff] %v14821_v28  ;;  %v18581_v40 = vld [vmem:[#allocation28_spill] sm:$0xff] }
 0x263   : > { %12190 = vpow2.f32 %v3377_v22  ;;  %v3246_v51 = vsub.f32 %v14343_v30, %v2998_v44  ;;  %v18577_v44 = vld [vmem:[#allocation6_spill] sm:$0xff] }
 0x264   : > { %v14788_v10 = vpop.eup %12184  ;;  %3119 = vmax.xlane.f32.xlu1 %v14786_v27  ;;  %12192 = vpow2.f32 %v3375_v16  ;;  %v3379_v30 = vmul.f32 1.442695, %v3245_v45  ;;  %v14813_v16 = vadd.f32 %v14716_v29, %v14305_v20 }
 0x265   : > { %18571 = vst [vmem:[#allocation64_spill] sm:$0xff] %v14788_v10  ;;  %3623 = vadd.xlane.f32.xlu0 %v14788_v10  ;;  %v14797_v1 = vpop.eup %12186  ;;  %v3381_v27 = vmul.f32 1.442695, %v3246_v51  ;;  %v3000_v51 = vpop.xlane.xlu0 %2999 }
 0x266   : > { %18573 = vst [vmem:[#allocation66_spill] sm:$0xff] %v14797_v1  ;;  %v3002_v33 = vpop.xlane.xlu1 %3001  ;;  %18578 = vst [vmem:[#allocation27_spill] sm:$0xff] %v14813_v16 }
 0x267   : > { %12194 = vpow2.f32 %v3381_v27  ;;  %v3248_v22 = vsub.f32 %v18577_v44, %v3002_v33  ;;  %v3247_v27 = vsub.f32 %v18581_v40, %v3000_v51 }
 0x268   : > { %3061 = vmax.xlane.f32.xlu1 %v14794_v0  ;;  %12196 = vpow2.f32 %v3379_v30 }
 0x269   : > { %3629 = vadd.xlane.f32.xlu0 %v14797_v1  ;;  %v14806_v3 = vpop.eup %12188  ;;  %v3385_v45 = vmul.f32 1.442695, %v3248_v22  ;;  %v3383_v29 = vmul.f32 1.442695, %v3247_v27  ;;  %v3004_v35 = vpop.xlane.xlu0 %3003  ;;  %v18586_v22 = vld [vmem:[#allocation29_spill] sm:$0xff]  ;;  %v14840_v27 = vadd.f32 %v14734_v56, %v14333_v13 }
 0x26a   : > { %18576 = vst [vmem:[#allocation68_spill] sm:$0xff] %v14806_v3  ;;  %v3006_v33 = vpop.xlane.xlu1 %3005  ;;  %v3249_v51 = vsub.f32 %v18586_v22, %v3004_v35 }
 0x26b   : > { %12198 = vpow2.f32 %v3385_v45  ;;  %18587 = vst [vmem:[#allocation29_spill] sm:$0xff] %v14840_v27 }
 0x26c   : > { %3125 = vmax.xlane.f32.xlu1 %v14804_v15  ;;  %12200 = vpow2.f32 %v3383_v29  ;;  %v18590_v29 = vld [vmem:[#allocation31_spill] sm:$0xff] }
 0x26d   : > { %3627 = vadd.xlane.f32.xlu0 %v14806_v3  ;;  %v14815_v8 = vpop.eup %12190 }
 0x26e   : > { %18579 = vst [vmem:[#allocation6_spill] sm:$0xff] %v14815_v8  ;;  %v14824_v44 = vpop.eup %12192 }
 0x26f   : > { %18582 = vst [vmem:[#allocation28_spill] sm:$0xff] %v14824_v44 }
 0x270   : > { %3123 = vmax.xlane.f32.xlu1 %v14813_v16  ;;  %v18583_v16 = vld [vmem:[#allocation30_spill] sm:$0xff] }
 0x271   : > { %3633 = vadd.xlane.f32.xlu0 %v14815_v8  ;;  %v3250_v15 = vsub.f32 %v18583_v16, %v3006_v33  ;;  %v14831_v8 = vadd.f32 %v14729_v31, %v14351_v18  ;;  %v14833_v30 = vpop.eup %12194  ;;  %v3010_v16 = vpop.xlane.xlu1 %3009  ;;  %v14848_v31 = vadd.f32 %v14738_v26, %v14380_v50  ;;  %v3387_v33 = vmul.f32 1.442695, %v3249_v51 }
 0x272   : > { %18585 = vst [vmem:[#allocation81_spill] sm:$0xff] %v14833_v30  ;;  %v14842_v45 = vpop.eup %12196  ;;  %v3252_v35 = vsub.f32 %v18590_v29, %v3010_v16  ;;  %v14860_v26 = vadd.f32 %v14748_v14, %v14380_v50  ;;  %v14875_v50 = vadd.f32 %v14751_v17, %v14363_v41  ;;  %v18598_v17 = vld [vmem:[#allocation32_spill] sm:$0xff] }
 0x273   : > { %18584 = vst [vmem:[#allocation30_spill] sm:$0xff] %v14831_v8  ;;  %v3389_v40 = vmul.f32 1.442695, %v3250_v15  ;;  %18588 = vst [vmem:[#allocation82_spill] sm:$0xff] %v14842_v45  ;;  %v3008_v15 = vpop.xlane.xlu0 %3007 }
 0x274   : > { %3065 = vmax.xlane.f32.xlu1 %v14821_v28  ;;  %18589 = vst [vmem:[#allocation83_spill] sm:$0xff] %v14848_v31  ;;  %v3393_v28 = vmul.f32 1.442695, %v3252_v35  ;;  %18595 = vst [vmem:[#allocation85_spill] sm:$0xff] %v14875_v50 }
 0x275   : > { %3631 = vadd.xlane.f32.xlu0 %v14824_v44  ;;  %12202 = vpow2.f32 %v3389_v40  ;;  %v14851_v22 = vpop.eup %12198  ;;  %v3014_v40 = vpop.xlane.xlu1 %3013 }
 0x276   : > { %18591 = vst [vmem:[#allocation31_spill] sm:$0xff] %v14851_v22  ;;  %12204 = vpow2.f32 %v3387_v33  ;;  %v14866_v29 = vpop.eup %12200  ;;  %v3254_v33 = vsub.f32 %v14446_v37, %v3014_v40  ;;  %v14889_v37 = vadd.f32 %v14754_v49, %v14405_v47  ;;  %v14904_v49 = vadd.f32 %v14761_v11, %v14388_v52 }
 0x277   : > { %18594 = vst [vmem:[#allocation84_spill] sm:$0xff] %v14866_v29  ;;  %12206 = vpow2.f32 %v3393_v28  ;;  %v3012_v35 = vpop.xlane.xlu0 %3011  ;;  %v14918_v11 = vadd.f32 %v14756_v24, %v14405_v47 }
 0x278   : > { %3129 = vmax.xlane.f32.xlu1 %v14831_v8  ;;  %18597 = vst [vmem:[#allocation87_spill] sm:$0xff] %v14889_v37  ;;  %v3397_v28 = vmul.f32 1.442695, %v3254_v33  ;;  %18600 = vst [vmem:[#allocation88_spill] sm:$0xff] %v14904_v49 }
 0x279   : > { %3637 = vadd.xlane.f32.xlu0 %v14833_v30  ;;  %18602 = vst [vmem:[#allocation90_spill] sm:$0xff] %v14918_v11 }
 0x27c   : > { %3127 = vmax.xlane.f32.xlu1 %v14840_v27  ;;  %v18592_v27 = vld [vmem:[#allocation9_spill] sm:$0xff] }
 0x27d   : > { %3635 = vadd.xlane.f32.xlu0 %v14842_v45  ;;  %v3251_v8 = vsub.f32 %v18592_v27, %v3008_v15  ;;  %18593 = vst [vmem:[#allocation9_spill] sm:$0xff] %v14860_v26 }
 0x27f   : > { %v3391_v27 = vmul.f32 1.442695, %v3251_v8  ;;  %v3253_v8 = vsub.f32 %v18598_v17, %v3012_v35 }
 0x280   : > { %3069 = vmax.xlane.f32.xlu1 %v14848_v31 }
 0x281   : > { %v14854_v56 = vpop.f32.mrb[48].mxu1  ;;  %3641 = vadd.xlane.f32.xlu0 %v14851_v22  ;;  %v14881_v22 = vpop.eup %12202  ;;  %12208 = vpow2.f32 %v3391_v27  ;;  %v3395_v27 = vmul.f32 1.442695, %v3253_v8 }
 0x282   : > { %v14862_v51 = vpop.f32.mrb[49].mxu1  ;;  %18596 = vst [vmem:[#allocation86_spill] sm:$0xff] %v14881_v22  ;;  %v14896_v0 = vpop.eup %12204  ;;  %12210 = vpow2.f32 %v3397_v28 }
 0x283   : > { %v14864_v16 = vpop.f32.mrb[144].mxu0  ;;  %18599 = vst [vmem:[#allocation32_spill] sm:$0xff] %v14896_v0  ;;  %v14910_v17 = vpop.eup %12206  ;;  %12212 = vpow2.f32 %v3395_v27  ;;  %v14932_v27 = vadd.f32 %v14764_v57, %v14388_v52 }
 0x284   : > { %3133 = vmax.xlane.f32.xlu1 %v14860_v26  ;;  %v2711_v31 = vpop.f32.mrb[145].mxu0  ;;  %18601 = vst [vmem:[#allocation89_spill] sm:$0xff] %v14910_v17 }
 0x285   : > { %v14869_v30 = vpop.f32.mrb[50].mxu1  ;;  %3639 = vadd.xlane.f32.xlu0 %v14866_v29  ;;  %18604 = vst [vmem:[#allocation92_spill] sm:$0xff] %v14932_v27 }
 0x286   : > { %v14877_v14 = vpop.f32.mrb[51].mxu1 }
 0x287   : > { %v14879_v15 = vpop.f32.mrb[146].mxu0 }
 0x288   : > { %3131 = vmax.xlane.f32.xlu1 %v14875_v50  ;;  %v2721_v26 = vpop.f32.mrb[147].mxu0 }
 0x289   : > { %v14884_v45 = vpop.f32.mrb[52].mxu1  ;;  %3645 = vadd.xlane.f32.xlu0 %v14881_v22 }
 0x28a   : > { %v14892_v40 = vpop.f32.mrb[53].mxu1 }
 0x28b   : > { %v14894_v29 = vpop.f32.mrb[148].mxu0 }
 0x28c   : > { %3073 = vmax.xlane.f32.xlu1 %v14889_v37  ;;  %v2731_v50 = vpop.f32.mrb[149].mxu0 }
 0x28d   : > { %v14899_v44 = vpop.f32.mrb[54].mxu1  ;;  %3643 = vadd.xlane.f32.xlu0 %v14896_v0  ;;  %v14924_v0 = vpop.eup %12208 }
 0x28e   : > { %v14906_v33 = vpop.f32.mrb[55].mxu1  ;;  %18603 = vst [vmem:[#allocation91_spill] sm:$0xff] %v14924_v0  ;;  %v14938_v24 = vpop.eup %12210 }
 0x28f   : > { %v14908_v35 = vpop.f32.mrb[150].mxu0  ;;  %18606 = vst [vmem:[#allocation94_spill] sm:$0xff] %v14938_v24  ;;  %v14950_v57 = vpop.eup %12212 }
 0x290   : > { %3071 = vmax.xlane.f32.xlu1 %v14904_v49  ;;  %v2741_v37 = vpop.f32.mrb[151].mxu0  ;;  %18610 = vst [vmem:[#allocation98_spill] sm:$0xff] %v14950_v57 }
 0x291   : > { %v14913_v22 = vpop.f32.mrb[56].mxu1  ;;  %3649 = vadd.xlane.f32.xlu0 %v14910_v17 }
 0x292   : > { %v14920_v8 = vpop.f32.mrb[57].mxu1 }
 0x293   : > { %v14922_v28 = vpop.f32.mrb[152].mxu0 }
 0x294   : > { %3137 = vmax.xlane.f32.xlu1 %v14918_v11  ;;  %v2751_v1 = vpop.f32.mrb[153].mxu0  ;;  %v14946_v11 = vadd.f32 %v14767_v39, %v14434_v59 }
 0x295   : > { %v14927_v49 = vpop.f32.mrb[58].mxu1  ;;  %3647 = vadd.xlane.f32.xlu0 %v14924_v0 }
 0x296   : > { %v14934_v17 = vpop.f32.mrb[59].mxu1  ;;  %18608 = vst [vmem:[#allocation96_spill] sm:$0xff] %v14946_v11 }
 0x297   : > { %v14936_v47 = vpop.f32.mrb[154].mxu0 }
 0x298   : > { %18605 = vst [vmem:[#allocation93_spill] sm:$0xff] %v14936_v47  ;;  %3135 = vmax.xlane.f32.xlu1 %v14932_v27  ;;  %v2761_v3 = vpop.f32.mrb[155].mxu0  ;;  %v14959_v27 = vadd.f32 %v2711_v31, %v14233_v61  ;;  %v14976_v31 = vadd.f32 %v14769_v62, %v14434_v59  ;;  %v14990_v59 = vadd.f32 %v2741_v37, %v14305_v20 }
 0x299   : > { %v14941_v43 = vpop.f32.mrb[60].mxu1  ;;  %3653 = vadd.xlane.f32.xlu0 %v14938_v24  ;;  %v14963_v24 = vadd.f32 %v14774_v19, %v14417_v48  ;;  %v3016_v19 = vpop.xlane.xlu0 %3015  ;;  %v14994_v62 = vadd.f32 %v14854_v56, %v14214_v36 }
 0x29a   : > { %18607 = vst [vmem:[#allocation95_spill] sm:$0xff] %v14941_v43  ;;  %v14948_v0 = vpop.f32.mrb[61].mxu1  ;;  %18612 = vst [vmem:[#allocation100_spill] sm:$0xff] %v14959_v27 }
 0x29b   : > { %18609 = vst [vmem:[#allocation97_spill] sm:$0xff] %v14948_v0  ;;  %18613 = vst [vmem:[#allocation101_spill] sm:$0xff] %v14963_v24 }
 0x29c   : > { %3077 = vmax.xlane.f32.xlu1 %v14946_v11  ;;  %v14953_v10 = vpop.f32.mrb[156].mxu0  ;;  %v14972_v11 = vadd.f32 %v2721_v26, %v14265_v23  ;;  %18615 = vst [vmem:[#allocation103_spill] sm:$0xff] %v14976_v31  ;;  %18618 = vst [vmem:[#allocation106_spill] sm:$0xff] %v14990_v59 }
 0x29d   : > { %v14955_v47 = vpop.f32.mrb[62].mxu1  ;;  %3651 = vadd.xlane.f32.xlu0 %v14950_v57  ;;  %v2771_v0 = vpop.f32.mrb[157].mxu0  ;;  %18619 = vst [vmem:[#allocation107_spill] sm:$0xff] %v14994_v62 }
 0x29e   : > { %18611 = vst [vmem:[#allocation99_spill] sm:$0xff] %v14955_v47  ;;  %v14965_v39 = vpop.f32.mrb[63].mxu1  ;;  %18614 = vst [vmem:[#allocation102_spill] sm:$0xff] %v14972_v11  ;;  %v3018_v47 = vpop.xlane.xlu1 %3017 }
 0x2a0   : > { %3075 = vmax.xlane.f32.xlu1 %v14963_v24  ;;  %v14968_v43 = vpop.f32.mrb[158].mxu0  ;;  %v14981_v24 = vadd.f32 %v2731_v50, %v14272_v7  ;;  %v3020_v50 = vpop.xlane.xlu0 %3019 }
 0x2a1   : > { %3175 = vmax.xlane.f32.xlu0 %v14959_v27  ;;  %v2781_v57 = vpop.f32.mrb[159].mxu0  ;;  %v14985_v27 = vadd.f32 %v14777_v4, %v14417_v48  ;;  %v15000_v4 = vadd.f32 %v2751_v1, %v14333_v13  ;;  %v15014_v13 = vadd.f32 %v14864_v16, %v14214_v36  ;;  %v15023_v1 = vadd.f32 %v14869_v30, %v14238_v54 }
 0x2a2   : > { %18616 = vst [vmem:[#allocation104_spill] sm:$0xff] %v14981_v24  ;;  %v3022_v26 = vpop.xlane.xlu1 %3021  ;;  %v15030_v36 = vadd.f32 %v14877_v14, %v14265_v23  ;;  %v15042_v23 = vadd.f32 %v14879_v15, %v14238_v54 }
 0x2a3   : > { %18617 = vst [vmem:[#allocation105_spill] sm:$0xff] %v14985_v27  ;;  %18620 = vst [vmem:[#allocation108_spill] sm:$0xff] %v15000_v4 }
 0x2a4   : > { %3141 = vmax.xlane.f32.xlu1 %v14976_v31  ;;  %v3255_v31 = vsub.f32 %v14525_v34, %v3016_v19  ;;  %v3024_v56 = vpop.xlane.xlu0 %3023  ;;  %18623 = vst [vmem:[#allocation111_spill] sm:$0xff] %v15014_v13  ;;  %v15019_v34 = vadd.f32 %v2771_v0, %v14388_v52  ;;  %18625 = vst [vmem:[#allocation113_spill] sm:$0xff] %v15023_v1  ;;  %v3257_v52 = vsub.f32 %v14539_v21, %v3020_v50 }
 0x2a5   : > { %3179 = vmax.xlane.f32.xlu0 %v14972_v11  ;;  %v3256_v11 = vsub.f32 %v14520_v9, %v3018_v47  ;;  %v15010_v9 = vadd.f32 %v2761_v3, %v14363_v41  ;;  %v3258_v41 = vsub.f32 %v14534_v32, %v3022_v26  ;;  %18626 = vst [vmem:[#allocation114_spill] sm:$0xff] %v15030_v36  ;;  %18628 = vst [vmem:[#allocation116_spill] sm:$0xff] %v15042_v23 }
 0x2a6   : > { %v3399_v47 = vmul.f32 1.442695, %v3255_v31  ;;  %18624 = vst [vmem:[#allocation112_spill] sm:$0xff] %v15019_v34  ;;  %v3403_v32 = vmul.f32 1.442695, %v3257_v52  ;;  %v15053_v19 = vadd.f32 %v2781_v57, %v14417_v48  ;;  %v3259_v15 = vsub.f32 %v14557_v63, %v3024_v56 }
 0x2a7   : > { %v3401_v37 = vmul.f32 1.442695, %v3256_v11  ;;  %18622 = vst [vmem:[#allocation110_spill] sm:$0xff] %v15010_v9  ;;  %v15070_v48 = vadd.f32 %v14892_v40, %v14272_v7 }
 0x2a8   : > { %3139 = vmax.xlane.f32.xlu1 %v14985_v27  ;;  %v3026_v27 = vpop.xlane.xlu1 %3025  ;;  %v3028_v3 = vpop.xlane.xlu0 %3027  ;;  %18630 = vst [vmem:[#allocation118_spill] sm:$0xff] %v15053_v19 }
 0x2a9   : > { %3183 = vmax.xlane.f32.xlu0 %v14981_v24  ;;  %v15004_v24 = vadd.f32 %v14862_v51, %v14233_v61  ;;  %12214 = vpow2.f32 %v3401_v37  ;;  %v3405_v51 = vmul.f32 1.442695, %v3258_v41  ;;  %v3260_v11 = vsub.f32 %v14552_v42, %v3026_v27  ;;  %18632 = vst [vmem:[#allocation120_spill] sm:$0xff] %v15070_v48 }
 0x2aa   : > { %12216 = vpow2.f32 %v3399_v47  ;;  %v15057_v42 = vadd.f32 %v14884_v45, %v14292_v25  ;;  %v3407_v45 = vmul.f32 1.442695, %v3259_v15  ;;  %v3261_v40 = vsub.f32 %v14571_v58, %v3028_v3 }
 0x2ab   : > { %18621 = vst [vmem:[#allocation109_spill] sm:$0xff] %v15004_v24  ;;  %12218 = vpow2.f32 %v3405_v51  ;;  %v3409_v54 = vmul.f32 1.442695, %v3260_v11  ;;  %v15102_v11 = vadd.f32 %v14899_v44, %v14324_v38  ;;  %v15119_v38 = vadd.f32 %v14906_v33, %v14305_v20 }
 0x2ac   : > { %3081 = vmax.xlane.f32.xlu1 %v14994_v62  ;;  %v3030_v61 = vpop.xlane.xlu1 %3029  ;;  %v15035_v30 = vpop.xlane.xlu0 %3031  ;;  %18631 = vst [vmem:[#allocation119_spill] sm:$0xff] %v15057_v42  ;;  %12220 = vpow2.f32 %v3403_v32  ;;  %v3411_v58 = vmul.f32 1.442695, %v3261_v40 }
 0x2ad   : > { %3187 = vmax.xlane.f32.xlu0 %v14990_v59  ;;  %12222 = vpow2.f32 %v3409_v54  ;;  %v3262_v57 = vsub.f32 %v14568_v2, %v3030_v61  ;;  %v15088_v2 = vadd.f32 %v14894_v29, %v14292_v25  ;;  %18636 = vst [vmem:[#allocation124_spill] sm:$0xff] %v15102_v11  ;;  %18638 = vst [vmem:[#allocation126_spill] sm:$0xff] %v15119_v38 }
 0x2ae   : > { %12224 = vpow2.f32 %v3407_v45  ;;  %v3263_v44 = vsub.f32 %v14585_v60, %v15035_v30  ;;  %v15140_v60 = vld [vmem:[%s17981_s3 + $0x38] sm:$0xff] }
 0x2af   : > { %v3413_v7 = vmul.f32 1.442695, %v3262_v57  ;;  %18634 = vst [vmem:[#allocation122_spill] sm:$0xff] %v15088_v2  ;;  %v15144_v30 = vadd.f32 %v15140_v60, %v14908_v35 }
 0x2b0   : > { %3079 = vmax.xlane.f32.xlu1 %v15004_v24  ;;  %v3034_v0 = vpop.xlane.xlu1 %3033  ;;  %v15060_v27 = vpop.xlane.xlu0 %3035  ;;  %v3415_v20 = vmul.f32 1.442695, %v3263_v44  ;;  %v18643_v44 = vld [vmem:[#allocation38_spill] sm:$0xff] }
 0x2b1   : > { %3191 = vmax.xlane.f32.xlu0 %v15000_v4  ;;  %12226 = vpow2.f32 %v3413_v7  ;;  %v3264_v25 = vsub.f32 %v14582_v53, %v3034_v0  ;;  %18640 = vst [vmem:[#allocation128_spill] sm:$0xff] %v15144_v30 }
 0x2b2   : > { %12228 = vpow2.f32 %v3411_v58 }
 0x2b3   : > { %v15033_v16 = vpop.eup %12214  ;;  %v3417_v53 = vmul.f32 1.442695, %v3264_v25 }
 0x2b4   : > { %3177 = vmax.xlane.f32.xlu1 %v15014_v13  ;;  %18627 = vst [vmem:[#allocation115_spill] sm:$0xff] %v15033_v16  ;;  %v15044_v14 = vpop.eup %12216  ;;  %v15047_v21 = vpop.xlane.xlu1 %3037 }
 0x2b5   : > { %3195 = vmax.xlane.f32.xlu0 %v15010_v9  ;;  %18629 = vst [vmem:[#allocation117_spill] sm:$0xff] %v15044_v14  ;;  %v15077_v56 = vpop.eup %12218  ;;  %v15079_v47 = vpop.xlane.xlu0 %3039  ;;  %12230 = vpow2.f32 %v3417_v53  ;;  %v3266_v33 = vsub.f32 %v14594_v46, %v15047_v21  ;;  %v15160_v21 = vadd.f32 %v14913_v22, %v14351_v18  ;;  %v3265_v9 = vsub.f32 %v18643_v44, %v15060_v27  ;;  %v15179_v18 = vld [vmem:[%s17981_s3 + $0x40] sm:$0xff] }
 0x2b6   : > { %18633 = vst [vmem:[#allocation121_spill] sm:$0xff] %v15077_v56  ;;  %v15092_v51 = vpop.eup %12220  ;;  %12232 = vpow2.f32 %v3415_v20  ;;  %v15183_v22 = vadd.f32 %v15179_v18, %v14920_v8 }
 0x2b7   : > { %18635 = vst [vmem:[#allocation123_spill] sm:$0xff] %v15092_v51  ;;  %v15109_v54 = vpop.eup %12222  ;;  %18642 = vst [vmem:[#allocation130_spill] sm:$0xff] %v15160_v21  ;;  %v3421_v35 = vmul.f32 1.442695, %v3266_v33  ;;  %v3419_v27 = vmul.f32 1.442695, %v3265_v9  ;;  %v3267_v9 = vsub.f32 %v14611_v55, %v15079_v47 }
 0x2b8   : > { %3085 = vmax.xlane.f32.xlu1 %v15023_v1  ;;  %v15075_v63 = vpop.xlane.xlu1 %3041  ;;  %18637 = vst [vmem:[#allocation125_spill] sm:$0xff] %v15109_v54  ;;  %v15127_v7 = vpop.eup %12224  ;;  %18645 = vst [vmem:[#allocation131_spill] sm:$0xff] %v15183_v22  ;;  %v15219_v55 = vld [vmem:[%s17981_s3 + $0x58] sm:$0xff] }
 0x2b9   : > { %3199 = vmax.xlane.f32.xlu0 %v15019_v34  ;;  %v15105_v29 = vpop.xlane.xlu0 %3043  ;;  %18639 = vst [vmem:[#allocation127_spill] sm:$0xff] %v15127_v7  ;;  %12234 = vpow2.f32 %v3421_v35  ;;  %v3268_v20 = vsub.f32 %v14608_v5, %v15075_v63  ;;  %v15202_v5 = vld [vmem:[%s17981_s3 + $0x48] sm:$0xff]  ;;  %v15223_v47 = vadd.f32 %v15219_v55, %v14927_v49 }
 0x2ba   : > { %12236 = vpow2.f32 %v3419_v27  ;;  %v15206_v63 = vadd.f32 %v15202_v5, %v14922_v28  ;;  %v3423_v28 = vmul.f32 1.442695, %v3267_v9 }
 0x2bb   : > { %v15150_v34 = vpop.eup %12226  ;;  %v3425_v8 = vmul.f32 1.442695, %v3268_v20  ;;  %18649 = vst [vmem:[#allocation135_spill] sm:$0xff] %v15223_v47 }
 0x2bc   : > { %3083 = vmax.xlane.f32.xlu1 %v15030_v36  ;;  %v15095_v52 = vpop.xlane.xlu1 %3045  ;;  %18641 = vst [vmem:[#allocation129_spill] sm:$0xff] %v15150_v34  ;;  %18647 = vst [vmem:[#allocation133_spill] sm:$0xff] %v15206_v63  ;;  %v18672_v36 = vld [vmem:[#allocation55_spill] sm:$0xff] }
 0x2bd   : > { %3657 = vadd.xlane.f32.xlu0 %v15033_v16  ;;  %12238 = vpow2.f32 %v3425_v8  ;;  %v3270_v20 = vsub.f32 %v14620_v6, %v15095_v52  ;;  %v3269_v6 = vsub.f32 %v14623_v12, %v15105_v29 }
 0x2be   : > { %12240 = vpow2.f32 %v3423_v28  ;;  %v18655_v28 = vld [vmem:[#allocation43_spill] sm:$0xff] }
 0x2bf   : > { %v3429_v8 = vmul.f32 1.442695, %v3270_v20 }
 0x2c0   : > { %3181 = vmax.xlane.f32.xlu1 %v15042_v23 }
 0x2c1   : > { %v15049_v31 = vpop.f32.mrb[64].mxu1  ;;  %3655 = vadd.xlane.f32.xlu0 %v15044_v14  ;;  %12242 = vpow2.f32 %v3429_v8  ;;  %v15267_v8 = vld [vmem:[%s17981_s3 + $0x68] sm:$0xff] }
 0x2c2   : > { %v15062_v26 = vpop.f32.mrb[65].mxu1 }
 0x2c4   : > { %3089 = vmax.xlane.f32.xlu1 %v15057_v42 }
 0x2c5   : > { %v15065_v50 = vpop.f32.mrb[66].mxu1  ;;  %3203 = vmax.xlane.f32.xlu0 %v15053_v19 }
 0x2c6   : > { %v15073_v37 = vpop.f32.mrb[67].mxu1 }
 0x2c8   : > { %3087 = vmax.xlane.f32.xlu1 %v15070_v48 }
 0x2c9   : > { %v15082_v41 = vpop.f32.mrb[68].mxu1  ;;  %3661 = vadd.xlane.f32.xlu0 %v15077_v56 }
 0x2ca   : > { %v15090_v61 = vpop.f32.mrb[69].mxu1 }
 0x2cc   : > { %3185 = vmax.xlane.f32.xlu1 %v15088_v2 }
 0x2cd   : > { %v15097_v32 = vpop.f32.mrb[70].mxu1  ;;  %3659 = vadd.xlane.f32.xlu0 %v15092_v51  ;;  %v15297_v51 = vadd.f32 %v15267_v8, %v14953_v10  ;;  %v15310_v10 = vld [vmem:[%s17981_s3 + $0x78] sm:$0xff] }
 0x2ce   : > { %v15107_v3 = vpop.f32.mrb[71].mxu1 }
 0x2cf   : > { %18665 = vst [vmem:[#allocation139_spill] sm:$0xff] %v15297_v51 }
 0x2d0   : > { %3093 = vmax.xlane.f32.xlu1 %v15102_v11  ;;  %v18668_v11 = vld [vmem:[#allocation99_spill] sm:$0xff] }
 0x2d1   : > { %v15112_v15 = vpop.xlane.xlu1 %3049  ;;  %v15114_v45 = vpop.f32.mrb[72].mxu1  ;;  %3665 = vadd.xlane.f32.xlu0 %v15109_v54  ;;  %v18653_v54 = vld [vmem:[#allocation93_spill] sm:$0xff] }
 0x2d2   : > { %v15123_v0 = vpop.xlane.xlu0 %3047  ;;  %v15125_v57 = vpop.f32.mrb[73].mxu1  ;;  %v3272_v20 = vsub.f32 %v18655_v28, %v15112_v15  ;;  %v18659_v28 = vld [vmem:[#allocation44_spill] sm:$0xff] }
 0x2d4   : > { %3091 = vmax.xlane.f32.xlu1 %v15119_v38  ;;  %v3433_v15 = vmul.f32 1.442695, %v3272_v20 }
 0x2d5   : > { %v15130_v40 = vpop.f32.mrb[74].mxu1  ;;  %v15132_v19 = vpop.xlane.xlu1 %3113  ;;  %3663 = vadd.xlane.f32.xlu0 %v15127_v7 }
 0x2d6   : > { %v15146_v58 = vpop.xlane.xlu0 %3051  ;;  %v15148_v25 = vpop.f32.mrb[75].mxu1 }
 0x2d8   : > { %3189 = vmax.xlane.f32.xlu1 %v15144_v30  ;;  %v15168_v30 = vpop.eup %12228 }
 0x2d9   : > { %v15153_v53 = vpop.f32.mrb[76].mxu1  ;;  %v15155_v46 = vpop.xlane.xlu1 %3111  ;;  %3669 = vadd.xlane.f32.xlu0 %v15150_v34  ;;  %18644 = vst [vmem:[#allocation38_spill] sm:$0xff] %v15168_v30 }
 0x2da   : > { %v15164_v4 = vpop.xlane.xlu0 %3055  ;;  %v15166_v59 = vpop.f32.mrb[77].mxu1 }
 0x2db   : > { %v15191_v13 = vpop.eup %12230 }
 0x2dc   : > { %3097 = vmax.xlane.f32.xlu1 %v15160_v21  ;;  %18646 = vst [vmem:[#allocation132_spill] sm:$0xff] %v15191_v13  ;;  %v15208_v35 = vpop.eup %12232 }
 0x2dd   : > { %v15171_v2 = vpop.f32.mrb[78].mxu1  ;;  %v15173_v23 = vpop.xlane.xlu1 %3053  ;;  %3667 = vadd.xlane.f32.xlu0 %v15168_v30  ;;  %18648 = vst [vmem:[#allocation134_spill] sm:$0xff] %v15208_v35 }
 0x2de   : > { %v15187_v33 = vpop.xlane.xlu0 %3059  ;;  %v15189_v44 = vpop.f32.mrb[79].mxu1 }
 0x2e0   : > { %3095 = vmax.xlane.f32.xlu1 %v15183_v22 }
 0x2e1   : > { %v15194_v34 = vpop.xlane.xlu1 %3117  ;;  %3673 = vadd.xlane.f32.xlu0 %v15191_v13  ;;  %v15227_v13 = vpop.eup %12234 }
 0x2e2   : > { %v15210_v30 = vpop.xlane.xlu0 %3063  ;;  %18650 = vst [vmem:[#allocation136_spill] sm:$0xff] %v15227_v13  ;;  %v15246_v9 = vpop.eup %12236 }
 0x2e3   : > { %18652 = vst [vmem:[#allocation138_spill] sm:$0xff] %v15246_v9  ;;  %v15258_v29 = vpop.eup %12238 }
 0x2e4   : > { %3193 = vmax.xlane.f32.xlu1 %v15206_v63  ;;  %18656 = vst [vmem:[#allocation43_spill] sm:$0xff] %v15258_v29 }
 0x2e5   : > { %v15213_v27 = vpop.xlane.xlu1 %3115  ;;  %3671 = vadd.xlane.f32.xlu0 %v15208_v35  ;;  %v15236_v35 = vld [vmem:[%s17981_s3 + $0x50] sm:$0xff] }
 0x2e6   : > { %v15240_v49 = vadd.f32 %v15236_v35, %v14934_v17  ;;  %v15244_v52 = vpop.xlane.xlu0 %3067  ;;  %v15254_v17 = vadd.f32 %v15219_v55, %v18653_v54  ;;  %v18657_v54 = vld [vmem:[#allocation95_spill] sm:$0xff] }
 0x2e8   : > { %3101 = vmax.xlane.f32.xlu1 %v15223_v47  ;;  %18651 = vst [vmem:[#allocation137_spill] sm:$0xff] %v15240_v49  ;;  %v3427_v47 = vmul.f32 1.442695, %v3269_v6  ;;  %18654 = vst [vmem:[#allocation93_spill] sm:$0xff] %v15254_v17  ;;  %v15271_v6 = vadd.f32 %v15267_v8, %v18657_v54  ;;  %v15284_v54 = vld [vmem:[%s17981_s3 + $0x60] sm:$0xff] }
 0x2e9   : > { %v15230_v63 = vpop.xlane.xlu1 %3057  ;;  %3677 = vadd.xlane.f32.xlu0 %v15227_v13 }
 0x2ea   : > { %18658 = vst [vmem:[#allocation95_spill] sm:$0xff] %v15271_v6 }
 0x2ec   : > { %3099 = vmax.xlane.f32.xlu1 %v15240_v49 }
 0x2ed   : > { %v15249_v13 = vpop.xlane.xlu1 %3121  ;;  %3675 = vadd.xlane.f32.xlu0 %v15246_v9  ;;  %v3271_v9 = vsub.f32 %v18659_v28, %v15123_v0  ;;  %v18663_v28 = vld [vmem:[#allocation48_spill] sm:$0xff] }
 0x2ee   : > { %v3626_v12 = vpop.xlane.xlu0 %3625  ;;  %v3303_v22 = vsub.f32 %v18663_v28, %v15155_v46 }
 0x2ef   : > { %12244 = vrcp.f32 %v3626_v12  ;;  %v3431_v0 = vmul.f32 1.442695, %v3271_v9 }
 0x2f0   : > { %3197 = vmax.xlane.f32.xlu1 %v15254_v17  ;;  %12246 = vpow2.f32 %v3427_v47  ;;  %v15275_v17 = vpop.eup %12240  ;;  %v18661_v47 = vld [vmem:[#allocation97_spill] sm:$0xff]  ;;  %v3495_v9 = vmul.f32 1.442695, %v3303_v22  ;;  %v18670_v22 = vld [vmem:[#allocation46_spill] sm:$0xff] }
 0x2f1   : > { %v15261_v49 = vpop.xlane.xlu1 %3119  ;;  %3681 = vadd.xlane.f32.xlu0 %v15258_v29  ;;  %18660 = vst [vmem:[#allocation44_spill] sm:$0xff] %v15275_v17  ;;  %v15288_v20 = vadd.f32 %v15284_v54, %v18661_v47 }
 0x2f2   : > { %v3624_v7 = vpop.xlane.xlu0 %3623 }
 0x2f3   : > { %12248 = vrcp.f32 %v3624_v7  ;;  %18662 = vst [vmem:[#allocation97_spill] sm:$0xff] %v15288_v20 }
 0x2f4   : > { %3105 = vmax.xlane.f32.xlu1 %v15271_v6  ;;  %12250 = vpow2.f32 %v3433_v15  ;;  %v15292_v6 = vpop.eup %12242  ;;  %v18666_v15 = vld [vmem:[#allocation50_spill] sm:$0xff] }
 0x2f5   : > { %v15278_v29 = vpop.xlane.xlu1 %3061  ;;  %3679 = vadd.xlane.f32.xlu0 %v15275_v17  ;;  %18664 = vst [vmem:[#allocation48_spill] sm:$0xff] %v15292_v6  ;;  %v3274_v46 = vsub.f32 %v18666_v15, %v15173_v23  ;;  %v3273_v23 = vsub.f32 %v18670_v22, %v15146_v58  ;;  %v3305_v58 = vsub.f32 %v18672_v36, %v15213_v27 }
 0x2f6   : > { %v3630_v56 = vpop.xlane.xlu0 %3629 }
 0x2f7   : > { %12252 = vrcp.f32 %v3630_v56  ;;  %v3437_v15 = vmul.f32 1.442695, %v3274_v46  ;;  %v3435_v14 = vmul.f32 1.442695, %v3273_v23 }
 0x2f8   : > { %3103 = vmax.xlane.f32.xlu1 %v15288_v20  ;;  %12254 = vpow2.f32 %v3431_v0  ;;  %v15314_v0 = vadd.f32 %v15310_v10, %v18668_v11 }
 0x2f9   : > { %v12245_v17 = vpop.eup %12244  ;;  %v15299_v21 = vpop.xlane.xlu1 %3125  ;;  %3685 = vadd.xlane.f32.xlu0 %v15292_v6 }
 0x2fa   : > { %v4008_v47 = vmul.f32 %v12245_v17, %v3626_v12  ;;  %v3628_v28 = vpop.xlane.xlu0 %3627  ;;  %v15304_v38 = vpop.eup %12246  ;;  %18669 = vst [vmem:[#allocation99_spill] sm:$0xff] %v15314_v0 }
 0x2fb   : > { %12256 = vrcp.f32 %v3628_v28  ;;  %18667 = vst [vmem:[#allocation50_spill] sm:$0xff] %v15304_v38 }
 0x2fc   : > { %3201 = vmax.xlane.f32.xlu1 %v15297_v51  ;;  %12258 = vpow2.f32 %v3495_v9  ;;  %v4136_v51 = vsub.f32 2.0, %v4008_v47 }
 0x2fd   : > { %v12249_v20 = vpop.eup %12248  ;;  %v15318_v12 = vpop.xlane.xlu1 %3123  ;;  %3683 = vadd.xlane.f32.xlu0 %v15304_v38  ;;  %v15347_v38 = vadd.f32 %v15310_v10, %v14968_v43 }
 0x2fe   : > { %v4007_v6 = vmul.f32 %v12249_v20, %v3624_v7  ;;  %v3634_v48 = vpop.xlane.xlu0 %3633  ;;  %v15321_v42 = vpop.eup %12250  ;;  %v15334_v7 = vld [vmem:[%s17981_s3 + $0x70] sm:$0xff]  ;;  %v4264_v9 = vmul.f32 %v12245_v17, %v4136_v51 }
 0x2ff   : > { %12260 = vrcp.f32 %v3634_v48  ;;  %18671 = vst [vmem:[#allocation46_spill] sm:$0xff] %v15321_v42  ;;  %18676 = vst [vmem:[#allocation142_spill] sm:$0xff] %v15347_v38 }
 0x300   : > { %v4135_v16 = vsub.f32 2.0, %v4007_v6  ;;  %3109 = vmax.xlane.f32.xlu1 %v15314_v0  ;;  %v15338_v6 = vadd.f32 %v15334_v7, %v14965_v39  ;;  %12262 = vpow2.f32 %v3437_v15  ;;  %v3499_v39 = vmul.f32 1.442695, %v3305_v58  ;;  %v18680_v15 = vld [vmem:[#allocation60_spill] sm:$0xff] }
 0x301   : > { %v12253_v11 = vpop.eup %12252  ;;  %v15326_v22 = vpop.f32.mrb[80].mxu1  ;;  %3689 = vadd.xlane.f32.xlu0 %v15321_v42 }
 0x302   : > { %v15328_v1 = vpop.xlane.xlu1 %3065  ;;  %18673 = vst [vmem:[#allocation55_spill] sm:$0xff] %v15338_v6  ;;  %v4010_v46 = vmul.f32 %v12253_v11, %v3630_v56  ;;  %v15340_v47 = vpop.f32.mrb[81].mxu1  ;;  %v4263_v27 = vmul.f32 %v12249_v20, %v4135_v16  ;;  %v18678_v56 = vld [vmem:[#allocation64_spill] sm:$0xff]  ;;  %v18679_v16 = vld [vmem:[#allocation58_spill] sm:$0xff] }
 0x303   : > { %18674 = vst [vmem:[#allocation140_spill] sm:$0xff] %v15340_v47  ;;  %v3632_v36 = vpop.xlane.xlu0 %3631  ;;  %v15342_v23 = vpop.eup %12254  ;;  %v3276_v20 = vsub.f32 %v18679_v16, %v15230_v63  ;;  %v15366_v63 = vld [vmem:[%s17981_s3 + $0x8] sm:$0xff] }
 0x304   : > { %12264 = vrcp.f32 %v3632_v36  ;;  %18675 = vst [vmem:[#allocation141_spill] sm:$0xff] %v15342_v23  ;;  %3107 = vmax.xlane.f32.xlu1 %v15338_v6  ;;  %v4391_v17 = vmul.f32 %v18678_v56, %v4263_v27  ;;  %v4392_v6 = vmul.f32 %v18680_v15, %v4264_v9  ;;  %v4138_v24 = vsub.f32 2.0, %v4010_v46  ;;  %v18684_v9 = vld [vmem:[#allocation49_spill] sm:$0xff] }
 0x305   : > { %v12257_v42 = vpop.eup %12256  ;;  %12266 = vpow2.f32 %v3435_v14  ;;  %v15349_v0 = vpop.f32.mrb[82].mxu1  ;;  %3687 = vadd.xlane.f32.xlu0 %v15342_v23  ;;  %v3275_v46 = vsub.f32 %v18684_v9, %v15164_v4 }
 0x306   : > { %18677 = vst [vmem:[#allocation143_spill] sm:$0xff] %v15349_v0  ;;  %v15351_v51 = vpop.xlane.xlu1 %3129  ;;  %v4009_v62 = vmul.f32 %v12257_v42, %v3628_v28  ;;  %v15358_v47 = vpop.f32.mrb[83].mxu1  ;;  %10690 = vmatprep.mubr.f32.mxu0 %v4391_v17  ;;  %v15370_v28 = vadd.f32 %v15366_v63, %v15049_v31  ;;  %v18688_v31 = vld [vmem:[#allocation39_spill] sm:$0xff] }
 0x307   : > { %18681 = vst [vmem:[#allocation64_spill] sm:$0xff] %v15358_v47  ;;  %v3638_v43 = vpop.xlane.xlu0 %3637  ;;  %v15360_v14 = vpop.eup %12258  ;;  %10691 = vmatmul.mubr.f32.vlgmr.msra.gmra.mrb[160].mxu0 %v4392_v6  ;;  %v3441_v6 = vmul.f32 1.442695, %v3276_v20 }
 0x308   : > { %12268 = vrcp.f32 %v3638_v43  ;;  %18682 = vst [vmem:[#allocation58_spill] sm:$0xff] %v15360_v14  ;;  %v4137_v58 = vsub.f32 2.0, %v4009_v62  ;;  %3205 = vmax.xlane.f32.xlu1 %v15347_v38  ;;  %18683 = vst [vmem:[#allocation60_spill] sm:$0xff] %v15370_v28  ;;  %v18686_v62 = vld [vmem:[#allocation17_spill] sm:$0xff]  ;;  %v4266_v38 = vmul.f32 %v12253_v11, %v4138_v24  ;;  %v18692_v24 = vld [vmem:[#allocation59_spill] sm:$0xff] }
 0x309   : > { %v12261_v23 = vpop.eup %12260  ;;  %v15374_v27 = vpop.f32.mrb[84].mxu1  ;;  %3751 = vadd.xlane.f32.xlu0 %v15360_v14  ;;  %11933 = vmatpush3.bf16.msra.mxu0 %v18686_v62  ;;  %12270 = vpow2.f32 %v3499_v39  ;;  %v15389_v62 = vld [vmem:[%s17981_s3] sm:$0xff]  ;;  %v3439_v39 = vmul.f32 1.442695, %v3275_v46  ;;  %v3308_v11 = vsub.f32 %v18692_v24, %v15249_v13 }
 0x30a   : > { %18685 = vst [vmem:[#allocation49_spill] sm:$0xff] %v15374_v27  ;;  %v15376_v56 = vpop.xlane.xlu1 %3127  ;;  %v4012_v17 = vmul.f32 %v12261_v23, %v3634_v48  ;;  %v15380_v16 = vpop.f32.mrb[85].mxu1  ;;  %11935 = vmatprep.subr.bf16.mxu0 %v18688_v31  ;;  %v4265_v47 = vmul.f32 %v12257_v42, %v4137_v58  ;;  %18690 = vst [vmem:[#allocation144_spill] sm:$0xff] %v15389_v62  ;;  %v15393_v48 = vadd.f32 %v15389_v62, %v15062_v26  ;;  %v18693_v58 = vld [vmem:[#allocation68_spill] sm:$0xff]  ;;  %v18695_v46 = vld [vmem:[#allocation66_spill] sm:$0xff] }
 0x30b   : > { %18687 = vst [vmem:[#allocation17_spill] sm:$0xff] %v15380_v16  ;;  %v3636_v15 = vpop.xlane.xlu0 %3635  ;;  %v15383_v4 = vpop.eup %12262  ;;  %v4394_v0 = vmul.f32 %v18695_v46, %v4266_v38  ;;  %v18696_v62 = vld [vmem:[#allocation42_spill] sm:$0xff]  ;;  %v15422_v38 = vld [vmem:[%s17981_s3 + $0x18] sm:$0xff]  ;;  %v18702_v46 = vld [vmem:[#allocation47_spill] sm:$0xff] }
 0x30c   : > { %12272 = vrcp.f32 %v3636_v15  ;;  %18689 = vst [vmem:[#allocation39_spill] sm:$0xff] %v15383_v4  ;;  %3145 = vmax.xlane.f32.xlu1 %v15370_v28  ;;  %18691 = vst [vmem:[#allocation145_spill] sm:$0xff] %v15393_v48  ;;  %v4393_v14 = vmul.f32 %v18693_v58, %v4265_v47  ;;  %v4140_v28 = vsub.f32 2.0, %v4012_v17 }
 0x30d   : > { %v15397_v20 = vpop.f32.mrb[86].mxu1  ;;  %3693 = vadd.xlane.f32.xlu0 %v15383_v4  ;;  %11937 = vmatpush3.bf16.msra.mxu0 %v18688_v31  ;;  %12274 = vpow2.f32 %v3441_v6  ;;  %v3505_v31 = vmul.f32 1.442695, %v3308_v11  ;;  %v18698_v6 = vld [vmem:[#allocation63_spill] sm:$0xff] }
 0x30e   : > { %v12265_v9 = vpop.eup %12264  ;;  %v15399_v42 = vpop.xlane.xlu1 %3069  ;;  %11939 = vmatprep.subr.bf16.mxu0 %v18696_v62  ;;  %10693 = vmatprep.mubr.f32.mxu0 %v4393_v14  ;;  %v4268_v11 = vmul.f32 %v12261_v23, %v4140_v28 }
 0x30f   : > { %v4011_v16 = vmul.f32 %v12265_v9, %v3632_v36  ;;  %v15404_v27 = vpop.f32.mrb[87].mxu1  ;;  %v3642_v26 = vpop.xlane.xlu0 %3641  ;;  %10694 = vmatmul.mubr.f32.gmra.mrb[162].mxu0 %v4394_v0  ;;  %v3307_v36 = vsub.f32 %v18698_v6, %v15261_v49  ;;  %v15426_v0 = vadd.f32 %v15422_v38, %v15065_v50  ;;  %v15437_v50 = vld [vmem:[%s17981_s3 + $0x10] sm:$0xff] }
 0x310   : > { %18694 = vst [vmem:[#allocation59_spill] sm:$0xff] %v15404_v27  ;;  %v15408_v13 = vpop.eup %12266  ;;  %12276 = vrcp.f32 %v3642_v26  ;;  %3143 = vmax.xlane.f32.xlu1 %v15393_v48  ;;  %v18710_v27 = vld [vmem:[#allocation52_spill] sm:$0xff] }
 0x311   : > { %18697 = vst [vmem:[#allocation68_spill] sm:$0xff] %v15408_v13  ;;  %v4139_v24 = vsub.f32 2.0, %v4011_v16  ;;  %v15413_v17 = vpop.f32.mrb[88].mxu1  ;;  %3691 = vadd.xlane.f32.xlu0 %v15408_v13  ;;  %11941 = vmatpush3.bf16.msra.mxu0 %v18696_v62  ;;  %18700 = vst [vmem:[#allocation42_spill] sm:$0xff] %v15426_v0  ;;  %12278 = vpow2.f32 %v3439_v39  ;;  %v3503_v23 = vmul.f32 1.442695, %v3307_v36 }
 0x312   : > { %v12269_v47 = vpop.eup %12268  ;;  %18699 = vst [vmem:[#allocation66_spill] sm:$0xff] %v15413_v17  ;;  %v15415_v58 = vpop.xlane.xlu1 %3133  ;;  %11943 = vmatprep.subr.bf16.mxu0 %v18702_v46 }
 0x313   : > { %v4014_v14 = vmul.f32 %v12269_v47, %v3638_v43  ;;  %v15428_v49 = vpop.f32.mrb[89].mxu1  ;;  %v3640_v16 = vpop.xlane.xlu0 %3639  ;;  %v4267_v6 = vmul.f32 %v12265_v9, %v4139_v24  ;;  %v15441_v43 = vadd.f32 %v15437_v50, %v15073_v37  ;;  %v18706_v9 = vld [vmem:[#allocation28_spill] sm:$0xff] }
 0x314   : > { %18701 = vst [vmem:[#allocation63_spill] sm:$0xff] %v15428_v49  ;;  %12280 = vrcp.f32 %v3640_v16  ;;  %v15431_v62 = vpop.eup %12270  ;;  %3149 = vmax.xlane.f32.xlu1 %v15426_v0  ;;  %v18707_v0 = vld [vmem:[#allocation65_spill] sm:$0xff] }
 0x315   : > { %18703 = vst [vmem:[#allocation47_spill] sm:$0xff] %v15431_v62  ;;  %18704 = vst [vmem:[#allocation146_spill] sm:$0xff] %v15441_v43  ;;  %12282 = vpow2.f32 %v3505_v31  ;;  %v15443_v28 = vpop.f32.mrb[90].mxu1  ;;  %3755 = vadd.xlane.f32.xlu0 %v15431_v62  ;;  %v4395_v24 = vmul.f32 %v18706_v9, %v4267_v6  ;;  %11945 = vmatpush3.bf16.msra.mxu0 %v18702_v46  ;;  %v3278_v13 = vsub.f32 %v18707_v0, %v15278_v29  ;;  %v18709_v31 = vld [vmem:[#allocation6_spill] sm:$0xff]  ;;  %v15462_v29 = vld [vmem:[%s17981_s3 + $0x28] sm:$0xff] }
 0x316   : > { %v12273_v4 = vpop.eup %12272  ;;  %18705 = vst [vmem:[#allocation147_spill] sm:$0xff] %v15443_v28  ;;  %v15445_v39 = vpop.xlane.xlu1 %3131  ;;  %v4142_v48 = vsub.f32 2.0, %v4014_v14  ;;  %v4396_v36 = vmul.f32 %v18709_v31, %v4268_v11  ;;  %11947 = vmatprep.subr.bf16.mxu0 %v18710_v27  ;;  %v18713_v0 = vld [vmem:[#allocation51_spill] sm:$0xff] }
 0x317   : > { %v4013_v17 = vmul.f32 %v12273_v4, %v3636_v15  ;;  %v15452_v49 = vpop.f32.mrb[91].mxu1  ;;  %v3646_v37 = vpop.xlane.xlu0 %3645  ;;  %10696 = vmatprep.mubr.f32.mxu0 %v4395_v24  ;;  %v15466_v15 = vadd.f32 %v15462_v29, %v15082_v41  ;;  %v3277_v14 = vsub.f32 %v18713_v0, %v15187_v33  ;;  %v18716_v41 = vld [vmem:[#allocation57_spill] sm:$0xff] }
 0x318   : > { %18708 = vst [vmem:[#allocation28_spill] sm:$0xff] %v15452_v49  ;;  %12284 = vrcp.f32 %v3646_v37  ;;  %v15456_v28 = vpop.eup %12274  ;;  %10697 = vmatmul.mubr.f32.gmra.mrb[164].mxu0 %v4396_v36  ;;  %3147 = vmax.xlane.f32.xlu1 %v15441_v43  ;;  %v4270_v36 = vmul.f32 %v12269_v47, %v4142_v48  ;;  %v18722_v49 = vld [vmem:[#allocation61_spill] sm:$0xff] }
 0x319   : > { %18711 = vst [vmem:[#allocation65_spill] sm:$0xff] %v15456_v28  ;;  %v4141_v62 = vsub.f32 2.0, %v4013_v17  ;;  %18712 = vst [vmem:[#allocation6_spill] sm:$0xff] %v15466_v15  ;;  %v15470_v11 = vpop.f32.mrb[92].mxu1  ;;  %3697 = vadd.xlane.f32.xlu0 %v15456_v28  ;;  %11949 = vmatpush3.bf16.msra.mxu0 %v18710_v27  ;;  %12286 = vpow2.f32 %v3503_v23  ;;  %v3445_v17 = vmul.f32 1.442695, %v3278_v13 }
 0x31a   : > { %v12277_v46 = vpop.eup %12276  ;;  %18714 = vst [vmem:[#allocation52_spill] sm:$0xff] %v15470_v11  ;;  %v15472_v6 = vpop.xlane.xlu1 %3073  ;;  %11951 = vmatprep.subr.bf16.mxu0 %v18716_v41  ;;  %v15485_v27 = vld [vmem:[%s17981_s3 + $0x20] sm:$0xff]  ;;  %v3443_v13 = vmul.f32 1.442695, %v3277_v14  ;;  %v18720_v28 = vld [vmem:[#allocation67_spill] sm:$0xff]  ;;  %v18721_v14 = vld [vmem:[#allocation81_spill] sm:$0xff] }
 0x31b   : > { %v4016_v9 = vmul.f32 %v12277_v46, %v3642_v26  ;;  %v15476_v24 = vpop.f32.mrb[93].mxu1  ;;  %v3644_v31 = vpop.xlane.xlu0 %3643  ;;  %v4269_v43 = vmul.f32 %v12273_v4, %v4141_v62  ;;  %v15489_v26 = vadd.f32 %v15485_v27, %v15090_v61  ;;  %v18719_v4 = vld [vmem:[#allocation82_spill] sm:$0xff] }
 0x31c   : > { %18715 = vst [vmem:[#allocation51_spill] sm:$0xff] %v15476_v24  ;;  %12288 = vrcp.f32 %v3644_v31  ;;  %v15479_v33 = vpop.eup %12278  ;;  %3153 = vmax.xlane.f32.xlu1 %v15466_v15  ;;  %v3310_v15 = vsub.f32 %v18720_v28, %v15299_v21  ;;  %v15509_v21 = vadd.f32 %v15140_v60, %v15097_v32 }
 0x31d   : > { %18717 = vst [vmem:[#allocation57_spill] sm:$0xff] %v15479_v33  ;;  %v4144_v48 = vsub.f32 2.0, %v4016_v9  ;;  %v15491_v47 = vpop.f32.mrb[94].mxu1  ;;  %3695 = vadd.xlane.f32.xlu0 %v15479_v33  ;;  %v4397_v62 = vmul.f32 %v18719_v4, %v4269_v43  ;;  %11953 = vmatpush3.bf16.msra.mxu0 %v18716_v41  ;;  %12290 = vpow2.f32 %v3445_v17  ;;  %v4398_v9 = vmul.f32 %v18721_v14, %v4270_v36  ;;  %v18725_v36 = vld [vmem:[#allocation27_spill] sm:$0xff]  ;;  %v18726_v14 = vld [vmem:[#allocation62_spill] sm:$0xff] }
 0x31e   : > { %v12281_v0 = vpop.eup %12280  ;;  %18718 = vst [vmem:[#allocation148_spill] sm:$0xff] %v15491_v47  ;;  %v15493_v23 = vpop.xlane.xlu1 %3071  ;;  %11955 = vmatprep.subr.bf16.mxu0 %v18722_v49  ;;  %18724 = vst [vmem:[#allocation67_spill] sm:$0xff] %v15509_v21  ;;  %v3509_v17 = vmul.f32 1.442695, %v3310_v15  ;;  %v18730_v15 = vld [vmem:[#allocation31_spill] sm:$0xff] }
 0x31f   : > { %v4015_v11 = vmul.f32 %v12281_v0, %v3640_v16  ;;  %v15500_v24 = vpop.f32.mrb[95].mxu1  ;;  %v3650_v61 = vpop.xlane.xlu0 %3649  ;;  %10699 = vmatprep.mubr.f32.mxu0 %v4397_v62  ;;  %v4272_v28 = vmul.f32 %v12277_v46, %v4144_v48  ;;  %v18731_v48 = vld [vmem:[#allocation80_spill] sm:$0xff] }
 0x320   : > { %v15504_v47 = vpop.eup %12282  ;;  %12292 = vrcp.f32 %v3650_v61  ;;  %10700 = vmatmul.mubr.f32.gmra.mrb[166].mxu0 %v4398_v9  ;;  %3151 = vmax.xlane.f32.xlu1 %v15489_v26 }
 0x321   : > { %18723 = vst [vmem:[#allocation82_spill] sm:$0xff] %v15504_v47  ;;  %v4143_v33 = vsub.f32 2.0, %v4015_v11  ;;  %12294 = vpow2.f32 %v3443_v13  ;;  %3761 = vadd.xlane.f32.xlu0 %v15504_v47  ;;  %11957 = vmatpush3.bf16.msra.mxu0 %v18722_v49  ;;  %v3309_v11 = vsub.f32 %v18725_v36, %v15318_v12  ;;  %v18728_v13 = vld [vmem:[#allocation84_spill] sm:$0xff]  ;;  %v3280_v36 = vsub.f32 %v18731_v48, %v15328_v1 }
 0x322   : > { %v12285_v43 = vpop.eup %12284  ;;  %v15511_v16 = vpop.xlane.xlu1 %3137  ;;  %11959 = vmatprep.subr.bf16.mxu0 %v18726_v14  ;;  %v15525_v49 = vld [vmem:[%s17981_s3 + $0x30] sm:$0xff] }
 0x323   : > { %v4018_v41 = vmul.f32 %v12285_v43, %v3646_v37  ;;  %v3648_v4 = vpop.xlane.xlu0 %3647  ;;  %v4271_v62 = vmul.f32 %v12281_v0, %v4143_v33  ;;  %v15518_v32 = vpop.eup %12286  ;;  %v15529_v12 = vadd.f32 %v15525_v49, %v15107_v3  ;;  %v4400_v33 = vmul.f32 %v18730_v15, %v4272_v28 }
 0x324   : > { %12296 = vrcp.f32 %v3648_v4  ;;  %18727 = vst [vmem:[#allocation81_spill] sm:$0xff] %v15518_v32  ;;  %3157 = vmax.xlane.f32.xlu1 %v15509_v21  ;;  %v3507_v0 = vmul.f32 1.442695, %v3309_v11  ;;  %v18732_v21 = vld [vmem:[#allocation69_spill] sm:$0xff]  ;;  %v18733_v11 = vld [vmem:[#allocation54_spill] sm:$0xff] }
 0x325   : > { %v4399_v9 = vmul.f32 %v18728_v13, %v4271_v62  ;;  %18729 = vst [vmem:[#allocation61_spill] sm:$0xff] %v15529_v12  ;;  %v4146_v37 = vsub.f32 2.0, %v4018_v41  ;;  %3759 = vadd.xlane.f32.xlu0 %v15518_v32  ;;  %11961 = vmatpush3.bf16.msra.mxu0 %v18726_v14  ;;  %12298 = vpow2.f32 %v3509_v17  ;;  %v15544_v17 = vadd.f32 %v15202_v5, %v15114_v45  ;;  %v18734_v45 = vld [vmem:[#allocation32_spill] sm:$0xff] }
 0x326   : > { %v12289_v47 = vpop.eup %12288  ;;  %v15531_v46 = vpop.xlane.xlu1 %3135  ;;  %11995 = vmatprep.subr.bf16.mxu0 %v18732_v21  ;;  %v3279_v1 = vsub.f32 %v18733_v11, %v15210_v30 }
 0x327   : > { %v4017_v62 = vmul.f32 %v12289_v47, %v3644_v31  ;;  %v3654_v13 = vpop.xlane.xlu0 %3653  ;;  %10702 = vmatprep.mubr.f32.mxu0 %v4399_v9  ;;  %v15539_v3 = vpop.eup %12290  ;;  %v4274_v14 = vmul.f32 %v12285_v43, %v4146_v37  ;;  %v3449_v9 = vmul.f32 1.442695, %v3280_v36  ;;  %v18735_v43 = vld [vmem:[#allocation86_spill] sm:$0xff] }
 0x328   : > { %12300 = vrcp.f32 %v3654_v13  ;;  %10703 = vmatmul.mubr.f32.gmra.mrb[168].mxu0 %v4400_v33  ;;  %3155 = vmax.xlane.f32.xlu1 %v15529_v12  ;;  %v3447_v12 = vmul.f32 1.442695, %v3279_v1 }
 0x329   : > { %v4145_v41 = vsub.f32 2.0, %v4017_v62  ;;  %3701 = vadd.xlane.f32.xlu0 %v15539_v3  ;;  %12302 = vpow2.f32 %v3507_v0  ;;  %v4402_v37 = vmul.f32 %v18735_v43, %v4274_v14  ;;  %v15572_v14 = vadd.f32 %v15219_v55, %v15130_v40  ;;  %v18740_v40 = vld [vmem:[#allocation91_spill] sm:$0xff] }
 0x32a   : > { %v12293_v28 = vpop.eup %12292  ;;  %v15548_v31 = vpop.xlane.xlu1 %3077 }
 0x32b   : > { %v4020_v15 = vmul.f32 %v12293_v28, %v3650_v61  ;;  %v3652_v33 = vpop.xlane.xlu0 %3651  ;;  %v4273_v48 = vmul.f32 %v12289_v47, %v4145_v41  ;;  %v15551_v62 = vpop.eup %12294  ;;  %v15561_v61 = vadd.f32 %v15179_v18, %v15125_v57  ;;  %v18736_v47 = vld [vmem:[#allocation30_spill] sm:$0xff] }
 0x32c   : > { %12304 = vrcp.f32 %v3652_v33  ;;  %3161 = vmax.xlane.f32.xlu1 %v15544_v17  ;;  %v3312_v0 = vsub.f32 %v18736_v47, %v15351_v51  ;;  %v15587_v47 = vadd.f32 %v15236_v35, %v15148_v25  ;;  %v18743_v35 = vld [vmem:[#allocation45_spill] sm:$0xff] }
 0x32d   : > { %v4401_v5 = vmul.f32 %v18734_v45, %v4273_v48  ;;  %v4148_v30 = vsub.f32 2.0, %v4020_v15  ;;  %3699 = vadd.xlane.f32.xlu0 %v15551_v62  ;;  %12306 = vpow2.f32 %v3449_v9 }
 0x32e   : > { %v12297_v32 = vpop.eup %12296  ;;  %v15555_v11 = vpop.xlane.xlu1 %3075  ;;  %12308 = vpow2.f32 %v3447_v12  ;;  %v3513_v51 = vmul.f32 1.442695, %v3312_v0  ;;  %v18742_v0 = vld [vmem:[#allocation83_spill] sm:$0xff] }
 0x32f   : > { %v4019_v36 = vmul.f32 %v12297_v32, %v3648_v4  ;;  %10705 = vmatprep.mubr.f32.mxu0 %v4401_v5  ;;  %v15565_v41 = vpop.xlane.xlu0 %3175  ;;  %v15567_v1 = vpop.eup %12298  ;;  %v4276_v18 = vmul.f32 %v12293_v28, %v4148_v30  ;;  %v18738_v4 = vld [vmem:[#allocation29_spill] sm:$0xff] }
 0x330   : > { %10706 = vmatmul.mubr.f32.gmra.mrb[170].mxu0 %v4402_v37  ;;  %18737 = vst [vmem:[#allocation27_spill] sm:$0xff] %v15567_v1  ;;  %3159 = vmax.xlane.f32.xlu1 %v15561_v61  ;;  %v3311_v9 = vsub.f32 %v18738_v4, %v15376_v56  ;;  %v18741_v56 = vld [vmem:[#allocation89_spill] sm:$0xff]  ;;  %12310 = vpow2.f32 %v3513_v51 }
 0x331   : > { %v4147_v15 = vsub.f32 2.0, %v4019_v36  ;;  %3765 = vadd.xlane.f32.xlu0 %v15567_v1  ;;  %v3282_v36 = vsub.f32 %v18742_v0, %v15399_v42  ;;  %v18746_v0 = vld [vmem:[#allocation53_spill] sm:$0xff] }
 0x332   : > { %v12301_v48 = vpop.eup %12300  ;;  %v15574_v57 = vpop.xlane.xlu1 %3141 }
 0x333   : > { %v4022_v45 = vmul.f32 %v12301_v48, %v3654_v13  ;;  %v15579_v5 = vpop.xlane.xlu0 %3179  ;;  %v4275_v43 = vmul.f32 %v12297_v32, %v4147_v15  ;;  %v15581_v37 = vpop.eup %12302  ;;  %v4404_v13 = vmul.f32 %v18741_v56, %v4276_v18  ;;  %v3511_v32 = vmul.f32 1.442695, %v3311_v9 }
 0x334   : > { %18739 = vst [vmem:[#allocation62_spill] sm:$0xff] %v15581_v37  ;;  %3165 = vmax.xlane.f32.xlu1 %v15572_v14  ;;  %v15604_v18 = vadd.f32 %v15267_v8, %v15153_v53 }
 0x335   : > { %v4403_v55 = vmul.f32 %v18740_v40, %v4275_v43  ;;  %v4150_v28 = vsub.f32 2.0, %v4022_v45  ;;  %3763 = vadd.xlane.f32.xlu0 %v15581_v37  ;;  %v3304_v45 = vsub.f32 %v18743_v35, %v15132_v19  ;;  %12312 = vpow2.f32 %v3511_v32  ;;  %v18745_v19 = vld [vmem:[#allocation98_spill] sm:$0xff]  ;;  %v18748_v32 = vld [vmem:[#allocation9_spill] sm:$0xff]  ;;  %v18765_v37 = vld [vmem:[#allocation143_spill] sm:$0xff] }
 0x336   : > { %v12305_v12 = vpop.eup %12304  ;;  %v15589_v30 = vpop.xlane.xlu1 %3139  ;;  %v3453_v40 = vmul.f32 1.442695, %v3282_v36  ;;  %v3314_v36 = vsub.f32 %v18748_v32, %v15415_v58  ;;  %v18750_v58 = vld [vmem:[#allocation85_spill] sm:$0xff] }
 0x337   : > { %v4021_v15 = vmul.f32 %v12305_v12, %v3652_v33  ;;  %10708 = vmatprep.mubr.f32.mxu0 %v4403_v55  ;;  %v15595_v4 = vpop.xlane.xlu0 %3183  ;;  %v15597_v43 = vpop.eup %12306  ;;  %v4278_v42 = vmul.f32 %v12301_v48, %v4150_v28  ;;  %v18744_v33 = vld [vmem:[#allocation56_spill] sm:$0xff]  ;;  %v3497_v8 = vmul.f32 1.442695, %v3304_v45  ;;  %v15625_v28 = vadd.f32 %v15284_v54, %v15166_v59 }
 0x338   : > { %10709 = vmatmul.mubr.f32.gmra.mrb[172].mxu0 %v4404_v13  ;;  %3163 = vmax.xlane.f32.xlu1 %v15587_v47  ;;  %v3281_v9 = vsub.f32 %v18744_v33, %v15244_v52  ;;  %v15613_v13 = vpop.eup %12308  ;;  %v18747_v52 = vld [vmem:[#allocation94_spill] sm:$0xff]  ;;  %12314 = vpow2.f32 %v3453_v40  ;;  %v15639_v59 = vadd.f32 %v15310_v10, %v15171_v2  ;;  %v3517_v54 = vmul.f32 1.442695, %v3314_v36  ;;  %v18756_v36 = vld [vmem:[#allocation96_spill] sm:$0xff] }
 0x339   : > { %v4149_v25 = vsub.f32 2.0, %v4021_v15  ;;  %3705 = vadd.xlane.f32.xlu0 %v15597_v43  ;;  %v3306_v15 = vsub.f32 %v18746_v0, %v15194_v34  ;;  %v4406_v48 = vmul.f32 %v18747_v52, %v4278_v42  ;;  %12316 = vpow2.f32 %v3497_v8 }
 0x33a   : > { %v15606_v51 = vpop.xlane.xlu1 %3081  ;;  %v15631_v34 = vpop.eup %12310  ;;  %v3313_v33 = vsub.f32 %v18750_v58, %v15445_v39  ;;  %v15653_v2 = vadd.f32 %v15334_v7, %v15189_v44  ;;  %v18754_v44 = vld [vmem:[#allocation88_spill] sm:$0xff] }
 0x33b   : > { %v15611_v55 = vpop.xlane.xlu0 %3187  ;;  %v4277_v56 = vmul.f32 %v12305_v12, %v4149_v25  ;;  %v3451_v12 = vmul.f32 1.442695, %v3281_v9  ;;  %18749 = vst [vmem:[#allocation84_spill] sm:$0xff] %v15631_v34  ;;  %v3501_v45 = vmul.f32 1.442695, %v3306_v15  ;;  %v3283_v7 = vsub.f32 %v18754_v44, %v15493_v23 }
 0x33c   : > { %3169 = vmax.xlane.f32.xlu1 %v15604_v18  ;;  %v3515_v10 = vmul.f32 1.442695, %v3313_v33 }
 0x33d   : > { %v4405_v53 = vmul.f32 %v18745_v19, %v4277_v56  ;;  %3703 = vadd.xlane.f32.xlu0 %v15613_v13  ;;  %12318 = vpow2.f32 %v3451_v12  ;;  %v18752_v19 = vld [vmem:[#allocation87_spill] sm:$0xff]  ;;  %v3455_v32 = vmul.f32 1.442695, %v3283_v7 }
 0x33e   : > { %v15619_v35 = vpop.xlane.xlu1 %3079  ;;  %12320 = vpow2.f32 %v3501_v45  ;;  %v3284_v39 = vsub.f32 %v18752_v19, %v15472_v6  ;;  %v3286_v45 = vsub.f32 %v18756_v36, %v15548_v31  ;;  %v18759_v31 = vld [vmem:[#allocation101_spill] sm:$0xff] }
 0x33f   : > { %10711 = vmatprep.mubr.f32.mxu0 %v4405_v53  ;;  %v15629_v25 = vpop.xlane.xlu0 %3191  ;;  %v15645_v40 = vpop.eup %12312  ;;  %12322 = vpow2.f32 %v3517_v54 }
 0x340   : > { %10712 = vmatmul.mubr.f32.gmra.mrb[174].mxu0 %v4406_v48  ;;  %3167 = vmax.xlane.f32.xlu1 %v15625_v28  ;;  %18751 = vst [vmem:[#allocation31_spill] sm:$0xff] %v15645_v40  ;;  %12324 = vpow2.f32 %v3515_v10  ;;  %v3457_v15 = vmul.f32 1.442695, %v3284_v39  ;;  %v15687_v10 = vadd.f32 %v15366_v63, %v15326_v22  ;;  %v3461_v19 = vmul.f32 1.442695, %v3286_v45 }
 0x341   : > { %3769 = vadd.xlane.f32.xlu0 %v15631_v34  ;;  %v3285_v39 = vsub.f32 %v18759_v31, %v15555_v11  ;;  %v18762_v34 = vld [vmem:[#allocation144_spill] sm:$0xff] }
 0x342   : > { %v15634_v42 = vpop.xlane.xlu1 %3177  ;;  %v15659_v8 = vpop.eup %12314 }
 0x343   : > { %v15643_v9 = vpop.xlane.xlu0 %3195  ;;  %18753 = vst [vmem:[#allocation80_spill] sm:$0xff] %v15659_v8  ;;  %v15667_v48 = vpop.eup %12316  ;;  %v3459_v63 = vmul.f32 1.442695, %v3285_v39 }
 0x344   : > { %3173 = vmax.xlane.f32.xlu1 %v15639_v59  ;;  %18755 = vst [vmem:[#allocation69_spill] sm:$0xff] %v15667_v48 }
 0x345   : > { %3767 = vadd.xlane.f32.xlu0 %v15645_v40 }
 0x346   : > { %v15648_v56 = vpop.xlane.xlu1 %3085 }
 0x347   : > { %v15657_v53 = vpop.xlane.xlu0 %3199  ;;  %v15669_v12 = vpop.eup %12318 }
 0x348   : > { %3171 = vmax.xlane.f32.xlu1 %v15653_v2  ;;  %v15677_v58 = vpop.eup %12320 }
 0x349   : > { %3709 = vadd.xlane.f32.xlu0 %v15659_v8  ;;  %18757 = vst [vmem:[#allocation54_spill] sm:$0xff] %v15677_v58  ;;  %v15679_v23 = vpop.eup %12322 }
 0x34a   : > { %v15662_v0 = vpop.xlane.xlu1 %3083  ;;  %18758 = vst [vmem:[#allocation32_spill] sm:$0xff] %v15679_v23  ;;  %v15693_v44 = vpop.eup %12324 }
 0x34b   : > { %v3658_v52 = vpop.xlane.xlu0 %3657  ;;  %18760 = vst [vmem:[#allocation86_spill] sm:$0xff] %v15693_v44 }
 0x34c   : > { %12326 = vrcp.f32 %v3658_v52  ;;  %3753 = vadd.xlane.f32.xlu1 %v15667_v48 }
 0x34d   : > { %3707 = vadd.xlane.f32.xlu0 %v15669_v12  ;;  %12328 = vpow2.f32 %v3457_v15 }
 0x34e   : > { %v15672_v6 = vpop.xlane.xlu1 %3181 }
 0x34f   : > { %v3656_v54 = vpop.xlane.xlu0 %3655 }
 0x350   : > { %12330 = vrcp.f32 %v3656_v54  ;;  %3757 = vadd.xlane.f32.xlu1 %v15677_v58 }
 0x351   : > { %3773 = vadd.xlane.f32.xlu0 %v15679_v23  ;;  %12332 = vpow2.f32 %v3455_v32  ;;  %v18761_v23 = vld [vmem:[#allocation140_spill] sm:$0xff]  ;;  %v18763_v32 = vld [vmem:[#allocation107_spill] sm:$0xff] }
 0x352   : > { %v15682_v33 = vpop.xlane.xlu1 %3089  ;;  %v15701_v22 = vadd.f32 %v18762_v34, %v18761_v23  ;;  %12334 = vpow2.f32 %v3461_v19  ;;  %v3288_v11 = vsub.f32 %v18763_v32, %v15606_v51  ;;  %v18767_v51 = vld [vmem:[#allocation109_spill] sm:$0xff] }
 0x353   : > { %v15691_v15 = vpop.xlane.xlu0 %3203 }
 0x354   : > { %3209 = vmax.xlane.f32.xlu1 %v15687_v10  ;;  %v3465_v23 = vmul.f32 1.442695, %v3288_v11 }
 0x355   : > { %3771 = vadd.xlane.f32.xlu0 %v15693_v44  ;;  %v15710_v44 = vadd.f32 %v15422_v38, %v18765_v37  ;;  %v18769_v38 = vld [vmem:[#allocation64_spill] sm:$0xff] }
 0x356   : > { %v15696_v7 = vpop.xlane.xlu1 %3087  ;;  %v12327_v36 = vpop.eup %12326  ;;  %v15722_v37 = vadd.f32 %v15437_v50, %v18769_v38  ;;  %v18773_v50 = vld [vmem:[#allocation117_spill] sm:$0xff] }
 0x357   : > { %v3662_v45 = vpop.xlane.xlu0 %3661  ;;  %v4024_v31 = vmul.f32 %v12327_v36, %v3658_v52  ;;  %v15705_v40 = vpop.eup %12328  ;;  %18766 = vst [vmem:[#allocation29_spill] sm:$0xff] %v15710_v44  ;;  %v3287_v52 = vsub.f32 %v18767_v51, %v15619_v35  ;;  %v18770_v35 = vld [vmem:[#allocation113_spill] sm:$0xff] }
 0x358   : > { %18764 = vst [vmem:[#allocation30_spill] sm:$0xff] %v15705_v40  ;;  %12336 = vrcp.f32 %v3662_v45  ;;  %3207 = vmax.xlane.f32.xlu1 %v15701_v22 }
 0x359   : > { %v4152_v58 = vsub.f32 2.0, %v4024_v31  ;;  %3713 = vadd.xlane.f32.xlu0 %v15705_v40  ;;  %12338 = vpow2.f32 %v3459_v63  ;;  %v3463_v63 = vmul.f32 1.442695, %v3287_v52 }
 0x35a   : > { %v12331_v1 = vpop.eup %12330  ;;  %v15712_v34 = vpop.xlane.xlu1 %3185 }
 0x35b   : > { %v4023_v19 = vmul.f32 %v12331_v1, %v3656_v54  ;;  %v3660_v39 = vpop.xlane.xlu0 %3659  ;;  %v15717_v32 = vpop.eup %12332  ;;  %v4280_v31 = vmul.f32 %v12327_v36, %v4152_v58  ;;  %v3290_v54 = vsub.f32 %v18770_v35, %v15648_v56  ;;  %v18774_v36 = vld [vmem:[#allocation115_spill] sm:$0xff] }
 0x35c   : > { %12340 = vrcp.f32 %v3660_v39  ;;  %18768 = vst [vmem:[#allocation91_spill] sm:$0xff] %v15717_v32  ;;  %3213 = vmax.xlane.f32.xlu1 %v15710_v44  ;;  %v15727_v40 = vpop.eup %12334 }
 0x35d   : > { %v4151_v48 = vsub.f32 2.0, %v4023_v19  ;;  %3711 = vadd.xlane.f32.xlu0 %v15717_v32  ;;  %12342 = vpow2.f32 %v3465_v23  ;;  %18771 = vst [vmem:[#allocation89_spill] sm:$0xff] %v15727_v40  ;;  %v18772_v19 = vld [vmem:[#allocation114_spill] sm:$0xff]  ;;  %v4408_v38 = vmul.f32 %v18774_v36, %v4280_v31  ;;  %v18775_v23 = vld [vmem:[#allocation119_spill] sm:$0xff]  ;;  %v3469_v35 = vmul.f32 1.442695, %v3290_v54 }
 0x35e   : > { %v3094_v8 = vpop.xlane.xlu1 %3093  ;;  %v3289_v44 = vsub.f32 %v18772_v19, %v15662_v0  ;;  %v3292_v52 = vsub.f32 %v18775_v23, %v15682_v33  ;;  %v18778_v36 = vld [vmem:[#allocation120_spill] sm:$0xff] }
 0x35f   : > { %v3666_v11 = vpop.xlane.xlu0 %3665  ;;  %v4279_v51 = vmul.f32 %v12331_v1, %v4151_v48  ;;  %v18776_v1 = vld [vmem:[#allocation49_spill] sm:$0xff] }
 0x360   : > { %12344 = vrcp.f32 %v3666_v11  ;;  %3211 = vmax.xlane.f32.xlu1 %v15722_v37  ;;  %v15739_v48 = vadd.f32 %v15462_v29, %v18776_v1  ;;  %v3467_v31 = vmul.f32 1.442695, %v3289_v44  ;;  %v3291_v29 = vsub.f32 %v18778_v36, %v15696_v7 }
 0x361   : > { %v4407_v58 = vmul.f32 %v18773_v50, %v4279_v51  ;;  %3717 = vadd.xlane.f32.xlu0 %v15727_v40  ;;  %12346 = vpow2.f32 %v3463_v63  ;;  %v3473_v50 = vmul.f32 1.442695, %v3292_v52  ;;  %v18779_v63 = vld [vmem:[#allocation124_spill] sm:$0xff]  ;;  %v15760_v7 = vadd.f32 %v15140_v60, %v15397_v20  ;;  %v18785_v40 = vld [vmem:[#allocation126_spill] sm:$0xff] }
 0x362   : > { %v3092_v32 = vpop.xlane.xlu1 %3091  ;;  %v12337_v56 = vpop.eup %12336  ;;  %v3294_v54 = vsub.f32 %v18779_v63, %v3094_v8  ;;  %v18784_v63 = vld [vmem:[#allocation72_spill] sm:$0xff]  ;;  %v18786_v20 = vld [vmem:[#allocation130_spill] sm:$0xff] }
 0x363   : > { %10746 = vmatprep.mubr.f32.mxu0 %v4407_v58  ;;  %v3664_v0 = vpop.xlane.xlu0 %3663  ;;  %v4026_v19 = vmul.f32 %v12337_v56, %v3662_v45  ;;  %v15741_v51 = vpop.eup %12338  ;;  %v18780_v45 = vld [vmem:[#allocation70_spill] sm:$0xff]  ;;  %v3293_v60 = vsub.f32 %v18785_v40, %v3092_v32 }
 0x364   : > { %12348 = vrcp.f32 %v3664_v0  ;;  %10747 = vmatmul.mubr.f32.vlgmr.msra.gmra.mrb[176].mxu0 %v4408_v38  ;;  %18777 = vst [vmem:[#allocation83_spill] sm:$0xff] %v15741_v51  ;;  %3217 = vmax.xlane.f32.xlu1 %v15739_v48  ;;  %v18781_v38 = vld [vmem:[#allocation17_spill] sm:$0xff]  ;;  %v3477_v36 = vmul.f32 1.442695, %v3294_v54 }
 0x365   : > { %11997 = vmatpush3.bf16.msra.mxu0 %v18732_v21  ;;  %v4154_v23 = vsub.f32 2.0, %v4026_v19  ;;  %3715 = vadd.xlane.f32.xlu0 %v15741_v51  ;;  %v15754_v44 = vadd.f32 %v15485_v27, %v18781_v38  ;;  %12350 = vpow2.f32 %v3469_v35  ;;  %v3471_v27 = vmul.f32 1.442695, %v3291_v29  ;;  %v18790_v29 = vld [vmem:[#allocation123_spill] sm:$0xff] }
 0x366   : > { %v12341_v33 = vpop.eup %12340  ;;  %v15748_v58 = vpop.xlane.xlu1 %3189  ;;  %11999 = vmatprep.subr.bf16.mxu0 %v18780_v45 }
 0x367   : > { %18782 = vst [vmem:[#allocation45_spill] sm:$0xff] %v15754_v44  ;;  %v4025_v21 = vmul.f32 %v12341_v33, %v3660_v39  ;;  %v3670_v1 = vpop.xlane.xlu0 %3669  ;;  %v15756_v52 = vpop.eup %12342  ;;  %v4282_v39 = vmul.f32 %v12337_v56, %v4154_v23 }
 0x368   : > { %12352 = vrcp.f32 %v3670_v1  ;;  %18783 = vst [vmem:[#allocation56_spill] sm:$0xff] %v15756_v52  ;;  %3215 = vmax.xlane.f32.xlu1 %v15754_v44 }
 0x369   : > { %12354 = vpow2.f32 %v3467_v31  ;;  %v4153_v8 = vsub.f32 2.0, %v4025_v21  ;;  %12001 = vmatpush3.bf16.msra.mxu0 %v18780_v45  ;;  %3721 = vadd.xlane.f32.xlu0 %v15756_v52  ;;  %v18788_v45 = vld [vmem:[#allocation59_spill] sm:$0xff] }
 0x36a   : > { %v12345_v19 = vpop.eup %12344  ;;  %12356 = vpow2.f32 %v3473_v50  ;;  %v3098_v35 = vpop.xlane.xlu1 %3097  ;;  %12003 = vmatprep.subr.bf16.mxu0 %v18784_v63  ;;  %v15772_v50 = vadd.f32 %v15525_v49, %v18788_v45  ;;  %v3475_v49 = vmul.f32 1.442695, %v3293_v60 }
 0x36b   : > { %v4028_v38 = vmul.f32 %v12345_v19, %v3666_v11  ;;  %v3296_v31 = vsub.f32 %v18786_v20, %v3098_v35  ;;  %v3668_v21 = vpop.xlane.xlu0 %3667  ;;  %v4281_v51 = vmul.f32 %v12341_v33, %v4153_v8  ;;  %v15768_v44 = vpop.eup %12346  ;;  %v18791_v33 = vld [vmem:[#allocation121_spill] sm:$0xff]  ;;  %v18792_v8 = vld [vmem:[#allocation20_spill] sm:$0xff]  ;;  %v18793_v20 = vld [vmem:[#allocation131_spill] sm:$0xff] }
 0x36c   : > { %12358 = vrcp.f32 %v3668_v21  ;;  %18787 = vst [vmem:[#allocation98_spill] sm:$0xff] %v15768_v44  ;;  %18789 = vst [vmem:[#allocation53_spill] sm:$0xff] %v15772_v50  ;;  %3221 = vmax.xlane.f32.xlu1 %v15760_v7  ;;  %v4410_v54 = vmul.f32 %v18791_v33, %v4282_v39 }
 0x36d   : > { %v4409_v56 = vmul.f32 %v18790_v29, %v4281_v51  ;;  %12005 = vmatpush3.bf16.msra.mxu0 %v18784_v63  ;;  %12360 = vpow2.f32 %v3477_v36  ;;  %v4156_v40 = vsub.f32 2.0, %v4028_v38  ;;  %v3481_v32 = vmul.f32 1.442695, %v3296_v31  ;;  %3719 = vadd.xlane.f32.xlu0 %v15768_v44 }
 0x36e   : > { %v12349_v11 = vpop.eup %12348  ;;  %v3096_v23 = vpop.xlane.xlu1 %3095  ;;  %12007 = vmatprep.subr.bf16.mxu0 %v18792_v8  ;;  %12362 = vpow2.f32 %v3471_v27  ;;  %v18795_v27 = vld [vmem:[#allocation21_spill] sm:$0xff] }
 0x36f   : > { %v4027_v35 = vmul.f32 %v12349_v11, %v3664_v0  ;;  %v3295_v45 = vsub.f32 %v18793_v20, %v3096_v23  ;;  %10749 = vmatprep.mubr.f32.mxu0 %v4409_v56  ;;  %v3674_v51 = vpop.xlane.xlu0 %3673  ;;  %v15781_v63 = vpop.eup %12350  ;;  %v4284_v0 = vmul.f32 %v12345_v19, %v4156_v40 }
 0x370   : > { %12364 = vrcp.f32 %v3674_v51  ;;  %10750 = vmatmul.mubr.f32.gmra.mrb[178].mxu0 %v4410_v54  ;;  %18794 = vst [vmem:[#allocation94_spill] sm:$0xff] %v15781_v63  ;;  %3219 = vmax.xlane.f32.xlu1 %v15772_v50  ;;  %v18827_v50 = vld [vmem:[#allocation90_spill] sm:$0xff] }
 0x371   : > { %v4155_v36 = vsub.f32 2.0, %v4027_v35  ;;  %12009 = vmatpush3.bf16.msra.mxu0 %v18792_v8  ;;  %12366 = vpow2.f32 %v3481_v32  ;;  %3725 = vadd.xlane.f32.xlu0 %v15781_v63  ;;  %v3479_v29 = vmul.f32 1.442695, %v3295_v45  ;;  %v18798_v32 = vld [vmem:[#allocation127_spill] sm:$0xff]  ;;  %v18799_v35 = vld [vmem:[#allocation125_spill] sm:$0xff] }
 0x372   : > { %v12353_v38 = vpop.eup %12352  ;;  %v15785_v39 = vpop.xlane.xlu1 %3193  ;;  %12011 = vmatprep.subr.bf16.mxu0 %v18795_v27  ;;  %12368 = vpow2.f32 %v3475_v49  ;;  %v4412_v49 = vmul.f32 %v18799_v35, %v4284_v0 }
 0x373   : > { %v15789_v60 = vpop.eup %12354  ;;  %v4030_v31 = vmul.f32 %v12353_v38, %v3670_v1  ;;  %v3672_v56 = vpop.xlane.xlu0 %3671  ;;  %v4283_v23 = vmul.f32 %v12349_v11, %v4155_v36  ;;  %v18800_v1 = vld [vmem:[#allocation22_spill] sm:$0xff]  ;;  %v18801_v11 = vld [vmem:[#allocation135_spill] sm:$0xff] }
 0x374   : > { %18796 = vst [vmem:[#allocation9_spill] sm:$0xff] %v15789_v60  ;;  %v15791_v33 = vpop.eup %12356  ;;  %12370 = vrcp.f32 %v3672_v56 }
 0x375   : > { %18797 = vst [vmem:[#allocation85_spill] sm:$0xff] %v15791_v33  ;;  %3729 = vadd.xlane.f32.xlu1 %v15791_v33  ;;  %v4411_v54 = vmul.f32 %v18798_v32, %v4283_v23  ;;  %12013 = vmatpush3.bf16.msra.mxu0 %v18795_v27  ;;  %v4158_v19 = vsub.f32 2.0, %v4030_v31  ;;  %12372 = vpow2.f32 %v3479_v29  ;;  %v18804_v29 = vld [vmem:[#allocation77_spill] sm:$0xff] }
 0x376   : > { %v12359_v8 = vpop.eup %12358  ;;  %v3102_v40 = vpop.xlane.xlu1 %3101  ;;  %3723 = vadd.xlane.f32.xlu0 %v15789_v60  ;;  %12015 = vmatprep.subr.bf16.mxu0 %v18800_v1 }
 0x377   : > { %v4029_v20 = vmul.f32 %v12359_v8, %v3668_v21  ;;  %v3298_v45 = vsub.f32 %v18801_v11, %v3102_v40  ;;  %10752 = vmatprep.mubr.f32.mxu0 %v4411_v54  ;;  %v3678_v36 = vpop.xlane.xlu0 %3677  ;;  %v15800_v33 = vpop.eup %12360  ;;  %v4286_v21 = vmul.f32 %v12353_v38, %v4158_v19  ;;  %v18805_v40 = vld [vmem:[#allocation137_spill] sm:$0xff] }
 0x378   : > { %18802 = vst [vmem:[#allocation87_spill] sm:$0xff] %v15800_v33  ;;  %12374 = vrcp.f32 %v3678_v36  ;;  %10753 = vmatmul.mubr.f32.gmra.mrb[180].mxu0 %v4412_v49  ;;  %v15802_v27 = vpop.eup %12362 }
 0x379   : > { %18803 = vst [vmem:[#allocation88_spill] sm:$0xff] %v15802_v27  ;;  %v4157_v31 = vsub.f32 2.0, %v4029_v20  ;;  %v3485_v23 = vmul.f32 1.442695, %v3298_v45  ;;  %3733 = vadd.xlane.f32.xlu1 %v15800_v33  ;;  %12017 = vmatpush3.bf16.msra.mxu0 %v18800_v1  ;;  %v18808_v1 = vld [vmem:[#allocation38_spill] sm:$0xff] }
 0x37a   : > { %v12365_v0 = vpop.eup %12364  ;;  %v3100_v32 = vpop.xlane.xlu1 %3099  ;;  %3727 = vadd.xlane.f32.xlu0 %v15802_v27  ;;  %12019 = vmatprep.subr.bf16.mxu0 %v18804_v29  ;;  %v18815_v27 = vld [vmem:[#allocation134_spill] sm:$0xff] }
 0x37b   : > { %v4032_v54 = vmul.f32 %v12365_v0, %v3674_v51  ;;  %12376 = vpow2.f32 %v3485_v23  ;;  %v3297_v35 = vsub.f32 %v18805_v40, %v3100_v32  ;;  %v3676_v49 = vpop.xlane.xlu0 %3675  ;;  %v4285_v11 = vmul.f32 %v12359_v8, %v4157_v31  ;;  %v15809_v63 = vpop.eup %12366  ;;  %v18809_v23 = vld [vmem:[#allocation129_spill] sm:$0xff]  ;;  %v18810_v31 = vld [vmem:[#allocation79_spill] sm:$0xff] }
 0x37c   : > { %18806 = vst [vmem:[#allocation96_spill] sm:$0xff] %v15809_v63  ;;  %12378 = vrcp.f32 %v3676_v49  ;;  %v15811_v20 = vpop.eup %12368  ;;  %v4414_v8 = vmul.f32 %v18809_v23, %v4286_v21  ;;  %v18813_v23 = vld [vmem:[#allocation95_spill] sm:$0xff] }
 0x37d   : > { %18807 = vst [vmem:[#allocation101_spill] sm:$0xff] %v15811_v20  ;;  %v3483_v45 = vmul.f32 1.442695, %v3297_v35  ;;  %3737 = vadd.xlane.f32.xlu1 %v15809_v63  ;;  %v4413_v33 = vmul.f32 %v18808_v1, %v4285_v11  ;;  %12021 = vmatpush3.bf16.msra.mxu0 %v18804_v29  ;;  %v4160_v19 = vsub.f32 2.0, %v4032_v54  ;;  %v18812_v63 = vld [vmem:[#allocation23_spill] sm:$0xff] }
 0x37e   : > { %v12371_v38 = vpop.eup %12370  ;;  %v15816_v51 = vpop.xlane.xlu1 %3197  ;;  %3731 = vadd.xlane.f32.xlu0 %v15811_v20  ;;  %12023 = vmatprep.subr.bf16.mxu0 %v18810_v31 }
 0x37f   : > { %v4031_v32 = vmul.f32 %v12371_v38, %v3672_v56  ;;  %12380 = vpow2.f32 %v3483_v45  ;;  %10755 = vmatprep.mubr.f32.mxu0 %v4413_v33  ;;  %v3682_v40 = vpop.xlane.xlu0 %3681  ;;  %v15821_v35 = vpop.eup %12372  ;;  %v4288_v1 = vmul.f32 %v12365_v0, %v4160_v19 }
 0x380   : > { %12382 = vrcp.f32 %v3682_v40  ;;  %10756 = vmatmul.mubr.f32.gmra.mrb[182].mxu0 %v4414_v8  ;;  %18811 = vst [vmem:[#allocation140_spill] sm:$0xff] %v15821_v35 }
 0x381   : > { %v4159_v11 = vsub.f32 2.0, %v4031_v32  ;;  %12025 = vmatpush3.bf16.msra.mxu0 %v18810_v31 }
 0x382   : > { %v12375_v29 = vpop.eup %12374  ;;  %v3106_v54 = vpop.xlane.xlu1 %3105  ;;  %3735 = vadd.xlane.f32.xlu0 %v15821_v35  ;;  %12059 = vmatprep.subr.bf16.mxu0 %v18812_v63  ;;  %v18816_v35 = vld [vmem:[#allocation132_spill] sm:$0xff] }
 0x383   : > { %v4034_v21 = vmul.f32 %v12375_v29, %v3678_v36  ;;  %v3300_v56 = vsub.f32 %v18813_v23, %v3106_v54  ;;  %v3680_v45 = vpop.xlane.xlu0 %3679  ;;  %v4287_v33 = vmul.f32 %v12371_v38, %v4159_v11  ;;  %v4416_v0 = vmul.f32 %v18816_v35, %v4288_v1  ;;  %v18817_v36 = vld [vmem:[#allocation97_spill] sm:$0xff] }
 0x384   : > { %12384 = vrcp.f32 %v3680_v45 }
 0x385   : > { %v15827_v20 = vpop.eup %12376  ;;  %v3489_v8 = vmul.f32 1.442695, %v3300_v56  ;;  %v4415_v32 = vmul.f32 %v18815_v27, %v4287_v33  ;;  %v4162_v31 = vsub.f32 2.0, %v4034_v21 }
 0x386   : > { %18814 = vst [vmem:[#allocation144_spill] sm:$0xff] %v15827_v20  ;;  %v12379_v60 = vpop.eup %12378  ;;  %3741 = vadd.xlane.f32.xlu1 %v15827_v20  ;;  %v3104_v52 = vpop.xlane.xlu1 %3103 }
 0x387   : > { %v4033_v19 = vmul.f32 %v12379_v60, %v3676_v49  ;;  %12386 = vpow2.f32 %v3489_v8  ;;  %v3299_v63 = vsub.f32 %v18817_v36, %v3104_v52  ;;  %10758 = vmatprep.mubr.f32.mxu0 %v4415_v32  ;;  %v3686_v54 = vpop.xlane.xlu0 %3685  ;;  %v4290_v56 = vmul.f32 %v12375_v29, %v4162_v31  ;;  %v18819_v52 = vld [vmem:[#allocation138_spill] sm:$0xff]  ;;  %v18820_v36 = vld [vmem:[#allocation136_spill] sm:$0xff] }
 0x388   : > { %12388 = vrcp.f32 %v3686_v54  ;;  %10759 = vmatmul.mubr.f32.gmra.mrb[184].mxu0 %v4416_v0 }
 0x389   : > { %v15833_v38 = vpop.eup %12380  ;;  %v4161_v11 = vsub.f32 2.0, %v4033_v19  ;;  %v3487_v23 = vmul.f32 1.442695, %v3299_v63  ;;  %v4418_v20 = vmul.f32 %v18820_v36, %v4290_v56  ;;  %v18821_v63 = vld [vmem:[#allocation99_spill] sm:$0xff] }
 0x38a   : > { %18818 = vst [vmem:[#allocation107_spill] sm:$0xff] %v15833_v38  ;;  %v12383_v27 = vpop.eup %12382  ;;  %3739 = vadd.xlane.f32.xlu0 %v15833_v38  ;;  %v15836_v21 = vpop.xlane.xlu1 %3201 }
 0x38b   : > { %v4036_v33 = vmul.f32 %v12383_v27, %v3682_v40  ;;  %12390 = vpow2.f32 %v3487_v23  ;;  %v3684_v49 = vpop.xlane.xlu0 %3683  ;;  %v4289_v35 = vmul.f32 %v12379_v60, %v4161_v11  ;;  %v18823_v11 = vld [vmem:[#allocation92_spill] sm:$0xff] }
 0x38c   : > { %12392 = vrcp.f32 %v3684_v49  ;;  %v3315_v23 = vsub.f32 %v18823_v11, %v15531_v46  ;;  %v3316_v46 = vsub.f32 %v18827_v50, %v15511_v16  ;;  %v18829_v50 = vld [vmem:[#allocation105_spill] sm:$0xff] }
 0x38d   : > { %v4417_v1 = vmul.f32 %v18819_v52, %v4289_v35  ;;  %v4164_v32 = vsub.f32 2.0, %v4036_v33 }
 0x38e   : > { %v12385_v8 = vpop.eup %12384  ;;  %v3110_v0 = vpop.xlane.xlu1 %3109 }
 0x38f   : > { %v4035_v19 = vmul.f32 %v12385_v8, %v3680_v45  ;;  %v3302_v44 = vsub.f32 %v18821_v63, %v3110_v0  ;;  %10761 = vmatprep.mubr.f32.mxu0 %v4417_v1  ;;  %v3690_v38 = vpop.xlane.xlu0 %3689  ;;  %v4292_v35 = vmul.f32 %v12383_v27, %v4164_v32  ;;  %v18824_v45 = vld [vmem:[#allocation55_spill] sm:$0xff] }
 0x390   : > { %12394 = vrcp.f32 %v3690_v38  ;;  %10762 = vmatmul.mubr.f32.gmra.mrb[186].mxu0 %v4418_v20 }
 0x391   : > { %v15841_v29 = vpop.eup %12386  ;;  %v4163_v40 = vsub.f32 2.0, %v4035_v19  ;;  %v3493_v31 = vmul.f32 1.442695, %v3302_v44  ;;  %v18826_v19 = vld [vmem:[#allocation44_spill] sm:$0xff] }
 0x392   : > { %18822 = vst [vmem:[#allocation143_spill] sm:$0xff] %v15841_v29  ;;  %v12389_v60 = vpop.eup %12388  ;;  %3745 = vadd.xlane.f32.xlu1 %v15841_v29  ;;  %v3108_v33 = vpop.xlane.xlu1 %3107 }
 0x393   : > { %v4038_v56 = vmul.f32 %v12389_v60, %v3686_v54  ;;  %12396 = vpow2.f32 %v3493_v31  ;;  %v3301_v52 = vsub.f32 %v18824_v45, %v3108_v33  ;;  %v3688_v1 = vpop.xlane.xlu0 %3687  ;;  %v4291_v0 = vmul.f32 %v12385_v8, %v4163_v40  ;;  %v18828_v54 = vld [vmem:[#allocation43_spill] sm:$0xff] }
 0x394   : > { %12398 = vrcp.f32 %v3688_v1  ;;  %v4420_v32 = vmul.f32 %v18828_v54, %v4292_v35  ;;  %v3519_v31 = vmul.f32 1.442695, %v3315_v23  ;;  %v18831_v23 = vld [vmem:[#allocation50_spill] sm:$0xff] }
 0x395   : > { %v15847_v20 = vpop.eup %12390  ;;  %v3491_v36 = vmul.f32 1.442695, %v3301_v52  ;;  %v4419_v44 = vmul.f32 %v18826_v19, %v4291_v0  ;;  %v4166_v11 = vsub.f32 2.0, %v4038_v56  ;;  %v3521_v52 = vmul.f32 1.442695, %v3316_v46 }
 0x396   : > { %18825 = vst [vmem:[#allocation109_spill] sm:$0xff] %v15847_v20  ;;  %v12393_v63 = vpop.eup %12392  ;;  %3743 = vadd.xlane.f32.xlu0 %v15847_v20  ;;  %v15853_v27 = vpop.xlane.xlu1 %3205  ;;  %v3317_v56 = vsub.f32 %v18829_v50, %v15589_v30 }
 0x397   : > { %v4037_v33 = vmul.f32 %v12393_v63, %v3684_v49  ;;  %12400 = vpow2.f32 %v3491_v36  ;;  %10764 = vmatprep.mubr.f32.mxu0 %v4419_v44  ;;  %v15856_v8 = vpop.xlane.xlu0 %3751  ;;  %v4294_v16 = vmul.f32 %v12389_v60, %v4166_v11  ;;  %v18833_v11 = vld [vmem:[#allocation103_spill] sm:$0xff] }
 0x398   : > { %10765 = vmatmul.mubr.f32.gmra.mrb[188].mxu0 %v4420_v32  ;;  %12402 = vpow2.f32 %v3519_v31  ;;  %v18832_v32 = vld [vmem:[#allocation48_spill] sm:$0xff]  ;;  %v3318_v30 = vsub.f32 %v18833_v11, %v15574_v57  ;;  %v18839_v11 = vld [vmem:[#allocation141_spill] sm:$0xff] }
 0x399   : > { %v4165_v40 = vsub.f32 2.0, %v4037_v33  ;;  %v4422_v60 = vmul.f32 %v18832_v32, %v4294_v16  ;;  %v12710_v33 = vld [vmem:[%s17981_s3 + $0x40] sm:$0xff]  ;;  %v12711_v32 = vld [vmem:[%s17981_s3 + $0x48] sm:$0xff] }
 0x39a   : > { %v12395_v45 = vpop.eup %12394  ;;  %v15858_v0 = vpop.xlane.xlu1 %3145 }
 0x39b   : > { %v4040_v19 = vmul.f32 %v12395_v45, %v3690_v38  ;;  %v3694_v29 = vpop.xlane.xlu0 %3693  ;;  %v4293_v35 = vmul.f32 %v12393_v63, %v4165_v40  ;;  %v3523_v38 = vmul.f32 1.442695, %v3317_v56  ;;  %v18834_v40 = vld [vmem:[#allocation63_spill] sm:$0xff] }
 0x39c   : > { %12404 = vrcp.f32 %v3694_v29  ;;  %v15875_v50 = vadd.f32 %v12710_v33, %v18834_v40  ;;  %v18840_v40 = vld [vmem:[#allocation46_spill] sm:$0xff] }
 0x39d   : > { %v15862_v49 = vpop.eup %12396  ;;  %v4421_v36 = vmul.f32 %v18831_v23, %v4293_v35  ;;  %v4168_v54 = vsub.f32 2.0, %v4040_v19  ;;  %12406 = vpow2.f32 %v3521_v52  ;;  %v3525_v35 = vmul.f32 1.442695, %v3318_v30  ;;  %v18841_v30 = vld [vmem:[#allocation102_spill] sm:$0xff] }
 0x39e   : > { %18830 = vst [vmem:[#allocation64_spill] sm:$0xff] %v15862_v49  ;;  %v12399_v44 = vpop.eup %12398  ;;  %3749 = vadd.xlane.f32.xlu1 %v15862_v49  ;;  %v15866_v46 = vpop.xlane.xlu1 %3143 }
 0x39f   : > { %v4039_v31 = vmul.f32 %v12399_v44, %v3688_v1  ;;  %10767 = vmatprep.mubr.f32.mxu0 %v4421_v36  ;;  %v3692_v63 = vpop.xlane.xlu0 %3691  ;;  %v4296_v52 = vmul.f32 %v12395_v45, %v4168_v54  ;;  %v18836_v1 = vld [vmem:[#allocation100_spill] sm:$0xff] }
 0x3a0   : > { %12408 = vrcp.f32 %v3692_v63  ;;  %10768 = vmatmul.mubr.f32.gmra.mrb[190].mxu0 %v4422_v60  ;;  %v3335_v56 = vsub.f32 %v18836_v1, %v15565_v41  ;;  %v18837_v60 = vld [vmem:[#allocation66_spill] sm:$0xff] }
 0x3a1   : > { %v15877_v19 = vpop.eup %12400  ;;  %v4167_v16 = vsub.f32 2.0, %v4039_v31  ;;  %12410 = vpow2.f32 %v3523_v38  ;;  %v15891_v45 = vadd.f32 %v12711_v32, %v18837_v60  ;;  %v4424_v49 = vmul.f32 %v18840_v40, %v4296_v52  ;;  %v18842_v32 = vld [vmem:[#allocation28_spill] sm:$0xff] }
 0x3a2   : > { %18835 = vst [vmem:[#allocation113_spill] sm:$0xff] %v15877_v19  ;;  %3223 = vmax.xlane.f32.xlu1 %v15875_v50  ;;  %3747 = vadd.xlane.f32.xlu0 %v15877_v19  ;;  %v15881_v57 = vpop.xlane.xlu1 %3149  ;;  %v15893_v54 = vpop.eup %12402  ;;  %12412 = vpow2.f32 %v3525_v35  ;;  %v3337_v38 = vsub.f32 %v18841_v30, %v15579_v5 }
 0x3a3   : > { %v15885_v23 = vpop.xlane.xlu0 %3755  ;;  %v4295_v36 = vmul.f32 %v12399_v44, %v4167_v16  ;;  %18838 = vst [vmem:[#allocation114_spill] sm:$0xff] %v15893_v54  ;;  %v3559_v44 = vmul.f32 1.442695, %v3335_v56 }
 0x3a5   : > { %v4423_v31 = vmul.f32 %v18839_v11, %v4295_v36  ;;  %v12712_v36 = vld [vmem:[%s17981_s3 + $0x50] sm:$0xff]  ;;  %v18845_v11 = vld [vmem:[#allocation5_spill] sm:$0xff] }
 0x3a6   : > { %v12405_v33 = vpop.eup %12404  ;;  %3225 = vmax.xlane.f32.xlu1 %v15891_v45  ;;  %3775 = vadd.xlane.f32.xlu0 %v15893_v54  ;;  %v15899_v41 = vpop.xlane.xlu1 %3147  ;;  %v15907_v52 = vadd.f32 %v12712_v36, %v18842_v32  ;;  %v12713_v32 = vld [vmem:[%s17981_s3 + $0x58] sm:$0xff] }
 0x3a7   : > { %v4042_v16 = vmul.f32 %v12405_v33, %v3694_v29  ;;  %10802 = vmatprep.mubr.f32.mxu1 %v4423_v31  ;;  %v3698_v1 = vpop.xlane.xlu0 %3697  ;;  %v15909_v60 = vpop.eup %12406  ;;  %v3563_v29 = vmul.f32 1.442695, %v3337_v38  ;;  %v18846_v31 = vld [vmem:[#allocation60_spill] sm:$0xff] }
 0x3a8   : > { %18843 = vst [vmem:[#allocation117_spill] sm:$0xff] %v15907_v52  ;;  %12414 = vrcp.f32 %v3698_v1  ;;  %10803 = vmatmul.mubr.f32.vlgmr.msra.gmra.mrb[96].mxu1 %v4424_v49  ;;  %18844 = vst [vmem:[#allocation115_spill] sm:$0xff] %v15909_v60  ;;  %v3320_v40 = vsub.f32 %v18846_v31, %v15858_v0  ;;  %v18847_v49 = vld [vmem:[#allocation7_spill] sm:$0xff] }
 0x3a9   : > { %12029 = vmatpush3.bf16.msra.mxu1 %v18845_v11  ;;  %v4170_v35 = vsub.f32 2.0, %v4042_v16  ;;  %12416 = vpow2.f32 %v3559_v44  ;;  %v18848_v16 = vld [vmem:[#allocation147_spill] sm:$0xff] }
 0x3aa   : > { %v12409_v56 = vpop.eup %12408  ;;  %3227 = vmax.xlane.f32.xlu1 %v15907_v52  ;;  %3777 = vadd.xlane.f32.xlu0 %v15909_v60  ;;  %v15914_v5 = vpop.xlane.xlu1 %3153  ;;  %v15923_v11 = vadd.f32 %v12713_v32, %v18848_v16  ;;  %v18851_v44 = vld [vmem:[#allocation111_spill] sm:$0xff]  ;;  %v3529_v31 = vmul.f32 1.442695, %v3320_v40  ;;  %v18852_v32 = vld [vmem:[#allocation145_spill] sm:$0xff]  ;;  %v18853_v52 = vld [vmem:[#allocation8_spill] sm:$0xff] }
 0x3ab   : > { %v4041_v30 = vmul.f32 %v12409_v56, %v3692_v63  ;;  %v3696_v36 = vpop.xlane.xlu0 %3695  ;;  %12031 = vmatprep.subr.bf16.mxu1 %v18847_v49  ;;  %v15925_v60 = vpop.eup %12410  ;;  %v3336_v0 = vsub.f32 %v18851_v44, %v15634_v42  ;;  %v4298_v38 = vmul.f32 %v12405_v33, %v4170_v35  ;;  %v3319_v16 = vsub.f32 %v18852_v32, %v15866_v46  ;;  %v12714_v42 = vld [vmem:[%s17981_s3 + $0x60] sm:$0xff]  ;;  %v18856_v33 = vld [vmem:[#allocation68_spill] sm:$0xff]  ;;  %v18858_v32 = vld [vmem:[#allocation39_spill] sm:$0xff] }
 0x3ac   : > { %18849 = vst [vmem:[#allocation119_spill] sm:$0xff] %v15923_v11  ;;  %12418 = vrcp.f32 %v3696_v36  ;;  %18850 = vst [vmem:[#allocation49_spill] sm:$0xff] %v15925_v60  ;;  %v18857_v40 = vld [vmem:[#allocation116_spill] sm:$0xff] }
 0x3ad   : > { %v4169_v54 = vsub.f32 2.0, %v4041_v30  ;;  %12033 = vmatpush3.bf16.msra.mxu1 %v18847_v49  ;;  %12420 = vpow2.f32 %v3563_v29  ;;  %v18854_v49 = vld [vmem:[#allocation51_spill] sm:$0xff]  ;;  %v3561_v46 = vmul.f32 1.442695, %v3336_v0  ;;  %v18860_v0 = vld [vmem:[#allocation10_spill] sm:$0xff] }
 0x3ae   : > { %3229 = vmax.xlane.f32.xlu1 %v15923_v11  ;;  %3779 = vadd.xlane.f32.xlu0 %v15925_v60  ;;  %v15932_v63 = vpop.xlane.xlu1 %3151  ;;  %v15943_v44 = vadd.f32 %v12714_v42, %v18854_v49  ;;  %v15945_v60 = vpop.eup %12412  ;;  %v4426_v11 = vmul.f32 %v18858_v32, %v4298_v38  ;;  %12422 = vpow2.f32 %v3529_v31  ;;  %v3527_v42 = vmul.f32 1.442695, %v3319_v16  ;;  %v18859_v49 = vld [vmem:[#allocation42_spill] sm:$0xff] }
 0x3af   : > { %v15936_v19 = vpop.xlane.xlu0 %3761  ;;  %v4297_v30 = vmul.f32 %v12409_v56, %v4169_v54  ;;  %12035 = vmatprep.subr.bf16.mxu1 %v18853_v52  ;;  %18855 = vst [vmem:[#allocation120_spill] sm:$0xff] %v15945_v60  ;;  %v3338_v54 = vsub.f32 %v18857_v40, %v15672_v6  ;;  %v3322_v20 = vsub.f32 %v18859_v49, %v15881_v57  ;;  %v12715_v6 = vld [vmem:[%s17981_s3 + $0x68] sm:$0xff]  ;;  %12424 = vpow2.f32 %v3561_v46  ;;  %v12716_v46 = vld [vmem:[%s17981_s3 + $0x70] sm:$0xff] }
 0x3b0   : > { %12426 = vpow2.f32 %v3527_v42 }
 0x3b1   : > { %v4425_v35 = vmul.f32 %v18856_v33, %v4297_v30  ;;  %12037 = vmatpush3.bf16.msra.mxu1 %v18853_v52  ;;  %v18861_v33 = vld [vmem:[#allocation52_spill] sm:$0xff]  ;;  %v3565_v57 = vmul.f32 1.442695, %v3338_v54  ;;  %v3533_v49 = vmul.f32 1.442695, %v3322_v20 }
 0x3b2   : > { %v12415_v29 = vpop.eup %12414  ;;  %3231 = vmax.xlane.f32.xlu1 %v15943_v44  ;;  %3781 = vadd.xlane.f32.xlu0 %v15945_v60  ;;  %v3158_v56 = vpop.xlane.xlu1 %3157  ;;  %v15963_v40 = vadd.f32 %v12715_v6, %v18861_v33 }
 0x3b3   : > { %v4044_v30 = vmul.f32 %v12415_v29, %v3698_v1  ;;  %10805 = vmatprep.mubr.f32.mxu1 %v4425_v35  ;;  %v15956_v52 = vpop.xlane.xlu0 %3759  ;;  %12039 = vmatprep.subr.bf16.mxu1 %v18860_v0  ;;  %v15965_v38 = vpop.eup %12416  ;;  %v18863_v1 = vld [vmem:[#allocation146_spill] sm:$0xff] }
 0x3b4   : > { %10806 = vmatmul.mubr.f32.gmra.mrb[98].mxu1 %v4426_v11  ;;  %18862 = vst [vmem:[#allocation124_spill] sm:$0xff] %v15965_v38  ;;  %v3321_v16 = vsub.f32 %v18863_v1, %v15899_v41  ;;  %v18864_v11 = vld [vmem:[#allocation6_spill] sm:$0xff]  ;;  %v15979_v41 = vadd.f32 %v12716_v46, %v15500_v24  ;;  %v18866_v1 = vld [vmem:[#allocation67_spill] sm:$0xff] }
 0x3b5   : > { %12041 = vmatpush3.bf16.msra.mxu1 %v18860_v0  ;;  %v4172_v35 = vsub.f32 2.0, %v4044_v30  ;;  %v3324_v6 = vsub.f32 %v18864_v11, %v15914_v5  ;;  %v18865_v0 = vld [vmem:[#allocation12_spill] sm:$0xff]  ;;  %v3323_v5 = vsub.f32 %v15489_v26, %v15932_v63  ;;  %v3326_v11 = vsub.f32 %v18866_v1, %v3158_v56 }
 0x3b6   : > { %v12419_v31 = vpop.eup %12418  ;;  %3233 = vmax.xlane.f32.xlu1 %v15963_v40  ;;  %3815 = vadd.xlane.f32.xlu0 %v15965_v38  ;;  %v3156_v32 = vpop.xlane.xlu1 %3155  ;;  %v3531_v20 = vmul.f32 1.442695, %v3321_v16  ;;  %v18868_v16 = vld [vmem:[#allocation148_spill] sm:$0xff] }
 0x3b7   : > { %v4043_v33 = vmul.f32 %v12419_v31, %v3696_v36  ;;  %v3702_v60 = vpop.xlane.xlu0 %3701  ;;  %12043 = vmatprep.subr.bf16.mxu1 %v18865_v0  ;;  %v15981_v54 = vpop.eup %12420  ;;  %v4300_v42 = vmul.f32 %v12415_v29, %v4172_v35  ;;  %v3537_v24 = vmul.f32 1.442695, %v3324_v6  ;;  %v3535_v56 = vmul.f32 1.442695, %v3323_v5  ;;  %v18870_v35 = vld [vmem:[#allocation61_spill] sm:$0xff] }
 0x3b8   : > { %12428 = vrcp.f32 %v3702_v60  ;;  %v15996_v63 = vpop.eup %12422  ;;  %v18871_v6 = vld [vmem:[#allocation65_spill] sm:$0xff]  ;;  %v3541_v1 = vmul.f32 1.442695, %v3326_v11 }
 0x3b9   : > { %v4171_v30 = vsub.f32 2.0, %v4043_v33  ;;  %12045 = vmatpush3.bf16.msra.mxu1 %v18865_v0  ;;  %12430 = vpow2.f32 %v3565_v57  ;;  %v18867_v33 = vld [vmem:[#allocation14_spill] sm:$0xff]  ;;  %v12717_v57 = vld [vmem:[%s17981_s3 + $0x78] sm:$0xff] }
 0x3ba   : > { %3235 = vmax.xlane.f32.xlu1 %v15979_v41  ;;  %3819 = vadd.xlane.f32.xlu0 %v15981_v54  ;;  %v3162_v36 = vpop.xlane.xlu1 %3161  ;;  %12432 = vpow2.f32 %v3533_v49  ;;  %v15994_v26 = vadd.f32 %v12717_v57, %v18868_v16  ;;  %v18869_v0 = vld [vmem:[#allocation57_spill] sm:$0xff] }
 0x3bb   : > { %v3700_v46 = vpop.xlane.xlu0 %3699  ;;  %v4299_v38 = vmul.f32 %v12419_v31, %v4171_v30  ;;  %12047 = vmatprep.subr.bf16.mxu1 %v18867_v33  ;;  %v3325_v31 = vsub.f32 %v18870_v35, %v3156_v32  ;;  %v4428_v30 = vmul.f32 %v18871_v6, %v4300_v42  ;;  %v3328_v57 = vsub.f32 %v15544_v17, %v3162_v36 }
 0x3bc   : > { %12434 = vrcp.f32 %v3700_v46 }
 0x3bd   : > { %v4427_v29 = vmul.f32 %v18869_v0, %v4299_v38  ;;  %12049 = vmatpush3.bf16.msra.mxu1 %v18867_v33  ;;  %12436 = vpow2.f32 %v3531_v20  ;;  %v18872_v38 = vld [vmem:[#allocation16_spill] sm:$0xff]  ;;  %v16008_v20 = vpop.eup %12424  ;;  %v3539_v33 = vmul.f32 1.442695, %v3325_v31 }
 0x3be   : > { %3237 = vmax.xlane.f32.xlu1 %v15994_v26  ;;  %3785 = vadd.xlane.f32.xlu0 %v15996_v63  ;;  %v3160_v49 = vpop.xlane.xlu1 %3159  ;;  %12438 = vpow2.f32 %v3537_v24  ;;  %v16010_v32 = vpop.eup %12426  ;;  %v3545_v24 = vmul.f32 1.442695, %v3328_v57  ;;  %v18875_v57 = vld [vmem:[#allocation19_spill] sm:$0xff] }
 0x3bf   : > { %10808 = vmatprep.mubr.f32.mxu1 %v4427_v29  ;;  %v16005_v16 = vpop.xlane.xlu0 %3765  ;;  %12051 = vmatprep.subr.bf16.mxu1 %v18872_v38  ;;  %12440 = vpow2.f32 %v3535_v56  ;;  %v3327_v42 = vsub.f32 %v15561_v61, %v3160_v49  ;;  %v18873_v29 = vld [vmem:[#allocation18_spill] sm:$0xff] }
 0x3c0   : > { %10809 = vmatmul.mubr.f32.gmra.mrb[100].mxu1 %v4428_v30  ;;  %12442 = vpow2.f32 %v3541_v1 }
 0x3c1   : > { %12053 = vmatpush3.bf16.msra.mxu1 %v18872_v38  ;;  %12444 = vpow2.f32 %v3539_v33  ;;  %v3543_v49 = vmul.f32 1.442695, %v3327_v42 }
 0x3c2   : > { %v12429_v5 = vpop.eup %12428  ;;  %3817 = vadd.xlane.f32.xlu1 %v16008_v20  ;;  %3783 = vadd.xlane.f32.xlu0 %v16010_v32  ;;  %v3166_v17 = vpop.xlane.xlu1 %3165  ;;  %12446 = vpow2.f32 %v3545_v24 }
 0x3c3   : > { %v4046_v36 = vmul.f32 %v12429_v5, %v3702_v60  ;;  %v3330_v11 = vsub.f32 %v15572_v14, %v3166_v17  ;;  %v16017_v0 = vpop.xlane.xlu0 %3763  ;;  %12055 = vmatprep.subr.bf16.mxu1 %v18873_v29  ;;  %v16020_v35 = vpop.eup %12430 }
 0x3c4   : > { %v16022_v56 = vpop.eup %12432 }
 0x3c5   : > { %18874 = vst [vmem:[#allocation70_spill] sm:$0xff] %v16022_v56  ;;  %12057 = vmatpush3.bf16.msra.mxu1 %v18873_v29  ;;  %v4174_v31 = vsub.f32 2.0, %v4046_v36  ;;  %v3549_v6 = vmul.f32 1.442695, %v3330_v11 }
 0x3c6   : > { %v12435_v61 = vpop.eup %12434  ;;  %3821 = vadd.xlane.f32.xlu1 %v16020_v35  ;;  %3789 = vadd.xlane.f32.xlu0 %v16022_v56  ;;  %v3164_v60 = vpop.xlane.xlu1 %3163 }
 0x3c7   : > { %v4045_v14 = vmul.f32 %v12435_v61, %v3700_v46  ;;  %v3329_v30 = vsub.f32 %v15587_v47, %v3164_v60  ;;  %v3706_v1 = vpop.xlane.xlu0 %3705  ;;  %12091 = vmatprep.subr.bf16.mxu1 %v18875_v57  ;;  %v16029_v38 = vpop.eup %12436  ;;  %v4302_v46 = vmul.f32 %v12429_v5, %v4174_v31 }
 0x3c8   : > { %12448 = vrcp.f32 %v3706_v1  ;;  %v16031_v17 = vpop.eup %12438 }
 0x3c9   : > { %v4173_v33 = vsub.f32 2.0, %v4045_v14  ;;  %12450 = vpow2.f32 %v3543_v49  ;;  %v3547_v42 = vmul.f32 1.442695, %v3329_v30  ;;  %v16036_v29 = vpop.eup %12440  ;;  %v4430_v5 = vmul.f32 %v15539_v3, %v4302_v46 }
 0x3ca   : > { %3787 = vadd.xlane.f32.xlu0 %v16029_v38  ;;  %3793 = vadd.xlane.f32.xlu1 %v16031_v17  ;;  %v3170_v36 = vpop.xlane.xlu1 %3169  ;;  %12452 = vpow2.f32 %v3549_v6  ;;  %v16038_v60 = vpop.eup %12442 }
 0x3cb   : > { %v3332_v47 = vsub.f32 %v15604_v18, %v3170_v36  ;;  %v3704_v24 = vpop.xlane.xlu0 %3703  ;;  %v4301_v11 = vmul.f32 %v12435_v61, %v4173_v33  ;;  %18876 = vst [vmem:[#allocation17_spill] sm:$0xff] %v16038_v60  ;;  %v16047_v31 = vpop.eup %12444  ;;  %v18879_v33 = vld [vmem:[#allocation122_spill] sm:$0xff] }
 0x3cc   : > { %12454 = vrcp.f32 %v3704_v24  ;;  %18877 = vst [vmem:[#allocation72_spill] sm:$0xff] %v16047_v31  ;;  %v16049_v6 = vpop.eup %12446 }
 0x3cd   : > { %v3553_v56 = vmul.f32 1.442695, %v3332_v47  ;;  %v4429_v49 = vmul.f32 %v15551_v62, %v4301_v11  ;;  %12456 = vpow2.f32 %v3547_v42  ;;  %18878 = vst [vmem:[#allocation126_spill] sm:$0xff] %v16049_v6  ;;  %v3340_v42 = vsub.f32 %v18879_v33, %v15712_v34 }
 0x3ce   : > { %3791 = vadd.xlane.f32.xlu0 %v16036_v29  ;;  %3797 = vadd.xlane.f32.xlu1 %v16038_v60  ;;  %v3168_v14 = vpop.xlane.xlu1 %3167  ;;  %v18884_v60 = vld [vmem:[#allocation106_spill] sm:$0xff] }
 0x3cf   : > { %12458 = vpow2.f32 %v3553_v56  ;;  %v3331_v18 = vsub.f32 %v15625_v28, %v3168_v14  ;;  %10811 = vmatprep.mubr.f32.mxu1 %v4429_v49  ;;  %v16045_v61 = vpop.xlane.xlu0 %3769  ;;  %v18882_v14 = vld [vmem:[#allocation104_spill] sm:$0xff] }
 0x3d0   : > { %10812 = vmatmul.mubr.f32.gmra.mrb[102].mxu1 %v4430_v5  ;;  %v3339_v34 = vsub.f32 %v18882_v14, %v15595_v4  ;;  %v3569_v5 = vmul.f32 1.442695, %v3340_v42  ;;  %v3341_v4 = vsub.f32 %v18884_v60, %v15611_v55 }
 0x3d1   : > { %v3551_v62 = vmul.f32 1.442695, %v3331_v18 }
 0x3d2   : > { %v12449_v30 = vpop.eup %12448  ;;  %3795 = vadd.xlane.f32.xlu0 %v16047_v31  ;;  %3801 = vadd.xlane.f32.xlu1 %v16049_v6  ;;  %v3174_v3 = vpop.xlane.xlu1 %3173  ;;  %v3567_v31 = vmul.f32 1.442695, %v3339_v34  ;;  %v18889_v34 = vld [vmem:[#allocation112_spill] sm:$0xff] }
 0x3d3   : > { %v4048_v56 = vmul.f32 %v12449_v30, %v3706_v1  ;;  %12460 = vpow2.f32 %v3551_v62  ;;  %v3334_v28 = vsub.f32 %v15639_v59, %v3174_v3  ;;  %v16056_v36 = vpop.xlane.xlu0 %3767  ;;  %v16058_v46 = vpop.eup %12450  ;;  %v18883_v59 = vld [vmem:[#allocation128_spill] sm:$0xff] }
 0x3d4   : > { %18880 = vst [vmem:[#allocation130_spill] sm:$0xff] %v16058_v46  ;;  %v16060_v47 = vpop.eup %12452  ;;  %v3342_v62 = vsub.f32 %v18883_v59, %v15748_v58  ;;  %v18887_v58 = vld [vmem:[#allocation110_spill] sm:$0xff] }
 0x3d5   : > { %18881 = vst [vmem:[#allocation59_spill] sm:$0xff] %v16060_v47  ;;  %v3557_v11 = vmul.f32 1.442695, %v3334_v28  ;;  %v4176_v18 = vsub.f32 2.0, %v4048_v56  ;;  %v18886_v56 = vld [vmem:[#allocation108_spill] sm:$0xff] }
 0x3d6   : > { %v12455_v49 = vpop.eup %12454  ;;  %3799 = vadd.xlane.f32.xlu0 %v16058_v46  ;;  %3805 = vadd.xlane.f32.xlu1 %v16060_v47  ;;  %v3172_v1 = vpop.xlane.xlu1 %3171  ;;  %v3343_v14 = vsub.f32 %v18886_v56, %v15629_v25  ;;  %v3573_v60 = vmul.f32 1.442695, %v3342_v62 }
 0x3d7   : > { %v4047_v33 = vmul.f32 %v12455_v49, %v3704_v24  ;;  %12462 = vpow2.f32 %v3557_v11  ;;  %v3333_v3 = vsub.f32 %v15653_v2, %v3172_v1  ;;  %v3710_v6 = vpop.xlane.xlu0 %3709  ;;  %v16069_v28 = vpop.eup %12456  ;;  %v3345_v24 = vsub.f32 %v18887_v58, %v15643_v9  ;;  %v18888_v11 = vld [vmem:[#allocation133_spill] sm:$0xff]  ;;  %v18891_v58 = vld [vmem:[#allocation118_spill] sm:$0xff] }
 0x3d8   : > { %12464 = vrcp.f32 %v3710_v6  ;;  %v4304_v55 = vmul.f32 %v12449_v30, %v4176_v18  ;;  %v3344_v1 = vsub.f32 %v18888_v11, %v15785_v39  ;;  %v3575_v56 = vmul.f32 1.442695, %v3343_v14 }
 0x3d9   : > { %v16073_v42 = vpop.eup %12458  ;;  %v4175_v47 = vsub.f32 2.0, %v4047_v33  ;;  %v3555_v46 = vmul.f32 1.442695, %v3333_v3  ;;  %12466 = vpow2.f32 %v3569_v5  ;;  %v3571_v33 = vmul.f32 1.442695, %v3341_v4 }
 0x3da   : > { %18885 = vst [vmem:[#allocation123_spill] sm:$0xff] %v16073_v42  ;;  %3803 = vadd.xlane.f32.xlu0 %v16069_v28  ;;  %3809 = vadd.xlane.f32.xlu1 %v16073_v42  ;;  %v16081_v2 = vpop.xlane.xlu1 %3753  ;;  %v3347_v3 = vsub.f32 %v18889_v34, %v15657_v53  ;;  %v16087_v9 = vpop.f32.mrb[160].mxu0  ;;  %v3349_v42 = vsub.f32 %v18891_v58, %v15691_v15  ;;  %v3577_v62 = vmul.f32 1.442695, %v3344_v1  ;;  %v18894_v15 = vld [vmem:[#allocation139_spill] sm:$0xff] }
 0x3db   : > { %12468 = vpow2.f32 %v3555_v46  ;;  %v3708_v25 = vpop.xlane.xlu0 %3707  ;;  %v4303_v59 = vmul.f32 %v12455_v49, %v4175_v47  ;;  %18890 = vst [vmem:[#allocation121_spill] sm:$0xff] %v16087_v9  ;;  %v16093_v30 = vpop.f32.mrb[161].mxu0  ;;  %v3579_v46 = vmul.f32 1.442695, %v3345_v24  ;;  %v18893_v47 = vld [vmem:[#allocation93_spill] sm:$0xff]  ;;  %v4432_v18 = vmul.f32 %v15597_v43, %v4304_v55  ;;  %v18895_v43 = vld [vmem:[#allocation142_spill] sm:$0xff] }
 0x3dc   : > { %12470 = vrcp.f32 %v3708_v25  ;;  %18892 = vst [vmem:[#allocation20_spill] sm:$0xff] %v16093_v30  ;;  %v3346_v49 = vsub.f32 %v18893_v47, %v15816_v51  ;;  %v3348_v4 = vsub.f32 %v18894_v15, %v15836_v21  ;;  %v3587_v51 = vmul.f32 1.442695, %v3349_v42 }
 0x3dd   : > { %v16089_v5 = vpop.eup %12460  ;;  %v4431_v39 = vmul.f32 %v15613_v13, %v4303_v59  ;;  %12472 = vpow2.f32 %v3567_v31  ;;  %v3583_v13 = vmul.f32 1.442695, %v3347_v3  ;;  %v3350_v55 = vsub.f32 %v18895_v43, %v15853_v27 }
 0x3de   : > { %3807 = vadd.xlane.f32.xlu0 %v16089_v5  ;;  %v16099_v53 = vpop.xlane.xlu1 %3757  ;;  %12474 = vpow2.f32 %v3573_v60  ;;  %v3581_v11 = vmul.f32 1.442695, %v3346_v49  ;;  %v3585_v21 = vmul.f32 1.442695, %v3348_v4 }
 0x3df   : > { %10814 = vmatprep.mubr.f32.mxu1 %v4431_v39  ;;  %v16104_v14 = vpop.xlane.xlu0 %3773  ;;  %12476 = vpow2.f32 %v3571_v33  ;;  %v3589_v27 = vmul.f32 1.442695, %v3350_v55 }
 0x3e0   : > { %10815 = vmatmul.mubr.f32.gmra.mrb[104].mxu1 %v4432_v18  ;;  %12478 = vpow2.f32 %v3575_v56 }
 0x3e1   : > { %v16106_v31 = vpop.eup %12462  ;;  %12480 = vpow2.f32 %v3579_v46 }
 0x3e2   : > { %v12465_v24 = vpop.eup %12464  ;;  %3813 = vadd.xlane.f32.xlu1 %v16106_v31  ;;  %v3210_v60 = vpop.xlane.xlu1 %3209  ;;  %12482 = vpow2.f32 %v3577_v62 }
 0x3e3   : > { %v4050_v1 = vmul.f32 %v12465_v24, %v3710_v6  ;;  %v16111_v59 = vpop.xlane.xlu0 %3771  ;;  %v16113_v33 = vpop.eup %12466  ;;  %12484 = vpow2.f32 %v3583_v13 }
 0x3e4   : > { %v16115_v34 = vpop.f32.mrb[162].mxu0  ;;  %12486 = vpow2.f32 %v3587_v51 }
 0x3e5   : > { %18896 = vst [vmem:[#allocation131_spill] sm:$0xff] %v16115_v34  ;;  %v16117_v42 = vpop.eup %12468  ;;  %v16119_v3 = vpop.f32.mrb[163].mxu0  ;;  %12488 = vpow2.f32 %v3581_v11  ;;  %v4178_v58 = vsub.f32 2.0, %v4050_v1 }
 0x3e6   : > { %18897 = vst [vmem:[#allocation21_spill] sm:$0xff] %v16119_v3  ;;  %3825 = vadd.xlane.f32.xlu1 %v16113_v33  ;;  %3811 = vadd.xlane.f32.xlu0 %v16117_v42  ;;  %v3208_v56 = vpop.xlane.xlu1 %3207  ;;  %v12471_v6 = vpop.eup %12470  ;;  %12490 = vpow2.f32 %v3585_v21 }
 0x3e7   : > { %v3714_v39 = vpop.xlane.xlu0 %3713  ;;  %v16123_v46 = vpop.eup %12472  ;;  %v4049_v47 = vmul.f32 %v12471_v6, %v3708_v25  ;;  %v4306_v13 = vmul.f32 %v12465_v24, %v4178_v58  ;;  %v3352_v25 = vsub.f32 %v15687_v10, %v3210_v60  ;;  %v3351_v24 = vsub.f32 %v15701_v22, %v3208_v56 }
 0x3e8   : > { %12492 = vrcp.f32 %v3714_v39  ;;  %v16125_v49 = vpop.eup %12474 }
 0x3e9   : > { %18898 = vst [vmem:[#allocation127_spill] sm:$0xff] %v16125_v49  ;;  %12494 = vrcp.f32 %v15856_v8  ;;  %v16128_v18 = vpop.eup %12476  ;;  %v4177_v62 = vsub.f32 2.0, %v4049_v47  ;;  %v3593_v58 = vmul.f32 1.442695, %v3352_v25  ;;  %v18906_v47 = vld [vmem:[#allocation29_spill] sm:$0xff] }
 0x3ea   : > { %12496 = vpow2.f32 %v3589_v27  ;;  %3829 = vadd.xlane.f32.xlu1 %v16125_v49  ;;  %3823 = vadd.xlane.f32.xlu0 %v16123_v46  ;;  %v3214_v15 = vpop.xlane.xlu1 %3213  ;;  %v16132_v4 = vpop.eup %12478  ;;  %v3591_v56 = vmul.f32 1.442695, %v3351_v24 }
 0x3eb   : > { %18899 = vst [vmem:[#allocation125_spill] sm:$0xff] %v16132_v4  ;;  %12498 = vrcp.f32 %v15885_v23  ;;  %v3712_v51 = vpop.xlane.xlu0 %3711  ;;  %v16136_v11 = vpop.eup %12480  ;;  %v4305_v43 = vmul.f32 %v12471_v6, %v4177_v62  ;;  %v3354_v62 = vsub.f32 %v18906_v47, %v3214_v15 }
 0x3ec   : > { %18900 = vst [vmem:[#allocation22_spill] sm:$0xff] %v16136_v11  ;;  %v16138_v55 = vpop.f32.mrb[164].mxu0  ;;  %12500 = vrcp.f32 %v3712_v51  ;;  %v16140_v21 = vpop.eup %12482 }
 0x3ed   : > { %18901 = vst [vmem:[#allocation135_spill] sm:$0xff] %v16138_v55  ;;  %18902 = vst [vmem:[#allocation77_spill] sm:$0xff] %v16140_v21  ;;  %12502 = vrcp.f32 %v15936_v19  ;;  %v16143_v1 = vpop.f32.mrb[165].mxu0  ;;  %v16145_v27 = vpop.eup %12484  ;;  %v4433_v60 = vmul.f32 %v15669_v12, %v4305_v43 }
 0x3ee   : > { %18903 = vst [vmem:[#allocation137_spill] sm:$0xff] %v16143_v1  ;;  %18904 = vst [vmem:[#allocation38_spill] sm:$0xff] %v16145_v27  ;;  %12504 = vrcp.f32 %v15956_v52  ;;  %3833 = vadd.xlane.f32.xlu1 %v16140_v21  ;;  %3827 = vadd.xlane.f32.xlu0 %v16128_v18  ;;  %v3212_v10 = vpop.xlane.xlu1 %3211  ;;  %v16152_v6 = vpop.eup %12486  ;;  %v18907_v1 = vld [vmem:[#allocation80_spill] sm:$0xff] }
 0x3ef   : > { %18905 = vst [vmem:[#allocation129_spill] sm:$0xff] %v16152_v6  ;;  %12506 = vrcp.f32 %v16005_v16  ;;  %v3718_v55 = vpop.xlane.xlu0 %3717  ;;  %v4434_v34 = vmul.f32 %v18907_v1, %v4306_v13  ;;  %v16157_v3 = vpop.eup %12488  ;;  %10817 = vmatprep.mubr.f32.mxu1 %v4433_v60  ;;  %v3353_v25 = vsub.f32 %v15722_v37, %v3212_v10  ;;  %v3597_v1 = vmul.f32 1.442695, %v3354_v62 }
 0x3f0   : > { %18908 = vst [vmem:[#allocation79_spill] sm:$0xff] %v16157_v3  ;;  %12508 = vrcp.f32 %v3718_v55  ;;  %v16159_v22 = vpop.eup %12490 }
 0x3f1   : > { %18909 = vst [vmem:[#allocation95_spill] sm:$0xff] %v16159_v22  ;;  %12510 = vrcp.f32 %v16081_v2  ;;  %10818 = vmatmul.mubr.f32.gmra.mrb[106].mxu1 %v4434_v34 }
 0x3f2   : > { %v12493_v12 = vpop.eup %12492  ;;  %12512 = vrcp.f32 %v16017_v0  ;;  %3837 = vadd.xlane.f32.xlu1 %v16157_v3  ;;  %3831 = vadd.xlane.f32.xlu0 %v16132_v4  ;;  %v3218_v15 = vpop.xlane.xlu1 %3217 }
 0x3f3   : > { %v16166_v13 = vpop.eup %12494  ;;  %12514 = vpow2.f32 %v3593_v58  ;;  %v4052_v43 = vmul.f32 %v12493_v12, %v3714_v39  ;;  %v3356_v60 = vsub.f32 %v15739_v48, %v3218_v15  ;;  %v3716_v47 = vpop.xlane.xlu0 %3715  ;;  %v3595_v58 = vmul.f32 1.442695, %v3353_v25 }
 0x3f4   : > { %v16169_v34 = vpop.eup %12496  ;;  %v16171_v9 = vpop.f32.mrb[166].mxu0  ;;  %12516 = vrcp.f32 %v3716_v47 }
 0x3f5   : > { %18910 = vst [vmem:[#allocation134_spill] sm:$0xff] %v16169_v34  ;;  %18911 = vst [vmem:[#allocation132_spill] sm:$0xff] %v16171_v9  ;;  %v16173_v24 = vpop.eup %12498  ;;  %12518 = vrcp.f32 %v16099_v53  ;;  %v16176_v37 = vpop.f32.mrb[167].mxu0  ;;  %v4180_v30 = vsub.f32 2.0, %v4052_v43  ;;  %v3601_v15 = vmul.f32 1.442695, %v3356_v60 }
 0x3f6   : > { %18912 = vst [vmem:[#allocation97_spill] sm:$0xff] %v16176_v37  ;;  %v12501_v10 = vpop.eup %12500  ;;  %12520 = vpow2.f32 %v3591_v56  ;;  %3841 = vadd.xlane.f32.xlu1 %v16159_v22  ;;  %3835 = vadd.xlane.f32.xlu0 %v16136_v11  ;;  %v3216_v48 = vpop.xlane.xlu1 %3215  ;;  %v18913_v9 = vld [vmem:[#allocation45_spill] sm:$0xff]  ;;  %v4071_v37 = vmul.f32 %v16166_v13, %v15856_v8 }
 0x3f7   : > { %v16180_v39 = vpop.eup %12502  ;;  %12522 = vpow2.f32 %v3597_v1  ;;  %v4051_v62 = vmul.f32 %v12501_v10, %v3712_v51  ;;  %v3355_v3 = vsub.f32 %v18913_v9, %v3216_v48  ;;  %v16183_v21 = vpop.xlane.xlu0 %3721  ;;  %v4308_v1 = vmul.f32 %v12493_v12, %v4180_v30 }
 0x3f8   : > { %v16185_v4 = vpop.eup %12504  ;;  %12524 = vrcp.f32 %v16183_v21  ;;  %v4073_v30 = vmul.f32 %v16173_v24, %v15885_v23 }
 0x3f9   : > { %v16188_v56 = vpop.eup %12506  ;;  %12526 = vrcp.f32 %v16056_v36  ;;  %v4179_v25 = vsub.f32 2.0, %v4051_v62  ;;  %v3599_v51 = vmul.f32 1.442695, %v3355_v3 }
 0x3fa   : > { %v12509_v43 = vpop.eup %12508  ;;  %12528 = vpow2.f32 %v3595_v58  ;;  %3845 = vadd.xlane.f32.xlu1 %v16169_v34  ;;  %3839 = vadd.xlane.f32.xlu0 %v16145_v27  ;;  %v3222_v9 = vpop.xlane.xlu1 %3221  ;;  %v4199_v34 = vsub.f32 2.0, %v4071_v37 }
 0x3fb   : > { %v16195_v60 = vpop.eup %12510  ;;  %v4307_v48 = vmul.f32 %v12501_v10, %v4179_v25  ;;  %v4054_v22 = vmul.f32 %v12509_v43, %v3718_v55  ;;  %12530 = vpow2.f32 %v3601_v15  ;;  %v3358_v11 = vsub.f32 %v15760_v7, %v3222_v9  ;;  %v16198_v62 = vpop.f32.mrb[168].mxu0  ;;  %v18917_v10 = vld [vmem:[#allocation91_spill] sm:$0xff]  ;;  %v18918_v9 = vld [vmem:[#allocation30_spill] sm:$0xff] }
 0x3fc   : > { %18914 = vst [vmem:[#allocation138_spill] sm:$0xff] %v16198_v62  ;;  %v16200_v49 = vpop.xlane.xlu0 %3719  ;;  %v16202_v8 = vpop.eup %12512  ;;  %v4072_v15 = vmul.f32 %v16195_v60, %v16081_v2  ;;  %v4436_v62 = vmul.f32 %v18918_v9, %v4308_v1  ;;  %v4075_v1 = vmul.f32 %v16185_v4, %v15956_v52 }
 0x3fd   : > { %12532 = vrcp.f32 %v16200_v49  ;;  %v16207_v3 = vpop.f32.mrb[169].mxu0  ;;  %v16209_v12 = vpop.eup %12514  ;;  %v3605_v55 = vmul.f32 1.442695, %v3358_v11  ;;  %v4435_v7 = vmul.f32 %v18917_v10, %v4307_v48  ;;  %v4182_v25 = vsub.f32 2.0, %v4054_v22  ;;  %v18919_v11 = vld [vmem:[#allocation53_spill] sm:$0xff] }
 0x3fe   : > { %18915 = vst [vmem:[#allocation136_spill] sm:$0xff] %v16207_v3  ;;  %18916 = vst [vmem:[#allocation99_spill] sm:$0xff] %v16209_v12  ;;  %12534 = vrcp.f32 %v16045_v61  ;;  %v12517_v58 = vpop.eup %12516  ;;  %3843 = vadd.xlane.f32.xlu0 %v16152_v6  ;;  %3849 = vadd.xlane.f32.xlu1 %v16209_v12  ;;  %v3220_v23 = vpop.xlane.xlu1 %3219  ;;  %v4201_v22 = vsub.f32 2.0, %v4073_v30 }
 0x3ff   : > { %12536 = vpow2.f32 %v3599_v51  ;;  %v16218_v3 = vpop.eup %12518  ;;  %v4053_v27 = vmul.f32 %v12517_v58, %v3716_v47  ;;  %v3357_v48 = vsub.f32 %v18919_v11, %v3220_v23  ;;  %10820 = vmatprep.mubr.f32.mxu1 %v4435_v7  ;;  %v4200_v23 = vsub.f32 2.0, %v4072_v15 }
 0x400   : > { %12538 = vpow2.f32 %v3605_v55  ;;  %v16221_v10 = vpop.xlane.xlu0 %3725  ;;  %v16223_v2 = vpop.eup %12520  ;;  %10821 = vmatmul.mubr.f32.gmra.mrb[108].mxu1 %v4436_v62  ;;  %v4074_v7 = vmul.f32 %v16218_v3, %v16099_v53  ;;  %v4310_v30 = vmul.f32 %v12509_v43, %v4182_v25  ;;  %v4327_v53 = vmul.f32 %v16166_v13, %v4199_v34 }
 0x401   : > { %18920 = vst [vmem:[#allocation92_spill] sm:$0xff] %v16223_v2  ;;  %12540 = vrcp.f32 %v16221_v10  ;;  %v16226_v51 = vpop.eup %12522  ;;  %v4181_v47 = vsub.f32 2.0, %v4053_v27  ;;  %v3603_v37 = vmul.f32 1.442695, %v3357_v48  ;;  %v4329_v25 = vmul.f32 %v16173_v24, %v4201_v22  ;;  %v18927_v22 = vld [vmem:[#allocation89_spill] sm:$0xff] }
 0x402   : > { %18921 = vst [vmem:[#allocation55_spill] sm:$0xff] %v16226_v51  ;;  %12542 = vrcp.f32 %v16111_v59  ;;  %v12525_v55 = vpop.eup %12524  ;;  %3847 = vadd.xlane.f32.xlu0 %v16223_v2  ;;  %3853 = vadd.xlane.f32.xlu1 %v16226_v51  ;;  %v16236_v62 = vpop.xlane.xlu1 %3729  ;;  %v4328_v13 = vmul.f32 %v16195_v60, %v4200_v23  ;;  %v4202_v34 = vsub.f32 2.0, %v4074_v7  ;;  %v18928_v23 = vld [vmem:[#allocation58_spill] sm:$0xff] }
 0x403   : > { %12544 = vrcp.f32 %v16104_v14  ;;  %v16238_v9 = vpop.eup %12526  ;;  %v4309_v52 = vmul.f32 %v12517_v58, %v4181_v47  ;;  %v4056_v27 = vmul.f32 %v12525_v55, %v16183_v21  ;;  %v16241_v11 = vpop.f32.mrb[170].mxu0  ;;  %v4076_v21 = vmul.f32 %v16180_v39, %v15936_v19  ;;  %v18926_v47 = vld [vmem:[#allocation83_spill] sm:$0xff] }
 0x404   : > { %12546 = vpow2.f32 %v3603_v37  ;;  %18922 = vst [vmem:[#allocation44_spill] sm:$0xff] %v16241_v11  ;;  %v16243_v15 = vpop.xlane.xlu0 %3723  ;;  %v16246_v48 = vpop.eup %12528  ;;  %v4203_v58 = vsub.f32 2.0, %v4075_v1  ;;  %v4077_v19 = vmul.f32 %v16202_v8, %v16017_v0  ;;  %v4455_v7 = vmul.f32 %v18928_v23, %v4327_v53 }
 0x405   : > { %18923 = vst [vmem:[#allocation90_spill] sm:$0xff] %v16246_v48  ;;  %12548 = vrcp.f32 %v16236_v62  ;;  %v16249_v43 = vpop.f32.mrb[171].mxu0  ;;  %v16252_v51 = vpop.eup %12530  ;;  %v4437_v37 = vmul.f32 %v18926_v47, %v4309_v52  ;;  %v4184_v12 = vsub.f32 2.0, %v4056_v27  ;;  %v4078_v27 = vmul.f32 %v16188_v56, %v16005_v16 }
 0x406   : > { %18924 = vst [vmem:[#allocation43_spill] sm:$0xff] %v16249_v43  ;;  %18925 = vst [vmem:[#allocation105_spill] sm:$0xff] %v16252_v51  ;;  %12550 = vrcp.f32 %v16243_v15  ;;  %3851 = vadd.xlane.f32.xlu0 %v16246_v48  ;;  %3857 = vadd.xlane.f32.xlu1 %v16252_v51  ;;  %v16261_v24 = vpop.xlane.xlu1 %3733  ;;  %v4438_v43 = vmul.f32 %v18927_v22, %v4310_v30  ;;  %v18929_v30 = vld [vmem:[#allocation47_spill] sm:$0xff]  ;;  %v4331_v53 = vmul.f32 %v16185_v4, %v4203_v58  ;;  %v18930_v51 = vld [vmem:[#allocation69_spill] sm:$0xff] }
 0x407   : > { %v12533_v11 = vpop.eup %12532  ;;  %12552 = vrcp.f32 %v16261_v24  ;;  %10823 = vmatprep.mubr.f32.mxu1 %v4437_v37  ;;  %v4457_v47 = vmul.f32 %v18929_v30, %v4329_v25  ;;  %v4079_v37 = vmul.f32 %v16238_v9, %v16056_v36  ;;  %v4456_v48 = vmul.f32 %v18930_v51, %v4328_v13  ;;  %v18933_v13 = vld [vmem:[#allocation98_spill] sm:$0xff]  ;;  %v18934_v30 = vld [vmem:[#allocation56_spill] sm:$0xff] }
 0x408   : > { %v16264_v2 = vpop.eup %12534  ;;  %v4055_v1 = vmul.f32 %v12533_v11, %v16200_v49  ;;  %v16270_v60 = vpop.xlane.xlu0 %3727  ;;  %10824 = vmatmul.mubr.f32.gmra.mrb[110].mxu1 %v4438_v43  ;;  %v4204_v49 = vsub.f32 2.0, %v4076_v21  ;;  %v4330_v16 = vmul.f32 %v16218_v3, %v4202_v34  ;;  %v4312_v6 = vmul.f32 %v12525_v55, %v4184_v12 }
 0x409   : > { %v16273_v52 = vpop.eup %12536  ;;  %12554 = vrcp.f32 %v16270_v60  ;;  %10914 = vmatprep.mubr.f32.mxu1 %v4455_v7  ;;  %v4205_v21 = vsub.f32 2.0, %v4077_v19  ;;  %v4206_v12 = vsub.f32 2.0, %v4078_v27 }
 0x40a   : > { %v16279_v0 = vpop.eup %12538  ;;  %v4183_v22 = vsub.f32 2.0, %v4055_v1  ;;  %3855 = vadd.xlane.f32.xlu0 %v16273_v52  ;;  %v16288_v43 = vpop.xlane.xlu1 %3737  ;;  %v4332_v19 = vmul.f32 %v16180_v39, %v4204_v49 }
 0x40b   : > { %v12541_v23 = vpop.eup %12540  ;;  %3861 = vadd.xlane.f32.xlu1 %v16279_v0  ;;  %12556 = vrcp.f32 %v16288_v43  ;;  %v16294_v4 = vpop.f32.mrb[172].mxu0 }
 0x40c   : > { %v16290_v25 = vpop.eup %12542  ;;  %v4311_v36 = vmul.f32 %v12533_v11, %v4183_v22  ;;  %v4058_v1 = vmul.f32 %v12541_v23, %v16221_v10  ;;  %18931 = vst [vmem:[#allocation50_spill] sm:$0xff] %v16294_v4  ;;  %v16296_v51 = vpop.xlane.xlu0 %3731  ;;  %10915 = vmatmul.mubr.f32.vlgmr.msra.gmra.mrb[112].mxu1 %v4456_v48  ;;  %v4080_v11 = vmul.f32 %v16264_v2, %v16045_v61  ;;  %v4207_v10 = vsub.f32 2.0, %v4079_v37  ;;  %v18935_v4 = vld [vmem:[#allocation54_spill] sm:$0xff]  ;;  %v18936_v61 = vld [vmem:[#allocation71_spill] sm:$0xff] }
 0x40d   : > { %v16298_v3 = vpop.eup %12544  ;;  %12558 = vrcp.f32 %v16296_v51  ;;  %v16301_v55 = vpop.f32.mrb[173].mxu0  ;;  %10917 = vmatprep.mubr.f32.mxu1 %v4457_v47  ;;  %12093 = vmatpush3.bf16.msra.mxu1 %v18875_v57  ;;  %v4081_v27 = vmul.f32 %v16290_v25, %v16111_v59  ;;  %v4440_v22 = vmul.f32 %v18934_v30, %v4312_v6  ;;  %v18937_v57 = vld [vmem:[#allocation81_spill] sm:$0xff]  ;;  %v4334_v6 = vmul.f32 %v16188_v56, %v4206_v12 }
 0x40e   : > { %18932 = vst [vmem:[#allocation48_spill] sm:$0xff] %v16301_v55  ;;  %v16303_v58 = vpop.eup %12546  ;;  %v4439_v34 = vmul.f32 %v18933_v13, %v4311_v36  ;;  %v4186_v48 = vsub.f32 2.0, %v4058_v1  ;;  %v4458_v55 = vmul.f32 %v18935_v4, %v4330_v16  ;;  %12095 = vmatprep.subr.bf16.mxu1 %v18936_v61  ;;  %v4459_v49 = vmul.f32 %v18937_v57, %v4331_v53  ;;  %v18938_v13 = vld [vmem:[#allocation82_spill] sm:$0xff] }
 0x40f   : > { %v12549_v7 = vpop.eup %12548  ;;  %3859 = vadd.xlane.f32.xlu0 %v16303_v58  ;;  %v4333_v36 = vmul.f32 %v16202_v8, %v4205_v21  ;;  %v4208_v1 = vsub.f32 2.0, %v4080_v11  ;;  %v4335_v4 = vmul.f32 %v16238_v9, %v4207_v10  ;;  %v4460_v53 = vmul.f32 %v18938_v13, %v4332_v19  ;;  %v18942_v11 = vld [vmem:[#allocation62_spill] sm:$0xff]  ;;  %v18943_v19 = vld [vmem:[#allocation73_spill] sm:$0xff] }
 0x410   : > { %v12551_v47 = vpop.eup %12550  ;;  %v4060_v37 = vmul.f32 %v12549_v7, %v16236_v62  ;;  %10858 = vmatprep.mubr.f32.mxu0 %v4439_v34  ;;  %v16317_v39 = vpop.xlane.xlu0 %3735  ;;  %10918 = vmatmul.mubr.f32.gmra.mrb[114].mxu1 %v4458_v55  ;;  %v4082_v62 = vmul.f32 %v16298_v3, %v16104_v14  ;;  %v18939_v34 = vld [vmem:[#allocation23_spill] sm:$0xff]  ;;  %v4314_v21 = vmul.f32 %v12541_v23, %v4186_v48 }
 0x411   : > { %v4057_v59 = vmul.f32 %v12551_v47, %v16243_v15  ;;  %12560 = vrcp.f32 %v16317_v39  ;;  %10859 = vmatmul.mubr.f32.vlgmr.msra.gmra.mrb[192].mxu0 %v4440_v22  ;;  %v12553_v16 = vpop.eup %12552  ;;  %10920 = vmatprep.mubr.f32.mxu1 %v4459_v49  ;;  %v4209_v15 = vsub.f32 2.0, %v4081_v27  ;;  %v18940_v22 = vld [vmem:[#allocation24_spill] sm:$0xff]  ;;  %v4461_v10 = vmul.f32 %v18942_v11, %v4333_v36  ;;  %v18947_v11 = vld [vmem:[#allocation94_spill] sm:$0xff] }
 0x412   : > { %12061 = vmatpush3.bf16.msra.mxu0 %v18939_v34  ;;  %v4062_v55 = vmul.f32 %v12553_v16, %v16261_v24  ;;  %12097 = vmatpush3.bf16.msra.mxu1 %v18936_v61  ;;  %v4188_v56 = vsub.f32 2.0, %v4060_v37  ;;  %v18944_v24 = vld [vmem:[#allocation27_spill] sm:$0xff]  ;;  %v4210_v49 = vsub.f32 2.0, %v4082_v62  ;;  %v18946_v34 = vld [vmem:[#allocation9_spill] sm:$0xff] }
 0x413   : > { %v12555_v8 = vpop.eup %12554  ;;  %v4185_v30 = vsub.f32 2.0, %v4057_v59  ;;  %12063 = vmatprep.subr.bf16.mxu0 %v18940_v22  ;;  %v3742_v12 = vpop.xlane.xlu1 %3741  ;;  %12099 = vmatprep.subr.bf16.mxu1 %v18943_v19  ;;  %v4462_v27 = vmul.f32 %v18944_v24, %v4334_v6  ;;  %v18945_v37 = vld [vmem:[#allocation31_spill] sm:$0xff]  ;;  %v4336_v59 = vmul.f32 %v16264_v2, %v4208_v1  ;;  %v4337_v13 = vmul.f32 %v16290_v25, %v4209_v15  ;;  %v18950_v15 = vld [vmem:[#allocation88_spill] sm:$0xff]  ;;  %v18953_v24 = vld [vmem:[#allocation85_spill] sm:$0xff] }
 0x414   : > { %v4059_v9 = vmul.f32 %v12555_v8, %v16270_v60  ;;  %v16333_v14 = vpop.f32.mrb[174].mxu0  ;;  %12562 = vrcp.f32 %v3742_v12  ;;  %10921 = vmatmul.mubr.f32.gmra.mrb[116].mxu1 %v4460_v53  ;;  %v4463_v60 = vmul.f32 %v18945_v37, %v4335_v4  ;;  %v4442_v53 = vmul.f32 %v18947_v11, %v4314_v21  ;;  %v18955_v37 = vld [vmem:[#allocation75_spill] sm:$0xff]  ;;  %v18959_v11 = vld [vmem:[#allocation26_spill] sm:$0xff] }
 0x415   : > { %18941 = vst [vmem:[#allocation103_spill] sm:$0xff] %v16333_v14  ;;  %v4313_v57 = vmul.f32 %v12551_v47, %v4185_v30  ;;  %v16337_v23 = vpop.f32.mrb[175].mxu0  ;;  %v12557_v48 = vpop.eup %12556  ;;  %10923 = vmatprep.mubr.f32.mxu1 %v4461_v10  ;;  %v4190_v47 = vsub.f32 2.0, %v4062_v55  ;;  %v18948_v14 = vld [vmem:[#allocation2_spill] sm:$0xff]  ;;  %v4316_v6 = vmul.f32 %v12549_v7, %v4188_v56  ;;  %v18951_v55 = vld [vmem:[#allocation84_spill] sm:$0xff]  ;;  %v4338_v7 = vmul.f32 %v16298_v3, %v4210_v49 }
 0x416   : > { %v4187_v61 = vsub.f32 2.0, %v4059_v9  ;;  %12065 = vmatpush3.bf16.msra.mxu0 %v18940_v22  ;;  %12101 = vmatpush3.bf16.msra.mxu1 %v18943_v19  ;;  %v4064_v4 = vmul.f32 %v12557_v48, %v16288_v43  ;;  %v18949_v22 = vld [vmem:[#allocation74_spill] sm:$0xff]  ;;  %v4464_v9 = vmul.f32 %v18951_v55, %v4336_v59 }
 0x417   : > { %v12559_v36 = vpop.eup %12558  ;;  %v4441_v30 = vmul.f32 %v18946_v34, %v4313_v57  ;;  %12067 = vmatprep.subr.bf16.mxu0 %v18948_v14  ;;  %v3740_v1 = vpop.xlane.xlu0 %3739  ;;  %12103 = vmatprep.subr.bf16.mxu1 %v18949_v22  ;;  %v18952_v43 = vld [vmem:[#allocation86_spill] sm:$0xff] }
 0x418   : > { %v4315_v62 = vmul.f32 %v12555_v8, %v4187_v61  ;;  %v4061_v2 = vmul.f32 %v12559_v36, %v16296_v51  ;;  %12564 = vrcp.f32 %v3740_v1  ;;  %10924 = vmatmul.mubr.f32.gmra.mrb[118].mxu1 %v4462_v27  ;;  %v4318_v8 = vmul.f32 %v12553_v16, %v4190_v47  ;;  %v18954_v61 = vld [vmem:[#allocation25_spill] sm:$0xff] }
 0x419   : > { %10861 = vmatprep.mubr.f32.mxu0 %v4441_v30  ;;  %10926 = vmatprep.mubr.f32.mxu1 %v4463_v60  ;;  %v4465_v56 = vmul.f32 %v18952_v43, %v4337_v13  ;;  %v4192_v51 = vsub.f32 2.0, %v4064_v4  ;;  %v4444_v27 = vmul.f32 %v18953_v24, %v4316_v6  ;;  %v18956_v16 = vld [vmem:[#allocation101_spill] sm:$0xff]  ;;  %v18957_v60 = vld [vmem:[#allocation87_spill] sm:$0xff]  ;;  %v18958_v13 = vld [vmem:[#allocation32_spill] sm:$0xff] }
 0x41a   : > { %v4189_v25 = vsub.f32 2.0, %v4061_v2  ;;  %10862 = vmatmul.mubr.f32.gmra.mrb[194].mxu0 %v4442_v53  ;;  %v4443_v21 = vmul.f32 %v18950_v15, %v4315_v62  ;;  %12105 = vmatpush3.bf16.msra.mxu1 %v18949_v22  ;;  %v4446_v59 = vmul.f32 %v18957_v60, %v4318_v8  ;;  %v18960_v53 = vld [vmem:[#allocation76_spill] sm:$0xff]  ;;  %v18963_v15 = vld [vmem:[#allocation3_spill] sm:$0xff] }
 0x41b   : > { %v12561_v10 = vpop.eup %12560  ;;  %12069 = vmatpush3.bf16.msra.mxu0 %v18948_v14  ;;  %12107 = vmatprep.subr.bf16.mxu1 %v18955_v37  ;;  %v18961_v6 = vld [vmem:[#allocation140_spill] sm:$0xff] }
 0x41c   : > { %v4317_v19 = vmul.f32 %v12559_v36, %v4189_v25  ;;  %v4063_v57 = vmul.f32 %v12561_v10, %v16317_v39  ;;  %10864 = vmatprep.mubr.f32.mxu0 %v4443_v21  ;;  %12071 = vmatprep.subr.bf16.mxu0 %v18954_v61  ;;  %v4466_v36 = vmul.f32 %v18958_v13, %v4338_v7  ;;  %v18964_v21 = vld [vmem:[#allocation78_spill] sm:$0xff]  ;;  %v18965_v8 = vld [vmem:[#allocation4_spill] sm:$0xff]  ;;  %v18970_v13 = vld [vmem:[#allocation13_spill] sm:$0xff] }
 0x41d   : > { %10927 = vmatmul.mubr.f32.gmra.mrb[120].mxu1 %v4464_v9  ;;  %v4320_v39 = vmul.f32 %v12557_v48, %v4192_v51  ;;  %v8835_v9 = vld [vmem:[%s17979_s1 + $0x20] sm:$0xff]  ;;  %v18966_v43 = vld [vmem:[#allocation40_spill] sm:$0xff]  ;;  %v18967_v51 = vld [vmem:[#allocation107_spill] sm:$0xff] }
 0x41e   : > { %v4191_v3 = vsub.f32 2.0, %v4063_v57  ;;  %10865 = vmatmul.mubr.f32.gmra.mrb[196].mxu0 %v4444_v27  ;;  %10929 = vmatprep.mubr.f32.mxu1 %v4465_v56  ;;  %v4445_v49 = vmul.f32 %v18956_v16, %v4317_v19  ;;  %v12563_v14 = vpop.eup %12562  ;;  %v18968_v24 = vld [vmem:[#allocation144_spill] sm:$0xff] }
 0x41f   : > { %12073 = vmatpush3.bf16.msra.mxu0 %v18954_v61  ;;  %12109 = vmatpush3.bf16.msra.mxu1 %v18955_v37  ;;  %v4066_v34 = vmul.f32 %v12563_v14, %v3742_v12  ;;  %v3746_v30 = vpop.xlane.xlu1 %3745  ;;  %v18962_v12 = vld [vmem:[#allocation96_spill] sm:$0xff] }
 0x420   : > { %v4319_v47 = vmul.f32 %v12561_v10, %v4191_v3  ;;  %10867 = vmatprep.mubr.f32.mxu0 %v4445_v49  ;;  %12075 = vmatprep.subr.bf16.mxu0 %v18959_v11  ;;  %12566 = vrcp.f32 %v3746_v30  ;;  %v4448_v25 = vmul.f32 %v18962_v12, %v4320_v39  ;;  %v8836_v10 = vld [vmem:[%s17979_s1 + $0x28] sm:$0xff] }
 0x421   : > { %10930 = vmatmul.mubr.f32.gmra.mrb[122].mxu1 %v4466_v36  ;;  %12111 = vmatprep.subr.bf16.mxu1 %v18960_v53  ;;  %v4194_v2 = vsub.f32 2.0, %v4066_v34  ;;  %v16384_v56 = vpack.c.bf16 %v8836_v10, %v8835_v9  ;;  %v18969_v3 = vld [vmem:[#allocation11_spill] sm:$0xff] }
 0x422   : > { %10868 = vmatmul.mubr.f32.gmra.mrb[198].mxu0 %v4446_v59  ;;  %v4447_v62 = vmul.f32 %v18961_v6, %v4319_v47  ;;  %v12565_v4 = vpop.eup %12564 }
 0x423   : > { %12077 = vmatpush3.bf16.msra.mxu0 %v18959_v11  ;;  %12113 = vmatpush3.bf16.msra.mxu1 %v18960_v53  ;;  %v4065_v48 = vmul.f32 %v12565_v4, %v3740_v1  ;;  %v3744_v22 = vpop.xlane.xlu0 %3743  ;;  %v4322_v1 = vmul.f32 %v12563_v14, %v4194_v2 }
 0x424   : > { %10870 = vmatprep.mubr.f32.mxu0 %v4447_v62  ;;  %12079 = vmatprep.subr.bf16.mxu0 %v18963_v15  ;;  %12568 = vrcp.f32 %v3744_v22  ;;  %v18971_v62 = vld [vmem:[#allocation109_spill] sm:$0xff] }
 0x425   : > { %12115 = vmatprep.subr.bf16.mxu1 %v18964_v21  ;;  %v4193_v55 = vsub.f32 2.0, %v4065_v48  ;;  %v4450_v27 = vmul.f32 %v18968_v24, %v4322_v1 }
 0x426   : > { %10871 = vmatmul.mubr.f32.gmra.mrb[200].mxu0 %v4448_v25 }
 0x427   : > { %12081 = vmatpush3.bf16.msra.mxu0 %v18963_v15  ;;  %12117 = vmatpush3.bf16.msra.mxu1 %v18964_v21  ;;  %v4321_v7 = vmul.f32 %v12565_v4, %v4193_v55  ;;  %v18973_v21 = vld [vmem:[#allocation117_spill] sm:$0xff] }
 0x428   : > { %12083 = vmatprep.subr.bf16.mxu0 %v18965_v8  ;;  %12119 = vmatprep.subr.bf16.mxu1 %v18966_v43 }
 0x429   : > { %v4449_v19 = vmul.f32 %v18967_v51, %v4321_v7 }
 0x42a   : > { %v12567_v57 = vpop.eup %12566 }
 0x42b   : > { %12085 = vmatpush3.bf16.msra.mxu0 %v18965_v8  ;;  %12121 = vmatpush3.bf16.msra.mxu1 %v18966_v43  ;;  %v4068_v61 = vmul.f32 %v12567_v57, %v3746_v30  ;;  %v3750_v37 = vpop.xlane.xlu1 %3749 }
 0x42c   : > { %10873 = vmatprep.mubr.f32.mxu0 %v4449_v19  ;;  %12087 = vmatprep.subr.bf16.mxu0 %v18969_v3  ;;  %12570 = vrcp.f32 %v3750_v37  ;;  %v18974_v19 = vld [vmem:[#allocation119_spill] sm:$0xff] }
 0x42d   : > { %10874 = vmatmul.mubr.f32.gmra.mrb[202].mxu0 %v4450_v27  ;;  %12155 = vmatprep.subr.bf16.mxu1 %v16384_v56  ;;  %v4196_v49 = vsub.f32 2.0, %v4068_v61 }
 0x42e   : > { %v12569_v16 = vpop.eup %12568 }
 0x42f   : > { %12089 = vmatpush3.bf16.msra.mxu0 %v18969_v3  ;;  %v4067_v14 = vmul.f32 %v12569_v16, %v3744_v22  ;;  %v3748_v60 = vpop.xlane.xlu0 %3747  ;;  %v3224_v59 = vpop.xlane.xlu1 %3223  ;;  %v4324_v47 = vmul.f32 %v12567_v57, %v4196_v49  ;;  %v18972_v22 = vld [vmem:[#allocation143_spill] sm:$0xff] }
 0x430   : > { %12123 = vmatprep.subr.bf16.mxu0 %v18970_v13  ;;  %12572 = vrcp.f32 %v3748_v60  ;;  %v3359_v36 = vsub.f32 %v15875_v50, %v3224_v59 }
 0x431   : > { %v4195_v39 = vsub.f32 2.0, %v4067_v14  ;;  %v4452_v12 = vmul.f32 %v18972_v22, %v4324_v47 }
 0x432   : > { %v3607_v34 = vmul.f32 1.442695, %v3359_v36  ;;  %v18975_v36 = vld [vmem:[#allocation113_spill] sm:$0xff] }
 0x433   : > { %v4323_v30 = vmul.f32 %v12569_v16, %v4195_v39  ;;  %v3776_v11 = vpop.xlane.xlu0 %3775  ;;  %v3226_v53 = vpop.xlane.xlu1 %3225 }
 0x434   : > { %12574 = vpow2.f32 %v3607_v34  ;;  %v3360_v6 = vsub.f32 %v15891_v45, %v3226_v53  ;;  %v18976_v53 = vld [vmem:[#allocation64_spill] sm:$0xff] }
 0x435   : > { %12576 = vrcp.f32 %v3776_v11  ;;  %v4451_v4 = vmul.f32 %v18971_v62, %v4323_v30 }
 0x436   : > { %v12571_v2 = vpop.eup %12570  ;;  %v3609_v48 = vmul.f32 1.442695, %v3360_v6 }
 0x437   : > { %v4070_v25 = vmul.f32 %v12571_v2, %v3750_v37  ;;  %v3778_v15 = vpop.xlane.xlu0 %3777  ;;  %10876 = vmatprep.mubr.f32.mxu0 %v4451_v4  ;;  %v3228_v50 = vpop.xlane.xlu1 %3227 }
 0x438   : > { %12578 = vpow2.f32 %v3609_v48  ;;  %v3361_v55 = vsub.f32 %v18973_v21, %v3228_v50  ;;  %v16399_v9 = vpop.f32.mrb[176].mxu0  ;;  %10877 = vmatmul.mubr.f32.gmra.mrb[204].mxu0 %v4452_v12 }
 0x439   : > { %12580 = vrcp.f32 %v3778_v15  ;;  %v16401_v10 = vpop.f32.mrb[177].mxu0  ;;  %v4198_v1 = vsub.f32 2.0, %v4070_v25 }
 0x43a   : > { %v12573_v45 = vpop.eup %12572  ;;  %v3611_v7 = vmul.f32 1.442695, %v3361_v55  ;;  %v18978_v55 = vld [vmem:[#allocation114_spill] sm:$0xff] }
 0x43b   : > { %v4069_v8 = vmul.f32 %v12573_v45, %v3748_v60  ;;  %v3780_v43 = vpop.xlane.xlu0 %3779  ;;  %v3230_v51 = vpop.xlane.xlu1 %3229  ;;  %v4326_v61 = vmul.f32 %v12571_v2, %v4198_v1 }
 0x43c   : > { %12582 = vpow2.f32 %v3611_v7  ;;  %v3362_v57 = vsub.f32 %v18974_v19, %v3230_v51 }
 0x43d   : > { %v4197_v24 = vsub.f32 2.0, %v4069_v8  ;;  %12584 = vrcp.f32 %v3780_v43  ;;  %v4454_v6 = vmul.f32 %v18976_v53, %v4326_v61  ;;  %v18980_v61 = vld [vmem:[#allocation115_spill] sm:$0xff]  ;;  %v18982_v53 = vld [vmem:[#allocation49_spill] sm:$0xff] }
 0x43e   : > { %v16404_v27 = vpop.eup %12574  ;;  %v3613_v37 = vmul.f32 1.442695, %v3362_v57 }
 0x43f   : > { %v12577_v3 = vpop.eup %12576  ;;  %v4325_v16 = vmul.f32 %v12573_v45, %v4197_v24  ;;  %v3782_v49 = vpop.xlane.xlu0 %3781  ;;  %3863 = vadd.xlane.f32.xlu0 %v16404_v27 }
 0x440   : > { %v3232_v14 = vpop.xlane.xlu1 %3231  ;;  %v4083_v59 = vmul.f32 %v12577_v3, %v3776_v11  ;;  %12586 = vpow2.f32 %v3613_v37 }
 0x441   : > { %v3363_v60 = vsub.f32 %v15943_v44, %v3232_v14  ;;  %12588 = vrcp.f32 %v3782_v49  ;;  %v4453_v39 = vmul.f32 %v18975_v36, %v4325_v16 }
 0x442   : > { %v16409_v47 = vpop.eup %12578  ;;  %v4211_v34 = vsub.f32 2.0, %v4083_v59 }
 0x443   : > { %v3615_v30 = vmul.f32 1.442695, %v3363_v60  ;;  %v12581_v62 = vpop.eup %12580  ;;  %v3816_v4 = vpop.xlane.xlu0 %3815  ;;  %10879 = vmatprep.mubr.f32.mxu0 %v4453_v39  ;;  %3865 = vadd.xlane.f32.xlu1 %v16409_v47 }
 0x444   : > { %v3234_v2 = vpop.xlane.xlu1 %3233  ;;  %v4339_v48 = vmul.f32 %v12577_v3, %v4211_v34  ;;  %v4084_v11 = vmul.f32 %v12581_v62, %v3778_v15  ;;  %v16414_v22 = vpop.f32.mrb[178].mxu0  ;;  %10880 = vmatmul.mubr.f32.gmra.mrb[206].mxu0 %v4454_v6 }
 0x445   : > { %12590 = vpow2.f32 %v3615_v30  ;;  %v3364_v44 = vsub.f32 %v15963_v40, %v3234_v2  ;;  %v16416_v12 = vpop.f32.mrb[179].mxu0 }
 0x446   : > { %12592 = vrcp.f32 %v3816_v4  ;;  %v16418_v25 = vpop.eup %12582  ;;  %v4212_v50 = vsub.f32 2.0, %v4084_v11  ;;  %v4467_v45 = vmul.f32 %v18978_v55, %v4339_v48 }
 0x447   : > { %18977 = vst [vmem:[#allocation63_spill] sm:$0xff] %v16418_v25  ;;  %v3617_v21 = vmul.f32 1.442695, %v3364_v44  ;;  %v12585_v1 = vpop.eup %12584  ;;  %v3820_v7 = vpop.xlane.xlu0 %3819  ;;  %3867 = vadd.xlane.f32.xlu0 %v16418_v25 }
 0x448   : > { %v3236_v15 = vpop.xlane.xlu1 %3235  ;;  %v4340_v8 = vmul.f32 %v12581_v62, %v4212_v50  ;;  %v4085_v51 = vmul.f32 %v12585_v1, %v3780_v43  ;;  %10932 = vmatprep.mubr.f32.mxu1 %v4467_v45  ;;  %v18984_v50 = vld [vmem:[#allocation120_spill] sm:$0xff] }
 0x449   : > { %12594 = vpow2.f32 %v3617_v21  ;;  %v3365_v40 = vsub.f32 %v15979_v41, %v3236_v15 }
 0x44a   : > { %v16423_v19 = vpop.eup %12586  ;;  %v4213_v57 = vsub.f32 2.0, %v4085_v51  ;;  %v4468_v37 = vmul.f32 %v18980_v61, %v4340_v8  ;;  %12596 = vrcp.f32 %v3820_v7 }
 0x44b   : > { %18979 = vst [vmem:[#allocation100_spill] sm:$0xff] %v16423_v19  ;;  %v3619_v24 = vmul.f32 1.442695, %v3365_v40  ;;  %v12589_v3 = vpop.eup %12588  ;;  %v3786_v16 = vpop.xlane.xlu0 %3785  ;;  %3869 = vadd.xlane.f32.xlu1 %v16423_v19  ;;  %v18986_v40 = vld [vmem:[#allocation124_spill] sm:$0xff] }
 0x44c   : > { %v3238_v14 = vpop.xlane.xlu1 %3237  ;;  %v4341_v59 = vmul.f32 %v12585_v1, %v4213_v57  ;;  %v4086_v60 = vmul.f32 %v12589_v3, %v3782_v49  ;;  %10933 = vmatmul.mubr.f32.gmra.mrb[124].mxu1 %v4468_v37  ;;  %v16428_v36 = vpop.f32.mrb[180].mxu0 }
 0x44d   : > { %12598 = vpow2.f32 %v3619_v24  ;;  %v3366_v43 = vsub.f32 %v15994_v26, %v3238_v14  ;;  %v16430_v41 = vpop.f32.mrb[181].mxu0 }
 0x44e   : > { %12600 = vrcp.f32 %v3786_v16  ;;  %v4214_v34 = vsub.f32 2.0, %v4086_v60  ;;  %v4469_v6 = vmul.f32 %v18982_v53, %v4341_v59 }
 0x44f   : > { %v16432_v39 = vpop.eup %12590  ;;  %v3621_v30 = vmul.f32 1.442695, %v3366_v43  ;;  %v3784_v2 = vpop.xlane.xlu0 %3783 }
 0x450   : > { %18981 = vst [vmem:[#allocation66_spill] sm:$0xff] %v16432_v39  ;;  %v12593_v62 = vpop.eup %12592  ;;  %3871 = vadd.xlane.f32.xlu0 %v16432_v39  ;;  %v3818_v49 = vpop.xlane.xlu1 %3817  ;;  %v4342_v48 = vmul.f32 %v12589_v3, %v4214_v34  ;;  %10935 = vmatprep.mubr.f32.mxu1 %v4469_v6 }
 0x451   : > { %v4103_v11 = vmul.f32 %v12593_v62, %v3816_v4  ;;  %12602 = vpow2.f32 %v3621_v30 }
 0x452   : > { %12604 = vrcp.f32 %v3784_v2  ;;  %v4470_v21 = vmul.f32 %v18984_v50, %v4342_v48 }
 0x453   : > { %v16436_v26 = vpop.eup %12594  ;;  %v4231_v44 = vsub.f32 2.0, %v4103_v11  ;;  %12606 = vrcp.f32 %v3818_v49  ;;  %v3790_v55 = vpop.xlane.xlu0 %3789 }
 0x454   : > { %18983 = vst [vmem:[#allocation141_spill] sm:$0xff] %v16436_v26  ;;  %3873 = vadd.xlane.f32.xlu1 %v16436_v26  ;;  %v3822_v45 = vpop.xlane.xlu1 %3821  ;;  %12608 = vrcp.f32 %v3790_v55  ;;  %10936 = vmatmul.mubr.f32.gmra.mrb[126].mxu1 %v4470_v21  ;;  %v16440_v15 = vpop.f32.mrb[182].mxu0 }
 0x455   : > { %v4359_v1 = vmul.f32 %v12593_v62, %v4231_v44  ;;  %v12597_v8 = vpop.eup %12596  ;;  %12610 = vrcp.f32 %v3822_v45  ;;  %v16442_v4 = vpop.f32.mrb[183].mxu0 }
 0x456   : > { %v4105_v3 = vmul.f32 %v12597_v8, %v3820_v7 }
 0x457   : > { %v16444_v51 = vpop.eup %12598  ;;  %v4487_v57 = vmul.f32 %v18986_v40, %v4359_v1  ;;  %v3788_v61 = vpop.xlane.xlu0 %3787 }
 0x458   : > { %18985 = vst [vmem:[#allocation46_spill] sm:$0xff] %v16444_v51  ;;  %v12601_v24 = vpop.eup %12600  ;;  %3875 = vadd.xlane.f32.xlu0 %v16444_v51  ;;  %v3794_v37 = vpop.xlane.xlu1 %3793  ;;  %12612 = vrcp.f32 %v3788_v61  ;;  %v4233_v6 = vsub.f32 2.0, %v4105_v3 }
 0x459   : > { %v4088_v14 = vmul.f32 %v12601_v24, %v3786_v16  ;;  %11026 = vmatprep.mubr.f32.mxu1 %v4487_v57  ;;  %12614 = vrcp.f32 %v3794_v37 }
 0x45b   : > { %v16448_v59 = vpop.eup %12602  ;;  %v4216_v43 = vsub.f32 2.0, %v4088_v14  ;;  %v3792_v34 = vpop.xlane.xlu0 %3791 }
 0x45c   : > { %18987 = vst [vmem:[#allocation102_spill] sm:$0xff] %v16448_v59  ;;  %v12605_v60 = vpop.eup %12604  ;;  %3877 = vadd.xlane.f32.xlu1 %v16448_v59  ;;  %v3798_v30 = vpop.xlane.xlu1 %3797  ;;  %12616 = vrcp.f32 %v3792_v34  ;;  %v4361_v59 = vmul.f32 %v12597_v8, %v4233_v6 }
 0x45d   : > { %v12607_v53 = vpop.eup %12606  ;;  %v4087_v62 = vmul.f32 %v12605_v60, %v3784_v2  ;;  %v16451_v48 = vpop.f32.mrb[184].mxu0  ;;  %12618 = vrcp.f32 %v3798_v30  ;;  %v4344_v21 = vmul.f32 %v12601_v24, %v4216_v43  ;;  %v8837_v2 = vld [vmem:[%s17979_s1 + $0x30] sm:$0xff] }
 0x45e   : > { %v4104_v11 = vmul.f32 %v12607_v53, %v3818_v49  ;;  %v16453_v7 = vpop.f32.mrb[185].mxu0  ;;  %v12609_v16 = vpop.eup %12608  ;;  %v8838_v49 = vld [vmem:[%s17979_s1 + $0x38] sm:$0xff] }
 0x45f   : > { %v4215_v44 = vsub.f32 2.0, %v4087_v62  ;;  %v12611_v50 = vpop.eup %12610  ;;  %v4090_v40 = vmul.f32 %v12609_v16, %v3790_v55  ;;  %v3796_v57 = vpop.xlane.xlu0 %3795  ;;  %v12158_v39 = vpack.c.bf16 %v8838_v49, %v8837_v2 }
 0x460   : > { %v4232_v1 = vsub.f32 2.0, %v4104_v11  ;;  %v16455_v14 = vpop.xlane.xlu1 %3801  ;;  %v4106_v3 = vmul.f32 %v12611_v50, %v3822_v45  ;;  %12620 = vrcp.f32 %v3796_v57  ;;  %v4472_v45 = vmul.f32 %v15996_v63, %v4344_v21 }
 0x461   : > { %v4343_v51 = vmul.f32 %v12605_v60, %v4215_v44  ;;  %12622 = vrcp.f32 %v16455_v14  ;;  %v4218_v55 = vsub.f32 2.0, %v4090_v40 }
 0x462   : > { %v4360_v62 = vmul.f32 %v12607_v53, %v4232_v1  ;;  %v12613_v24 = vpop.eup %12612  ;;  %v4234_v43 = vsub.f32 2.0, %v4106_v3  ;;  %v4489_v1 = vmul.f32 %v15981_v54, %v4361_v59  ;;  %v18988_v59 = vld [vmem:[#allocation33_spill] sm:$0xff] }
 0x463   : > { %v4471_v11 = vmul.f32 %v16010_v32, %v4343_v51  ;;  %v12615_v8 = vpop.eup %12614  ;;  %v4089_v6 = vmul.f32 %v12613_v24, %v3788_v61  ;;  %v3800_v44 = vpop.xlane.xlu0 %3799  ;;  %v4346_v32 = vmul.f32 %v12609_v16, %v4218_v55  ;;  %v18989_v16 = vld [vmem:[#allocation70_spill] sm:$0xff] }
 0x464   : > { %v4488_v60 = vmul.f32 %v16008_v20, %v4360_v62  ;;  %v16467_v26 = vpop.xlane.xlu1 %3805  ;;  %v4362_v19 = vmul.f32 %v12611_v50, %v4234_v43  ;;  %v4092_v25 = vmul.f32 %v12615_v8, %v3794_v37  ;;  %12624 = vrcp.f32 %v3800_v44  ;;  %v16469_v53 = vpop.f32.mrb[186].mxu0 }
 0x465   : > { %10970 = vmatprep.mubr.f32.mxu0 %v4471_v11  ;;  %v4217_v40 = vsub.f32 2.0, %v4089_v6  ;;  %12626 = vrcp.f32 %v16467_v26  ;;  %v16473_v63 = vpop.f32.mrb[187].mxu0  ;;  %v4474_v62 = vmul.f32 %v18989_v16, %v4346_v32 }
 0x466   : > { %11027 = vmatmul.mubr.f32.vlgmr.msra.gmra.mrb[128].mxu1 %v4488_v60  ;;  %10971 = vmatmul.mubr.f32.vlgmr.msra.gmra.mrb[208].mxu0 %v4472_v45  ;;  %v12617_v20 = vpop.eup %12616  ;;  %v4220_v51 = vsub.f32 2.0, %v4092_v25  ;;  %v4490_v61 = vmul.f32 %v16020_v35, %v4362_v19 }
 0x467   : > { %11029 = vmatprep.mubr.f32.mxu1 %v4489_v1  ;;  %12125 = vmatpush3.bf16.msra.mxu0 %v18970_v13  ;;  %v12619_v37 = vpop.eup %12618  ;;  %v4345_v50 = vmul.f32 %v12613_v24, %v4217_v40  ;;  %v4091_v21 = vmul.f32 %v12617_v20, %v3792_v34  ;;  %v3804_v3 = vpop.xlane.xlu0 %3803 }
 0x468   : > { %v3810_v54 = vpop.xlane.xlu1 %3809  ;;  %12127 = vmatprep.subr.bf16.mxu0 %v18988_v59  ;;  %12157 = vmatpush3.bf16.msra.mxu1 %v16384_v56  ;;  %v4094_v2 = vmul.f32 %v12619_v37, %v3798_v30  ;;  %12628 = vrcp.f32 %v3804_v3  ;;  %v4348_v19 = vmul.f32 %v12615_v8, %v4220_v51  ;;  %v18990_v30 = vld [vmem:[#allocation34_spill] sm:$0xff]  ;;  %v18991_v51 = vld [vmem:[#allocation15_spill] sm:$0xff] }
 0x469   : > { %12159 = vmatprep.subr.bf16.mxu1 %v12158_v39  ;;  %v4219_v49 = vsub.f32 2.0, %v4091_v21  ;;  %12630 = vrcp.f32 %v3810_v54  ;;  %v4473_v25 = vmul.f32 %v16029_v38, %v4345_v50 }
 0x46a   : > { %11030 = vmatmul.mubr.f32.gmra.mrb[130].mxu1 %v4490_v61  ;;  %v12621_v35 = vpop.eup %12620  ;;  %v4222_v13 = vsub.f32 2.0, %v4094_v2 }
 0x46b   : > { %12129 = vmatpush3.bf16.msra.mxu0 %v18988_v59  ;;  %v12623_v34 = vpop.eup %12622  ;;  %v4347_v24 = vmul.f32 %v12617_v20, %v4219_v49  ;;  %v4093_v55 = vmul.f32 %v12621_v35, %v3796_v57  ;;  %v3808_v43 = vpop.xlane.xlu0 %3807  ;;  %10973 = vmatprep.mubr.f32.mxu0 %v4473_v25  ;;  %v4476_v57 = vmul.f32 %v16031_v17, %v4348_v19  ;;  %v18993_v17 = vld [vmem:[#allocation17_spill] sm:$0xff] }
 0x46c   : > { %v16482_v56 = vpop.f32.mrb[188].mxu0  ;;  %12131 = vmatprep.subr.bf16.mxu0 %v18990_v30  ;;  %v4096_v11 = vmul.f32 %v12623_v34, %v16455_v14  ;;  %12632 = vrcp.f32 %v3808_v43  ;;  %10974 = vmatmul.mubr.f32.gmra.mrb[210].mxu0 %v4474_v62  ;;  %v4350_v6 = vmul.f32 %v12619_v37, %v4222_v13  ;;  %v18994_v13 = vld [vmem:[#allocation35_spill] sm:$0xff] }
 0x46d   : > { %v16486_v38 = vpop.f32.mrb[189].mxu0  ;;  %12161 = vmatpush3.bf16.msra.mxu1 %v12158_v39  ;;  %v4221_v8 = vsub.f32 2.0, %v4093_v55  ;;  %v4475_v45 = vmul.f32 %v16036_v29, %v4347_v24  ;;  %v18992_v29 = vld [vmem:[#allocation72_spill] sm:$0xff]  ;;  %v18995_v24 = vld [vmem:[#allocation130_spill] sm:$0xff] }
 0x46e   : > { %v12625_v60 = vpop.eup %12624  ;;  %v4224_v1 = vsub.f32 2.0, %v4096_v11  ;;  %v4478_v2 = vmul.f32 %v18993_v17, %v4350_v6 }
 0x46f   : > { %12133 = vmatpush3.bf16.msra.mxu0 %v18990_v30  ;;  %v12627_v40 = vpop.eup %12626  ;;  %v4349_v20 = vmul.f32 %v12621_v35, %v4221_v8  ;;  %v4095_v32 = vmul.f32 %v12625_v60, %v3800_v44  ;;  %10976 = vmatprep.mubr.f32.mxu0 %v4475_v45  ;;  %v3814_v14 = vpop.xlane.xlu1 %3813 }
 0x470   : > { %12135 = vmatprep.subr.bf16.mxu0 %v18991_v51  ;;  %v4098_v61 = vmul.f32 %v12627_v40, %v16467_v26  ;;  %12634 = vrcp.f32 %v3814_v14  ;;  %10977 = vmatmul.mubr.f32.gmra.mrb[212].mxu0 %v4476_v57  ;;  %v4352_v21 = vmul.f32 %v12623_v34, %v4224_v1  ;;  %v18997_v57 = vld [vmem:[#allocation36_spill] sm:$0xff] }
 0x471   : > { %v4223_v39 = vsub.f32 2.0, %v4095_v32  ;;  %v4477_v50 = vmul.f32 %v18992_v29, %v4349_v20 }
 0x472   : > { %v12629_v37 = vpop.eup %12628  ;;  %v4226_v59 = vsub.f32 2.0, %v4098_v61  ;;  %v18998_v61 = vld [vmem:[#allocation59_spill] sm:$0xff] }
 0x473   : > { %12137 = vmatpush3.bf16.msra.mxu0 %v18991_v51  ;;  %v12631_v49 = vpop.eup %12630  ;;  %v4351_v44 = vmul.f32 %v12625_v60, %v4223_v39  ;;  %v4097_v25 = vmul.f32 %v12629_v37, %v3804_v3  ;;  %v3812_v35 = vpop.xlane.xlu0 %3811  ;;  %10979 = vmatprep.mubr.f32.mxu0 %v4477_v50  ;;  %v18996_v3 = vld [vmem:[#allocation126_spill] sm:$0xff] }
 0x474   : > { %v3826_v19 = vpop.xlane.xlu1 %3825  ;;  %12139 = vmatprep.subr.bf16.mxu0 %v18994_v13  ;;  %v4100_v26 = vmul.f32 %v12631_v49, %v3810_v54  ;;  %12636 = vrcp.f32 %v3812_v35  ;;  %v16497_v16 = vpop.f32.mrb[190].mxu0  ;;  %10980 = vmatmul.mubr.f32.gmra.mrb[214].mxu0 %v4478_v2  ;;  %v4354_v11 = vmul.f32 %v12627_v40, %v4226_v59  ;;  %v4480_v45 = vmul.f32 %v18996_v3, %v4352_v21  ;;  %v18999_v21 = vld [vmem:[#allocation37_spill] sm:$0xff] }
 0x475   : > { %v4225_v62 = vsub.f32 2.0, %v4097_v25  ;;  %12638 = vrcp.f32 %v3826_v19  ;;  %v16499_v34 = vpop.f32.mrb[191].mxu0  ;;  %v4479_v55 = vmul.f32 %v18995_v24, %v4351_v44  ;;  %v19000_v44 = vld [vmem:[#allocation123_spill] sm:$0xff]  ;;  %v19001_v24 = vld [vmem:[#allocation41_spill] sm:$0xff] }
 0x476   : > { %v12633_v30 = vpop.eup %12632  ;;  %v4228_v8 = vsub.f32 2.0, %v4100_v26  ;;  %v4482_v39 = vmul.f32 %v18998_v61, %v4354_v11 }
 0x477   : > { %12141 = vmatpush3.bf16.msra.mxu0 %v18994_v13  ;;  %v4353_v60 = vmul.f32 %v12629_v37, %v4225_v62  ;;  %v4099_v6 = vmul.f32 %v12633_v30, %v3808_v43  ;;  %v3824_v54 = vpop.xlane.xlu0 %3823  ;;  %10982 = vmatprep.mubr.f32.mxu0 %v4479_v55 }
 0x478   : > { %v3830_v1 = vpop.xlane.xlu1 %3829  ;;  %12143 = vmatprep.subr.bf16.mxu0 %v18997_v57  ;;  %12640 = vrcp.f32 %v3824_v54  ;;  %10983 = vmatmul.mubr.f32.gmra.mrb[216].mxu0 %v4480_v45  ;;  %v4356_v40 = vmul.f32 %v12631_v49, %v4228_v8 }
 0x479   : > { %v4227_v20 = vsub.f32 2.0, %v4099_v6  ;;  %12642 = vrcp.f32 %v3830_v1  ;;  %v4481_v32 = vmul.f32 %v16069_v28, %v4353_v60 }
 0x47a   : > { %v12635_v51 = vpop.eup %12634  ;;  %v4484_v25 = vmul.f32 %v19000_v44, %v4356_v40 }
 0x47b   : > { %12145 = vmatpush3.bf16.msra.mxu0 %v18997_v57  ;;  %v4355_v29 = vmul.f32 %v12633_v30, %v4227_v20  ;;  %v4102_v50 = vmul.f32 %v12635_v51, %v3814_v14  ;;  %v3828_v43 = vpop.xlane.xlu0 %3827  ;;  %10985 = vmatprep.mubr.f32.mxu0 %v4481_v32  ;;  %v16509_v59 = vpop.f32.mrb[96].mxu1 }
 0x47c   : > { %v3834_v37 = vpop.xlane.xlu1 %3833  ;;  %12147 = vmatprep.subr.bf16.mxu0 %v18999_v21  ;;  %12644 = vrcp.f32 %v3828_v43  ;;  %10986 = vmatmul.mubr.f32.gmra.mrb[218].mxu0 %v4482_v39  ;;  %v16511_v17 = vpop.f32.mrb[97].mxu1 }
 0x47d   : > { %12646 = vrcp.f32 %v3834_v37  ;;  %v4483_v28 = vmul.f32 %v16089_v5, %v4355_v29  ;;  %v4230_v49 = vsub.f32 2.0, %v4102_v50 }
 0x47e   : > { %v12637_v2 = vpop.eup %12636 }
 0x47f   : > { %12149 = vmatpush3.bf16.msra.mxu0 %v18999_v21  ;;  %v12639_v14 = vpop.eup %12638  ;;  %v4101_v13 = vmul.f32 %v12637_v2, %v3812_v35  ;;  %v3832_v26 = vpop.xlane.xlu0 %3831  ;;  %10988 = vmatprep.mubr.f32.mxu0 %v4483_v28  ;;  %v4358_v5 = vmul.f32 %v12635_v51, %v4230_v49 }
 0x480   : > { %v3838_v62 = vpop.xlane.xlu1 %3837  ;;  %12151 = vmatprep.subr.bf16.mxu0 %v19001_v24  ;;  %v4108_v55 = vmul.f32 %v12639_v14, %v3826_v19  ;;  %12648 = vrcp.f32 %v3832_v26  ;;  %10989 = vmatmul.mubr.f32.gmra.mrb[220].mxu0 %v4484_v25 }
 0x481   : > { %v4229_v30 = vsub.f32 2.0, %v4101_v13  ;;  %12650 = vrcp.f32 %v3838_v62  ;;  %v4486_v39 = vmul.f32 %v16106_v31, %v4358_v5 }
 0x482   : > { %v12641_v11 = vpop.eup %12640  ;;  %v4236_v8 = vsub.f32 2.0, %v4108_v55 }
 0x483   : > { %12153 = vmatpush3.bf16.msra.mxu0 %v19001_v24  ;;  %v12643_v3 = vpop.eup %12642  ;;  %v4357_v45 = vmul.f32 %v12637_v2, %v4229_v30  ;;  %v4107_v60 = vmul.f32 %v12641_v11, %v3824_v54  ;;  %v3836_v6 = vpop.xlane.xlu0 %3835 }
 0x484   : > { %v3842_v35 = vpop.xlane.xlu1 %3841  ;;  %v4110_v57 = vmul.f32 %v12643_v3, %v3830_v1  ;;  %12652 = vrcp.f32 %v3836_v6  ;;  %v4364_v40 = vmul.f32 %v12639_v14, %v4236_v8 }
 0x485   : > { %v4235_v20 = vsub.f32 2.0, %v4107_v60  ;;  %12654 = vrcp.f32 %v3842_v35  ;;  %v4485_v19 = vmul.f32 %v16117_v42, %v4357_v45 }
 0x486   : > { %v12645_v32 = vpop.eup %12644  ;;  %v4238_v61 = vsub.f32 2.0, %v4110_v57  ;;  %v4492_v14 = vmul.f32 %v16113_v33, %v4364_v40  ;;  %v19003_v40 = vld [vmem:[#allocation125_spill] sm:$0xff] }
 0x487   : > { %v12647_v51 = vpop.eup %12646  ;;  %v4363_v29 = vmul.f32 %v12641_v11, %v4235_v20  ;;  %v4109_v50 = vmul.f32 %v12645_v32, %v3828_v43  ;;  %v3840_v21 = vpop.xlane.xlu0 %3839  ;;  %10991 = vmatprep.mubr.f32.mxu0 %v4485_v19 }
 0x488   : > { %v3846_v28 = vpop.xlane.xlu1 %3845  ;;  %v4112_v54 = vmul.f32 %v12647_v51, %v3834_v37  ;;  %12656 = vrcp.f32 %v3840_v21  ;;  %v16520_v2 = vpop.f32.mrb[98].mxu1  ;;  %10992 = vmatmul.mubr.f32.gmra.mrb[222].mxu0 %v4486_v39  ;;  %v4366_v25 = vmul.f32 %v12643_v3, %v4238_v61  ;;  %v19002_v3 = vld [vmem:[#allocation127_spill] sm:$0xff] }
 0x489   : > { %v4237_v1 = vsub.f32 2.0, %v4109_v50  ;;  %12658 = vrcp.f32 %v3846_v28  ;;  %v16522_v49 = vpop.f32.mrb[99].mxu1  ;;  %v4491_v42 = vmul.f32 %v16123_v46, %v4363_v29 }
 0x48a   : > { %v12649_v44 = vpop.eup %12648  ;;  %v4240_v31 = vsub.f32 2.0, %v4112_v54  ;;  %v4494_v60 = vmul.f32 %v19002_v3, %v4366_v25 }
 0x48b   : > { %v12651_v43 = vpop.eup %12650  ;;  %v4365_v13 = vmul.f32 %v12645_v32, %v4237_v1  ;;  %v4111_v24 = vmul.f32 %v12649_v44, %v3832_v26  ;;  %v3844_v55 = vpop.xlane.xlu0 %3843  ;;  %11032 = vmatprep.mubr.f32.mxu1 %v4491_v42 }
 0x48c   : > { %v3850_v37 = vpop.xlane.xlu1 %3849  ;;  %v4114_v30 = vmul.f32 %v12651_v43, %v3838_v62  ;;  %12660 = vrcp.f32 %v3844_v55  ;;  %11033 = vmatmul.mubr.f32.gmra.mrb[132].mxu1 %v4492_v14  ;;  %v4368_v46 = vmul.f32 %v12647_v51, %v4240_v31  ;;  %v19004_v51 = vld [vmem:[#allocation77_spill] sm:$0xff] }
 0x48d   : > { %v4239_v11 = vsub.f32 2.0, %v4111_v24  ;;  %12662 = vrcp.f32 %v3850_v37  ;;  %v4493_v5 = vmul.f32 %v16128_v18, %v4365_v13  ;;  %v19005_v13 = vld [vmem:[#allocation22_spill] sm:$0xff] }
 0x48e   : > { %v12653_v8 = vpop.eup %12652  ;;  %v4242_v45 = vsub.f32 2.0, %v4114_v30  ;;  %v4496_v50 = vmul.f32 %v19004_v51, %v4368_v46 }
 0x48f   : > { %v12655_v57 = vpop.eup %12654  ;;  %v4367_v33 = vmul.f32 %v12649_v44, %v4239_v11  ;;  %v4113_v20 = vmul.f32 %v12653_v8, %v3836_v6  ;;  %v3848_v19 = vpop.xlane.xlu0 %3847  ;;  %11035 = vmatprep.mubr.f32.mxu1 %v4493_v5  ;;  %v19006_v5 = vld [vmem:[#allocation79_spill] sm:$0xff] }
 0x490   : > { %v3854_v26 = vpop.xlane.xlu1 %3853  ;;  %v4116_v32 = vmul.f32 %v12655_v57, %v3842_v35  ;;  %12664 = vrcp.f32 %v3848_v19  ;;  %11036 = vmatmul.mubr.f32.gmra.mrb[134].mxu1 %v4494_v60  ;;  %v4370_v18 = vmul.f32 %v12651_v43, %v4242_v45 }
 0x491   : > { %v4241_v62 = vsub.f32 2.0, %v4113_v20  ;;  %12666 = vrcp.f32 %v3854_v26  ;;  %v4495_v61 = vmul.f32 %v19003_v40, %v4367_v33  ;;  %v19007_v20 = vld [vmem:[#allocation38_spill] sm:$0xff] }
 0x492   : > { %v12657_v39 = vpop.eup %12656  ;;  %v4244_v29 = vsub.f32 2.0, %v4116_v32 }
 0x493   : > { %v12659_v54 = vpop.eup %12658  ;;  %v4369_v1 = vmul.f32 %v12653_v8, %v4241_v62  ;;  %v4115_v42 = vmul.f32 %v12657_v39, %v3840_v21  ;;  %v3852_v44 = vpop.xlane.xlu0 %3851  ;;  %11038 = vmatprep.mubr.f32.mxu1 %v4495_v61  ;;  %v4498_v8 = vmul.f32 %v19006_v5, %v4370_v18 }
 0x494   : > { %v3858_v6 = vpop.xlane.xlu1 %3857  ;;  %v4118_v25 = vmul.f32 %v12659_v54, %v3846_v28  ;;  %12668 = vrcp.f32 %v3852_v44  ;;  %v16530_v35 = vpop.f32.mrb[100].mxu1  ;;  %11039 = vmatmul.mubr.f32.gmra.mrb[136].mxu1 %v4496_v50  ;;  %v4372_v30 = vmul.f32 %v12655_v57, %v4244_v29  ;;  %v19008_v57 = vld [vmem:[#allocation95_spill] sm:$0xff] }
 0x495   : > { %v4243_v31 = vsub.f32 2.0, %v4115_v42  ;;  %12670 = vrcp.f32 %v3858_v6  ;;  %v16532_v14 = vpop.f32.mrb[101].mxu1  ;;  %v4497_v43 = vmul.f32 %v19005_v13, %v4369_v1  ;;  %v19009_v1 = vld [vmem:[#allocation129_spill] sm:$0xff] }
 0x496   : > { %v12661_v24 = vpop.eup %12660  ;;  %v4246_v11 = vsub.f32 2.0, %v4118_v25  ;;  %v4500_v29 = vmul.f32 %v19008_v57, %v4372_v30 }
 0x497   : > { %v12663_v21 = vpop.eup %12662  ;;  %v4371_v46 = vmul.f32 %v12657_v39, %v4243_v31  ;;  %v4117_v45 = vmul.f32 %v12661_v24, %v3844_v55  ;;  %v3856_v3 = vpop.xlane.xlu0 %3855  ;;  %11041 = vmatprep.mubr.f32.mxu1 %v4497_v43  ;;  %v19010_v43 = vld [vmem:[#allocation134_spill] sm:$0xff] }
 0x498   : > { %v3862_v28 = vpop.xlane.xlu1 %3861  ;;  %v4120_v60 = vmul.f32 %v12663_v21, %v3850_v37  ;;  %12672 = vrcp.f32 %v3856_v3  ;;  %11042 = vmatmul.mubr.f32.gmra.mrb[138].mxu1 %v4498_v8  ;;  %v4374_v40 = vmul.f32 %v12659_v54, %v4246_v11 }
 0x499   : > { %v4245_v33 = vsub.f32 2.0, %v4117_v45  ;;  %12674 = vrcp.f32 %v3862_v28  ;;  %v4499_v32 = vmul.f32 %v19007_v20, %v4371_v46 }
 0x49a   : > { %v12665_v62 = vpop.eup %12664  ;;  %v4248_v61 = vsub.f32 2.0, %v4120_v60  ;;  %v4502_v5 = vmul.f32 %v19010_v43, %v4374_v40  ;;  %v19013_v60 = vld [vmem:[#allocation99_spill] sm:$0xff]  ;;  %v19019_v43 = vld [vmem:[#allocation137_spill] sm:$0xff] }
 0x49b   : > { %v12667_v51 = vpop.eup %12666  ;;  %v4373_v18 = vmul.f32 %v12661_v24, %v4245_v33  ;;  %v4119_v50 = vmul.f32 %v12665_v62, %v3848_v19  ;;  %11044 = vmatprep.mubr.f32.mxu1 %v4499_v32  ;;  %v19011_v24 = vld [vmem:[#allocation20_spill] sm:$0xff] }
 0x49c   : > { %v3860_v39 = vpop.xlane.xlu0 %3859  ;;  %v4122_v55 = vmul.f32 %v12667_v51, %v3854_v26  ;;  %11045 = vmatmul.mubr.f32.gmra.mrb[140].mxu1 %v4500_v29  ;;  %v4376_v31 = vmul.f32 %v12663_v21, %v4248_v61  ;;  %v19012_v26 = vld [vmem:[#allocation92_spill] sm:$0xff] }
 0x49d   : > { %12676 = vrcp.f32 %v3860_v39  ;;  %v4247_v37 = vsub.f32 2.0, %v4119_v50  ;;  %v4501_v42 = vmul.f32 %v19009_v1, %v4373_v18  ;;  %v19015_v18 = vld [vmem:[#allocation21_spill] sm:$0xff]  ;;  %v19016_v50 = vld [vmem:[#allocation90_spill] sm:$0xff] }
 0x49e   : > { %v12669_v25 = vpop.eup %12668  ;;  %v4250_v13 = vsub.f32 2.0, %v4122_v55  ;;  %v4504_v33 = vmul.f32 %v19013_v60, %v4376_v31  ;;  %v19025_v60 = vld [vmem:[#allocation138_spill] sm:$0xff] }
 0x49f   : > { %v12671_v54 = vpop.eup %12670  ;;  %v4375_v11 = vmul.f32 %v12665_v62, %v4247_v37  ;;  %v4121_v8 = vmul.f32 %v12669_v25, %v3852_v44  ;;  %11047 = vmatprep.mubr.f32.mxu1 %v4501_v42 }
 0x4a0   : > { %v4124_v30 = vmul.f32 %v12671_v54, %v3858_v6  ;;  %11048 = vmatmul.mubr.f32.gmra.mrb[142].mxu1 %v4502_v5  ;;  %v4378_v20 = vmul.f32 %v12667_v51, %v4250_v13  ;;  %v19014_v6 = vld [vmem:[#allocation121_spill] sm:$0xff] }
 0x4a1   : > { %v4249_v19 = vsub.f32 2.0, %v4121_v8  ;;  %11114 = vmatprep.mubr.msk.f32.mxu1 %vm333_vm0, %v19011_v24  ;;  %v4503_v46 = vmul.f32 %v19012_v26, %v4375_v11  ;;  %v19020_v8 = vld [vmem:[#allocation105_spill] sm:$0xff] }
 0x4a2   : > { %v12673_v45 = vpop.eup %12672  ;;  %v4252_v21 = vsub.f32 2.0, %v4124_v30 }
 0x4a3   : > { %v12675_v32 = vpop.eup %12674  ;;  %v4377_v61 = vmul.f32 %v12669_v25, %v4249_v19  ;;  %v4123_v40 = vmul.f32 %v12673_v45, %v3856_v3  ;;  %11082 = vmatprep.mubr.f32.mxu0 %v4503_v46  ;;  %v16544_v62 = vpop.f32.mrb[102].mxu1  ;;  %v19017_v3 = vld [vmem:[#allocation55_spill] sm:$0xff]  ;;  %v19023_v46 = vld [vmem:[#allocation132_spill] sm:$0xff] }
 0x4a4   : > { %v4126_v44 = vmul.f32 %v12675_v32, %v3862_v28  ;;  %11083 = vmatmul.mubr.f32.vlgmr.msra.gmra.mrb[224].mxu0 %v4504_v33  ;;  %11115 = vmatmul.mubr.msk.f32.vlgmr.msra.gmra.mrb[144].mxu1 %vm333_vm0, %v19014_v6  ;;  %v16548_v57 = vpop.f32.mrb[103].mxu1  ;;  %v4380_v37 = vmul.f32 %v12671_v54, %v4252_v21  ;;  %v4506_v42 = vmul.f32 %v19017_v3, %v4378_v20  ;;  %v19018_v28 = vld [vmem:[#allocation131_spill] sm:$0xff]  ;;  %v19029_v21 = vld [vmem:[#allocation50_spill] sm:$0xff] }
 0x4a5   : > { %v4251_v29 = vsub.f32 2.0, %v4123_v40  ;;  %11117 = vmatprep.mubr.msk.f32.mxu1 %vm333_vm0, %v19015_v18  ;;  %v4505_v51 = vmul.f32 %v19016_v50, %v4377_v61  ;;  %v19021_v19 = vld [vmem:[#allocation135_spill] sm:$0xff] }
 0x4a6   : > { %v4254_v1 = vsub.f32 2.0, %v4126_v44  ;;  %v4508_v30 = vmul.f32 %v19020_v8, %v4380_v37  ;;  %v19026_v20 = vld [vmem:[#allocation43_spill] sm:$0xff] }
 0x4a7   : > { %v12677_v55 = vpop.eup %12676  ;;  %v4379_v25 = vmul.f32 %v12673_v45, %v4251_v29  ;;  %11085 = vmatprep.mubr.f32.mxu0 %v4505_v51 }
 0x4a8   : > { %v4125_v31 = vmul.f32 %v12677_v55, %v3860_v39  ;;  %11086 = vmatmul.mubr.f32.gmra.mrb[226].mxu0 %v4506_v42  ;;  %11118 = vmatmul.mubr.msk.f32.gmra.mrb[146].mxu1 %vm333_vm0, %v19018_v28  ;;  %v4382_v11 = vmul.f32 %v12675_v32, %v4254_v1  ;;  %v19022_v39 = vld [vmem:[#allocation97_spill] sm:$0xff]  ;;  %v19030_v32 = vld [vmem:[#allocation103_spill] sm:$0xff] }
 0x4a9   : > { %11120 = vmatprep.mubr.msk.f32.mxu1 %vm333_vm0, %v19019_v43  ;;  %v4507_v5 = vmul.f32 %v16273_v52, %v4379_v25  ;;  %v19024_v52 = vld [vmem:[#allocation136_spill] sm:$0xff] }
 0x4aa   : > { %v4253_v13 = vsub.f32 2.0, %v4125_v31  ;;  %v4510_v26 = vmul.f32 %v16279_v0, %v4382_v11  ;;  %v19028_v0 = vld [vmem:[#allocation48_spill] sm:$0xff] }
 0x4ab   : > { %11088 = vmatprep.mubr.f32.mxu0 %v4507_v5 }
 0x4ac   : > { %v4381_v54 = vmul.f32 %v12677_v55, %v4253_v13  ;;  %11089 = vmatmul.mubr.f32.gmra.mrb[228].mxu0 %v4508_v30  ;;  %11121 = vmatmul.mubr.msk.f32.gmra.mrb[148].mxu1 %vm333_vm0, %v19021_v19  ;;  %v19032_v19 = vld [vmem:[#allocation100_spill] sm:$0xff] }
 0x4ad   : > { %11123 = vmatprep.mubr.msk.f32.mxu1 %vm333_vm0, %v19022_v39 }
 0x4ae   : > { %v4509_v24 = vmul.f32 %v16303_v58, %v4381_v54  ;;  %v19027_v58 = vld [vmem:[#allocation44_spill] sm:$0xff] }
 0x4b0   : > { %11091 = vmatprep.mubr.f32.mxu0 %v4509_v24  ;;  %11124 = vmatmul.mubr.msk.f32.gmra.mrb[150].mxu1 %vm333_vm0, %v19023_v46 }
 0x4b1   : > { %11092 = vmatmul.mubr.f32.gmra.mrb[230].mxu0 %v4510_v26  ;;  %11126 = vmatprep.mubr.msk.f32.mxu1 %vm333_vm0, %v19024_v52 }
 0x4b3   : > { %v16570_v45 = vpop.f32.mrb[104].mxu1 }
 0x4b4   : > { %11127 = vmatmul.mubr.msk.f32.gmra.mrb[152].mxu1 %vm333_vm0, %v19025_v60  ;;  %v16574_v33 = vpop.f32.mrb[105].mxu1 }
 0x4b5   : > { %11129 = vmatprep.mubr.msk.f32.mxu1 %vm333_vm0, %v19026_v20 }
 0x4b8   : > { %11130 = vmatmul.mubr.msk.f32.gmra.mrb[154].mxu1 %vm333_vm0, %v19027_v58  ;;  %v19033_v58 = vld [vmem:[#allocation66_spill] sm:$0xff] }
 0x4b9   : > { %11132 = vmatprep.mubr.msk.f32.mxu1 %vm333_vm0, %v19028_v0 }
 0x4bc   : > { %11133 = vmatmul.mubr.msk.f32.gmra.mrb[156].mxu1 %vm333_vm0, %v19029_v21 }
 0x4bd   : > { %11135 = vmatprep.mubr.msk.f32.mxu1 %vm333_vm0, %v16337_v23 }
 0x4c0   : > { %11136 = vmatmul.mubr.msk.f32.gmra.mrb[158].mxu1 %vm333_vm0, %v19030_v32 }
 0x4c1   : > { %11138 = vmatprep.mubr.msk.f32.mxu1 %vm333_vm0, %v16401_v10 }
 0x4c4   : > { %v16590_v61 = vpop.f32.mrb[106].mxu1  ;;  %11139 = vmatmul.mubr.msk.f32.gmra.mrb[160].mxu1 %vm333_vm0, %v16399_v9 }
 0x4c5   : > { %v16594_v40 = vpop.f32.mrb[107].mxu1  ;;  %11141 = vmatprep.mubr.msk.f32.mxu1 %vm333_vm0, %v16416_v12 }
 0x4c8   : > { %11142 = vmatmul.mubr.msk.f32.gmra.mrb[162].mxu1 %vm333_vm0, %v16414_v22 }
 0x4c9   : > { %11144 = vmatprep.mubr.msk.f32.mxu1 %vm333_vm0, %v16430_v41 }
 0x4cc   : > { %v3864_v23 = vpop.xlane.xlu0 %3863  ;;  %11145 = vmatmul.mubr.msk.f32.gmra.mrb[164].mxu1 %vm333_vm0, %v16428_v36 }
 0x4cd   : > { %12678 = vrcp.f32 %v3864_v23  ;;  %11147 = vmatprep.mubr.msk.f32.mxu1 %vm333_vm0, %v16442_v4 }
 0x4d0   : > { %11148 = vmatmul.mubr.msk.f32.gmra.mrb[166].mxu1 %vm333_vm0, %v16440_v15  ;;  %v3866_v9 = vpop.xlane.xlu1 %3865 }
 0x4d1   : > { %12680 = vrcp.f32 %v3866_v9  ;;  %11150 = vmatprep.mubr.msk.f32.mxu1 %vm333_vm0, %v16453_v7 }
 0x4d3   : > { %v16610_v10 = vpop.f32.mrb[108].mxu1 }
 0x4d4   : > { %v3868_v22 = vpop.xlane.xlu0 %3867  ;;  %11151 = vmatmul.mubr.msk.f32.gmra.mrb[168].mxu1 %vm333_vm0, %v16451_v48  ;;  %v16614_v12 = vpop.f32.mrb[109].mxu1 }
 0x4d5   : > { %12682 = vrcp.f32 %v3868_v22  ;;  %11153 = vmatprep.mubr.msk.f32.mxu1 %vm333_vm0, %v16473_v63 }
 0x4d7   : > { %v12679_v36 = vpop.eup %12678 }
 0x4d8   : > { %v4127_v41 = vmul.f32 %v12679_v36, %v3864_v23  ;;  %11154 = vmatmul.mubr.msk.f32.gmra.mrb[170].mxu1 %vm333_vm0, %v16469_v53  ;;  %v3870_v15 = vpop.xlane.xlu1 %3869 }
 0x4d9   : > { %12684 = vrcp.f32 %v3870_v15  ;;  %11156 = vmatprep.mubr.msk.f32.mxu1 %vm333_vm0, %v16486_v38 }
 0x4da   : > { %v4255_v4 = vsub.f32 2.0, %v4127_v41  ;;  %v8968_v41 = vld [vmem:[%s17979_s1 + $0x48] sm:$0xff] }
 0x4db   : > { %v12681_v7 = vpop.eup %12680  ;;  %v16622_v44 = vpop.f32.mrb[110].mxu1 }
 0x4dc   : > { %v4383_v48 = vmul.f32 %v12679_v36, %v4255_v4  ;;  %v4128_v6 = vmul.f32 %v12681_v7, %v3866_v9  ;;  %11157 = vmatmul.mubr.msk.f32.gmra.mrb[172].mxu1 %vm333_vm0, %v16482_v56  ;;  %v16626_v63 = vpop.f32.mrb[111].mxu1  ;;  %v19034_v4 = vld [vmem:[#allocation141_spill] sm:$0xff] }
 0x4dd   : > { %v3872_v29 = vpop.xlane.xlu0 %3871  ;;  %11159 = vmatprep.mubr.msk.f32.mxu1 %vm333_vm0, %v16499_v34 }
 0x4de   : > { %12686 = vrcp.f32 %v3872_v29  ;;  %v4256_v53 = vsub.f32 2.0, %v4128_v6  ;;  %v4511_v18 = vmul.f32 %v16404_v27, %v4383_v48 }
 0x4df   : > { %v12683_v38 = vpop.eup %12682  ;;  %v16631_v50 = vpop.f32.mrb[112].mxu1 }
 0x4e0   : > { %v4384_v51 = vmul.f32 %v12681_v7, %v4256_v53  ;;  %v4129_v55 = vmul.f32 %v12683_v38, %v3868_v22  ;;  %11094 = vmatprep.mubr.f32.mxu0 %v4511_v18  ;;  %11160 = vmatmul.mubr.msk.f32.gmra.mrb[174].mxu1 %vm333_vm0, %v16497_v16  ;;  %v16635_v56 = vpop.f32.mrb[113].mxu1 }
 0x4e1   : > { %v3874_v37 = vpop.xlane.xlu1 %3873  ;;  %11162 = vmatprep.mubr.msk.f32.mxu1 %vm333_vm0, %v16511_v17  ;;  %v19031_v17 = vld [vmem:[#allocation63_spill] sm:$0xff] }
 0x4e2   : > { %12688 = vrcp.f32 %v3874_v37  ;;  %v4257_v34 = vsub.f32 2.0, %v4129_v55  ;;  %v4512_v1 = vmul.f32 %v16409_v47, %v4384_v51  ;;  %v8969_v51 = vld [vmem:[%s17979_s1 + $0x50] sm:$0xff]  ;;  %v8970_v55 = vld [vmem:[%s17979_s1 + $0x58] sm:$0xff] }
 0x4e3   : > { %v12685_v27 = vpop.eup %12684  ;;  %v16642_v42 = vpop.f32.mrb[114].mxu1 }
 0x4e4   : > { %v16640_v3 = vpop.f32.mrb[192].mxu0  ;;  %v4385_v25 = vmul.f32 %v12683_v38, %v4257_v34  ;;  %v4130_v31 = vmul.f32 %v12685_v27, %v3870_v15  ;;  %11095 = vmatmul.mubr.f32.gmra.mrb[232].mxu0 %v4512_v1  ;;  %11163 = vmatmul.mubr.msk.f32.gmra.mrb[176].mxu1 %vm333_vm0, %v16509_v59  ;;  %v16648_v13 = vpop.f32.mrb[115].mxu1  ;;  %v19035_v34 = vld [vmem:[#allocation46_spill] sm:$0xff] }
 0x4e5   : > { %v3876_v28 = vpop.xlane.xlu0 %3875  ;;  %v16646_v16 = vpop.f32.mrb[193].mxu0  ;;  %11165 = vmatprep.mubr.msk.f32.mxu1 %vm333_vm0, %v16522_v49 }
 0x4e6   : > { %12690 = vrcp.f32 %v3876_v28  ;;  %v4258_v47 = vsub.f32 2.0, %v4130_v31  ;;  %v4513_v43 = vmul.f32 %v19031_v17, %v4385_v25  ;;  %v19036_v31 = vld [vmem:[#allocation102_spill] sm:$0xff] }
 0x4e7   : > { %v16653_v11 = vpop.f32.mrb[116].mxu1 }
 0x4e8   : > { %v12687_v5 = vpop.eup %12686  ;;  %v4386_v8 = vmul.f32 %v12685_v27, %v4258_v47  ;;  %11097 = vmatprep.mubr.f32.mxu0 %v4513_v43  ;;  %11166 = vmatmul.mubr.msk.f32.gmra.mrb[178].mxu1 %vm333_vm0, %v16520_v2  ;;  %v16657_v54 = vpop.f32.mrb[117].mxu1 }
 0x4e9   : > { %v4131_v30 = vmul.f32 %v12687_v5, %v3872_v29  ;;  %v3878_v59 = vpop.xlane.xlu1 %3877  ;;  %11168 = vmatprep.mubr.msk.f32.mxu1 %vm333_vm0, %v16532_v14 }
 0x4ea   : > { %12692 = vrcp.f32 %v3878_v59  ;;  %v4514_v39 = vmul.f32 %v19032_v19, %v4386_v8 }
 0x4eb   : > { %v4259_v49 = vsub.f32 2.0, %v4131_v30  ;;  %v16662_v26 = vpop.f32.mrb[118].mxu1 }
 0x4ec   : > { %v12689_v24 = vpop.eup %12688  ;;  %11098 = vmatmul.mubr.f32.gmra.mrb[234].mxu0 %v4514_v39  ;;  %11169 = vmatmul.mubr.msk.f32.gmra.mrb[180].mxu1 %vm333_vm0, %v16530_v35  ;;  %v16666_v2 = vpop.f32.mrb[119].mxu1 }
 0x4ed   : > { %v4387_v46 = vmul.f32 %v12687_v5, %v4259_v49  ;;  %v4132_v52 = vmul.f32 %v12689_v24, %v3874_v37  ;;  %v10863_v60 = vpop.f32.mrb[194].mxu0  ;;  %11171 = vmatprep.mubr.msk.f32.mxu1 %vm333_vm0, %v16548_v57  ;;  %v8967_v57 = vld [vmem:[%s17979_s1 + $0x40] sm:$0xff] }
 0x4ee   : > { %v5030_v20 = vpop.f32.mrb[195].mxu0  ;;  %v12162_v48 = vpack.c.bf16 %v8968_v41, %v8967_v57 }
 0x4ef   : > { %v4260_v14 = vsub.f32 2.0, %v4132_v52  ;;  %v4515_v0 = vmul.f32 %v19033_v58, %v4387_v46 }
 0x4f0   : > { %v12691_v21 = vpop.eup %12690  ;;  %v16671_v32 = vpop.f32.mrb[120].mxu1  ;;  %11172 = vmatmul.mubr.msk.f32.gmra.mrb[182].mxu1 %vm333_vm0, %v16544_v62  ;;  %12163 = vmatprep.subr.bf16.mxu0 %v12162_v48 }
 0x4f1   : > { %v4388_v23 = vmul.f32 %v12689_v24, %v4260_v14  ;;  %v4133_v9 = vmul.f32 %v12691_v21, %v3876_v28  ;;  %v10866_v22 = vpop.f32.mrb[196].mxu0  ;;  %11100 = vmatprep.mubr.f32.mxu0 %v4515_v0  ;;  %v16675_v35 = vpop.f32.mrb[121].mxu1  ;;  %11174 = vmatprep.mubr.msk.f32.mxu1 %vm333_vm0, %v16574_v33 }
 0x4f2   : > { %v5040_v36 = vpop.f32.mrb[197].mxu0  ;;  %12165 = vmatpush3.bf16.msra.mxu0 %v12162_v48  ;;  %12170 = vmatprep.subr.bf16.mxu1 %v12162_v48 }
 0x4f3   : > { %v4261_v15 = vsub.f32 2.0, %v4133_v9  ;;  %v4516_v7 = vmul.f32 %v19034_v4, %v4388_v23  ;;  %12172 = vmatpush3.bf16.msra.mxu1 %v12162_v48 }
 0x4f4   : > { %v12693_v6 = vpop.eup %12692  ;;  %v16686_v62 = vpop.f32.mrb[122].mxu1  ;;  %11175 = vmatmul.mubr.msk.f32.gmra.mrb[184].mxu1 %vm333_vm0, %v16570_v45  ;;  %v12166_v45 = vpack.c.bf16 %v8970_v55, %v8969_v51 }
 0x4f5   : > { %v4389_v29 = vmul.f32 %v12691_v21, %v4261_v15  ;;  %v4134_v53 = vmul.f32 %v12693_v6, %v3878_v59  ;;  %v10869_v18 = vpop.f32.mrb[198].mxu0  ;;  %11101 = vmatmul.mubr.f32.gmra.mrb[236].mxu0 %v4516_v7  ;;  %v16690_v33 = vpop.f32.mrb[123].mxu1  ;;  %11177 = vmatprep.mubr.msk.f32.mxu1 %vm333_vm0, %v16594_v40 }
 0x4f6   : > { %v5050_v38 = vpop.f32.mrb[199].mxu0  ;;  %12167 = vmatprep.subr.bf16.mxu0 %v12166_v45  ;;  %12171 = vmatprep.subr.bf16.mxu1 %v12166_v45 }
 0x4f7   : > { %v4262_v37 = vsub.f32 2.0, %v4134_v53  ;;  %v4517_v1 = vmul.f32 %v19035_v34, %v4389_v29  ;;  %12169 = vmatpush3.bf16.msra.mxu0 %v12166_v45  ;;  %12173 = vmatpush3.bf16.msra.mxu1 %v12166_v45 }
 0x4f8   : > { %11178 = vmatmul.mubr.msk.f32.gmra.mrb[186].mxu1 %vm333_vm0, %v16590_v61 }
 0x4f9   : > { %v4390_v27 = vmul.f32 %v12693_v6, %v4262_v37  ;;  %v10872_v25 = vpop.f32.mrb[200].mxu0  ;;  %11103 = vmatprep.mubr.f32.mxu0 %v4517_v1  ;;  %11180 = vmatprep.mubr.msk.f32.mxu1 %vm333_vm0, %v16614_v12 }
 0x4fa   : > { %v5060_v40 = vpop.f32.mrb[201].mxu0 }
 0x4fb   : > { %v4518_v28 = vmul.f32 %v19036_v31, %v4390_v27 }
 0x4fc   : > { %11181 = vmatmul.mubr.msk.f32.gmra.mrb[188].mxu1 %vm333_vm0, %v16610_v10 }
 0x4fd   : > { %11104 = vmatmul.mubr.f32.gmra.mrb[238].mxu0 %v4518_v28  ;;  %11183 = vmatprep.mubr.msk.f32.mxu1 %vm333_vm0, %v16626_v63 }
 0x500   : > { %v10875_v47 = vpop.f32.mrb[202].mxu0  ;;  %11184 = vmatmul.mubr.msk.f32.gmra.mrb[190].mxu1 %vm333_vm0, %v16622_v44 }
 0x501   : > { %v5070_v17 = vpop.f32.mrb[203].mxu0  ;;  %11186 = vmatprep.mubr.msk.f32.mxu1 %vm333_vm0, %v16646_v16 }
 0x504   : > { %11187 = vmatmul.mubr.msk.f32.gmra.mrb[192].mxu1 %vm333_vm0, %v16640_v3 }
 0x505   : > { %11189 = vmatprep.mubr.msk.f32.mxu1 %vm333_vm0, %v5030_v20 }
 0x508   : > { %11190 = vmatmul.mubr.msk.f32.gmra.mrb[194].mxu1 %vm333_vm0, %v10863_v60 }
 0x509   : > { %11192 = vmatprep.mubr.msk.f32.mxu1 %vm333_vm0, %v5040_v36 }
 0x50b   : > { %v10878_v61 = vpop.f32.mrb[204].mxu0 }
 0x50c   : > { %v5080_v10 = vpop.f32.mrb[205].mxu0  ;;  %11193 = vmatmul.mubr.msk.f32.gmra.mrb[196].mxu1 %vm333_vm0, %v10866_v22 }
 0x50d   : > { %11195 = vmatprep.mubr.msk.f32.mxu1 %vm333_vm0, %v5050_v38 }
 0x510   : > { %11196 = vmatmul.mubr.msk.f32.gmra.mrb[198].mxu1 %vm333_vm0, %v10869_v18 }
 0x511   : > { %11198 = vmatprep.mubr.msk.f32.mxu1 %vm333_vm0, %v5060_v40 }
 0x514   : > { %11199 = vmatmul.mubr.msk.f32.gmra.mrb[200].mxu1 %vm333_vm0, %v10872_v25 }
 0x515   : > { %11201 = vmatprep.mubr.msk.f32.mxu1 %vm333_vm0, %v5070_v17 }
 0x517   : > { %v10881_v12 = vpop.f32.mrb[206].mxu0 }
 0x518   : > { %v5090_v44 = vpop.f32.mrb[207].mxu0  ;;  %11202 = vmatmul.mubr.msk.f32.gmra.mrb[202].mxu1 %vm333_vm0, %v10875_v47 }
 0x519   : > { %11204 = vmatprep.mubr.msk.f32.mxu1 %vm333_vm0, %v5080_v10 }
 0x51c   : > { %11205 = vmatmul.mubr.msk.f32.gmra.mrb[204].mxu1 %vm333_vm0, %v10878_v61 }
 0x51d   : > { %11207 = vmatprep.mubr.msk.f32.mxu1 %vm333_vm0, %v5090_v44 }
 0x51f   : > { %v10934_v63 = vpop.f32.mrb[124].mxu1 }
 0x520   : > { %v5225_v3 = vpop.f32.mrb[125].mxu1  ;;  %11208 = vmatmul.mubr.msk.f32.gmra.mrb[206].mxu1 %vm333_vm0, %v10881_v12 }
 0x521   : > { %11210 = vmatprep.mubr.msk.f32.mxu1 %vm333_vm0, %v16635_v56 }
 0x524   : > { %11211 = vmatmul.mubr.msk.f32.gmra.mrb[208].mxu1 %vm333_vm0, %v16631_v50 }
 0x525   : > { %11213 = vmatprep.mubr.msk.f32.mxu1 %vm333_vm0, %v16648_v13 }
 0x527   : > { %v10937_v16 = vpop.f32.mrb[126].mxu1 }
 0x528   : > { %v5235_v43 = vpop.f32.mrb[127].mxu1  ;;  %11214 = vmatmul.mubr.msk.f32.gmra.mrb[210].mxu1 %vm333_vm0, %v16642_v42 }
 0x529   : > { %11216 = vmatprep.mubr.msk.f32.mxu1 %vm333_vm0, %v16657_v54 }
 0x52c   : > { %11217 = vmatmul.mubr.msk.f32.gmra.mrb[212].mxu1 %vm333_vm0, %v16653_v11 }
 0x52d   : > { %11219 = vmatprep.mubr.msk.f32.mxu1 %vm333_vm0, %v16666_v2 }
 0x530   : > { %11220 = vmatmul.mubr.msk.f32.gmra.mrb[214].mxu1 %vm333_vm0, %v16662_v26 }
 0x531   : > { %11222 = vmatprep.mubr.msk.f32.mxu1 %vm333_vm0, %v16675_v35 }
 0x534   : > { %11223 = vmatmul.mubr.msk.f32.gmra.mrb[216].mxu1 %vm333_vm0, %v16671_v32 }
 0x535   : > { %11225 = vmatprep.mubr.msk.f32.mxu1 %vm333_vm0, %v16690_v33 }
 0x538   : > { %11226 = vmatmul.mubr.msk.f32.gmra.mrb[218].mxu1 %vm333_vm0, %v16686_v62 }
 0x539   : > { %v11028_v50 = vpop.f32.mrb[128].mxu1  ;;  %v10972_v56 = vpop.f32.mrb[208].mxu0  ;;  %11228 = vmatprep.mubr.msk.f32.mxu1 %vm333_vm0, %v5225_v3 }
 0x53a   : > { %v5455_v42 = vpop.f32.mrb[129].mxu1  ;;  %v5310_v13 = vpop.f32.mrb[209].mxu0 }
 0x53c   : > { %11229 = vmatmul.mubr.msk.f32.gmra.mrb[220].mxu1 %vm333_vm0, %v10934_v63 }
 0x53d   : > { %v11031_v5 = vpop.f32.mrb[130].mxu1  ;;  %11231 = vmatprep.mubr.msk.f32.mxu1 %vm333_vm0, %v5235_v43 }
 0x53e   : > { %v5465_v11 = vpop.f32.mrb[131].mxu1 }
 0x53f   : > { %v10975_v8 = vpop.f32.mrb[210].mxu0 }
 0x540   : > { %v5320_v30 = vpop.f32.mrb[211].mxu0  ;;  %11232 = vmatmul.mubr.msk.f32.gmra.mrb[222].mxu1 %vm333_vm0, %v10937_v16 }
 0x541   : > { %11234 = vmatprep.mubr.msk.f32.mxu1 %vm333_vm0, %v5310_v13 }
 0x543   : > { %v10978_v59 = vpop.f32.mrb[212].mxu0 }
 0x544   : > { %v5330_v54 = vpop.f32.mrb[213].mxu0  ;;  %11235 = vmatmul.mubr.msk.f32.gmra.mrb[224].mxu1 %vm333_vm0, %v10972_v56 }
 0x545   : > { %11237 = vmatprep.mubr.msk.f32.mxu1 %vm333_vm0, %v5320_v30 }
 0x547   : > { %v10981_v49 = vpop.f32.mrb[214].mxu0 }
 0x548   : > { %v5340_v19 = vpop.f32.mrb[215].mxu0  ;;  %11238 = vmatmul.mubr.msk.f32.gmra.mrb[226].mxu1 %vm333_vm0, %v10975_v8 }
 0x549   : > { %11240 = vmatprep.mubr.msk.f32.mxu1 %vm333_vm0, %v5330_v54 }
 0x54b   : > { %v10984_v39 = vpop.f32.mrb[216].mxu0 }
 0x54c   : > { %v5350_v24 = vpop.f32.mrb[217].mxu0  ;;  %11241 = vmatmul.mubr.msk.f32.gmra.mrb[228].mxu1 %vm333_vm0, %v10978_v59 }
 0x54d   : > { %11243 = vmatprep.mubr.msk.f32.mxu1 %vm333_vm0, %v5340_v19 }
 0x54f   : > { %v10987_v26 = vpop.f32.mrb[218].mxu0 }
 0x550   : > { %v5360_v46 = vpop.f32.mrb[219].mxu0  ;;  %11244 = vmatmul.mubr.msk.f32.gmra.mrb[230].mxu1 %vm333_vm0, %v10981_v49 }
 0x551   : > { %11246 = vmatprep.mubr.msk.f32.mxu1 %vm333_vm0, %v5350_v24 }
 0x553   : > { %v10990_v52 = vpop.f32.mrb[220].mxu0 }
 0x554   : > { %v5370_v60 = vpop.f32.mrb[221].mxu0  ;;  %11247 = vmatmul.mubr.msk.f32.gmra.mrb[232].mxu1 %vm333_vm0, %v10984_v39 }
 0x555   : > { %11249 = vmatprep.mubr.msk.f32.mxu1 %vm333_vm0, %v5360_v46 }
 0x558   : > { %11250 = vmatmul.mubr.msk.f32.gmra.mrb[234].mxu1 %vm333_vm0, %v10987_v26 }
 0x559   : > { %11252 = vmatprep.mubr.msk.f32.mxu1 %vm333_vm0, %v5370_v60 }
 0x55b   : > { %v10993_v2 = vpop.f32.mrb[222].mxu0 }
 0x55c   : > { %v5380_v20 = vpop.f32.mrb[223].mxu0  ;;  %11253 = vmatmul.mubr.msk.f32.gmra.mrb[236].mxu1 %vm333_vm0, %v10990_v52 }
 0x55d   : > { %11255 = vmatprep.mubr.msk.f32.mxu1 %vm333_vm0, %v5380_v20 }
 0x55f   : > { %v11034_v14 = vpop.f32.mrb[132].mxu1 }
 0x560   : > { %v5475_v58 = vpop.f32.mrb[133].mxu1  ;;  %11256 = vmatmul.mubr.msk.f32.gmra.mrb[238].mxu1 %vm333_vm0, %v10993_v2 }
 0x561   : > { %11258 = vmatprep.mubr.msk.f32.mxu1 %vm333_vm0, %v5455_v42 }
 0x563   : > { %v11037_v0 = vpop.f32.mrb[134].mxu1 }
 0x564   : > { %v5485_v21 = vpop.f32.mrb[135].mxu1  ;;  %11259 = vmatmul.mubr.msk.f32.gmra.mrb[240].mxu1 %vm333_vm0, %v11028_v50 }
 0x565   : > { %11261 = vmatprep.mubr.msk.f32.mxu1 %vm333_vm0, %v5465_v11 }
 0x567   : > { %v11040_v32 = vpop.f32.mrb[136].mxu1 }
 0x568   : > { %v5495_v23 = vpop.f32.mrb[137].mxu1  ;;  %11262 = vmatmul.mubr.msk.f32.gmra.mrb[242].mxu1 %vm333_vm0, %v11031_v5 }
 0x569   : > { %11264 = vmatprep.mubr.msk.f32.mxu1 %vm333_vm0, %v5475_v58 }
 0x56b   : > { %v11043_v9 = vpop.f32.mrb[138].mxu1 }
 0x56c   : > { %v5505_v22 = vpop.f32.mrb[139].mxu1  ;;  %11265 = vmatmul.mubr.msk.f32.gmra.mrb[244].mxu1 %vm333_vm0, %v11034_v14 }
 0x56d   : > { %11267 = vmatprep.mubr.msk.f32.mxu1 %vm333_vm0, %v5485_v21 }
 0x56f   : > { %v11046_v35 = vpop.f32.mrb[140].mxu1 }
 0x570   : > { %v5515_v36 = vpop.f32.mrb[141].mxu1  ;;  %11268 = vmatmul.mubr.msk.f32.gmra.mrb[246].mxu1 %vm333_vm0, %v11037_v0 }
 0x571   : > { %11270 = vmatprep.mubr.msk.f32.mxu1 %vm333_vm0, %v5495_v23 }
 0x573   : > { %v11049_v57 = vpop.f32.mrb[142].mxu1 }
 0x574   : > { %v5525_v41 = vpop.f32.mrb[143].mxu1  ;;  %11271 = vmatmul.mubr.msk.f32.gmra.mrb[248].mxu1 %vm333_vm0, %v11040_v32 }
 0x575   : > { %11273 = vmatprep.mubr.msk.f32.mxu1 %vm333_vm0, %v5505_v22 }
 0x577   : > { %v11084_v15 = vpop.f32.mrb[224].mxu0  ;;  %v16785_v4 = vpop.f32.mrb[144].mxu1 }
 0x578   : > { %v5600_v7 = vpop.f32.mrb[225].mxu0  ;;  %v16787_v48 = vpop.f32.mrb[145].mxu1  ;;  %11274 = vmatmul.mubr.msk.f32.gmra.mrb[250].mxu1 %vm333_vm0, %v11043_v9 }
 0x579   : > { %11276 = vmatprep.mubr.msk.f32.mxu1 %vm333_vm0, %v5515_v36  ;;  %11314 = vmatprep.mubr.msk.f32.mxu0 %vm333_vm0, %v16787_v48 }
 0x57a   : > { %11315 = vmatmul.mubr.msk.f32.vlgmr.msra.gmra.mrb[240].mxu0 %vm333_vm0, %v16785_v4 }
 0x57b   : > { %v11087_v6 = vpop.f32.mrb[226].mxu0  ;;  %v16795_v62 = vpop.f32.mrb[146].mxu1 }
 0x57c   : > { %v5610_v29 = vpop.f32.mrb[227].mxu0  ;;  %v16797_v53 = vpop.f32.mrb[147].mxu1  ;;  %11277 = vmatmul.mubr.msk.f32.gmra.mrb[252].mxu1 %vm333_vm0, %v11046_v35 }
 0x57d   : > { %11279 = vmatprep.mubr.msk.f32.mxu1 %vm333_vm0, %v5525_v41  ;;  %11317 = vmatprep.mubr.msk.f32.mxu0 %vm333_vm0, %v16797_v53 }
 0x57e   : > { %11318 = vmatmul.mubr.msk.f32.gmra.mrb[242].mxu0 %vm333_vm0, %v16795_v62 }
 0x57f   : > { %v11090_v18 = vpop.f32.mrb[228].mxu0  ;;  %v16805_v33 = vpop.f32.mrb[148].mxu1 }
 0x580   : > { %v5620_v38 = vpop.f32.mrb[229].mxu0  ;;  %v16807_v51 = vpop.f32.mrb[149].mxu1  ;;  %11280 = vmatmul.mubr.msk.f32.gmra.mrb[254].mxu1 %vm333_vm0, %v11049_v57 }
 0x581   : > { %11282 = vmatprep.mubr.msk.f32.mxu1 %vm333_vm0, %v5600_v7  ;;  %11320 = vmatprep.mubr.msk.f32.mxu0 %vm333_vm0, %v16807_v51 }
 0x582   : > { %11321 = vmatmul.mubr.msk.f32.gmra.mrb[244].mxu0 %vm333_vm0, %v16805_v33 }
 0x583   : > { %v16815_v37 = vpop.f32.mrb[150].mxu1 }
 0x584   : > { %v11093_v55 = vpop.f32.mrb[230].mxu0  ;;  %v16817_v1 = vpop.f32.mrb[151].mxu1  ;;  %11283 = vmatmul.mubr.msk.f32.gmra.mrb[0].mxu1 %vm333_vm0, %v11084_v15 }
 0x585   : > { %v5630_v34 = vpop.f32.mrb[231].mxu0  ;;  %11285 = vmatprep.mubr.msk.f32.mxu1 %vm333_vm0, %v5610_v29  ;;  %11323 = vmatprep.mubr.msk.f32.mxu0 %vm333_vm0, %v16817_v1 }
 0x586   : > { %11324 = vmatmul.mubr.msk.f32.gmra.mrb[246].mxu0 %vm333_vm0, %v16815_v37 }
 0x587   : > { %v16825_v45 = vpop.f32.mrb[152].mxu1 }
 0x588   : > { %v16827_v27 = vpop.f32.mrb[153].mxu1  ;;  %11286 = vmatmul.mubr.msk.f32.gmra.mrb[2].mxu1 %vm333_vm0, %v11087_v6 }
 0x589   : > { %11288 = vmatprep.mubr.msk.f32.mxu1 %vm333_vm0, %v5620_v38  ;;  %11326 = vmatprep.mubr.msk.f32.mxu0 %vm333_vm0, %v16827_v27 }
 0x58a   : > { %11327 = vmatmul.mubr.msk.f32.gmra.mrb[248].mxu0 %vm333_vm0, %v16825_v45 }
 0x58b   : > { %v16835_v25 = vpop.f32.mrb[154].mxu1 }
 0x58c   : > { %v16837_v40 = vpop.f32.mrb[155].mxu1  ;;  %11289 = vmatmul.mubr.msk.f32.gmra.mrb[4].mxu1 %vm333_vm0, %v11090_v18 }
 0x58d   : > { %11291 = vmatprep.mubr.msk.f32.mxu1 %vm333_vm0, %v5630_v34  ;;  %11329 = vmatprep.mubr.msk.f32.mxu0 %vm333_vm0, %v16837_v40 }
 0x58e   : > { %11330 = vmatmul.mubr.msk.f32.gmra.mrb[250].mxu0 %vm333_vm0, %v16835_v25 }
 0x58f   : > { %v16845_v31 = vpop.f32.mrb[156].mxu1 }
 0x590   : > { %v16847_v28 = vpop.f32.mrb[157].mxu1  ;;  %11292 = vmatmul.mubr.msk.f32.gmra.mrb[6].mxu1 %vm333_vm0, %v11093_v55 }
 0x591   : > { %11332 = vmatprep.mubr.msk.f32.mxu0 %vm333_vm0, %v16847_v28 }
 0x592   : > { %11333 = vmatmul.mubr.msk.f32.gmra.mrb[252].mxu0 %vm333_vm0, %v16845_v31 }
 0x593   : > { %v16854_v47 = vpop.f32.mrb[158].mxu1 }
 0x594   : > { %v16856_v17 = vpop.f32.mrb[159].mxu1 }
 0x595   : > { %11335 = vmatprep.mubr.msk.f32.mxu0 %vm333_vm0, %v16856_v17 }
 0x596   : > { %11336 = vmatmul.mubr.msk.f32.gmra.mrb[254].mxu0 %vm333_vm0, %v16854_v47 }
 0x597   : > { %v16862_v61 = vpop.f32.mrb[160].mxu1 }
 0x598   : > { %v16864_v10 = vpop.f32.mrb[161].mxu1 }
 0x599   : > { %11338 = vmatprep.mubr.msk.f32.mxu0 %vm333_vm0, %v16864_v10 }
 0x59a   : > { %11339 = vmatmul.mubr.msk.f32.gmra.mrb[0].mxu0 %vm333_vm0, %v16862_v61 }
 0x59b   : > { %v16870_v12 = vpop.f32.mrb[162].mxu1 }
 0x59c   : > { %v16872_v44 = vpop.f32.mrb[163].mxu1 }
 0x59d   : > { %11341 = vmatprep.mubr.msk.f32.mxu0 %vm333_vm0, %v16872_v44 }
 0x59e   : > { %11342 = vmatmul.mubr.msk.f32.gmra.mrb[2].mxu0 %vm333_vm0, %v16870_v12 }
 0x59f   : > { %v16878_v63 = vpop.f32.mrb[164].mxu1 }
 0x5a0   : > { %v16880_v3 = vpop.f32.mrb[165].mxu1 }
 0x5a1   : > { %11344 = vmatprep.mubr.msk.f32.mxu0 %vm333_vm0, %v16880_v3 }
 0x5a2   : > { %11345 = vmatmul.mubr.msk.f32.gmra.mrb[4].mxu0 %vm333_vm0, %v16878_v63 }
 0x5a3   : > { %v16886_v16 = vpop.f32.mrb[166].mxu1 }
 0x5a4   : > { %v16888_v43 = vpop.f32.mrb[167].mxu1 }
 0x5a5   : > { %11347 = vmatprep.mubr.msk.f32.mxu0 %vm333_vm0, %v16888_v43 }
 0x5a6   : > { %11348 = vmatmul.mubr.msk.f32.gmra.mrb[6].mxu0 %vm333_vm0, %v16886_v16 }
 0x5a7   : > { %v16894_v50 = vpop.f32.mrb[168].mxu1 }
 0x5a8   : > { %v16896_v56 = vpop.f32.mrb[169].mxu1 }
 0x5a9   : > { %11350 = vmatprep.mubr.msk.f32.mxu0 %vm333_vm0, %v16896_v56 }
 0x5aa   : > { %11351 = vmatmul.mubr.msk.f32.gmra.mrb[8].mxu0 %vm333_vm0, %v16894_v50 }
 0x5ab   : > { %v16902_v42 = vpop.f32.mrb[170].mxu1 }
 0x5ac   : > { %v16904_v13 = vpop.f32.mrb[171].mxu1 }
 0x5ad   : > { %11353 = vmatprep.mubr.msk.f32.mxu0 %vm333_vm0, %v16904_v13 }
 0x5ae   : > { %11354 = vmatmul.mubr.msk.f32.gmra.mrb[10].mxu0 %vm333_vm0, %v16902_v42 }
 0x5af   : > { %v16910_v5 = vpop.f32.mrb[172].mxu1 }
 0x5b0   : > { %v16912_v11 = vpop.f32.mrb[173].mxu1 }
 0x5b1   : > { %11356 = vmatprep.mubr.msk.f32.mxu0 %vm333_vm0, %v16912_v11 }
 0x5b2   : > { %11357 = vmatmul.mubr.msk.f32.gmra.mrb[12].mxu0 %vm333_vm0, %v16910_v5 }
 0x5b3   : > { %v16918_v8 = vpop.f32.mrb[174].mxu1 }
 0x5b4   : > { %v16920_v30 = vpop.f32.mrb[175].mxu1 }
 0x5b5   : > { %11359 = vmatprep.mubr.msk.f32.mxu0 %vm333_vm0, %v16920_v30 }
 0x5b6   : > { %11360 = vmatmul.mubr.msk.f32.gmra.mrb[14].mxu0 %vm333_vm0, %v16918_v8 }
 0x5b7   : > { %v11096_v59 = vpop.f32.mrb[232].mxu0  ;;  %v16926_v54 = vpop.f32.mrb[176].mxu1 }
 0x5b8   : > { %v5640_v49 = vpop.f32.mrb[233].mxu0  ;;  %v16928_v19 = vpop.f32.mrb[177].mxu1 }
 0x5b9   : > { %11294 = vmatprep.mubr.msk.f32.mxu1 %vm333_vm0, %v5640_v49  ;;  %11362 = vmatprep.mubr.msk.f32.mxu0 %vm333_vm0, %v16928_v19 }
 0x5ba   : > { %11295 = vmatmul.mubr.msk.f32.gmra.mrb[8].mxu1 %vm333_vm0, %v11096_v59  ;;  %11363 = vmatmul.mubr.msk.f32.gmra.mrb[16].mxu0 %vm333_vm0, %v16926_v54 }
 0x5bb   : > { %v16936_v39 = vpop.f32.mrb[178].mxu1 }
 0x5bc   : > { %v16938_v24 = vpop.f32.mrb[179].mxu1 }
 0x5bd   : > { %11365 = vmatprep.mubr.msk.f32.mxu0 %vm333_vm0, %v16938_v24 }
 0x5be   : > { %11366 = vmatmul.mubr.msk.f32.gmra.mrb[18].mxu0 %vm333_vm0, %v16936_v39 }
 0x5bf   : > { %v11099_v26 = vpop.f32.mrb[234].mxu0  ;;  %v16944_v46 = vpop.f32.mrb[180].mxu1 }
 0x5c0   : > { %v5650_v52 = vpop.f32.mrb[235].mxu0  ;;  %v16946_v60 = vpop.f32.mrb[181].mxu1 }
 0x5c1   : > { %11297 = vmatprep.mubr.msk.f32.mxu1 %vm333_vm0, %v5650_v52  ;;  %11368 = vmatprep.mubr.msk.f32.mxu0 %vm333_vm0, %v16946_v60 }
 0x5c2   : > { %11298 = vmatmul.mubr.msk.f32.gmra.mrb[10].mxu1 %vm333_vm0, %v11099_v26  ;;  %11369 = vmatmul.mubr.msk.f32.gmra.mrb[20].mxu0 %vm333_vm0, %v16944_v46 }
 0x5c3   : > { %v16954_v2 = vpop.f32.mrb[182].mxu1 }
 0x5c4   : > { %v16956_v20 = vpop.f32.mrb[183].mxu1 }
 0x5c5   : > { %11371 = vmatprep.mubr.msk.f32.mxu0 %vm333_vm0, %v16956_v20 }
 0x5c6   : > { %11372 = vmatmul.mubr.msk.f32.gmra.mrb[22].mxu0 %vm333_vm0, %v16954_v2 }
 0x5c7   : > { %v16962_v58 = vpop.f32.mrb[184].mxu1 }
 0x5c8   : > { %v11102_v14 = vpop.f32.mrb[236].mxu0  ;;  %v16964_v21 = vpop.f32.mrb[185].mxu1 }
 0x5c9   : > { %v5660_v0 = vpop.f32.mrb[237].mxu0  ;;  %11374 = vmatprep.mubr.msk.f32.mxu0 %vm333_vm0, %v16964_v21 }
 0x5ca   : > { %11300 = vmatprep.mubr.msk.f32.mxu1 %vm333_vm0, %v5660_v0  ;;  %11375 = vmatmul.mubr.msk.f32.gmra.mrb[24].mxu0 %vm333_vm0, %v16962_v58 }
 0x5cb   : > { %11301 = vmatmul.mubr.msk.f32.gmra.mrb[12].mxu1 %vm333_vm0, %v11102_v14  ;;  %v16972_v32 = vpop.f32.mrb[186].mxu1 }
 0x5cc   : > { %v16974_v23 = vpop.f32.mrb[187].mxu1 }
 0x5cd   : > { %11377 = vmatprep.mubr.msk.f32.mxu0 %vm333_vm0, %v16974_v23 }
 0x5ce   : > { %11378 = vmatmul.mubr.msk.f32.gmra.mrb[26].mxu0 %vm333_vm0, %v16972_v32 }
 0x5cf   : > { %v16980_v22 = vpop.f32.mrb[188].mxu1 }
 0x5d0   : > { %v11105_v9 = vpop.f32.mrb[238].mxu0  ;;  %v16982_v36 = vpop.f32.mrb[189].mxu1 }
 0x5d1   : > { %v5670_v35 = vpop.f32.mrb[239].mxu0  ;;  %11380 = vmatprep.mubr.msk.f32.mxu0 %vm333_vm0, %v16982_v36 }
 0x5d2   : > { %11303 = vmatprep.mubr.msk.f32.mxu1 %vm333_vm0, %v5670_v35  ;;  %11381 = vmatmul.mubr.msk.f32.gmra.mrb[28].mxu0 %vm333_vm0, %v16980_v22 }
 0x5d3   : > { %11304 = vmatmul.mubr.msk.f32.gmra.mrb[14].mxu1 %vm333_vm0, %v11105_v9  ;;  %v16990_v57 = vpop.f32.mrb[190].mxu1 }
 0x5d4   : > { %v16992_v41 = vpop.f32.mrb[191].mxu1 }
 0x5d5   : > { %11383 = vmatprep.mubr.msk.f32.mxu0 %vm333_vm0, %v16992_v41 }
 0x5d6   : > { %11384 = vmatmul.mubr.msk.f32.gmra.mrb[30].mxu0 %vm333_vm0, %v16990_v57 }
 0x5d7   : > { %v16998_v15 = vpop.f32.mrb[192].mxu1 }
 0x5d8   : > { %v17000_v7 = vpop.f32.mrb[193].mxu1 }
 0x5d9   : > { %19037 = vst [vmem:[#allocation28_spill] sm:$0xff] %v17000_v7  ;;  %11386 = vmatprep.mubr.msk.f32.mxu0 %vm333_vm0, %v17000_v7 }
 0x5da   : > { %11387 = vmatmul.mubr.msk.f32.gmra.mrb[32].mxu0 %vm333_vm0, %v16998_v15 }
 0x5db   : > { %v17006_v6 = vpop.f32.mrb[194].mxu1 }
 0x5dc   : > { %19038 = vst [vmem:[#allocation5_spill] sm:$0xff] %v17006_v6  ;;  %v17008_v29 = vpop.f32.mrb[195].mxu1 }
 0x5dd   : > { %19039 = vst [vmem:[#allocation60_spill] sm:$0xff] %v17008_v29  ;;  %11389 = vmatprep.mubr.msk.f32.mxu0 %vm333_vm0, %v17008_v29 }
 0x5de   : > { %11390 = vmatmul.mubr.msk.f32.gmra.mrb[34].mxu0 %vm333_vm0, %v17006_v6 }
 0x5df   : > { %v17014_v18 = vpop.f32.mrb[196].mxu1 }
 0x5e0   : > { %19040 = vst [vmem:[#allocation7_spill] sm:$0xff] %v17014_v18  ;;  %v17016_v38 = vpop.f32.mrb[197].mxu1 }
 0x5e1   : > { %19041 = vst [vmem:[#allocation147_spill] sm:$0xff] %v17016_v38  ;;  %11392 = vmatprep.mubr.msk.f32.mxu0 %vm333_vm0, %v17016_v38 }
 0x5e2   : > { %11393 = vmatmul.mubr.msk.f32.gmra.mrb[36].mxu0 %vm333_vm0, %v17014_v18 }
 0x5e3   : > { %v17022_v55 = vpop.f32.mrb[198].mxu1 }
 0x5e4   : > { %19042 = vst [vmem:[#allocation111_spill] sm:$0xff] %v17022_v55  ;;  %v17024_v34 = vpop.f32.mrb[199].mxu1 }
 0x5e5   : > { %19043 = vst [vmem:[#allocation145_spill] sm:$0xff] %v17024_v34  ;;  %11395 = vmatprep.mubr.msk.f32.mxu0 %vm333_vm0, %v17024_v34 }
 0x5e6   : > { %11396 = vmatmul.mubr.msk.f32.gmra.mrb[38].mxu0 %vm333_vm0, %v17022_v55 }
 0x5e7   : > { %v17030_v59 = vpop.f32.mrb[200].mxu1 }
 0x5e8   : > { %19044 = vst [vmem:[#allocation8_spill] sm:$0xff] %v17030_v59  ;;  %v17032_v49 = vpop.f32.mrb[201].mxu1 }
 0x5e9   : > { %19045 = vst [vmem:[#allocation51_spill] sm:$0xff] %v17032_v49  ;;  %11398 = vmatprep.mubr.msk.f32.mxu0 %vm333_vm0, %v17032_v49 }
 0x5ea   : > { %11399 = vmatmul.mubr.msk.f32.gmra.mrb[40].mxu0 %vm333_vm0, %v17030_v59 }
 0x5eb   : > { %v17038_v26 = vpop.f32.mrb[202].mxu1 }
 0x5ec   : > { %19046 = vst [vmem:[#allocation68_spill] sm:$0xff] %v17038_v26  ;;  %v17040_v52 = vpop.f32.mrb[203].mxu1 }
 0x5ed   : > { %19047 = vst [vmem:[#allocation116_spill] sm:$0xff] %v17040_v52  ;;  %11401 = vmatprep.mubr.msk.f32.mxu0 %vm333_vm0, %v17040_v52 }
 0x5ee   : > { %11402 = vmatmul.mubr.msk.f32.gmra.mrb[42].mxu0 %vm333_vm0, %v17038_v26 }
 0x5ef   : > { %v17046_v14 = vpop.f32.mrb[204].mxu1 }
 0x5f0   : > { %19048 = vst [vmem:[#allocation39_spill] sm:$0xff] %v17046_v14  ;;  %v17048_v0 = vpop.f32.mrb[205].mxu1 }
 0x5f1   : > { %19049 = vst [vmem:[#allocation42_spill] sm:$0xff] %v17048_v0  ;;  %11404 = vmatprep.mubr.msk.f32.mxu0 %vm333_vm0, %v17048_v0 }
 0x5f2   : > { %11405 = vmatmul.mubr.msk.f32.gmra.mrb[44].mxu0 %vm333_vm0, %v17046_v14 }
 0x5f3   : > { %v17054_v9 = vpop.f32.mrb[206].mxu1 }
 0x5f4   : > { %19050 = vst [vmem:[#allocation10_spill] sm:$0xff] %v17054_v9  ;;  %v17056_v35 = vpop.f32.mrb[207].mxu1 }
 0x5f5   : > { %19051 = vst [vmem:[#allocation52_spill] sm:$0xff] %v17056_v35  ;;  %11407 = vmatprep.mubr.msk.f32.mxu0 %vm333_vm0, %v17056_v35 }
 0x5f6   : > { %11408 = vmatmul.mubr.msk.f32.gmra.mrb[46].mxu0 %vm333_vm0, %v17054_v9 }
 0x5f7   : > { %v17062_v52 = vpop.f32.mrb[208].mxu1 }
 0x5f8   : > { %19052 = vst [vmem:[#allocation146_spill] sm:$0xff] %v17062_v52  ;;  %v17064_v26 = vpop.f32.mrb[209].mxu1 }
 0x5f9   : > { %19053 = vst [vmem:[#allocation6_spill] sm:$0xff] %v17064_v26  ;;  %11410 = vmatprep.mubr.msk.f32.mxu0 %vm333_vm0, %v17064_v26 }
 0x5fa   : > { %11411 = vmatmul.mubr.msk.f32.gmra.mrb[48].mxu0 %vm333_vm0, %v17062_v52 }
 0x5fb   : > { %v17070_v0 = vpop.f32.mrb[210].mxu1 }
 0x5fc   : > { %19054 = vst [vmem:[#allocation12_spill] sm:$0xff] %v17070_v0  ;;  %v17072_v14 = vpop.f32.mrb[211].mxu1 }
 0x5fd   : > { %19055 = vst [vmem:[#allocation67_spill] sm:$0xff] %v17072_v14  ;;  %11413 = vmatprep.mubr.msk.f32.mxu0 %vm333_vm0, %v17072_v14 }
 0x5fe   : > { %11414 = vmatmul.mubr.msk.f32.gmra.mrb[50].mxu0 %vm333_vm0, %v17070_v0 }
 0x5ff   : > { %v17078_v35 = vpop.f32.mrb[212].mxu1 }
 0x600   : > { %19056 = vst [vmem:[#allocation14_spill] sm:$0xff] %v17078_v35  ;;  %v17080_v9 = vpop.f32.mrb[213].mxu1 }
 0x601   : > { %19057 = vst [vmem:[#allocation148_spill] sm:$0xff] %v17080_v9  ;;  %11416 = vmatprep.mubr.msk.f32.mxu0 %vm333_vm0, %v17080_v9 }
 0x602   : > { %11417 = vmatmul.mubr.msk.f32.gmra.mrb[52].mxu0 %vm333_vm0, %v17078_v35 }
 0x603   : > { %v17086_v26 = vpop.f32.mrb[214].mxu1 }
 0x604   : > { %19058 = vst [vmem:[#allocation57_spill] sm:$0xff] %v17086_v26  ;;  %v17088_v52 = vpop.f32.mrb[215].mxu1 }
 0x605   : > { %19059 = vst [vmem:[#allocation61_spill] sm:$0xff] %v17088_v52  ;;  %11419 = vmatprep.mubr.msk.f32.mxu0 %vm333_vm0, %v17088_v52 }
 0x606   : > { %11420 = vmatmul.mubr.msk.f32.gmra.mrb[54].mxu0 %vm333_vm0, %v17086_v26 }
 0x607   : > { %v17094_v14 = vpop.f32.mrb[216].mxu1 }
 0x608   : > { %19060 = vst [vmem:[#allocation65_spill] sm:$0xff] %v17094_v14  ;;  %v17096_v0 = vpop.f32.mrb[217].mxu1 }
 0x609   : > { %19061 = vst [vmem:[#allocation16_spill] sm:$0xff] %v17096_v0  ;;  %11422 = vmatprep.mubr.msk.f32.mxu0 %vm333_vm0, %v17096_v0 }
 0x60a   : > { %11423 = vmatmul.mubr.msk.f32.gmra.mrb[56].mxu0 %vm333_vm0, %v17094_v14 }
 0x60b   : > { %v17102_v9 = vpop.f32.mrb[218].mxu1 }
 0x60c   : > { %19062 = vst [vmem:[#allocation18_spill] sm:$0xff] %v17102_v9  ;;  %v17104_v35 = vpop.f32.mrb[219].mxu1 }
 0x60d   : > { %19063 = vst [vmem:[#allocation19_spill] sm:$0xff] %v17104_v35  ;;  %11425 = vmatprep.mubr.msk.f32.mxu0 %vm333_vm0, %v17104_v35 }
 0x60e   : > { %11426 = vmatmul.mubr.msk.f32.gmra.mrb[58].mxu0 %vm333_vm0, %v17102_v9 }
 0x60f   : > { %v17110_v52 = vpop.f32.mrb[220].mxu1 }
 0x610   : > { %19064 = vst [vmem:[#allocation122_spill] sm:$0xff] %v17110_v52  ;;  %v17112_v26 = vpop.f32.mrb[221].mxu1 }
 0x611   : > { %19065 = vst [vmem:[#allocation104_spill] sm:$0xff] %v17112_v26  ;;  %11428 = vmatprep.mubr.msk.f32.mxu0 %vm333_vm0, %v17112_v26 }
 0x612   : > { %11429 = vmatmul.mubr.msk.f32.gmra.mrb[60].mxu0 %vm333_vm0, %v17110_v52 }
 0x613   : > { %v17118_v0 = vpop.f32.mrb[222].mxu1 }
 0x614   : > { %19066 = vst [vmem:[#allocation128_spill] sm:$0xff] %v17118_v0  ;;  %v17120_v14 = vpop.f32.mrb[223].mxu1 }
 0x615   : > { %19067 = vst [vmem:[#allocation106_spill] sm:$0xff] %v17120_v14  ;;  %11431 = vmatprep.mubr.msk.f32.mxu0 %vm333_vm0, %v17120_v14 }
 0x616   : > { %11432 = vmatmul.mubr.msk.f32.gmra.mrb[62].mxu0 %vm333_vm0, %v17118_v0 }
 0x617   : > { %v17126_v35 = vpop.f32.mrb[224].mxu1 }
 0x618   : > { %19068 = vst [vmem:[#allocation108_spill] sm:$0xff] %v17126_v35  ;;  %v17128_v9 = vpop.f32.mrb[225].mxu1 }
 0x619   : > { %19069 = vst [vmem:[#allocation110_spill] sm:$0xff] %v17128_v9  ;;  %11434 = vmatprep.mubr.msk.f32.mxu0 %vm333_vm0, %v17128_v9 }
 0x61a   : > { %11435 = vmatmul.mubr.msk.f32.gmra.mrb[64].mxu0 %vm333_vm0, %v17126_v35 }
 0x61b   : > { %v17134_v26 = vpop.f32.mrb[226].mxu1 }
 0x61c   : > { %19070 = vst [vmem:[#allocation133_spill] sm:$0xff] %v17134_v26  ;;  %v17136_v52 = vpop.f32.mrb[227].mxu1 }
 0x61d   : > { %19071 = vst [vmem:[#allocation112_spill] sm:$0xff] %v17136_v52  ;;  %11437 = vmatprep.mubr.msk.f32.mxu0 %vm333_vm0, %v17136_v52 }
 0x61e   : > { %11438 = vmatmul.mubr.msk.f32.gmra.mrb[66].mxu0 %vm333_vm0, %v17134_v26 }
 0x61f   : > { %v17142_v14 = vpop.f32.mrb[228].mxu1 }
 0x620   : > { %19072 = vst [vmem:[#allocation118_spill] sm:$0xff] %v17142_v14  ;;  %v17144_v0 = vpop.f32.mrb[229].mxu1 }
 0x621   : > { %19073 = vst [vmem:[#allocation93_spill] sm:$0xff] %v17144_v0  ;;  %11440 = vmatprep.mubr.msk.f32.mxu0 %vm333_vm0, %v17144_v0 }
 0x622   : > { %11441 = vmatmul.mubr.msk.f32.gmra.mrb[68].mxu0 %vm333_vm0, %v17142_v14 }
 0x623   : > { %v17150_v9 = vpop.f32.mrb[230].mxu1 }
 0x624   : > { %19074 = vst [vmem:[#allocation139_spill] sm:$0xff] %v17150_v9  ;;  %v17152_v35 = vpop.f32.mrb[231].mxu1 }
 0x625   : > { %19075 = vst [vmem:[#allocation142_spill] sm:$0xff] %v17152_v35  ;;  %11443 = vmatprep.mubr.msk.f32.mxu0 %vm333_vm0, %v17152_v35 }
 0x626   : > { %11444 = vmatmul.mubr.msk.f32.gmra.mrb[70].mxu0 %vm333_vm0, %v17150_v9 }
 0x627   : > { %v17158_v52 = vpop.f32.mrb[232].mxu1 }
 0x628   : > { %19076 = vst [vmem:[#allocation29_spill] sm:$0xff] %v17158_v52  ;;  %v17160_v26 = vpop.f32.mrb[233].mxu1 }
 0x629   : > { %19077 = vst [vmem:[#allocation80_spill] sm:$0xff] %v17160_v26  ;;  %11446 = vmatprep.mubr.msk.f32.mxu0 %vm333_vm0, %v17160_v26 }
 0x62a   : > { %11447 = vmatmul.mubr.msk.f32.gmra.mrb[72].mxu0 %vm333_vm0, %v17158_v52 }
 0x62b   : > { %v17166_v0 = vpop.f32.mrb[234].mxu1 }
 0x62c   : > { %19078 = vst [vmem:[#allocation45_spill] sm:$0xff] %v17166_v0  ;;  %v17168_v14 = vpop.f32.mrb[235].mxu1 }
 0x62d   : > { %19079 = vst [vmem:[#allocation91_spill] sm:$0xff] %v17168_v14  ;;  %11449 = vmatprep.mubr.msk.f32.mxu0 %vm333_vm0, %v17168_v14 }
 0x62e   : > { %11450 = vmatmul.mubr.msk.f32.gmra.mrb[74].mxu0 %vm333_vm0, %v17166_v0 }
 0x62f   : > { %v17174_v35 = vpop.f32.mrb[236].mxu1 }
 0x630   : > { %19080 = vst [vmem:[#allocation30_spill] sm:$0xff] %v17174_v35  ;;  %v17176_v9 = vpop.f32.mrb[237].mxu1 }
 0x631   : > { %19081 = vst [vmem:[#allocation53_spill] sm:$0xff] %v17176_v9  ;;  %11452 = vmatprep.mubr.msk.f32.mxu0 %vm333_vm0, %v17176_v9 }
 0x632   : > { %11453 = vmatmul.mubr.msk.f32.gmra.mrb[76].mxu0 %vm333_vm0, %v17174_v35 }
 0x633   : > { %v17182_v26 = vpop.f32.mrb[238].mxu1 }
 0x634   : > { %19082 = vst [vmem:[#allocation83_spill] sm:$0xff] %v17182_v26  ;;  %v17184_v52 = vpop.f32.mrb[239].mxu1 }
 0x635   : > { %19083 = vst [vmem:[#allocation89_spill] sm:$0xff] %v17184_v52  ;;  %11455 = vmatprep.mubr.msk.f32.mxu0 %vm333_vm0, %v17184_v52 }
 0x636   : > { %11456 = vmatmul.mubr.msk.f32.gmra.mrb[78].mxu0 %vm333_vm0, %v17182_v26 }
 0x637   : > { %v17190_v14 = vpop.f32.mrb[240].mxu1 }
 0x638   : > { %19084 = vst [vmem:[#allocation58_spill] sm:$0xff] %v17190_v14  ;;  %v17192_v0 = vpop.f32.mrb[241].mxu1 }
 0x639   : > { %19085 = vst [vmem:[#allocation47_spill] sm:$0xff] %v17192_v0  ;;  %11458 = vmatprep.mubr.msk.f32.mxu0 %vm333_vm0, %v17192_v0 }
 0x63a   : > { %11459 = vmatmul.mubr.msk.f32.gmra.mrb[80].mxu0 %vm333_vm0, %v17190_v14 }
 0x63b   : > { %v17198_v9 = vpop.f32.mrb[242].mxu1 }
 0x63c   : > { %19086 = vst [vmem:[#allocation69_spill] sm:$0xff] %v17198_v9  ;;  %v17200_v35 = vpop.f32.mrb[243].mxu1 }
 0x63d   : > { %19087 = vst [vmem:[#allocation98_spill] sm:$0xff] %v17200_v35  ;;  %11461 = vmatprep.mubr.msk.f32.mxu0 %vm333_vm0, %v17200_v35 }
 0x63e   : > { %11462 = vmatmul.mubr.msk.f32.gmra.mrb[82].mxu0 %vm333_vm0, %v17198_v9 }
 0x63f   : > { %v17206_v52 = vpop.f32.mrb[244].mxu1 }
 0x640   : > { %19088 = vst [vmem:[#allocation56_spill] sm:$0xff] %v17206_v52  ;;  %v17208_v26 = vpop.f32.mrb[245].mxu1 }
 0x641   : > { %19089 = vst [vmem:[#allocation54_spill] sm:$0xff] %v17208_v26  ;;  %11464 = vmatprep.mubr.msk.f32.mxu0 %vm333_vm0, %v17208_v26 }
 0x642   : > { %11465 = vmatmul.mubr.msk.f32.gmra.mrb[84].mxu0 %vm333_vm0, %v17206_v52  ;;  %v17235_v52 = vld [vmem:[%s17980_s2] ss:$0 sm:$0xff] }
 0x643   : > { %v17214_v0 = vpop.f32.mrb[246].mxu1 }
 0x644   : > { %19090 = vst [vmem:[#allocation71_spill] sm:$0xff] %v17214_v0  ;;  %v17216_v14 = vpop.f32.mrb[247].mxu1 }
 0x645   : > { %19091 = vst [vmem:[#allocation81_spill] sm:$0xff] %v17216_v14  ;;  %11467 = vmatprep.mubr.msk.f32.mxu0 %vm333_vm0, %v17216_v14 }
 0x646   : > { %11468 = vmatmul.mubr.msk.f32.gmra.mrb[86].mxu0 %vm333_vm0, %v17214_v0 }
 0x647   : > { %v17222_v35 = vpop.f32.mrb[248].mxu1 }
 0x648   : > { %19092 = vst [vmem:[#allocation82_spill] sm:$0xff] %v17222_v35  ;;  %v17224_v9 = vpop.f32.mrb[249].mxu1 }
 0x649   : > { %19093 = vst [vmem:[#allocation23_spill] sm:$0xff] %v17224_v9  ;;  %11470 = vmatprep.mubr.msk.f32.mxu0 %vm333_vm0, %v17224_v9 }
 0x64a   : > { %11471 = vmatmul.mubr.msk.f32.gmra.mrb[88].mxu0 %vm333_vm0, %v17222_v35 }
 0x64b   : > { %v17230_v26 = vpop.f32.mrb[250].mxu1 }
 0x64c   : > { %19094 = vst [vmem:[#allocation24_spill] sm:$0xff] %v17230_v26  ;;  %v17237_v14 = vpop.f32.mrb[251].mxu1 }
 0x64d   : > { %19095 = vst [vmem:[#allocation62_spill] sm:$0xff] %v17237_v14  ;;  %v11316_v0 = vpop.f32.mrb[240].mxu0  ;;  %11473 = vmatprep.mubr.msk.f32.mxu0 %vm333_vm0, %v17237_v14 }
 0x64e   : > { %v7241_v49 = vadd.f32 %v11316_v0, %v17235_v52  ;;  %v7235_v9 = vpop.f32.mrb[241].mxu0  ;;  %11474 = vmatmul.mubr.msk.f32.gmra.mrb[90].mxu0 %vm333_vm0, %v17230_v26 }
 0x64f   : > { %v7236_v35 = vadd.f32 %v17235_v52, %v7235_v9  ;;  %v17245_v59 = vpop.f32.mrb[252].mxu1 }
 0x650   : > { %19096 = vst [vmem:[#allocation73_spill] sm:$0xff] %v17245_v59  ;;  %v7875_v34 = vmax.f32 %v7241_v49, 0.0  ;;  %v17247_v55 = vpop.f32.mrb[253].mxu1 }
 0x651   : > { %19097 = vst [vmem:[#allocation27_spill] sm:$0xff] %v17247_v55  ;;  %v7874_v38 = vmax.f32 %v7236_v35, 0.0  ;;  %v11319_v18 = vpop.f32.mrb[242].mxu0  ;;  %11476 = vmatprep.mubr.msk.f32.mxu0 %vm333_vm0, %v17247_v55 }
 0x652   : > { %v8003_v0 = vadd.f32 %v16785_v4, %v7875_v34  ;;  %v7251_v14 = vadd.f32 %v11319_v18, %v17235_v52  ;;  %v7245_v29 = vpop.f32.mrb[243].mxu0  ;;  %11477 = vmatmul.mubr.msk.f32.gmra.mrb[92].mxu0 %vm333_vm0, %v17245_v59  ;;  %v12718_v4 = vld [vmem:[%s12908_s29 + $0x8] sm:$0xff]  ;;  %v12719_v59 = vld [vmem:[%s12908_s29] sm:$0xff] }
 0x653   : > { %v8002_v49 = vadd.f32 %v7874_v38, %v16787_v48  ;;  %v7246_v9 = vadd.f32 %v17235_v52, %v7245_v29  ;;  %v17264_v35 = vpop.f32.mrb[254].mxu1 }
 0x654   : > { %v8131_v18 = vadd.f32 %v12718_v4, %v8003_v0  ;;  %v7877_v34 = vmax.f32 %v7251_v14, 0.0  ;;  %v17267_v55 = vpop.f32.mrb[255].mxu1 }
 0x655   : > { %19098 = vst [vmem:[#allocation31_spill] sm:$0xff] %v17267_v55  ;;  %v8130_v26 = vadd.f32 %v12719_v59, %v8002_v49  ;;  %v7876_v6 = vmax.f32 %v7246_v9, 0.0  ;;  %v11322_v7 = vpop.f32.mrb[244].mxu0  ;;  %11479 = vmatprep.mubr.msk.f32.mxu0 %vm333_vm0, %v17267_v55  ;;  %v12720_v49 = vld [vmem:[%s12908_s29 + $0x18] sm:$0xff] }
 0x656   : > { %8259 = vst.msk [vmem:[%s17260_s17 + $0x8] sm:$0xff] %vm333_vm0, %v8131_v18  ;;  %v8005_v48 = vadd.f32 %v16795_v62, %v7877_v34  ;;  %v7261_v29 = vadd.f32 %v11322_v7, %v17235_v52  ;;  %v7255_v38 = vpop.f32.mrb[245].mxu0  ;;  %11480 = vmatmul.mubr.msk.f32.gmra.mrb[94].mxu0 %vm333_vm0, %v17264_v35  ;;  %v12721_v7 = vld [vmem:[%s12908_s29 + $0x10] sm:$0xff] }
 0x657   : > { %8258 = vst.msk [vmem:[%s17260_s17] sm:$0xff] %vm333_vm0, %v8130_v26  ;;  %v8004_v59 = vadd.f32 %v7876_v6, %v16797_v53  ;;  %v7256_v14 = vadd.f32 %v17235_v52, %v7255_v38  ;;  %v17282_v0 = vpop.f32.mrb[0].mxu1 }
 0x658   : > { %v8133_v9 = vadd.f32 %v12720_v49, %v8005_v48  ;;  %v7879_v4 = vmax.f32 %v7261_v29, 0.0  ;;  %v17285_v62 = vpop.f32.mrb[1].mxu1 }
 0x659   : > { %v8132_v18 = vadd.f32 %v12721_v7, %v8004_v59  ;;  %v7878_v34 = vmax.f32 %v7256_v14, 0.0  ;;  %v11325_v55 = vpop.f32.mrb[246].mxu0  ;;  %11482 = vmatprep.mubr.msk.f32.mxu0 %vm333_vm0, %v17285_v62  ;;  %v12722_v59 = vld [vmem:[%s12908_s29 + $0x28] sm:$0xff] }
 0x65a   : > { %8261 = vst.msk [vmem:[%s17260_s17 + $0x18] sm:$0xff] %vm333_vm0, %v8133_v9  ;;  %v8007_v53 = vadd.f32 %v16805_v33, %v7879_v4  ;;  %v7271_v6 = vadd.f32 %v11325_v55, %v17235_v52  ;;  %v7265_v26 = vpop.f32.mrb[247].mxu0  ;;  %11483 = vmatmul.mubr.msk.f32.gmra.mrb[96].mxu0 %vm333_vm0, %v17282_v0  ;;  %v12723_v55 = vld [vmem:[%s12908_s29 + $0x20] sm:$0xff] }
 0x65b   : > { %8260 = vst.msk [vmem:[%s17260_s17 + $0x10] sm:$0xff] %vm333_vm0, %v8132_v18  ;;  %v8006_v48 = vadd.f32 %v7878_v34, %v16807_v51  ;;  %v7266_v29 = vadd.f32 %v17235_v52, %v7265_v26  ;;  %v17300_v38 = vpop.f32.mrb[2].mxu1 }
 0x65c   : > { %v8135_v14 = vadd.f32 %v12722_v59, %v8007_v53  ;;  %v7881_v49 = vmax.f32 %v7271_v6, 0.0  ;;  %v17303_v33 = vpop.f32.mrb[3].mxu1 }
 0x65d   : > { %v8134_v9 = vadd.f32 %v12723_v55, %v8006_v48  ;;  %v7880_v4 = vmax.f32 %v7266_v29, 0.0  ;;  %v11328_v7 = vpop.f32.mrb[248].mxu0  ;;  %11485 = vmatprep.mubr.msk.f32.mxu0 %vm333_vm0, %v17303_v33  ;;  %v12724_v48 = vld [vmem:[%s12908_s29 + $0x38] sm:$0xff] }
 0x65e   : > { %8263 = vst.msk [vmem:[%s17260_s17 + $0x28] sm:$0xff] %vm333_vm0, %v8135_v14  ;;  %v8009_v51 = vadd.f32 %v16815_v37, %v7881_v49  ;;  %v7281_v18 = vadd.f32 %v11328_v7, %v17235_v52  ;;  %v7275_v34 = vpop.f32.mrb[249].mxu0  ;;  %11486 = vmatmul.mubr.msk.f32.gmra.mrb[98].mxu0 %vm333_vm0, %v17300_v38  ;;  %v12725_v14 = vld [vmem:[%s12908_s29 + $0x30] sm:$0xff] }
 0x65f   : > { %8262 = vst.msk [vmem:[%s17260_s17 + $0x20] sm:$0xff] %vm333_vm0, %v8134_v9  ;;  %v8008_v53 = vadd.f32 %v7880_v4, %v16817_v1  ;;  %v7276_v6 = vadd.f32 %v17235_v52, %v7275_v34  ;;  %v17318_v26 = vpop.f32.mrb[4].mxu1 }
 0x660   : > { %v8137_v29 = vadd.f32 %v12724_v48, %v8009_v51  ;;  %v7883_v59 = vmax.f32 %v7281_v18, 0.0  ;;  %v17321_v37 = vpop.f32.mrb[5].mxu1 }
 0x661   : > { %v8136_v49 = vadd.f32 %v12725_v14, %v8008_v53  ;;  %v7882_v55 = vmax.f32 %v7276_v6, 0.0  ;;  %v11331_v7 = vpop.f32.mrb[250].mxu0  ;;  %11488 = vmatprep.mubr.msk.f32.mxu0 %vm333_vm0, %v17321_v37  ;;  %v12726_v53 = vld [vmem:[%s12908_s29 + $0x48] sm:$0xff] }
 0x662   : > { %8265 = vst.msk [vmem:[%s17260_s17 + $0x38] sm:$0xff] %vm333_vm0, %v8137_v29  ;;  %v8011_v1 = vadd.f32 %v16825_v45, %v7883_v59  ;;  %v7291_v9 = vadd.f32 %v11331_v7, %v17235_v52  ;;  %v7285_v4 = vpop.f32.mrb[251].mxu0  ;;  %11489 = vmatmul.mubr.msk.f32.gmra.mrb[100].mxu0 %vm333_vm0, %v17318_v26  ;;  %v12727_v29 = vld [vmem:[%s12908_s29 + $0x40] sm:$0xff] }
 0x663   : > { %8264 = vst.msk [vmem:[%s17260_s17 + $0x30] sm:$0xff] %vm333_vm0, %v8136_v49  ;;  %v8010_v51 = vadd.f32 %v7882_v55, %v16827_v27  ;;  %v7286_v18 = vadd.f32 %v17235_v52, %v7285_v4  ;;  %v17336_v34 = vpop.f32.mrb[6].mxu1  ;;  %v12728_v4 = vld [vmem:[%s12908_s29 + $0x58] sm:$0xff] }
 0x664   : > { %v8139_v6 = vadd.f32 %v12726_v53, %v8011_v1  ;;  %v7885_v45 = vmax.f32 %v7291_v9, 0.0  ;;  %v17339_v48 = vpop.f32.mrb[7].mxu1  ;;  %v12729_v53 = vld [vmem:[%s12908_s29 + $0x50] sm:$0xff] }
 0x665   : > { %v8138_v59 = vadd.f32 %v12727_v29, %v8010_v51  ;;  %v7884_v14 = vmax.f32 %v7286_v18, 0.0  ;;  %v11334_v7 = vpop.f32.mrb[252].mxu0  ;;  %11491 = vmatprep.mubr.msk.f32.mxu0 %vm333_vm0, %v17339_v48 }
 0x666   : > { %8267 = vst.msk [vmem:[%s17260_s17 + $0x48] sm:$0xff] %vm333_vm0, %v8139_v6  ;;  %v8013_v27 = vadd.f32 %v16835_v25, %v7885_v45  ;;  %v7301_v49 = vadd.f32 %v11334_v7, %v17235_v52  ;;  %v7295_v55 = vpop.f32.mrb[253].mxu0  ;;  %11492 = vmatmul.mubr.msk.f32.gmra.mrb[102].mxu0 %vm333_vm0, %v17336_v34 }
 0x667   : > { %8266 = vst.msk [vmem:[%s17260_s17 + $0x40] sm:$0xff] %vm333_vm0, %v8138_v59  ;;  %v8012_v1 = vadd.f32 %v7884_v14, %v16837_v40  ;;  %v7296_v9 = vadd.f32 %v17235_v52, %v7295_v55 }
 0x668   : > { %v8141_v51 = vadd.f32 %v12728_v4, %v8013_v27  ;;  %v7887_v18 = vmax.f32 %v7301_v49, 0.0  ;;  %v12730_v27 = vld [vmem:[%s12908_s29 + $0x68] sm:$0xff] }
 0x669   : > { %v8140_v25 = vadd.f32 %v12729_v53, %v8012_v1  ;;  %v7886_v6 = vmax.f32 %v7296_v9, 0.0  ;;  %v11337_v45 = vpop.f32.mrb[254].mxu0  ;;  %v12731_v1 = vld [vmem:[%s12908_s29 + $0x60] sm:$0xff] }
 0x66a   : > { %8269 = vst.msk [vmem:[%s17260_s17 + $0x58] sm:$0xff] %vm333_vm0, %v8141_v51  ;;  %v8015_v29 = vadd.f32 %v16845_v31, %v7887_v18  ;;  %v7311_v59 = vadd.f32 %v11337_v45, %v17235_v52  ;;  %v7305_v40 = vpop.f32.mrb[255].mxu0 }
 0x66b   : > { %8268 = vst.msk [vmem:[%s17260_s17 + $0x50] sm:$0xff] %vm333_vm0, %v8140_v25  ;;  %v8014_v14 = vadd.f32 %v7886_v6, %v16847_v28  ;;  %v7306_v7 = vadd.f32 %v17235_v52, %v7305_v40  ;;  %v12732_v6 = vld [vmem:[%s12908_s29 + $0x78] sm:$0xff] }
 0x66c   : > { %v8143_v49 = vadd.f32 %v12730_v27, %v8015_v29  ;;  %v7889_v55 = vmax.f32 %v7311_v59, 0.0  ;;  %v12733_v59 = vld [vmem:[%s12908_s29 + $0x70] sm:$0xff] }
 0x66d   : > { %v8142_v9 = vadd.f32 %v12731_v1, %v8014_v14  ;;  %v7888_v4 = vmax.f32 %v7306_v7, 0.0  ;;  %v11340_v31 = vpop.f32.mrb[0].mxu0  ;;  %v12734_v1 = vld [vmem:[%s12908_s29 + $0x88] sm:$0xff] }
 0x66e   : > { %8271 = vst.msk [vmem:[%s17260_s17 + $0x68] sm:$0xff] %vm333_vm0, %v8143_v49  ;;  %v8017_v51 = vadd.f32 %v16854_v47, %v7889_v55  ;;  %v7321_v18 = vadd.f32 %v11340_v31, %v17235_v52  ;;  %v7315_v28 = vpop.f32.mrb[1].mxu0  ;;  %v12735_v31 = vld [vmem:[%s12908_s29 + $0x80] sm:$0xff] }
 0x66f   : > { %8270 = vst.msk [vmem:[%s17260_s17 + $0x60] sm:$0xff] %vm333_vm0, %v8142_v9  ;;  %v8016_v53 = vadd.f32 %v7888_v4, %v16856_v17  ;;  %v7316_v25 = vadd.f32 %v17235_v52, %v7315_v28 }
 0x670   : > { %v8145_v45 = vadd.f32 %v12732_v6, %v8017_v51  ;;  %v7891_v29 = vmax.f32 %v7321_v18, 0.0 }
 0x671   : > { %v8144_v40 = vadd.f32 %v12733_v59, %v8016_v53  ;;  %v7890_v14 = vmax.f32 %v7316_v25, 0.0  ;;  %v11343_v47 = vpop.f32.mrb[2].mxu0 }
 0x672   : > { %8273 = vst.msk [vmem:[%s17260_s17 + $0x78] sm:$0xff] %vm333_vm0, %v8145_v45  ;;  %v8019_v7 = vadd.f32 %v16862_v61, %v7891_v29  ;;  %v7331_v27 = vadd.f32 %v11343_v47, %v17235_v52  ;;  %v7325_v17 = vpop.f32.mrb[3].mxu0  ;;  %v12736_v45 = vld [vmem:[%s12908_s29 + $0x98] sm:$0xff] }
 0x673   : > { %8272 = vst.msk [vmem:[%s17260_s17 + $0x70] sm:$0xff] %vm333_vm0, %v8144_v40  ;;  %v8018_v49 = vadd.f32 %v7890_v14, %v16864_v10  ;;  %v7326_v55 = vadd.f32 %v17235_v52, %v7325_v17  ;;  %v12737_v40 = vld [vmem:[%s12908_s29 + $0x90] sm:$0xff] }
 0x674   : > { %v8147_v9 = vadd.f32 %v12734_v1, %v8019_v7  ;;  %v7893_v4 = vmax.f32 %v7331_v27, 0.0 }
 0x675   : > { %v8146_v51 = vadd.f32 %v12735_v31, %v8018_v49  ;;  %v7892_v18 = vmax.f32 %v7326_v55, 0.0  ;;  %v11346_v61 = vpop.f32.mrb[4].mxu0  ;;  %v12738_v55 = vld [vmem:[%s12908_s29 + $0xa8] sm:$0xff] }
 0x676   : > { %8275 = vst.msk [vmem:[%s17260_s17 + $0x88] sm:$0xff] %vm333_vm0, %v8147_v9  ;;  %v8021_v28 = vadd.f32 %v16870_v12, %v7893_v4  ;;  %v7341_v53 = vadd.f32 %v11346_v61, %v17235_v52  ;;  %v7335_v10 = vpop.f32.mrb[5].mxu0  ;;  %v12739_v4 = vld [vmem:[%s12908_s29 + $0xa0] sm:$0xff] }
 0x677   : > { %8274 = vst.msk [vmem:[%s17260_s17 + $0x80] sm:$0xff] %vm333_vm0, %v8146_v51  ;;  %v8020_v25 = vadd.f32 %v7892_v18, %v16872_v44  ;;  %v7336_v6 = vadd.f32 %v17235_v52, %v7335_v10  ;;  %v12740_v10 = vld [vmem:[%s12908_s29 + $0xb8] sm:$0xff] }
 0x678   : > { %v8149_v29 = vadd.f32 %v12736_v45, %v8021_v28  ;;  %v7895_v59 = vmax.f32 %v7341_v53, 0.0  ;;  %v12741_v45 = vld [vmem:[%s12908_s29 + $0xb0] sm:$0xff] }
 0x679   : > { %v8148_v14 = vadd.f32 %v12737_v40, %v8020_v25  ;;  %v7894_v47 = vmax.f32 %v7336_v6, 0.0  ;;  %v11349_v12 = vpop.f32.mrb[6].mxu0 }
 0x67a   : > { %8277 = vst.msk [vmem:[%s17260_s17 + $0x98] sm:$0xff] %vm333_vm0, %v8149_v29  ;;  %v8023_v7 = vadd.f32 %v16878_v63, %v7895_v59  ;;  %v7351_v27 = vadd.f32 %v11349_v12, %v17235_v52  ;;  %v7345_v44 = vpop.f32.mrb[7].mxu0 }
 0x67b   : > { %8276 = vst.msk [vmem:[%s17260_s17 + $0x90] sm:$0xff] %vm333_vm0, %v8148_v14  ;;  %v8022_v17 = vadd.f32 %v7894_v47, %v16880_v3  ;;  %v7346_v49 = vadd.f32 %v17235_v52, %v7345_v44 }
 0x67c   : > { %v8151_v1 = vadd.f32 %v12738_v55, %v8023_v7  ;;  %v7897_v9 = vmax.f32 %v7351_v27, 0.0  ;;  %v12742_v7 = vld [vmem:[%s12908_s29 + $0xc8] sm:$0xff] }
 0x67d   : > { %v8150_v31 = vadd.f32 %v12739_v4, %v8022_v17  ;;  %v7896_v51 = vmax.f32 %v7346_v49, 0.0  ;;  %v11352_v63 = vpop.f32.mrb[8].mxu0  ;;  %v12743_v17 = vld [vmem:[%s12908_s29 + $0xc0] sm:$0xff] }
 0x67e   : > { %8279 = vst.msk [vmem:[%s17260_s17 + $0xa8] sm:$0xff] %vm333_vm0, %v8151_v1  ;;  %v8025_v18 = vadd.f32 %v16886_v16, %v7897_v9  ;;  %v7361_v61 = vadd.f32 %v11352_v63, %v17235_v52  ;;  %v7355_v3 = vpop.f32.mrb[9].mxu0 }
 0x67f   : > { %8278 = vst.msk [vmem:[%s17260_s17 + $0xa0] sm:$0xff] %vm333_vm0, %v8150_v31  ;;  %v8024_v28 = vadd.f32 %v7896_v51, %v16888_v43  ;;  %v7356_v53 = vadd.f32 %v17235_v52, %v7355_v3  ;;  %v12744_v51 = vld [vmem:[%s12908_s29 + $0xd8] sm:$0xff] }
 0x680   : > { %v8153_v25 = vadd.f32 %v12740_v10, %v8025_v18  ;;  %v7899_v6 = vmax.f32 %v7361_v61, 0.0  ;;  %v12745_v61 = vld [vmem:[%s12908_s29 + $0xd0] sm:$0xff] }
 0x681   : > { %v8152_v29 = vadd.f32 %v12741_v45, %v8024_v28  ;;  %v7898_v59 = vmax.f32 %v7356_v53, 0.0  ;;  %v11355_v16 = vpop.f32.mrb[10].mxu0  ;;  %v12746_v45 = vld [vmem:[%s12908_s29 + $0xe8] sm:$0xff] }
 0x682   : > { %8281 = vst.msk [vmem:[%s17260_s17 + $0xb8] sm:$0xff] %vm333_vm0, %v8153_v25  ;;  %v8027_v40 = vadd.f32 %v16894_v50, %v7899_v6  ;;  %v7371_v14 = vadd.f32 %v11355_v16, %v17235_v52  ;;  %v7365_v43 = vpop.f32.mrb[11].mxu0  ;;  %v12747_v16 = vld [vmem:[%s12908_s29 + $0xe0] sm:$0xff] }
 0x683   : > { %8280 = vst.msk [vmem:[%s17260_s17 + $0xb0] sm:$0xff] %vm333_vm0, %v8152_v29  ;;  %v8026_v47 = vadd.f32 %v7898_v59, %v16896_v56  ;;  %v7366_v12 = vadd.f32 %v17235_v52, %v7365_v43 }
 0x684   : > { %v8155_v27 = vadd.f32 %v12742_v7, %v8027_v40  ;;  %v7901_v44 = vmax.f32 %v7371_v14, 0.0 }
 0x685   : > { %v8154_v49 = vadd.f32 %v12743_v17, %v8026_v47  ;;  %v7900_v55 = vmax.f32 %v7366_v12, 0.0  ;;  %v11358_v50 = vpop.f32.mrb[12].mxu0  ;;  %v12748_v17 = vld [vmem:[%s12908_s29 + $0xf8] sm:$0xff] }
 0x686   : > { %8283 = vst.msk [vmem:[%s17260_s17 + $0xc8] sm:$0xff] %vm333_vm0, %v8155_v27  ;;  %v8029_v1 = vadd.f32 %v16902_v42, %v7901_v44  ;;  %v7381_v9 = vadd.f32 %v11358_v50, %v17235_v52  ;;  %v7375_v56 = vpop.f32.mrb[13].mxu0 }
 0x687   : > { %8282 = vst.msk [vmem:[%s17260_s17 + $0xc0] sm:$0xff] %vm333_vm0, %v8154_v49  ;;  %v8028_v4 = vadd.f32 %v7900_v55, %v16904_v13  ;;  %v7376_v31 = vadd.f32 %v17235_v52, %v7375_v56  ;;  %v12749_v55 = vld [vmem:[%s12908_s29 + $0xf0] sm:$0xff] }
 0x688   : > { %v8157_v63 = vadd.f32 %v12744_v51, %v8029_v1  ;;  %v7903_v18 = vmax.f32 %v7381_v9, 0.0 }
 0x689   : > { %v8156_v3 = vadd.f32 %v12745_v61, %v8028_v4  ;;  %v7902_v28 = vmax.f32 %v7376_v31, 0.0  ;;  %v11361_v53 = vpop.f32.mrb[14].mxu0 }
 0x68a   : > { %8285 = vst.msk [vmem:[%s17260_s17 + $0xd8] sm:$0xff] %vm333_vm0, %v8157_v63  ;;  %v8031_v42 = vadd.f32 %v16910_v5, %v7903_v18  ;;  %v7391_v10 = vadd.f32 %v11361_v53, %v17235_v52  ;;  %v7385_v25 = vpop.f32.mrb[15].mxu0  ;;  %v12750_v63 = vld [vmem:[%s12908_s29 + $0x108] sm:$0xff] }
 0x68b   : > { %8284 = vst.msk [vmem:[%s17260_s17 + $0xd0] sm:$0xff] %vm333_vm0, %v8156_v3  ;;  %v8030_v13 = vadd.f32 %v7902_v28, %v16912_v11  ;;  %v7386_v6 = vadd.f32 %v17235_v52, %v7385_v25  ;;  %v12751_v3 = vld [vmem:[%s12908_s29 + $0x100] sm:$0xff] }
 0x68c   : > { %v8159_v29 = vadd.f32 %v12746_v45, %v8031_v42  ;;  %v7905_v59 = vmax.f32 %v7391_v10, 0.0 }
 0x68d   : > { %v8158_v40 = vadd.f32 %v12747_v16, %v8030_v13  ;;  %v7904_v14 = vmax.f32 %v7386_v6, 0.0  ;;  %v17446_v43 = vpop.f32.mrb[8].mxu1  ;;  %v11364_v5 = vpop.f32.mrb[16].mxu0  ;;  %v12753_v16 = vld [vmem:[%s12908_s29 + $0x110] sm:$0xff] }
 0x68e   : > { %8287 = vst.msk [vmem:[%s17260_s17 + $0xe8] sm:$0xff] %vm333_vm0, %v8159_v29  ;;  %v8033_v47 = vadd.f32 %v16918_v8, %v7905_v59  ;;  %v7401_v11 = vadd.f32 %v11364_v5, %v17235_v52  ;;  %v17452_v12 = vpop.f32.mrb[9].mxu1  ;;  %v7395_v7 = vpop.f32.mrb[17].mxu0  ;;  %v12752_v29 = vld [vmem:[%s12908_s29 + $0x118] sm:$0xff] }
 0x68f   : > { %8286 = vst.msk [vmem:[%s17260_s17 + $0xe0] sm:$0xff] %vm333_vm0, %v8158_v40  ;;  %v8032_v27 = vadd.f32 %v7904_v14, %v16920_v30  ;;  %v7396_v44 = vadd.f32 %v17235_v52, %v7395_v7  ;;  %11494 = vmatprep.mubr.msk.f32.mxu0 %vm333_vm0, %v17452_v12 }
 0x690   : > { %v8161_v49 = vadd.f32 %v12748_v17, %v8033_v47  ;;  %v7907_v8 = vmax.f32 %v7401_v11, 0.0  ;;  %11495 = vmatmul.mubr.msk.f32.gmra.mrb[104].mxu0 %vm333_vm0, %v17446_v43 }
 0x691   : > { %v8160_v50 = vadd.f32 %v12749_v55, %v8032_v27  ;;  %v7906_v1 = vmax.f32 %v7396_v44, 0.0  ;;  %v11367_v9 = vpop.f32.mrb[18].mxu0  ;;  %v12754_v44 = vld [vmem:[%s12908_s29 + $0x128] sm:$0xff] }
 0x692   : > { %8289 = vst.msk [vmem:[%s17260_s17 + $0xf8] sm:$0xff] %vm333_vm0, %v8161_v49  ;;  %v8035_v30 = vadd.f32 %v16926_v54, %v7907_v8  ;;  %v7411_v56 = vadd.f32 %v11367_v9, %v17235_v52  ;;  %v7405_v4 = vpop.f32.mrb[19].mxu0  ;;  %v12755_v8 = vld [vmem:[%s12908_s29 + $0x120] sm:$0xff] }
 0x693   : > { %8288 = vst.msk [vmem:[%s17260_s17 + $0xf0] sm:$0xff] %vm333_vm0, %v8160_v50  ;;  %v8034_v31 = vadd.f32 %v7906_v1, %v16928_v19  ;;  %v7406_v51 = vadd.f32 %v17235_v52, %v7405_v4 }
 0x694   : > { %v8163_v18 = vadd.f32 %v12750_v63, %v8035_v30  ;;  %v7909_v61 = vmax.f32 %v7411_v56, 0.0 }
 0x695   : > { %v8162_v28 = vadd.f32 %v12751_v3, %v8034_v31  ;;  %v7908_v53 = vmax.f32 %v7406_v51, 0.0  ;;  %v17474_v42 = vpop.f32.mrb[10].mxu1  ;;  %v11370_v54 = vpop.f32.mrb[20].mxu0  ;;  %v12756_v51 = vld [vmem:[%s12908_s29 + $0x138] sm:$0xff] }
 0x696   : > { %8291 = vst.msk [vmem:[%s17260_s17 + $0x108] sm:$0xff] %vm333_vm0, %v8163_v18  ;;  %v8037_v10 = vadd.f32 %v16936_v39, %v7909_v61  ;;  %v7421_v19 = vadd.f32 %v11370_v54, %v17235_v52  ;;  %v17480_v25 = vpop.f32.mrb[11].mxu1  ;;  %v7415_v13 = vpop.f32.mrb[21].mxu0  ;;  %v12757_v18 = vld [vmem:[%s12908_s29 + $0x130] sm:$0xff] }
 0x697   : > { %8290 = vst.msk [vmem:[%s17260_s17 + $0x100] sm:$0xff] %vm333_vm0, %v8162_v28  ;;  %v8036_v6 = vadd.f32 %v7908_v53, %v16938_v24  ;;  %v7416_v45 = vadd.f32 %v17235_v52, %v7415_v13  ;;  %11497 = vmatprep.mubr.msk.f32.mxu0 %vm333_vm0, %v17480_v25  ;;  %v12758_v13 = vld [vmem:[%s12908_s29 + $0x148] sm:$0xff] }
 0x698   : > { %v8165_v59 = vadd.f32 %v12752_v29, %v8037_v10  ;;  %v7911_v39 = vmax.f32 %v7421_v19, 0.0  ;;  %11498 = vmatmul.mubr.msk.f32.gmra.mrb[106].mxu0 %vm333_vm0, %v17474_v42  ;;  %v12759_v29 = vld [vmem:[%s12908_s29 + $0x140] sm:$0xff] }
 0x699   : > { %v8164_v40 = vadd.f32 %v12753_v16, %v8036_v6  ;;  %v7910_v14 = vmax.f32 %v7416_v45, 0.0  ;;  %v11373_v5 = vpop.f32.mrb[22].mxu0 }
 0x69a   : > { %8293 = vst.msk [vmem:[%s17260_s17 + $0x118] sm:$0xff] %vm333_vm0, %v8165_v59  ;;  %v8039_v24 = vadd.f32 %v16944_v46, %v7911_v39  ;;  %v7431_v47 = vadd.f32 %v11373_v5, %v17235_v52  ;;  %v7425_v11 = vpop.f32.mrb[23].mxu0 }
 0x69b   : > { %8292 = vst.msk [vmem:[%s17260_s17 + $0x110] sm:$0xff] %vm333_vm0, %v8164_v40  ;;  %v8038_v7 = vadd.f32 %v7910_v14, %v16946_v60  ;;  %v7426_v27 = vadd.f32 %v17235_v52, %v7425_v11  ;;  %v12760_v11 = vld [vmem:[%s12908_s29 + $0x158] sm:$0xff] }
 0x69c   : > { %v8167_v17 = vadd.f32 %v12754_v44, %v8039_v24  ;;  %v7913_v49 = vmax.f32 %v7431_v47, 0.0 }
 0x69d   : > { %v8166_v55 = vadd.f32 %v12755_v8, %v8038_v7  ;;  %v7912_v50 = vmax.f32 %v7426_v27, 0.0  ;;  %v11376_v46 = vpop.f32.mrb[24].mxu0  ;;  %v12761_v27 = vld [vmem:[%s12908_s29 + $0x150] sm:$0xff] }
 0x69e   : > { %v17502_v1 = vpop.f32.mrb[12].mxu1  ;;  %8295 = vst.msk [vmem:[%s17260_s17 + $0x128] sm:$0xff] %vm333_vm0, %v8167_v17  ;;  %v8041_v9 = vadd.f32 %v16954_v2, %v7913_v49  ;;  %v7441_v60 = vadd.f32 %v11376_v46, %v17235_v52  ;;  %v7435_v56 = vpop.f32.mrb[25].mxu0 }
 0x69f   : > { %v17508_v30 = vpop.f32.mrb[13].mxu1  ;;  %8294 = vst.msk [vmem:[%s17260_s17 + $0x120] sm:$0xff] %vm333_vm0, %v8166_v55  ;;  %v8040_v4 = vadd.f32 %v7912_v50, %v16956_v20  ;;  %v7436_v31 = vadd.f32 %v17235_v52, %v7435_v56 }
 0x6a0   : > { %11500 = vmatprep.mubr.msk.f32.mxu0 %vm333_vm0, %v17508_v30  ;;  %v8169_v63 = vadd.f32 %v12756_v51, %v8041_v9  ;;  %v7915_v2 = vmax.f32 %v7441_v60, 0.0  ;;  %v12762_v9 = vld [vmem:[%s12908_s29 + $0x168] sm:$0xff] }
 0x6a1   : > { %11501 = vmatmul.mubr.msk.f32.gmra.mrb[108].mxu0 %vm333_vm0, %v17502_v1  ;;  %v8168_v61 = vadd.f32 %v12757_v18, %v8040_v4  ;;  %v7914_v3 = vmax.f32 %v7436_v31, 0.0  ;;  %v11379_v28 = vpop.f32.mrb[26].mxu0  ;;  %v12763_v4 = vld [vmem:[%s12908_s29 + $0x160] sm:$0xff] }
 0x6a2   : > { %8297 = vst.msk [vmem:[%s17260_s17 + $0x138] sm:$0xff] %vm333_vm0, %v8169_v63  ;;  %v8043_v20 = vadd.f32 %v16962_v58, %v7915_v2  ;;  %v7451_v53 = vadd.f32 %v11379_v28, %v17235_v52  ;;  %v7445_v54 = vpop.f32.mrb[27].mxu0 }
 0x6a3   : > { %8296 = vst.msk [vmem:[%s17260_s17 + $0x130] sm:$0xff] %vm333_vm0, %v8168_v61  ;;  %v8042_v10 = vadd.f32 %v7914_v3, %v16964_v21  ;;  %v7446_v19 = vadd.f32 %v17235_v52, %v7445_v54  ;;  %v12764_v3 = vld [vmem:[%s12908_s29 + $0x178] sm:$0xff] }
 0x6a4   : > { %v8171_v6 = vadd.f32 %v12758_v13, %v8043_v20  ;;  %v7917_v45 = vmax.f32 %v7451_v53, 0.0  ;;  %v12765_v53 = vld [vmem:[%s12908_s29 + $0x170] sm:$0xff] }
 0x6a5   : > { %v8170_v59 = vadd.f32 %v12759_v29, %v8042_v10  ;;  %v7916_v39 = vmax.f32 %v7446_v19, 0.0  ;;  %v11382_v58 = vpop.f32.mrb[28].mxu0 }
 0x6a6   : > { %v17530_v16 = vpop.f32.mrb[14].mxu1  ;;  %8299 = vst.msk [vmem:[%s17260_s17 + $0x148] sm:$0xff] %vm333_vm0, %v8171_v6  ;;  %v8045_v40 = vadd.f32 %v16972_v32, %v7917_v45  ;;  %v7461_v21 = vadd.f32 %v11382_v58, %v17235_v52  ;;  %v7455_v5 = vpop.f32.mrb[29].mxu0  ;;  %v19099_v6 = vld [vmem:[#allocation28_spill] sm:$0xff] }
 0x6a7   : > { %v17536_v14 = vpop.f32.mrb[15].mxu1  ;;  %8298 = vst.msk [vmem:[%s17260_s17 + $0x140] sm:$0xff] %vm333_vm0, %v8170_v59  ;;  %v8044_v24 = vadd.f32 %v7916_v39, %v16974_v23  ;;  %v7456_v47 = vadd.f32 %v17235_v52, %v7455_v5  ;;  %v12766_v59 = vld [vmem:[%s12908_s29 + $0x188] sm:$0xff] }
 0x6a8   : > { %11503 = vmatprep.mubr.msk.f32.mxu1 %vm333_vm0, %v17536_v14  ;;  %v8173_v7 = vadd.f32 %v12760_v11, %v8045_v40  ;;  %v7919_v32 = vmax.f32 %v7461_v21, 0.0  ;;  %v12767_v40 = vld [vmem:[%s12908_s29 + $0x180] sm:$0xff] }
 0x6a9   : > { %11504 = vmatmul.mubr.msk.f32.vlgmr.msra.gmra.mrb[16].mxu1 %vm333_vm0, %v17530_v16  ;;  %v8172_v44 = vadd.f32 %v12761_v27, %v8044_v24  ;;  %v7918_v17 = vmax.f32 %v7456_v47, 0.0  ;;  %v11385_v49 = vpop.f32.mrb[30].mxu0  ;;  %v19100_v24 = vld [vmem:[#allocation5_spill] sm:$0xff] }
 0x6aa   : > { %8301 = vst.msk [vmem:[%s17260_s17 + $0x158] sm:$0xff] %vm333_vm0, %v8173_v7  ;;  %v8047_v23 = vadd.f32 %v16980_v22, %v7919_v32  ;;  %v7471_v8 = vadd.f32 %v11385_v49, %v17235_v52  ;;  %v7465_v55 = vpop.f32.mrb[31].mxu0  ;;  %v19101_v32 = vld [vmem:[#allocation60_spill] sm:$0xff] }
 0x6ab   : > { %8300 = vst.msk [vmem:[%s17260_s17 + $0x150] sm:$0xff] %vm333_vm0, %v8172_v44  ;;  %v8046_v50 = vadd.f32 %v7918_v17, %v16982_v36  ;;  %v7466_v46 = vadd.f32 %v17235_v52, %v7465_v55  ;;  %v12768_v17 = vld [vmem:[%s12908_s29 + $0x198] sm:$0xff] }
 0x6ac   : > { %v8175_v60 = vadd.f32 %v12762_v9, %v8047_v23  ;;  %v7921_v56 = vmax.f32 %v7471_v8, 0.0  ;;  %v12769_v8 = vld [vmem:[%s12908_s29 + $0x190] sm:$0xff]  ;;  %v19102_v9 = vld [vmem:[#allocation7_spill] sm:$0xff] }
 0x6ad   : > { %v8174_v31 = vadd.f32 %v12763_v4, %v8046_v50  ;;  %v7920_v51 = vmax.f32 %v7466_v46, 0.0  ;;  %v11388_v22 = vpop.f32.mrb[32].mxu0 }
 0x6ae   : > { %8303 = vst.msk [vmem:[%s17260_s17 + $0x168] sm:$0xff] %vm333_vm0, %v8175_v60  ;;  %v8049_v63 = vadd.f32 %v16990_v57, %v7921_v56  ;;  %v7481_v2 = vadd.f32 %v11388_v22, %v17235_v52  ;;  %v7475_v36 = vpop.f32.mrb[33].mxu0 }
 0x6af   : > { %8302 = vst.msk [vmem:[%s17260_s17 + $0x160] sm:$0xff] %vm333_vm0, %v8174_v31  ;;  %v8048_v18 = vadd.f32 %v7920_v51, %v16992_v41  ;;  %v7476_v61 = vadd.f32 %v17235_v52, %v7475_v36  ;;  %v19103_v31 = vld [vmem:[#allocation147_spill] sm:$0xff] }
 0x6b0   : > { %v8177_v28 = vadd.f32 %v12764_v3, %v8049_v63  ;;  %v7923_v20 = vmax.f32 %v7481_v2, 0.0  ;;  %v12770_v63 = vld [vmem:[%s12908_s29 + $0x1a8] sm:$0xff] }
 0x6b1   : > { %v8176_v54 = vadd.f32 %v12765_v53, %v8048_v18  ;;  %v7922_v10 = vmax.f32 %v7476_v61, 0.0  ;;  %v11391_v57 = vpop.f32.mrb[34].mxu0  ;;  %v12771_v18 = vld [vmem:[%s12908_s29 + $0x1a0] sm:$0xff] }
 0x6b2   : > { %8305 = vst.msk [vmem:[%s17260_s17 + $0x178] sm:$0xff] %vm333_vm0, %v8177_v28  ;;  %v8051_v19 = vadd.f32 %v16998_v15, %v7923_v20  ;;  %v7491_v13 = vadd.f32 %v11391_v57, %v17235_v52  ;;  %v7485_v41 = vpop.f32.mrb[35].mxu0  ;;  %v19104_v20 = vld [vmem:[#allocation111_spill] sm:$0xff]  ;;  %v19105_v57 = vld [vmem:[#allocation145_spill] sm:$0xff] }
 0x6b3   : > { %8304 = vst.msk [vmem:[%s17260_s17 + $0x170] sm:$0xff] %vm333_vm0, %v8176_v54  ;;  %v8050_v45 = vadd.f32 %v7922_v10, %v19099_v6  ;;  %v7486_v29 = vadd.f32 %v17235_v52, %v7485_v41  ;;  %v12772_v41 = vld [vmem:[%s12908_s29 + $0x1b8] sm:$0xff] }
 0x6b4   : > { %v8179_v39 = vadd.f32 %v12766_v59, %v8051_v19  ;;  %v7925_v58 = vmax.f32 %v7491_v13, 0.0 }
 0x6b5   : > { %v8178_v21 = vadd.f32 %v12767_v40, %v8050_v45  ;;  %v7924_v5 = vmax.f32 %v7486_v29, 0.0  ;;  %v11394_v15 = vpop.f32.mrb[36].mxu0  ;;  %v12773_v29 = vld [vmem:[%s12908_s29 + $0x1b0] sm:$0xff] }
 0x6b6   : > { %8307 = vst.msk [vmem:[%s17260_s17 + $0x188] sm:$0xff] %vm333_vm0, %v8179_v39  ;;  %v8053_v47 = vadd.f32 %v19100_v24, %v7925_v58  ;;  %v7501_v11 = vadd.f32 %v11394_v15, %v17235_v52  ;;  %v7495_v7 = vpop.f32.mrb[37].mxu0  ;;  %v19106_v40 = vld [vmem:[#allocation8_spill] sm:$0xff]  ;;  %v19107_v24 = vld [vmem:[#allocation51_spill] sm:$0xff] }
 0x6b7   : > { %8306 = vst.msk [vmem:[%s17260_s17 + $0x180] sm:$0xff] %vm333_vm0, %v8178_v21  ;;  %v8052_v27 = vadd.f32 %v7924_v5, %v19101_v32  ;;  %v7496_v44 = vadd.f32 %v17235_v52, %v7495_v7  ;;  %v12774_v7 = vld [vmem:[%s12908_s29 + $0x1c8] sm:$0xff] }
 0x6b8   : > { %v8181_v49 = vadd.f32 %v12768_v17, %v8053_v47  ;;  %v7927_v23 = vmax.f32 %v7501_v11, 0.0 }
 0x6b9   : > { %v8180_v55 = vadd.f32 %v12769_v8, %v8052_v27  ;;  %v7926_v50 = vmax.f32 %v7496_v44, 0.0  ;;  %v11397_v46 = vpop.f32.mrb[38].mxu0  ;;  %v12775_v44 = vld [vmem:[%s12908_s29 + $0x1c0] sm:$0xff]  ;;  %v19108_v8 = vld [vmem:[#allocation68_spill] sm:$0xff] }
 0x6ba   : > { %8309 = vst.msk [vmem:[%s17260_s17 + $0x198] sm:$0xff] %vm333_vm0, %v8181_v49  ;;  %v8055_v60 = vadd.f32 %v19102_v9, %v7927_v23  ;;  %v7511_v56 = vadd.f32 %v11397_v46, %v17235_v52  ;;  %v7505_v4 = vpop.f32.mrb[39].mxu0  ;;  %v19109_v9 = vld [vmem:[#allocation116_spill] sm:$0xff] }
 0x6bb   : > { %8308 = vst.msk [vmem:[%s17260_s17 + $0x190] sm:$0xff] %vm333_vm0, %v8180_v55  ;;  %v8054_v51 = vadd.f32 %v7926_v50, %v19103_v31  ;;  %v7506_v22 = vadd.f32 %v17235_v52, %v7505_v4  ;;  %v12776_v4 = vld [vmem:[%s12908_s29 + $0x1d8] sm:$0xff] }
 0x6bc   : > { %v8183_v2 = vadd.f32 %v12770_v63, %v8055_v60  ;;  %v7929_v36 = vmax.f32 %v7511_v56, 0.0 }
 0x6bd   : > { %v8182_v61 = vadd.f32 %v12771_v18, %v8054_v51  ;;  %v7928_v3 = vmax.f32 %v7506_v22, 0.0  ;;  %v11400_v28 = vpop.f32.mrb[40].mxu0  ;;  %v12777_v22 = vld [vmem:[%s12908_s29 + $0x1d0] sm:$0xff]  ;;  %v19110_v18 = vld [vmem:[#allocation39_spill] sm:$0xff] }
 0x6be   : > { %8311 = vst.msk [vmem:[%s17260_s17 + $0x1a8] sm:$0xff] %vm333_vm0, %v8183_v2  ;;  %v8057_v53 = vadd.f32 %v19104_v20, %v7929_v36  ;;  %v7521_v54 = vadd.f32 %v11400_v28, %v17235_v52  ;;  %v7515_v10 = vpop.f32.mrb[41].mxu0  ;;  %v19111_v20 = vld [vmem:[#allocation42_spill] sm:$0xff] }
 0x6bf   : > { %8310 = vst.msk [vmem:[%s17260_s17 + $0x1a0] sm:$0xff] %vm333_vm0, %v8182_v61  ;;  %v8056_v19 = vadd.f32 %v7928_v3, %v19105_v57  ;;  %v7516_v13 = vadd.f32 %v17235_v52, %v7515_v10  ;;  %v12778_v10 = vld [vmem:[%s12908_s29 + $0x1e8] sm:$0xff] }
 0x6c0   : > { %v8185_v6 = vadd.f32 %v12772_v41, %v8057_v53  ;;  %v7931_v45 = vmax.f32 %v7521_v54, 0.0 }
 0x6c1   : > { %v8184_v59 = vadd.f32 %v12773_v29, %v8056_v19  ;;  %v7930_v39 = vmax.f32 %v7516_v13, 0.0  ;;  %v11403_v58 = vpop.f32.mrb[42].mxu0  ;;  %v12779_v13 = vld [vmem:[%s12908_s29 + $0x1e0] sm:$0xff] }
 0x6c2   : > { %8313 = vst.msk [vmem:[%s17260_s17 + $0x1b8] sm:$0xff] %vm333_vm0, %v8185_v6  ;;  %v8059_v21 = vadd.f32 %v19106_v40, %v7931_v45  ;;  %v7531_v5 = vadd.f32 %v11403_v58, %v17235_v52  ;;  %v7525_v15 = vpop.f32.mrb[43].mxu0  ;;  %v19112_v29 = vld [vmem:[#allocation10_spill] sm:$0xff]  ;;  %v19113_v40 = vld [vmem:[#allocation52_spill] sm:$0xff] }
 0x6c3   : > { %8312 = vst.msk [vmem:[%s17260_s17 + $0x1b0] sm:$0xff] %vm333_vm0, %v8184_v59  ;;  %v8058_v47 = vadd.f32 %v7930_v39, %v19107_v24  ;;  %v7526_v11 = vadd.f32 %v17235_v52, %v7525_v15  ;;  %v12780_v15 = vld [vmem:[%s12908_s29 + $0x1f8] sm:$0xff] }
 0x6c4   : > { %v8187_v32 = vadd.f32 %v12774_v7, %v8059_v21  ;;  %v7933_v27 = vmax.f32 %v7531_v5, 0.0 }
 0x6c5   : > { %v8186_v17 = vadd.f32 %v12775_v44, %v8058_v47  ;;  %v7932_v49 = vmax.f32 %v7526_v11, 0.0  ;;  %v11406_v23 = vpop.f32.mrb[44].mxu0  ;;  %v12781_v11 = vld [vmem:[%s12908_s29 + $0x1f0] sm:$0xff]  ;;  %v19114_v44 = vld [vmem:[#allocation146_spill] sm:$0xff] }
 0x6c6   : > { %8315 = vst.msk [vmem:[%s17260_s17 + $0x1c8] sm:$0xff] %vm333_vm0, %v8187_v32  ;;  %v8061_v55 = vadd.f32 %v19108_v8, %v7933_v27  ;;  %v7541_v50 = vadd.f32 %v11406_v23, %v17235_v52  ;;  %v7535_v46 = vpop.f32.mrb[45].mxu0  ;;  %v19115_v8 = vld [vmem:[#allocation6_spill] sm:$0xff] }
 0x6c7   : > { %8314 = vst.msk [vmem:[%s17260_s17 + $0x1c0] sm:$0xff] %vm333_vm0, %v8186_v17  ;;  %v8060_v60 = vadd.f32 %v7932_v49, %v19109_v9  ;;  %v7536_v56 = vadd.f32 %v17235_v52, %v7535_v46  ;;  %v12782_v46 = vld [vmem:[%s12908_s29 + $0x208] sm:$0xff] }
 0x6c8   : > { %v8189_v31 = vadd.f32 %v12776_v4, %v8061_v55  ;;  %v7935_v51 = vmax.f32 %v7541_v50, 0.0 }
 0x6c9   : > { %v8188_v63 = vadd.f32 %v12777_v22, %v8060_v60  ;;  %v7934_v2 = vmax.f32 %v7536_v56, 0.0  ;;  %v11409_v36 = vpop.f32.mrb[46].mxu0  ;;  %v12783_v56 = vld [vmem:[%s12908_s29 + $0x200] sm:$0xff]  ;;  %v19116_v22 = vld [vmem:[#allocation12_spill] sm:$0xff] }
 0x6ca   : > { %8317 = vst.msk [vmem:[%s17260_s17 + $0x1d8] sm:$0xff] %vm333_vm0, %v8189_v31  ;;  %v8063_v61 = vadd.f32 %v19110_v18, %v7935_v51  ;;  %v7551_v3 = vadd.f32 %v11409_v36, %v17235_v52  ;;  %v7545_v28 = vpop.f32.mrb[47].mxu0  ;;  %v19117_v18 = vld [vmem:[#allocation67_spill] sm:$0xff] }
 0x6cb   : > { %8316 = vst.msk [vmem:[%s17260_s17 + $0x1d0] sm:$0xff] %vm333_vm0, %v8188_v63  ;;  %v8062_v53 = vadd.f32 %v7934_v2, %v19111_v20  ;;  %v7546_v54 = vadd.f32 %v17235_v52, %v7545_v28  ;;  %v12784_v28 = vld [vmem:[%s12908_s29 + $0x218] sm:$0xff] }
 0x6cc   : > { %v8191_v57 = vadd.f32 %v12778_v10, %v8063_v61  ;;  %v7937_v19 = vmax.f32 %v7551_v3, 0.0 }
 0x6cd   : > { %v8190_v41 = vadd.f32 %v12779_v13, %v8062_v53  ;;  %v7936_v6 = vmax.f32 %v7546_v54, 0.0  ;;  %v11412_v45 = vpop.f32.mrb[48].mxu0  ;;  %v12785_v54 = vld [vmem:[%s12908_s29 + $0x210] sm:$0xff]  ;;  %v19118_v13 = vld [vmem:[#allocation14_spill] sm:$0xff] }
 0x6ce   : > { %8319 = vst.msk [vmem:[%s17260_s17 + $0x1e8] sm:$0xff] %vm333_vm0, %v8191_v57  ;;  %v8065_v59 = vadd.f32 %v19112_v29, %v7937_v19  ;;  %v7561_v39 = vadd.f32 %v11412_v45, %v17235_v52  ;;  %v7555_v58 = vpop.f32.mrb[49].mxu0  ;;  %v19119_v29 = vld [vmem:[#allocation148_spill] sm:$0xff] }
 0x6cf   : > { %8318 = vst.msk [vmem:[%s17260_s17 + $0x1e0] sm:$0xff] %vm333_vm0, %v8190_v41  ;;  %v8064_v21 = vadd.f32 %v7936_v6, %v19113_v40  ;;  %v7556_v5 = vadd.f32 %v17235_v52, %v7555_v58  ;;  %v12786_v58 = vld [vmem:[%s12908_s29 + $0x228] sm:$0xff] }
 0x6d0   : > { %v8193_v24 = vadd.f32 %v12780_v15, %v8065_v59  ;;  %v7939_v47 = vmax.f32 %v7561_v39, 0.0 }
 0x6d1   : > { %v8192_v7 = vadd.f32 %v12781_v11, %v8064_v21  ;;  %v7938_v32 = vmax.f32 %v7556_v5, 0.0  ;;  %v11415_v27 = vpop.f32.mrb[50].mxu0  ;;  %v12787_v5 = vld [vmem:[%s12908_s29 + $0x220] sm:$0xff]  ;;  %v19120_v11 = vld [vmem:[#allocation57_spill] sm:$0xff] }
 0x6d2   : > { %8321 = vst.msk [vmem:[%s17260_s17 + $0x1f8] sm:$0xff] %vm333_vm0, %v8193_v24  ;;  %v8067_v17 = vadd.f32 %v19114_v44, %v7939_v47  ;;  %v7571_v49 = vadd.f32 %v11415_v27, %v17235_v52  ;;  %v7565_v23 = vpop.f32.mrb[51].mxu0  ;;  %v19121_v44 = vld [vmem:[#allocation61_spill] sm:$0xff] }
 0x6d3   : > { %8320 = vst.msk [vmem:[%s17260_s17 + $0x1f0] sm:$0xff] %vm333_vm0, %v8192_v7  ;;  %v8066_v55 = vadd.f32 %v7938_v32, %v19115_v8  ;;  %v7566_v50 = vadd.f32 %v17235_v52, %v7565_v23  ;;  %v12788_v23 = vld [vmem:[%s12908_s29 + $0x238] sm:$0xff] }
 0x6d4   : > { %v8195_v9 = vadd.f32 %v12782_v46, %v8067_v17  ;;  %v7941_v60 = vmax.f32 %v7571_v49, 0.0 }
 0x6d5   : > { %v8194_v4 = vadd.f32 %v12783_v56, %v8066_v55  ;;  %v7940_v31 = vmax.f32 %v7566_v50, 0.0  ;;  %v11418_v51 = vpop.f32.mrb[52].mxu0  ;;  %v12789_v50 = vld [vmem:[%s12908_s29 + $0x230] sm:$0xff]  ;;  %v19122_v56 = vld [vmem:[#allocation65_spill] sm:$0xff] }
 0x6d6   : > { %8323 = vst.msk [vmem:[%s17260_s17 + $0x208] sm:$0xff] %vm333_vm0, %v8195_v9  ;;  %v8069_v63 = vadd.f32 %v19116_v22, %v7941_v60  ;;  %v7581_v2 = vadd.f32 %v11418_v51, %v17235_v52  ;;  %v7575_v36 = vpop.f32.mrb[53].mxu0  ;;  %v19123_v22 = vld [vmem:[#allocation16_spill] sm:$0xff] }
 0x6d7   : > { %8322 = vst.msk [vmem:[%s17260_s17 + $0x200] sm:$0xff] %vm333_vm0, %v8194_v4  ;;  %v8068_v61 = vadd.f32 %v7940_v31, %v19117_v18  ;;  %v7576_v3 = vadd.f32 %v17235_v52, %v7575_v36  ;;  %v12790_v36 = vld [vmem:[%s12908_s29 + $0x248] sm:$0xff] }
 0x6d8   : > { %v8197_v20 = vadd.f32 %v12784_v28, %v8069_v63  ;;  %v7943_v53 = vmax.f32 %v7581_v2, 0.0 }
 0x6d9   : > { %v8196_v10 = vadd.f32 %v12785_v54, %v8068_v61  ;;  %v7942_v57 = vmax.f32 %v7576_v3, 0.0  ;;  %v11421_v19 = vpop.f32.mrb[54].mxu0  ;;  %v12791_v3 = vld [vmem:[%s12908_s29 + $0x240] sm:$0xff] }
 0x6da   : > { %8325 = vst.msk [vmem:[%s17260_s17 + $0x218] sm:$0xff] %vm333_vm0, %v8197_v20  ;;  %v8071_v41 = vadd.f32 %v19118_v13, %v7943_v53  ;;  %v7591_v6 = vadd.f32 %v11421_v19, %v17235_v52  ;;  %v7585_v45 = vpop.f32.mrb[55].mxu0  ;;  %v19124_v54 = vld [vmem:[#allocation18_spill] sm:$0xff]  ;;  %v19125_v13 = vld [vmem:[#allocation19_spill] sm:$0xff] }
 0x6db   : > { %8324 = vst.msk [vmem:[%s17260_s17 + $0x210] sm:$0xff] %vm333_vm0, %v8196_v10  ;;  %v8070_v59 = vadd.f32 %v7942_v57, %v19119_v29  ;;  %v7586_v39 = vadd.f32 %v17235_v52, %v7585_v45  ;;  %v12792_v45 = vld [vmem:[%s12908_s29 + $0x258] sm:$0xff] }
 0x6dc   : > { %v8199_v40 = vadd.f32 %v12786_v58, %v8071_v41  ;;  %v7945_v21 = vmax.f32 %v7591_v6, 0.0 }
 0x6dd   : > { %v8198_v15 = vadd.f32 %v12787_v5, %v8070_v59  ;;  %v7944_v24 = vmax.f32 %v7586_v39, 0.0  ;;  %v11424_v47 = vpop.f32.mrb[56].mxu0  ;;  %v12793_v39 = vld [vmem:[%s12908_s29 + $0x250] sm:$0xff]  ;;  %v19126_v5 = vld [vmem:[#allocation122_spill] sm:$0xff] }
 0x6de   : > { %8327 = vst.msk [vmem:[%s17260_s17 + $0x228] sm:$0xff] %vm333_vm0, %v8199_v40  ;;  %v8073_v7 = vadd.f32 %v19120_v11, %v7945_v21  ;;  %v7601_v32 = vadd.f32 %v11424_v47, %v17235_v52  ;;  %v7595_v27 = vpop.f32.mrb[57].mxu0  ;;  %v19127_v11 = vld [vmem:[#allocation104_spill] sm:$0xff] }
 0x6df   : > { %8326 = vst.msk [vmem:[%s17260_s17 + $0x220] sm:$0xff] %vm333_vm0, %v8198_v15  ;;  %v8072_v17 = vadd.f32 %v7944_v24, %v19121_v44  ;;  %v7596_v49 = vadd.f32 %v17235_v52, %v7595_v27  ;;  %v12795_v44 = vld [vmem:[%s12908_s29 + $0x268] sm:$0xff] }
 0x6e0   : > { %v8201_v8 = vadd.f32 %v12788_v23, %v8073_v7  ;;  %v7947_v55 = vmax.f32 %v7601_v32, 0.0  ;;  %v17718_v32 = vld [vmem:[%s17980_s2] ss:$0 sm:$0xff] }
 0x6e1   : > { %v8200_v46 = vadd.f32 %v12789_v50, %v8072_v17  ;;  %v7946_v9 = vmax.f32 %v7596_v49, 0.0  ;;  %v11427_v60 = vpop.f32.mrb[58].mxu0  ;;  %v12796_v23 = vld [vmem:[%s12908_s29 + $0x260] sm:$0xff]  ;;  %v19128_v50 = vld [vmem:[#allocation128_spill] sm:$0xff] }
 0x6e2   : > { %8329 = vst.msk [vmem:[%s17260_s17 + $0x238] sm:$0xff] %vm333_vm0, %v8201_v8  ;;  %v8075_v4 = vadd.f32 %v19122_v56, %v7947_v55  ;;  %v7611_v31 = vadd.f32 %v11427_v60, %v17235_v52  ;;  %v7605_v51 = vpop.f32.mrb[59].mxu0  ;;  %v19129_v56 = vld [vmem:[#allocation106_spill] sm:$0xff] }
 0x6e3   : > { %8328 = vst.msk [vmem:[%s17260_s17 + $0x230] sm:$0xff] %vm333_vm0, %v8200_v46  ;;  %v8074_v63 = vadd.f32 %v7946_v9, %v19123_v22  ;;  %v7606_v2 = vadd.f32 %v17235_v52, %v7605_v51  ;;  %v12797_v51 = vld [vmem:[%s12908_s29 + $0x278] sm:$0xff] }
 0x6e4   : > { %v8203_v18 = vadd.f32 %v12790_v36, %v8075_v4  ;;  %v7949_v61 = vmax.f32 %v7611_v31, 0.0 }
 0x6e5   : > { %v8202_v28 = vadd.f32 %v12791_v3, %v8074_v63  ;;  %v7948_v20 = vmax.f32 %v7606_v2, 0.0  ;;  %v11430_v53 = vpop.f32.mrb[60].mxu0  ;;  %v12798_v2 = vld [vmem:[%s12908_s29 + $0x270] sm:$0xff] }
 0x6e6   : > { %8331 = vst.msk [vmem:[%s17260_s17 + $0x248] sm:$0xff] %vm333_vm0, %v8203_v18  ;;  %v8077_v10 = vadd.f32 %v19124_v54, %v7949_v61  ;;  %v7621_v57 = vadd.f32 %v11430_v53, %v17235_v52  ;;  %v7615_v19 = vpop.f32.mrb[61].mxu0  ;;  %v19130_v3 = vld [vmem:[#allocation108_spill] sm:$0xff]  ;;  %v19131_v54 = vld [vmem:[#allocation110_spill] sm:$0xff] }
 0x6e7   : > { %8330 = vst.msk [vmem:[%s17260_s17 + $0x240] sm:$0xff] %vm333_vm0, %v8202_v28  ;;  %v8076_v41 = vadd.f32 %v7948_v20, %v19125_v13  ;;  %v7616_v6 = vadd.f32 %v17235_v52, %v7615_v19  ;;  %v12799_v19 = vld [vmem:[%s12908_s29 + $0x288] sm:$0xff] }
 0x6e8   : > { %v8205_v29 = vadd.f32 %v12792_v45, %v8077_v10  ;;  %v7951_v59 = vmax.f32 %v7621_v57, 0.0 }
 0x6e9   : > { %v8204_v58 = vadd.f32 %v12793_v39, %v8076_v41  ;;  %v7950_v40 = vmax.f32 %v7616_v6, 0.0  ;;  %v11433_v21 = vpop.f32.mrb[62].mxu0  ;;  %v12800_v6 = vld [vmem:[%s12908_s29 + $0x280] sm:$0xff]  ;;  %v19132_v39 = vld [vmem:[#allocation133_spill] sm:$0xff] }
 0x6ea   : > { %8333 = vst.msk [vmem:[%s17260_s17 + $0x258] sm:$0xff] %vm333_vm0, %v8205_v29  ;;  %v8079_v15 = vadd.f32 %v19126_v5, %v7951_v59  ;;  %v7631_v24 = vadd.f32 %v11433_v21, %v17235_v52  ;;  %v7625_v47 = vpop.f32.mrb[63].mxu0  ;;  %v19133_v5 = vld [vmem:[#allocation112_spill] sm:$0xff] }
 0x6eb   : > { %8332 = vst.msk [vmem:[%s17260_s17 + $0x250] sm:$0xff] %vm333_vm0, %v8204_v58  ;;  %v8078_v7 = vadd.f32 %v7950_v40, %v19127_v11  ;;  %v7626_v27 = vadd.f32 %v17718_v32, %v7625_v47  ;;  %v12801_v47 = vld [vmem:[%s12908_s29 + $0x298] sm:$0xff] }
 0x6ec   : > { %v8207_v17 = vadd.f32 %v12795_v44, %v8079_v15  ;;  %v7953_v49 = vmax.f32 %v7631_v24, 0.0 }
 0x6ed   : > { %v8206_v52 = vadd.f32 %v12796_v23, %v8078_v7  ;;  %v7952_v8 = vmax.f32 %v7626_v27, 0.0  ;;  %v11436_v55 = vpop.f32.mrb[64].mxu0  ;;  %v12802_v27 = vld [vmem:[%s12908_s29 + $0x290] sm:$0xff]  ;;  %v19134_v23 = vld [vmem:[#allocation118_spill] sm:$0xff] }
 0x6ee   : > { %8335 = vst.msk [vmem:[%s17260_s17 + $0x268] sm:$0xff] %vm333_vm0, %v8207_v17  ;;  %v8081_v46 = vadd.f32 %v19128_v50, %v7953_v49  ;;  %v7641_v9 = vadd.f32 %v17718_v32, %v11436_v55  ;;  %v7635_v60 = vpop.f32.mrb[65].mxu0  ;;  %v19135_v50 = vld [vmem:[#allocation93_spill] sm:$0xff] }
 0x6ef   : > { %8334 = vst.msk [vmem:[%s17260_s17 + $0x260] sm:$0xff] %vm333_vm0, %v8206_v52  ;;  %v8080_v4 = vadd.f32 %v7952_v8, %v19129_v56  ;;  %v7636_v31 = vadd.f32 %v17718_v32, %v7635_v60  ;;  %v12803_v60 = vld [vmem:[%s12908_s29 + $0x2a8] sm:$0xff] }
 0x6f0   : > { %v8209_v22 = vadd.f32 %v12797_v51, %v8081_v46  ;;  %v7955_v63 = vmax.f32 %v7641_v9, 0.0 }
 0x6f1   : > { %v8208_v36 = vadd.f32 %v12798_v2, %v8080_v4  ;;  %v7954_v18 = vmax.f32 %v7636_v31, 0.0  ;;  %v11439_v61 = vpop.f32.mrb[66].mxu0  ;;  %v12804_v31 = vld [vmem:[%s12908_s29 + $0x2a0] sm:$0xff]  ;;  %v19136_v2 = vld [vmem:[#allocation139_spill] sm:$0xff] }
 0x6f2   : > { %8337 = vst.msk [vmem:[%s17260_s17 + $0x278] sm:$0xff] %vm333_vm0, %v8209_v22  ;;  %v8083_v28 = vadd.f32 %v19130_v3, %v7955_v63  ;;  %v7651_v20 = vadd.f32 %v17718_v32, %v11439_v61  ;;  %v7645_v53 = vpop.f32.mrb[67].mxu0  ;;  %v19137_v3 = vld [vmem:[#allocation142_spill] sm:$0xff] }
 0x6f3   : > { %8336 = vst.msk [vmem:[%s17260_s17 + $0x270] sm:$0xff] %vm333_vm0, %v8208_v36  ;;  %v8082_v10 = vadd.f32 %v7954_v18, %v19131_v54  ;;  %v7646_v57 = vadd.f32 %v17718_v32, %v7645_v53  ;;  %v12805_v53 = vld [vmem:[%s12908_s29 + $0x2b8] sm:$0xff] }
 0x6f4   : > { %v8211_v13 = vadd.f32 %v12799_v19, %v8083_v28  ;;  %v7957_v41 = vmax.f32 %v7651_v20, 0.0 }
 0x6f5   : > { %v8210_v45 = vadd.f32 %v12800_v6, %v8082_v10  ;;  %v7956_v29 = vmax.f32 %v7646_v57, 0.0  ;;  %v11442_v59 = vpop.f32.mrb[68].mxu0  ;;  %v12806_v57 = vld [vmem:[%s12908_s29 + $0x2b0] sm:$0xff]  ;;  %v19138_v6 = vld [vmem:[#allocation29_spill] sm:$0xff] }
 0x6f6   : > { %8339 = vst.msk [vmem:[%s17260_s17 + $0x288] sm:$0xff] %vm333_vm0, %v8211_v13  ;;  %v8085_v58 = vadd.f32 %v19132_v39, %v7957_v41  ;;  %v7661_v40 = vadd.f32 %v17718_v32, %v11442_v59  ;;  %v7655_v21 = vpop.f32.mrb[69].mxu0  ;;  %v19139_v39 = vld [vmem:[#allocation80_spill] sm:$0xff] }
 0x6f7   : > { %8338 = vst.msk [vmem:[%s17260_s17 + $0x280] sm:$0xff] %vm333_vm0, %v8210_v45  ;;  %v8084_v15 = vadd.f32 %v7956_v29, %v19133_v5  ;;  %v7656_v24 = vadd.f32 %v17718_v32, %v7655_v21  ;;  %v12807_v21 = vld [vmem:[%s12908_s29 + $0x2c8] sm:$0xff] }
 0x6f8   : > { %v8213_v11 = vadd.f32 %v12801_v47, %v8085_v58  ;;  %v7959_v7 = vmax.f32 %v7661_v40, 0.0 }
 0x6f9   : > { %v8212_v44 = vadd.f32 %v12802_v27, %v8084_v15  ;;  %v7958_v17 = vmax.f32 %v7656_v24, 0.0  ;;  %v11445_v49 = vpop.f32.mrb[70].mxu0  ;;  %v12808_v24 = vld [vmem:[%s12908_s29 + $0x2c0] sm:$0xff]  ;;  %v19140_v27 = vld [vmem:[#allocation45_spill] sm:$0xff] }
 0x6fa   : > { %8341 = vst.msk [vmem:[%s17260_s17 + $0x298] sm:$0xff] %vm333_vm0, %v8213_v11  ;;  %v8087_v52 = vadd.f32 %v19134_v23, %v7959_v7  ;;  %v7671_v8 = vadd.f32 %v17718_v32, %v11445_v49  ;;  %v7665_v55 = vpop.f32.mrb[71].mxu0  ;;  %v19141_v23 = vld [vmem:[#allocation91_spill] sm:$0xff] }
 0x6fb   : > { %8340 = vst.msk [vmem:[%s17260_s17 + $0x290] sm:$0xff] %vm333_vm0, %v8212_v44  ;;  %v8086_v46 = vadd.f32 %v7958_v17, %v19135_v50  ;;  %v7666_v9 = vadd.f32 %v17718_v32, %v7665_v55  ;;  %v12809_v55 = vld [vmem:[%s12908_s29 + $0x2d8] sm:$0xff] }
 0x6fc   : > { %v8215_v56 = vadd.f32 %v12803_v60, %v8087_v52  ;;  %v7961_v4 = vmax.f32 %v7671_v8, 0.0 }
 0x6fd   : > { %v8214_v51 = vadd.f32 %v12804_v31, %v8086_v46  ;;  %v7960_v22 = vmax.f32 %v7666_v9, 0.0  ;;  %v11448_v63 = vpop.f32.mrb[72].mxu0  ;;  %v12810_v9 = vld [vmem:[%s12908_s29 + $0x2d0] sm:$0xff]  ;;  %v19142_v31 = vld [vmem:[#allocation30_spill] sm:$0xff] }
 0x6fe   : > { %8343 = vst.msk [vmem:[%s17260_s17 + $0x2a8] sm:$0xff] %vm333_vm0, %v8215_v56  ;;  %v8089_v36 = vadd.f32 %v19136_v2, %v7961_v4  ;;  %v7681_v18 = vadd.f32 %v17718_v32, %v11448_v63  ;;  %v7675_v61 = vpop.f32.mrb[73].mxu0  ;;  %v19143_v2 = vld [vmem:[#allocation53_spill] sm:$0xff] }
 0x6ff   : > { %8342 = vst.msk [vmem:[%s17260_s17 + $0x2a0] sm:$0xff] %vm333_vm0, %v8214_v51  ;;  %v8088_v28 = vadd.f32 %v7960_v22, %v19137_v3  ;;  %v7676_v20 = vadd.f32 %v17718_v32, %v7675_v61  ;;  %v12811_v61 = vld [vmem:[%s12908_s29 + $0x2e8] sm:$0xff] }
 0x700   : > { %v8217_v54 = vadd.f32 %v12805_v53, %v8089_v36  ;;  %v7963_v10 = vmax.f32 %v7681_v18, 0.0 }
 0x701   : > { %v8216_v19 = vadd.f32 %v12806_v57, %v8088_v28  ;;  %v7962_v13 = vmax.f32 %v7676_v20, 0.0  ;;  %v11451_v41 = vpop.f32.mrb[74].mxu0  ;;  %v12812_v20 = vld [vmem:[%s12908_s29 + $0x2e0] sm:$0xff]  ;;  %v19144_v57 = vld [vmem:[#allocation83_spill] sm:$0xff] }
 0x702   : > { %8345 = vst.msk [vmem:[%s17260_s17 + $0x2b8] sm:$0xff] %vm333_vm0, %v8217_v54  ;;  %v8091_v45 = vadd.f32 %v19138_v6, %v7963_v10  ;;  %v7691_v29 = vadd.f32 %v17718_v32, %v11451_v41  ;;  %v7685_v59 = vpop.f32.mrb[75].mxu0  ;;  %v19145_v6 = vld [vmem:[#allocation89_spill] sm:$0xff] }
 0x703   : > { %8344 = vst.msk [vmem:[%s17260_s17 + $0x2b0] sm:$0xff] %vm333_vm0, %v8216_v19  ;;  %v8090_v58 = vadd.f32 %v7962_v13, %v19139_v39  ;;  %v7686_v40 = vadd.f32 %v17718_v32, %v7685_v59  ;;  %v12813_v59 = vld [vmem:[%s12908_s29 + $0x2f8] sm:$0xff] }
 0x704   : > { %v8219_v5 = vadd.f32 %v12807_v21, %v8091_v45  ;;  %v7965_v15 = vmax.f32 %v7691_v29, 0.0 }
 0x705   : > { %v8218_v47 = vadd.f32 %v12808_v24, %v8090_v58  ;;  %v7964_v11 = vmax.f32 %v7686_v40, 0.0  ;;  %v11454_v7 = vpop.f32.mrb[76].mxu0  ;;  %v12814_v40 = vld [vmem:[%s12908_s29 + $0x2f0] sm:$0xff]  ;;  %v19146_v24 = vld [vmem:[#allocation58_spill] sm:$0xff] }
 0x706   : > { %8347 = vst.msk [vmem:[%s17260_s17 + $0x2c8] sm:$0xff] %vm333_vm0, %v8219_v5  ;;  %v8093_v44 = vadd.f32 %v19140_v27, %v7965_v15  ;;  %v7701_v17 = vadd.f32 %v17718_v32, %v11454_v7  ;;  %v7695_v49 = vpop.f32.mrb[77].mxu0  ;;  %v19147_v27 = vld [vmem:[#allocation47_spill] sm:$0xff] }
 0x707   : > { %8346 = vst.msk [vmem:[%s17260_s17 + $0x2c0] sm:$0xff] %vm333_vm0, %v8218_v47  ;;  %v8092_v52 = vadd.f32 %v7964_v11, %v19141_v23  ;;  %v7696_v8 = vadd.f32 %v17718_v32, %v7695_v49  ;;  %v12815_v49 = vld [vmem:[%s12908_s29 + $0x308] sm:$0xff] }
 0x708   : > { %v8221_v50 = vadd.f32 %v12809_v55, %v8093_v44  ;;  %v7967_v46 = vmax.f32 %v7701_v17, 0.0 }
 0x709   : > { %v8220_v60 = vadd.f32 %v12810_v9, %v8092_v52  ;;  %v7966_v56 = vmax.f32 %v7696_v8, 0.0  ;;  %v11457_v4 = vpop.f32.mrb[78].mxu0  ;;  %v12816_v8 = vld [vmem:[%s12908_s29 + $0x300] sm:$0xff]  ;;  %v19148_v9 = vld [vmem:[#allocation69_spill] sm:$0xff] }
 0x70a   : > { %8349 = vst.msk [vmem:[%s17260_s17 + $0x2d8] sm:$0xff] %vm333_vm0, %v8221_v50  ;;  %v8095_v51 = vadd.f32 %v19142_v31, %v7967_v46  ;;  %v7711_v22 = vadd.f32 %v17718_v32, %v11457_v4  ;;  %v7705_v63 = vpop.f32.mrb[79].mxu0  ;;  %v19149_v31 = vld [vmem:[#allocation98_spill] sm:$0xff] }
 0x70b   : > { %8348 = vst.msk [vmem:[%s17260_s17 + $0x2d0] sm:$0xff] %vm333_vm0, %v8220_v60  ;;  %v8094_v36 = vadd.f32 %v7966_v56, %v19143_v2  ;;  %v7706_v18 = vadd.f32 %v17718_v32, %v7705_v63  ;;  %v12817_v63 = vld [vmem:[%s12908_s29 + $0x318] sm:$0xff] }
 0x70c   : > { %v8223_v3 = vadd.f32 %v12811_v61, %v8095_v51  ;;  %v7969_v28 = vmax.f32 %v7711_v22, 0.0 }
 0x70d   : > { %v8222_v53 = vadd.f32 %v12812_v20, %v8094_v36  ;;  %v7968_v54 = vmax.f32 %v7706_v18, 0.0  ;;  %v11460_v10 = vpop.f32.mrb[80].mxu0  ;;  %v12818_v18 = vld [vmem:[%s12908_s29 + $0x310] sm:$0xff] }
 0x70e   : > { %8351 = vst.msk [vmem:[%s17260_s17 + $0x2e8] sm:$0xff] %vm333_vm0, %v8223_v3  ;;  %v8097_v19 = vadd.f32 %v19144_v57, %v7969_v28  ;;  %v7721_v13 = vadd.f32 %v17718_v32, %v11460_v10  ;;  %v7715_v41 = vpop.f32.mrb[81].mxu0  ;;  %v19150_v20 = vld [vmem:[#allocation56_spill] sm:$0xff]  ;;  %v19151_v57 = vld [vmem:[#allocation54_spill] sm:$0xff] }
 0x70f   : > { %8350 = vst.msk [vmem:[%s17260_s17 + $0x2e0] sm:$0xff] %vm333_vm0, %v8222_v53  ;;  %v8096_v45 = vadd.f32 %v7968_v54, %v19145_v6  ;;  %v7716_v29 = vadd.f32 %v17718_v32, %v7715_v41  ;;  %v12819_v41 = vld [vmem:[%s12908_s29 + $0x328] sm:$0xff] }
 0x710   : > { %v8225_v39 = vadd.f32 %v12813_v59, %v8097_v19  ;;  %v7971_v58 = vmax.f32 %v7721_v13, 0.0 }
 0x711   : > { %v8224_v21 = vadd.f32 %v12814_v40, %v8096_v45  ;;  %v7970_v5 = vmax.f32 %v7716_v29, 0.0  ;;  %v11463_v15 = vpop.f32.mrb[82].mxu0  ;;  %v12820_v29 = vld [vmem:[%s12908_s29 + $0x320] sm:$0xff]  ;;  %v19152_v40 = vld [vmem:[#allocation71_spill] sm:$0xff] }
 0x712   : > { %8353 = vst.msk [vmem:[%s17260_s17 + $0x2f8] sm:$0xff] %vm333_vm0, %v8225_v39  ;;  %v8099_v47 = vadd.f32 %v19146_v24, %v7971_v58  ;;  %v7731_v11 = vadd.f32 %v17718_v32, %v11463_v15  ;;  %v7725_v7 = vpop.f32.mrb[83].mxu0  ;;  %v19153_v24 = vld [vmem:[#allocation81_spill] sm:$0xff] }
 0x713   : > { %8352 = vst.msk [vmem:[%s17260_s17 + $0x2f0] sm:$0xff] %vm333_vm0, %v8224_v21  ;;  %v8098_v44 = vadd.f32 %v7970_v5, %v19147_v27  ;;  %v7726_v17 = vadd.f32 %v17718_v32, %v7725_v7  ;;  %v12821_v7 = vld [vmem:[%s12908_s29 + $0x338] sm:$0xff] }
 0x714   : > { %v8227_v23 = vadd.f32 %v12815_v49, %v8099_v47  ;;  %v7973_v52 = vmax.f32 %v7731_v11, 0.0 }
 0x715   : > { %v8226_v55 = vadd.f32 %v12816_v8, %v8098_v44  ;;  %v7972_v50 = vmax.f32 %v7726_v17, 0.0  ;;  %v11466_v46 = vpop.f32.mrb[84].mxu0  ;;  %v12822_v17 = vld [vmem:[%s12908_s29 + $0x330] sm:$0xff]  ;;  %v19154_v8 = vld [vmem:[#allocation82_spill] sm:$0xff] }
 0x716   : > { %8355 = vst.msk [vmem:[%s17260_s17 + $0x308] sm:$0xff] %vm333_vm0, %v8227_v23  ;;  %v8101_v60 = vadd.f32 %v19148_v9, %v7973_v52  ;;  %v7741_v56 = vadd.f32 %v17718_v32, %v11466_v46  ;;  %v7735_v4 = vpop.f32.mrb[85].mxu0  ;;  %v19155_v9 = vld [vmem:[#allocation23_spill] sm:$0xff] }
 0x717   : > { %8354 = vst.msk [vmem:[%s17260_s17 + $0x300] sm:$0xff] %vm333_vm0, %v8226_v55  ;;  %v8100_v51 = vadd.f32 %v7972_v50, %v19149_v31  ;;  %v7736_v22 = vadd.f32 %v17718_v32, %v7735_v4  ;;  %v12823_v4 = vld [vmem:[%s12908_s29 + $0x348] sm:$0xff] }
 0x718   : > { %v8229_v2 = vadd.f32 %v12817_v63, %v8101_v60  ;;  %v7975_v36 = vmax.f32 %v7741_v56, 0.0 }
 0x719   : > { %v8228_v61 = vadd.f32 %v12818_v18, %v8100_v51  ;;  %v7974_v3 = vmax.f32 %v7736_v22, 0.0  ;;  %v11469_v28 = vpop.f32.mrb[86].mxu0  ;;  %v12824_v22 = vld [vmem:[%s12908_s29 + $0x340] sm:$0xff]  ;;  %v19156_v18 = vld [vmem:[#allocation24_spill] sm:$0xff] }
 0x71a   : > { %8357 = vst.msk [vmem:[%s17260_s17 + $0x318] sm:$0xff] %vm333_vm0, %v8229_v2  ;;  %v8103_v53 = vadd.f32 %v19150_v20, %v7975_v36  ;;  %v7751_v54 = vadd.f32 %v17718_v32, %v11469_v28  ;;  %v7745_v10 = vpop.f32.mrb[87].mxu0  ;;  %v19157_v20 = vld [vmem:[#allocation62_spill] sm:$0xff] }
 0x71b   : > { %8356 = vst.msk [vmem:[%s17260_s17 + $0x310] sm:$0xff] %vm333_vm0, %v8228_v61  ;;  %v8102_v19 = vadd.f32 %v7974_v3, %v19151_v57  ;;  %v7746_v13 = vadd.f32 %v17718_v32, %v7745_v10  ;;  %v12825_v10 = vld [vmem:[%s12908_s29 + $0x358] sm:$0xff] }
 0x71c   : > { %v8231_v6 = vadd.f32 %v12819_v41, %v8103_v53  ;;  %v7977_v45 = vmax.f32 %v7751_v54, 0.0 }
 0x71d   : > { %v8230_v59 = vadd.f32 %v12820_v29, %v8102_v19  ;;  %v7976_v39 = vmax.f32 %v7746_v13, 0.0  ;;  %v11472_v58 = vpop.f32.mrb[88].mxu0  ;;  %v12826_v13 = vld [vmem:[%s12908_s29 + $0x350] sm:$0xff]  ;;  %v19158_v29 = vld [vmem:[#allocation73_spill] sm:$0xff] }
 0x71e   : > { %8359 = vst.msk [vmem:[%s17260_s17 + $0x328] sm:$0xff] %vm333_vm0, %v8231_v6  ;;  %v8105_v21 = vadd.f32 %v19152_v40, %v7977_v45  ;;  %v7761_v5 = vadd.f32 %v17718_v32, %v11472_v58  ;;  %v7755_v15 = vpop.f32.mrb[89].mxu0  ;;  %v19159_v40 = vld [vmem:[#allocation27_spill] sm:$0xff] }
 0x71f   : > { %8358 = vst.msk [vmem:[%s17260_s17 + $0x320] sm:$0xff] %vm333_vm0, %v8230_v59  ;;  %v8104_v47 = vadd.f32 %v7976_v39, %v19153_v24  ;;  %v7756_v11 = vadd.f32 %v17718_v32, %v7755_v15  ;;  %v12827_v15 = vld [vmem:[%s12908_s29 + $0x368] sm:$0xff] }
 0x720   : > { %v8233_v27 = vadd.f32 %v12821_v7, %v8105_v21  ;;  %v7979_v44 = vmax.f32 %v7761_v5, 0.0 }
 0x721   : > { %v8232_v49 = vadd.f32 %v12822_v17, %v8104_v47  ;;  %v7978_v23 = vmax.f32 %v7756_v11, 0.0  ;;  %v11475_v52 = vpop.f32.mrb[90].mxu0  ;;  %v12828_v11 = vld [vmem:[%s12908_s29 + $0x360] sm:$0xff] }
 0x722   : > { %8361 = vst.msk [vmem:[%s17260_s17 + $0x338] sm:$0xff] %vm333_vm0, %v8233_v27  ;;  %v8107_v55 = vadd.f32 %v19154_v8, %v7979_v44  ;;  %v7771_v50 = vadd.f32 %v17718_v32, %v11475_v52  ;;  %v7765_v46 = vpop.f32.mrb[91].mxu0  ;;  %v19160_v52 = vld [vmem:[#allocation31_spill] sm:$0xff] }
 0x723   : > { %8360 = vst.msk [vmem:[%s17260_s17 + $0x330] sm:$0xff] %vm333_vm0, %v8232_v49  ;;  %v8106_v60 = vadd.f32 %v7978_v23, %v19155_v9  ;;  %v7766_v56 = vadd.f32 %v17718_v32, %v7765_v46 }
 0x724   : > { %v8235_v31 = vadd.f32 %v12823_v4, %v8107_v55  ;;  %v7981_v51 = vmax.f32 %v7771_v50, 0.0  ;;  %v12829_v50 = vld [vmem:[%s12908_s29 + $0x378] sm:$0xff] }
 0x725   : > { %v8234_v63 = vadd.f32 %v12824_v22, %v8106_v60  ;;  %v7980_v2 = vmax.f32 %v7766_v56, 0.0  ;;  %v11478_v36 = vpop.f32.mrb[92].mxu0  ;;  %v12830_v60 = vld [vmem:[%s12908_s29 + $0x370] sm:$0xff] }
 0x726   : > { %8363 = vst.msk [vmem:[%s17260_s17 + $0x348] sm:$0xff] %vm333_vm0, %v8235_v31  ;;  %v8109_v61 = vadd.f32 %v19156_v18, %v7981_v51  ;;  %v7781_v3 = vadd.f32 %v17718_v32, %v11478_v36  ;;  %v7775_v28 = vpop.f32.mrb[93].mxu0  ;;  %v12831_v36 = vld [vmem:[%s12908_s29 + $0x388] sm:$0xff] }
 0x727   : > { %8362 = vst.msk [vmem:[%s17260_s17 + $0x340] sm:$0xff] %vm333_vm0, %v8234_v63  ;;  %v8108_v53 = vadd.f32 %v7980_v2, %v19157_v20  ;;  %v7776_v54 = vadd.f32 %v17718_v32, %v7775_v28 }
 0x728   : > { %v8237_v57 = vadd.f32 %v12825_v10, %v8109_v61  ;;  %v7983_v19 = vmax.f32 %v7781_v3, 0.0  ;;  %v12832_v3 = vld [vmem:[%s12908_s29 + $0x380] sm:$0xff] }
 0x729   : > { %v8236_v41 = vadd.f32 %v12826_v13, %v8108_v53  ;;  %v7982_v6 = vmax.f32 %v7776_v54, 0.0  ;;  %v11481_v45 = vpop.f32.mrb[94].mxu0 }
 0x72a   : > { %8365 = vst.msk [vmem:[%s17260_s17 + $0x358] sm:$0xff] %vm333_vm0, %v8237_v57  ;;  %v8111_v59 = vadd.f32 %v19158_v29, %v7983_v19  ;;  %v7791_v39 = vadd.f32 %v17718_v32, %v11481_v45  ;;  %v7785_v58 = vpop.f32.mrb[95].mxu0  ;;  %v12833_v19 = vld [vmem:[%s12908_s29 + $0x398] sm:$0xff] }
 0x72b   : > { %8364 = vst.msk [vmem:[%s17260_s17 + $0x350] sm:$0xff] %vm333_vm0, %v8236_v41  ;;  %v8110_v21 = vadd.f32 %v7982_v6, %v19159_v40  ;;  %v7786_v5 = vadd.f32 %v17718_v32, %v7785_v58  ;;  %v12834_v6 = vld [vmem:[%s12908_s29 + $0x390] sm:$0xff] }
 0x72c   : > { %v8239_v24 = vadd.f32 %v12827_v15, %v8111_v59  ;;  %v7985_v47 = vmax.f32 %v7791_v39, 0.0 }
 0x72d   : > { %v8238_v7 = vadd.f32 %v12828_v11, %v8110_v21  ;;  %v7984_v27 = vmax.f32 %v7786_v5, 0.0  ;;  %v11484_v44 = vpop.f32.mrb[96].mxu0  ;;  %v12835_v21 = vld [vmem:[%s12908_s29 + $0x3a8] sm:$0xff] }
 0x72e   : > { %8367 = vst.msk [vmem:[%s17260_s17 + $0x368] sm:$0xff] %vm333_vm0, %v8239_v24  ;;  %v8113_v17 = vadd.f32 %v17264_v35, %v7985_v47  ;;  %v7801_v49 = vadd.f32 %v17718_v32, %v11484_v44  ;;  %v7795_v23 = vpop.f32.mrb[97].mxu0  ;;  %v12836_v24 = vld [vmem:[%s12908_s29 + $0x3a0] sm:$0xff]  ;;  %v12838_v44 = vld [vmem:[%s12908_s29 + $0x3b0] sm:$0xff] }
 0x72f   : > { %8366 = vst.msk [vmem:[%s17260_s17 + $0x360] sm:$0xff] %vm333_vm0, %v8238_v7  ;;  %v8112_v8 = vadd.f32 %v7984_v27, %v19160_v52  ;;  %v7796_v55 = vadd.f32 %v17718_v32, %v7795_v23 }
 0x730   : > { %v8241_v46 = vadd.f32 %v12829_v50, %v8113_v17  ;;  %v7987_v9 = vmax.f32 %v7801_v49, 0.0 }
 0x731   : > { %v8240_v56 = vadd.f32 %v12830_v60, %v8112_v8  ;;  %v7986_v4 = vmax.f32 %v7796_v55, 0.0  ;;  %v11487_v35 = vpop.f32.mrb[98].mxu0  ;;  %v12840_v60 = vld [vmem:[%s12908_s29 + $0x3c0] sm:$0xff] }
 0x732   : > { %8369 = vst.msk [vmem:[%s17260_s17 + $0x378] sm:$0xff] %vm333_vm0, %v8241_v46  ;;  %v8115_v31 = vadd.f32 %v17282_v0, %v7987_v9  ;;  %v7811_v51 = vadd.f32 %v17718_v32, %v11487_v35  ;;  %v7805_v22 = vpop.f32.mrb[99].mxu0  ;;  %v12839_v46 = vld [vmem:[%s12908_s29 + $0x3c8] sm:$0xff] }
 0x733   : > { %8368 = vst.msk [vmem:[%s17260_s17 + $0x370] sm:$0xff] %vm333_vm0, %v8240_v56  ;;  %v8114_v63 = vadd.f32 %v7986_v4, %v17285_v62  ;;  %v7806_v2 = vadd.f32 %v17718_v32, %v7805_v22 }
 0x734   : > { %v8243_v18 = vadd.f32 %v12831_v36, %v8115_v31  ;;  %v7989_v61 = vmax.f32 %v7811_v51, 0.0 }
 0x735   : > { %v8242_v28 = vadd.f32 %v12832_v3, %v8114_v63  ;;  %v7988_v20 = vmax.f32 %v7806_v2, 0.0  ;;  %v11490_v0 = vpop.f32.mrb[100].mxu0  ;;  %v12841_v2 = vld [vmem:[%s12908_s29 + $0x3d8] sm:$0xff] }
 0x736   : > { %8371 = vst.msk [vmem:[%s17260_s17 + $0x388] sm:$0xff] %vm333_vm0, %v8243_v18  ;;  %v8117_v53 = vadd.f32 %v17300_v38, %v7989_v61  ;;  %v7821_v54 = vadd.f32 %v17718_v32, %v11490_v0  ;;  %v7815_v62 = vpop.f32.mrb[101].mxu0  ;;  %v12842_v18 = vld [vmem:[%s12908_s29 + $0x3d0] sm:$0xff] }
 0x737   : > { %8370 = vst.msk [vmem:[%s17260_s17 + $0x380] sm:$0xff] %vm333_vm0, %v8242_v28  ;;  %v8116_v10 = vadd.f32 %v7988_v20, %v17303_v33  ;;  %v7816_v57 = vadd.f32 %v17718_v32, %v7815_v62  ;;  %v12843_v62 = vld [vmem:[%s12908_s29 + $0x3e8] sm:$0xff] }
 0x738   : > { %v8245_v13 = vadd.f32 %v12833_v19, %v8117_v53  ;;  %v7991_v41 = vmax.f32 %v7821_v54, 0.0 }
 0x739   : > { %v8244_v45 = vadd.f32 %v12834_v6, %v8116_v10  ;;  %v7990_v29 = vmax.f32 %v7816_v57, 0.0  ;;  %v11493_v38 = vpop.f32.mrb[102].mxu0  ;;  %v12844_v57 = vld [vmem:[%s12908_s29 + $0x3e0] sm:$0xff] }
 0x73a   : > { %8373 = vst.msk [vmem:[%s17260_s17 + $0x398] sm:$0xff] %vm333_vm0, %v8245_v13  ;;  %v8119_v59 = vadd.f32 %v17318_v26, %v7991_v41  ;;  %v7831_v33 = vadd.f32 %v17718_v32, %v11493_v38  ;;  %v7825_v39 = vpop.f32.mrb[103].mxu0 }
 0x73b   : > { %8372 = vst.msk [vmem:[%s17260_s17 + $0x390] sm:$0xff] %vm333_vm0, %v8244_v45  ;;  %v8118_v58 = vadd.f32 %v7990_v29, %v17321_v37  ;;  %v7826_v40 = vadd.f32 %v17718_v32, %v7825_v39  ;;  %v12837_v37 = vld [vmem:[%s12908_s29 + $0x3b8] sm:$0xff]  ;;  %v12846_v39 = vld [vmem:[%s12908_s29 + $0x3f0] sm:$0xff] }
 0x73c   : > { %v8247_v5 = vadd.f32 %v12835_v21, %v8119_v59  ;;  %v7993_v15 = vmax.f32 %v7831_v33, 0.0  ;;  %v12845_v59 = vld [vmem:[%s12908_s29 + $0x3f8] sm:$0xff] }
 0x73d   : > { %v8246_v47 = vadd.f32 %v12836_v24, %v8118_v58  ;;  %v7992_v11 = vmax.f32 %v7826_v40, 0.0 }
 0x73e   : > { %8375 = vst.msk [vmem:[%s17260_s17 + $0x3a8] sm:$0xff] %vm333_vm0, %v8247_v5  ;;  %v8121_v26 = vadd.f32 %v17336_v34, %v7993_v15 }
 0x73f   : > { %8374 = vst.msk [vmem:[%s17260_s17 + $0x3a0] sm:$0xff] %vm333_vm0, %v8246_v47  ;;  %v8120_v7 = vadd.f32 %v7992_v11, %v17339_v48 }
 0x740   : > { %v8249_v27 = vadd.f32 %v12837_v37, %v8121_v26 }
 0x741   : > { %v8248_v17 = vadd.f32 %v12838_v44, %v8120_v7 }
 0x742   : > { %8377 = vst.msk [vmem:[%s17260_s17 + $0x3b8] sm:$0xff] %vm333_vm0, %v8249_v27 }
 0x743   : > { %8376 = vst.msk [vmem:[%s17260_s17 + $0x3b0] sm:$0xff] %vm333_vm0, %v8248_v17 }
 0x763   : > { %v11496_v49 = vpop.f32.mrb[104].mxu0 }
 0x764   : > { %v7841_v23 = vadd.f32 %v17718_v32, %v11496_v49  ;;  %v7835_v34 = vpop.f32.mrb[105].mxu0 }
 0x765   : > { %v7836_v52 = vadd.f32 %v17718_v32, %v7835_v34 }
 0x766   : > { %v7995_v8 = vmax.f32 %v7841_v23, 0.0 }
 0x767   : > { %v7994_v55 = vmax.f32 %v7836_v52, 0.0 }
 0x768   : > { %v8123_v48 = vadd.f32 %v17446_v43, %v7995_v8 }
 0x769   : > { %v8122_v50 = vadd.f32 %v7994_v55, %v17452_v12 }
 0x76a   : > { %v8251_v9 = vadd.f32 %v12839_v46, %v8123_v48 }
 0x76b   : > { %v8250_v56 = vadd.f32 %v12840_v60, %v8122_v50  ;;  %v11499_v4 = vpop.f32.mrb[106].mxu0 }
 0x76c   : > { %8379 = vst.msk [vmem:[%s17260_s17 + $0x3c8] sm:$0xff] %vm333_vm0, %v8251_v9  ;;  %v7851_v35 = vadd.f32 %v17718_v32, %v11499_v4  ;;  %v7845_v31 = vpop.f32.mrb[107].mxu0 }
 0x76d   : > { %8378 = vst.msk [vmem:[%s17260_s17 + $0x3c0] sm:$0xff] %vm333_vm0, %v8250_v56  ;;  %v7846_v43 = vadd.f32 %v17718_v32, %v7845_v31 }
 0x76e   : > { %v7997_v51 = vmax.f32 %v7851_v35, 0.0 }
 0x76f   : > { %v7996_v22 = vmax.f32 %v7846_v43, 0.0 }
 0x770   : > { %v8125_v12 = vadd.f32 %v17474_v42, %v7997_v51 }
 0x771   : > { %v8124_v63 = vadd.f32 %v7996_v22, %v17480_v25 }
 0x772   : > { %v8253_v36 = vadd.f32 %v12841_v2, %v8125_v12 }
 0x773   : > { %v8252_v61 = vadd.f32 %v12842_v18, %v8124_v63 }
 0x774   : > { %v11502_v3 = vpop.f32.mrb[108].mxu0  ;;  %8381 = vst.msk [vmem:[%s17260_s17 + $0x3d8] sm:$0xff] %vm333_vm0, %v8253_v36 }
 0x775   : > { %v7861_v28 = vadd.f32 %v17718_v32, %v11502_v3  ;;  %v7855_v20 = vpop.f32.mrb[109].mxu0  ;;  %8380 = vst.msk [vmem:[%s17260_s17 + $0x3d0] sm:$0xff] %vm333_vm0, %v8252_v61 }
 0x776   : > { %v7856_v42 = vadd.f32 %v17718_v32, %v7855_v20 }
 0x777   : > { %v7999_v0 = vmax.f32 %v7861_v28, 0.0 }
 0x778   : > { %v7998_v53 = vmax.f32 %v7856_v42, 0.0 }
 0x779   : > { %v8127_v25 = vadd.f32 %v17502_v1, %v7999_v0 }
 0x77a   : > { %v8126_v54 = vadd.f32 %v7998_v53, %v17508_v30 }
 0x77b   : > { %v8255_v10 = vadd.f32 %v12843_v62, %v8127_v25 }
 0x77c   : > { %v8254_v19 = vadd.f32 %v12844_v57, %v8126_v54  ;;  %v11505_v13 = vpop.f32.mrb[16].mxu1 }
 0x77d   : > { %8383 = vst.msk [vmem:[%s17260_s17 + $0x3e8] sm:$0xff] %vm333_vm0, %v8255_v10  ;;  %v7871_v41 = vadd.f32 %v17718_v32, %v11505_v13  ;;  %v7865_v6 = vpop.f32.mrb[17].mxu1 }
 0x77e   : > { %8382 = vst.msk [vmem:[%s17260_s17 + $0x3e0] sm:$0xff] %vm333_vm0, %v8254_v19  ;;  %v7866_v1 = vadd.f32 %v17718_v32, %v7865_v6 }
 0x77f   : > { %v8001_v45 = vmax.f32 %v7871_v41, 0.0 }
 0x780   : > { %v8000_v29 = vmax.f32 %v7866_v1, 0.0 }
 0x781   : > { %v8129_v30 = vadd.f32 %v17530_v16, %v8001_v45 }
 0x782   : > { %v8128_v38 = vadd.f32 %v8000_v29, %v17536_v14 }
 0x783   : > { %v8257_v33 = vadd.f32 %v12845_v59, %v8129_v30 }
 0x784   : > { %v8256_v58 = vadd.f32 %v12846_v39, %v8128_v38 }
 0x785   : > { %8385 = vst.msk [vmem:[%s17260_s17 + $0x3f8] sm:$0xff] %vm333_vm0, %v8257_v33 }
 0x786   : > { %8384 = vst.msk [vmem:[%s17260_s17 + $0x3f0] sm:$0xff] %vm333_vm0, %v8256_v58 }
 0x787 PF: > { %s14_s15 = sadd.s32 1, %s12853_s15  }
 0x788   : > { %p11_p4 = scmp.ge.s32.totalorder %s14_s15, 4  }
 0x78a   :  { %13 = sbr.rel (!%p11_p4) target bundleno = 1 (0x1), region = 68 }

</bundles_post_ra>
